<compile_context>
chip_gen: v7x
topology: tpu7x:2x2x1
jax: 0.10.0
libtpu: 0.0.40
codegen_flags: <defaults>
</compile_context>

<pallas_src>
import functools

import jax
import jax.numpy as jnp
import numpy as np
from jax.experimental import pallas as pl
from jax.experimental.pallas import tpu as pltpu

LN_EPS = 1e-5  # PyTorch nn.LayerNorm default
F32 = jnp.float32


# --------------------- math helpers (in-kernel and reference) ---------------------

def _erf(x):
    # Abramowitz & Stegun 7.1.26 (~1.5e-7 abs err): matches PyTorch's exact-erf
    # nn.GELU to fp32 tolerance; exp lands on the EUP slot.
    a1, a2, a3, a4, a5 = 0.254829592, -0.284496736, 1.421413741, -1.453152027, 1.061405429
    p = 0.3275911
    sgn = jnp.where(x >= 0.0, 1.0, -1.0)
    ax = jnp.abs(x)
    t = 1.0 / (1.0 + p * ax)
    poly = ((((a5 * t + a4) * t + a3) * t + a2) * t + a1) * t
    return sgn * (1.0 - poly * jnp.exp(-ax * ax))


def _gelu(x):
    return 0.5 * x * (1.0 + _erf(x * 0.7071067811865476))


def _layernorm(x, g, b):
    mu = jnp.mean(x, axis=-1, keepdims=True)
    var = jnp.mean(jnp.square(x - mu), axis=-1, keepdims=True)
    return (x - mu) * jax.lax.rsqrt(var + LN_EPS) * g + b


def _softmax(x):                       # exact -- reference only
    m = jnp.max(x, axis=-1, keepdims=True)
    e = jnp.exp(x - m)
    return e / jnp.sum(e, axis=-1, keepdims=True)


def _sigmoid(x):                       # exact -- reference only
    return 1.0 / (1.0 + jnp.exp(-x))


def _softmax_fast(x):                  # in-kernel: recip on EUP slot
    m = jnp.max(x, axis=-1, keepdims=True)
    e = jnp.exp(x - m)
    return e * pl.reciprocal(jnp.sum(e, axis=-1, keepdims=True), approx=True)


def _sigmoid_fast(x):                  # in-kernel: recip on EUP slot
    return pl.reciprocal(1.0 + jnp.exp(-x), approx=True)


# ------------------------------ in-kernel building blocks --------------------------

def _ln_mlp(x, g, b, w1, b1, w2, b2):
    """LayerNorm -> Linear -> GELU -> Linear on a (N, Din) tile."""
    xn = _layernorm(x, g, b)
    h = _gelu(jnp.dot(xn, w1, preferred_element_type=F32) + b1)
    return jnp.dot(h, w2, preferred_element_type=F32) + b2


def _mhsa(xn, wqkv, wproj, bproj, num_heads):
    """Multi-head self-attention on a (N, E) tile.

    One fused (N,E)@(E,3E) QKV matmul, head-batched score/softmax/AV
    dot_generals, and one (N,E)@(E,E) output projection.
    """
    N, E = xn.shape
    hd = E // num_heads
    scale = float(hd) ** -0.5

    qkv = jnp.dot(xn, wqkv, preferred_element_type=F32)                       # (N, 3E)
    q = jnp.stack([qkv[:, h * hd:(h + 1) * hd] for h in range(num_heads)], axis=0)
    k = jnp.stack([qkv[:, E + h * hd:E + (h + 1) * hd] for h in range(num_heads)], axis=0)
    v = jnp.stack([qkv[:, 2 * E + h * hd:2 * E + (h + 1) * hd] for h in range(num_heads)], axis=0)

    s = jax.lax.dot_general(q, k, (((2,), (2,)), ((0,), (0,))),
                            preferred_element_type=F32) * scale               # (H, N, N)
    a = _softmax_fast(s)
    o = jax.lax.dot_general(a, v, (((2,), (1,)), ((0,), (0,))),
                            preferred_element_type=F32)                       # (H, N, hd)
    o = jnp.concatenate([o[h] for h in range(num_heads)], axis=-1)            # (N, E)
    return jnp.dot(o, wproj, preferred_element_type=F32) + bproj


def _token_infer(fea, token_row, lng, lnb, wq, wk, wv, wp, bp):
    """recon/pred token inference: single-head sigmoid attention of fea[1:-1]
    against the token at `token_row`, projection, residual on fea[1:-1]."""
    N, E = fea.shape
    scale = float(E) ** -0.5
    x = _layernorm(fea, lng, lnb)
    t = x[token_row:token_row + 1, :]                                         # (1,   E)
    f = x[1:N - 1, :]                                                         # (N-2, E)
    q = jnp.dot(f, wq, preferred_element_type=F32)
    k = jnp.dot(t, wk, preferred_element_type=F32)
    v = jnp.dot(t, wv, preferred_element_type=F32)
    attn = _sigmoid_fast(jax.lax.dot_general(q, k, (((1,), (1,)), ((), ())),
                                             preferred_element_type=F32) * scale)  # (N-2, 1)
    infer = jnp.dot(attn * v, wp, preferred_element_type=F32) + bp            # attn*v == attn@v (one key)
    return infer + fea[1:N - 1, :]


# ----------------------------------- fused kernel ----------------------------------

def _token_trans_kernel(num_heads, depth, *refs):
    fea_ref, rt_ref, pt_ref = refs[0], refs[1], refs[2]
    recon_o, pred_o, x_o, rt_o, pt_o, x_scr = refs[-6:]
    wrefs = iter(refs[3:len(refs) - 6])

    def load():      # small weight: materialize full block
        return next(wrefs)[...]

    def take():      # depth-stacked weight: keep the ref, index per layer
        return next(wrefs)

    norm_g, norm_b = load(), load()
    mlp_w1, mlp_b1, mlp_w2, mlp_b2 = load(), load(), load(), load()
    ln1_g, ln1_b, wqkv, wproj, bproj = take(), take(), take(), take(), take()
    ln2_g, ln2_b, wm1, bm1, wm2, bm2 = take(), take(), take(), take(), take(), take()
    enc_g, enc_b = load(), load()
    recon_p = [load() for _ in range(7)]
    pred_p = [load() for _ in range(7)]
    n2_g, n2_b = load(), load()
    mlp2_p = [load() for _ in range(4)]
    n2c_g, n2c_b = load(), load()
    mlp2c_p = [load() for _ in range(4)]

    # fea = self.mlp(self.norm(fea))                         (Nf, in_dim) -> (Nf, E)
    fea_e = _ln_mlp(fea_ref[0], norm_g, norm_b, mlp_w1, mlp_b1, mlp_w2, mlp_b2)
    Nf = fea_e.shape[0]
    N = Nf + 2

    # fea = cat((recon_tokens, fea, pred_tokens), dim=1): assembled in a VMEM
    # scratch tile (no wrapper concat, no HBM round-trip, output block written once).
    x_scr[0:1, :] = rt_ref[0]
    x_scr[1:1 + Nf, :] = fea_e
    x_scr[N - 1:N, :] = pt_ref[0]
    x = x_scr[...]                                                            # (N, E)

    # token_TransformerEncoder: `depth` pre-norm blocks, stacked weights VMEM-resident.
    for d in range(depth):
        xn = _layernorm(x, ln1_g[d], ln1_b[d])
        x = x + _mhsa(xn, wqkv[d], wproj[d], bproj[d], num_heads)
        xn2 = _layernorm(x, ln2_g[d], ln2_b[d])
        h1 = _gelu(jnp.dot(xn2, wm1[d], preferred_element_type=F32) + bm1[d])
        x = x + jnp.dot(h1, wm2[d], preferred_element_type=F32) + bm2[d]
    x = _layernorm(x, enc_g, enc_b)

    # recon/pred token inference + output MLPs, all on the VMEM-resident x.
    recon_fea = _token_infer(x, 0, *recon_p)
    pred_fea = _token_infer(x, N - 1, *pred_p)

    recon_o[0] = _ln_mlp(recon_fea, n2_g, n2_b, *mlp2_p)
    pred_o[0] = _ln_mlp(pred_fea, n2c_g, n2c_b, *mlp2c_p)
    x_o[0] = x
    rt_o[0] = x[0:1, :]
    pt_o[0] = x[N - 1:N, :]


# ---------------------------------- parameters -------------------------------------

def init_params(key, in_dim, embed_dim, depth, num_heads, mlp_ratio):
    E = embed_dim
    hidden = int(embed_dim * mlp_ratio)
    ks = iter(jax.random.split(key, 96))

    def randn(shape, s=0.02):
        return s * jax.random.normal(next(ks), shape, F32)

    def ln(shape):
        return 1.0 + randn(shape, 0.1), randn(shape, 0.1)

    p = {}
    p["norm_g"], p["norm_b"] = ln((1, in_dim))
    p["mlp_w1"], p["mlp_b1"] = randn((in_dim, E)), randn((1, E))
    p["mlp_w2"], p["mlp_b2"] = randn((E, E)), randn((1, E))

    p["ln1_g"], p["ln1_b"] = ln((depth, 1, E))
    p["wqkv"] = randn((depth, E, 3 * E))
    p["wproj"] = randn((depth, E, E))
    p["bproj"] = randn((depth, 1, E))
    p["ln2_g"], p["ln2_b"] = ln((depth, 1, E))
    p["wm1"], p["bm1"] = randn((depth, E, hidden)), randn((depth, 1, hidden))
    p["wm2"], p["bm2"] = randn((depth, hidden, E)), randn((depth, 1, E))

    p["enc_g"], p["enc_b"] = ln((1, E))

    def token_inf():
        lng, lnb = ln((1, E))
        return (lng, lnb, randn((E, E)), randn((E, E)), randn((E, E)),
                randn((E, E)), randn((1, E)))

    p["recon"] = token_inf()
    p["pred"] = token_inf()

    p["norm2_g"], p["norm2_b"] = ln((1, E))
    p["mlp2_w1"], p["mlp2_b1"] = randn((E, in_dim)), randn((1, in_dim))
    p["mlp2_w2"], p["mlp2_b2"] = randn((in_dim, in_dim)), randn((1, in_dim))

    p["norm2c_g"], p["norm2c_b"] = ln((1, E))
    p["mlp2c_w1"], p["mlp2c_b1"] = randn((E, in_dim)), randn((1, in_dim))
    p["mlp2c_w2"], p["mlp2c_b2"] = randn((in_dim, in_dim)), randn((1, in_dim))
    return p


def _flat_weights(p):
    return [
        p["norm_g"], p["norm_b"], p["mlp_w1"], p["mlp_b1"], p["mlp_w2"], p["mlp_b2"],
        p["ln1_g"], p["ln1_b"], p["wqkv"], p["wproj"], p["bproj"],
        p["ln2_g"], p["ln2_b"], p["wm1"], p["bm1"], p["wm2"], p["bm2"],
        p["enc_g"], p["enc_b"],
        *p["recon"], *p["pred"],
        p["norm2_g"], p["norm2_b"], p["mlp2_w1"], p["mlp2_b1"], p["mlp2_w2"], p["mlp2_b2"],
        p["norm2c_g"], p["norm2c_b"], p["mlp2c_w1"], p["mlp2c_b1"], p["mlp2c_w2"], p["mlp2c_b2"],
    ]


# ------------------------------------ wrapper ---------------------------------------

def token_trans_forward(fea, recon_tokens, pred_tokens, params, num_heads):
    B, Nf, in_dim = fea.shape
    E = recon_tokens.shape[-1]
    N = Nf + 2
    depth = params["wqkv"].shape[0]
    weights = _flat_weights(params)

    kernel = functools.partial(_token_trans_kernel, num_heads, depth)

    data_specs = [
        pl.BlockSpec((1, Nf, in_dim), lambda b: (b, 0, 0)),
        pl.BlockSpec((1, 1, E), lambda b: (b, 0, 0)),
        pl.BlockSpec((1, 1, E), lambda b: (b, 0, 0)),
    ]
    # Weight blocks have a constant block index across the grid, so Pallas DMAs
    # them once and they stay VMEM-resident for all batch steps.
    weight_specs = [pl.BlockSpec(w.shape, (lambda b, nd=w.ndim: (0,) * nd)) for w in weights]

    out_shape = (
        jax.ShapeDtypeStruct((B, Nf, in_dim), F32),   # recon_fea
        jax.ShapeDtypeStruct((B, Nf, in_dim), F32),   # pred_fea
        jax.ShapeDtypeStruct((B, N, E), F32),         # fea (post-encoder)
        jax.ShapeDtypeStruct((B, 1, E), F32),         # recon_tokens
        jax.ShapeDtypeStruct((B, 1, E), F32),         # pred_tokens
    )
    out_specs = (
        pl.BlockSpec((1, Nf, in_dim), lambda b: (b, 0, 0)),
        pl.BlockSpec((1, Nf, in_dim), lambda b: (b, 0, 0)),
        pl.BlockSpec((1, N, E), lambda b: (b, 0, 0)),
        pl.BlockSpec((1, 1, E), lambda b: (b, 0, 0)),
        pl.BlockSpec((1, 1, E), lambda b: (b, 0, 0)),
    )

    return pl.pallas_call(
        kernel,
        grid=(B,),
        in_specs=data_specs + weight_specs,
        out_specs=out_specs,
        out_shape=out_shape,
        scratch_shapes=[pltpu.VMEM((N, E), F32)],     # concat staging tile
        compiler_params=pltpu.CompilerParams(dimension_semantics=("parallel",)),
    )(fea, recon_tokens, pred_tokens, *weights)


# ------------------------------- pure-JAX reference ----------------------------------

def reference_forward(fea, recon_tokens, pred_tokens, p, num_heads):
    P = jax.lax.Precision.HIGHEST
    mm = functools.partial(jnp.matmul, precision=P)

    def ln_mlp(x, g, b, w1, b1, w2, b2):
        return mm(_gelu(mm(_layernorm(x, g, b), w1) + b1), w2) + b2

    fea_e = ln_mlp(fea, p["norm_g"], p["norm_b"],
                   p["mlp_w1"], p["mlp_b1"], p["mlp_w2"], p["mlp_b2"])
    x = jnp.concatenate([recon_tokens, fea_e, pred_tokens], axis=1)
    B, N, E = x.shape
    H = num_heads
    hd = E // H
    for d in range(p["wqkv"].shape[0]):
        xn = _layernorm(x, p["ln1_g"][d], p["ln1_b"][d])
        qkv = mm(xn, p["wqkv"][d])
        q = qkv[..., 0 * E:1 * E].reshape(B, N, H, hd)
        k = qkv[..., 1 * E:2 * E].reshape(B, N, H, hd)
        v = qkv[..., 2 * E:3 * E].reshape(B, N, H, hd)
        s = jnp.einsum("bnhd,bmhd->bhnm", q, k, precision=P) * (float(hd) ** -0.5)
        o = jnp.einsum("bhnm,bmhd->bnhd", _softmax(s), v, precision=P).reshape(B, N, E)
        x = x + mm(o, p["wproj"][d]) + p["bproj"][d]
        xn2 = _layernorm(x, p["ln2_g"][d], p["ln2_b"][d])
        h1 = _gelu(mm(xn2, p["wm1"][d]) + p["bm1"][d])
        x = x + mm(h1, p["wm2"][d]) + p["bm2"][d]
    x = _layernorm(x, p["enc_g"], p["enc_b"])

    def token_infer(xx, idx, lng, lnb, wq, wk, wv, wp, bp):
        xl = _layernorm(xx, lng, lnb)
        t, f = xl[:, idx:idx + 1, :], xl[:, 1:-1, :]
        q, k, v = mm(f, wq), mm(t, wk), mm(t, wv)
        attn = _sigmoid(jnp.einsum("bnd,bmd->bnm", q, k, precision=P) * (float(E) ** -0.5))
        return mm(mm(attn, v), wp) + bp + xx[:, 1:-1, :]

    recon_fea = token_infer(x, 0, *p["recon"])
    pred_fea = token_infer(x, N - 1, *p["pred"])
    recon_out = ln_mlp(recon_fea, p["norm2_g"], p["norm2_b"],
                       p["mlp2_w1"], p["mlp2_b1"], p["mlp2_w2"], p["mlp2_b2"])
    pred_out = ln_mlp(pred_fea, p["norm2c_g"], p["norm2c_b"],
                      p["mlp2c_w1"], p["mlp2c_b1"], p["mlp2c_w2"], p["mlp2c_b2"])
    return recon_out, pred_out, x, x[:, 0:1, :], x[:, N - 1:N, :]


# -------------------------------------- main -----------------------------------------

if __name__ == "__main__":
    B, Nf = 2, 14
    in_dim, embed_dim, depth, num_heads, mlp_ratio = 32, 48, 2, 6, 3.0

    key = jax.random.PRNGKey(0)
    k_fea, k_rt, k_pt, k_par = jax.random.split(key, 4)
    fea = jax.random.normal(k_fea, (B, Nf, in_dim), F32)
    recon_tokens = jax.random.normal(k_rt, (B, 1, embed_dim), F32)
    pred_tokens = jax.random.normal(k_pt, (B, 1, embed_dim), F32)

    params = init_params(k_par, in_dim, embed_dim, depth, num_heads, mlp_ratio)

    outs = token_trans_forward(fea, recon_tokens, pred_tokens, params, num_heads)
    jax.block_until_ready(outs)

    recon_out, pred_out, x, rt, pt = outs
    assert recon_out.shape == (B, Nf, in_dim)
    assert pred_out.shape == (B, Nf, in_dim)
    assert x.shape == (B, Nf + 2, embed_dim)
    assert rt.shape == (B, 1, embed_dim) and pt.shape == (B, 1, embed_dim)

    # correctness vs. pure-JAX reference (tolerance covers MXU f32 precision modes
    # and the EUP approx-reciprocal in softmax/sigmoid denominators)
    refs = reference_forward(fea, recon_tokens, pred_tokens, params, num_heads)
    for got, want in zip(outs, refs):
        np.testing.assert_allclose(np.asarray(got), np.asarray(want), rtol=2e-2, atol=1e-3)

    print("KERNEL_OK")
</pallas_src>

<mosaic_0001>
module attributes {stable_mosaic.version = 11 : i64} {
  func.func @_token_trans_kernel(%arg0: i32, %arg1: memref<1x14x32xf32, #tpu.memory_space<vmem>>, %arg2: memref<1x1x48xf32, #tpu.memory_space<vmem>>, %arg3: memref<1x1x48xf32, #tpu.memory_space<vmem>>, %arg4: memref<1x32xf32, #tpu.memory_space<vmem>>, %arg5: memref<1x32xf32, #tpu.memory_space<vmem>>, %arg6: memref<32x48xf32, #tpu.memory_space<vmem>>, %arg7: memref<1x48xf32, #tpu.memory_space<vmem>>, %arg8: memref<48x48xf32, #tpu.memory_space<vmem>>, %arg9: memref<1x48xf32, #tpu.memory_space<vmem>>, %arg10: memref<2x1x48xf32, #tpu.memory_space<vmem>>, %arg11: memref<2x1x48xf32, #tpu.memory_space<vmem>>, %arg12: memref<2x48x144xf32, #tpu.memory_space<vmem>>, %arg13: memref<2x48x48xf32, #tpu.memory_space<vmem>>, %arg14: memref<2x1x48xf32, #tpu.memory_space<vmem>>, %arg15: memref<2x1x48xf32, #tpu.memory_space<vmem>>, %arg16: memref<2x1x48xf32, #tpu.memory_space<vmem>>, %arg17: memref<2x48x144xf32, #tpu.memory_space<vmem>>, %arg18: memref<2x1x144xf32, #tpu.memory_space<vmem>>, %arg19: memref<2x144x48xf32, #tpu.memory_space<vmem>>, %arg20: memref<2x1x48xf32, #tpu.memory_space<vmem>>, %arg21: memref<1x48xf32, #tpu.memory_space<vmem>>, %arg22: memref<1x48xf32, #tpu.memory_space<vmem>>, %arg23: memref<1x48xf32, #tpu.memory_space<vmem>>, %arg24: memref<1x48xf32, #tpu.memory_space<vmem>>, %arg25: memref<48x48xf32, #tpu.memory_space<vmem>>, %arg26: memref<48x48xf32, #tpu.memory_space<vmem>>, %arg27: memref<48x48xf32, #tpu.memory_space<vmem>>, %arg28: memref<48x48xf32, #tpu.memory_space<vmem>>, %arg29: memref<1x48xf32, #tpu.memory_space<vmem>>, %arg30: memref<1x48xf32, #tpu.memory_space<vmem>>, %arg31: memref<1x48xf32, #tpu.memory_space<vmem>>, %arg32: memref<48x48xf32, #tpu.memory_space<vmem>>, %arg33: memref<48x48xf32, #tpu.memory_space<vmem>>, %arg34: memref<48x48xf32, #tpu.memory_space<vmem>>, %arg35: memref<48x48xf32, #tpu.memory_space<vmem>>, %arg36: memref<1x48xf32, #tpu.memory_space<vmem>>, %arg37: memref<1x48xf32, #tpu.memory_space<vmem>>, %arg38: memref<1x48xf32, #tpu.memory_space<vmem>>, %arg39: memref<48x32xf32, #tpu.memory_space<vmem>>, %arg40: memref<1x32xf32, #tpu.memory_space<vmem>>, %arg41: memref<32x32xf32, #tpu.memory_space<vmem>>, %arg42: memref<1x32xf32, #tpu.memory_space<vmem>>, %arg43: memref<1x48xf32, #tpu.memory_space<vmem>>, %arg44: memref<1x48xf32, #tpu.memory_space<vmem>>, %arg45: memref<48x32xf32, #tpu.memory_space<vmem>>, %arg46: memref<1x32xf32, #tpu.memory_space<vmem>>, %arg47: memref<32x32xf32, #tpu.memory_space<vmem>>, %arg48: memref<1x32xf32, #tpu.memory_space<vmem>>, %arg49: memref<1x14x32xf32, #tpu.memory_space<vmem>>, %arg50: memref<1x14x32xf32, #tpu.memory_space<vmem>>, %arg51: memref<1x16x48xf32, #tpu.memory_space<vmem>>, %arg52: memref<1x1x48xf32, #tpu.memory_space<vmem>>, %arg53: memref<1x1x48xf32, #tpu.memory_space<vmem>>, %arg54: memref<16x48xf32, #tpu.memory_space<vmem>>) attributes {dimension_semantics = [#tpu.dimension_semantics<parallel>], iteration_bounds = array<i64: 2>, scalar_prefetch = 0 : i64, scratch_operands = 1 : i64, tpu.core_type = #tpu.core_type<tc>, window_params = [{transform_indices = @transform_0, window_bounds = array<i64: 1, 14, 32>}, {transform_indices = @transform_1, window_bounds = array<i64: 1, 1, 48>}, {transform_indices = @transform_2, window_bounds = array<i64: 1, 1, 48>}, {pipeline_mode = #tpu.pipeline_mode<synchronous>, transform_indices = @transform_3, window_bounds = array<i64: 1, 32>}, {pipeline_mode = #tpu.pipeline_mode<synchronous>, transform_indices = @transform_4, window_bounds = array<i64: 1, 32>}, {pipeline_mode = #tpu.pipeline_mode<synchronous>, transform_indices = @transform_5, window_bounds = array<i64: 32, 48>}, {pipeline_mode = #tpu.pipeline_mode<synchronous>, transform_indices = @transform_6, window_bounds = array<i64: 1, 48>}, {pipeline_mode = #tpu.pipeline_mode<synchronous>, transform_indices = @transform_7, window_bounds = array<i64: 48, 48>}, {pipeline_mode = #tpu.pipeline_mode<synchronous>, transform_indices = @transform_8, window_bounds = array<i64: 1, 48>}, {pipeline_mode = #tpu.pipeline_mode<synchronous>, transform_indices = @transform_9, window_bounds = array<i64: 2, 1, 48>}, {pipeline_mode = #tpu.pipeline_mode<synchronous>, transform_indices = @transform_10, window_bounds = array<i64: 2, 1, 48>}, {pipeline_mode = #tpu.pipeline_mode<synchronous>, transform_indices = @transform_11, window_bounds = array<i64: 2, 48, 144>}, {pipeline_mode = #tpu.pipeline_mode<synchronous>, transform_indices = @transform_12, window_bounds = array<i64: 2, 48, 48>}, {pipeline_mode = #tpu.pipeline_mode<synchronous>, transform_indices = @transform_13, window_bounds = array<i64: 2, 1, 48>}, {pipeline_mode = #tpu.pipeline_mode<synchronous>, transform_indices = @transform_14, window_bounds = array<i64: 2, 1, 48>}, {pipeline_mode = #tpu.pipeline_mode<synchronous>, transform_indices = @transform_15, window_bounds = array<i64: 2, 1, 48>}, {pipeline_mode = #tpu.pipeline_mode<synchronous>, transform_indices = @transform_16, window_bounds = array<i64: 2, 48, 144>}, {pipeline_mode = #tpu.pipeline_mode<synchronous>, transform_indices = @transform_17, window_bounds = array<i64: 2, 1, 144>}, {pipeline_mode = #tpu.pipeline_mode<synchronous>, transform_indices = @transform_18, window_bounds = array<i64: 2, 144, 48>}, {pipeline_mode = #tpu.pipeline_mode<synchronous>, transform_indices = @transform_19, window_bounds = array<i64: 2, 1, 48>}, {pipeline_mode = #tpu.pipeline_mode<synchronous>, transform_indices = @transform_20, window_bounds = array<i64: 1, 48>}, {pipeline_mode = #tpu.pipeline_mode<synchronous>, transform_indices = @transform_21, window_bounds = array<i64: 1, 48>}, {pipeline_mode = #tpu.pipeline_mode<synchronous>, transform_indices = @transform_22, window_bounds = array<i64: 1, 48>}, {pipeline_mode = #tpu.pipeline_mode<synchronous>, transform_indices = @transform_23, window_bounds = array<i64: 1, 48>}, {pipeline_mode = #tpu.pipeline_mode<synchronous>, transform_indices = @transform_24, window_bounds = array<i64: 48, 48>}, {pipeline_mode = #tpu.pipeline_mode<synchronous>, transform_indices = @transform_25, window_bounds = array<i64: 48, 48>}, {pipeline_mode = #tpu.pipeline_mode<synchronous>, transform_indices = @transform_26, window_bounds = array<i64: 48, 48>}, {pipeline_mode = #tpu.pipeline_mode<synchronous>, transform_indices = @transform_27, window_bounds = array<i64: 48, 48>}, {pipeline_mode = #tpu.pipeline_mode<synchronous>, transform_indices = @transform_28, window_bounds = array<i64: 1, 48>}, {pipeline_mode = #tpu.pipeline_mode<synchronous>, transform_indices = @transform_29, window_bounds = array<i64: 1, 48>}, {pipeline_mode = #tpu.pipeline_mode<synchronous>, transform_indices = @transform_30, window_bounds = array<i64: 1, 48>}, {pipeline_mode = #tpu.pipeline_mode<synchronous>, transform_indices = @transform_31, window_bounds = array<i64: 48, 48>}, {pipeline_mode = #tpu.pipeline_mode<synchronous>, transform_indices = @transform_32, window_bounds = array<i64: 48, 48>}, {pipeline_mode = #tpu.pipeline_mode<synchronous>, transform_indices = @transform_33, window_bounds = array<i64: 48, 48>}, {pipeline_mode = #tpu.pipeline_mode<synchronous>, transform_indices = @transform_34, window_bounds = array<i64: 48, 48>}, {pipeline_mode = #tpu.pipeline_mode<synchronous>, transform_indices = @transform_35, window_bounds = array<i64: 1, 48>}, {pipeline_mode = #tpu.pipeline_mode<synchronous>, transform_indices = @transform_36, window_bounds = array<i64: 1, 48>}, {pipeline_mode = #tpu.pipeline_mode<synchronous>, transform_indices = @transform_37, window_bounds = array<i64: 1, 48>}, {pipeline_mode = #tpu.pipeline_mode<synchronous>, transform_indices = @transform_38, window_bounds = array<i64: 48, 32>}, {pipeline_mode = #tpu.pipeline_mode<synchronous>, transform_indices = @transform_39, window_bounds = array<i64: 1, 32>}, {pipeline_mode = #tpu.pipeline_mode<synchronous>, transform_indices = @transform_40, window_bounds = array<i64: 32, 32>}, {pipeline_mode = #tpu.pipeline_mode<synchronous>, transform_indices = @transform_41, window_bounds = array<i64: 1, 32>}, {pipeline_mode = #tpu.pipeline_mode<synchronous>, transform_indices = @transform_42, window_bounds = array<i64: 1, 48>}, {pipeline_mode = #tpu.pipeline_mode<synchronous>, transform_indices = @transform_43, window_bounds = array<i64: 1, 48>}, {pipeline_mode = #tpu.pipeline_mode<synchronous>, transform_indices = @transform_44, window_bounds = array<i64: 48, 32>}, {pipeline_mode = #tpu.pipeline_mode<synchronous>, transform_indices = @transform_45, window_bounds = array<i64: 1, 32>}, {pipeline_mode = #tpu.pipeline_mode<synchronous>, transform_indices = @transform_46, window_bounds = array<i64: 32, 32>}, {pipeline_mode = #tpu.pipeline_mode<synchronous>, transform_indices = @transform_47, window_bounds = array<i64: 1, 32>}, {transform_indices = @transform_48, window_bounds = array<i64: 1, 14, 32>}, {transform_indices = @transform_49, window_bounds = array<i64: 1, 14, 32>}, {transform_indices = @transform_50, window_bounds = array<i64: 1, 16, 48>}, {transform_indices = @transform_51, window_bounds = array<i64: 1, 1, 48>}, {transform_indices = @transform_52, window_bounds = array<i64: 1, 1, 48>}]} {
    %c0 = arith.constant 0 : index
    %c0_0 = arith.constant 0 : index
    %0 = vector.load %arg4[%c0, %c0_0] : memref<1x32xf32, #tpu.memory_space<vmem>>, vector<1x32xf32>
    %c0_1 = arith.constant 0 : index
    %c0_2 = arith.constant 0 : index
    %1 = vector.load %arg5[%c0_1, %c0_2] : memref<1x32xf32, #tpu.memory_space<vmem>>, vector<1x32xf32>
    %c0_3 = arith.constant 0 : index
    %c0_4 = arith.constant 0 : index
    %2 = vector.load %arg6[%c0_3, %c0_4] : memref<32x48xf32, #tpu.memory_space<vmem>>, vector<32x48xf32>
    %c0_5 = arith.constant 0 : index
    %c0_6 = arith.constant 0 : index
    %3 = vector.load %arg7[%c0_5, %c0_6] : memref<1x48xf32, #tpu.memory_space<vmem>>, vector<1x48xf32>
    %c0_7 = arith.constant 0 : index
    %c0_8 = arith.constant 0 : index
    %4 = vector.load %arg8[%c0_7, %c0_8] : memref<48x48xf32, #tpu.memory_space<vmem>>, vector<48x48xf32>
    %c0_9 = arith.constant 0 : index
    %c0_10 = arith.constant 0 : index
    %5 = vector.load %arg9[%c0_9, %c0_10] : memref<1x48xf32, #tpu.memory_space<vmem>>, vector<1x48xf32>
    %c0_11 = arith.constant 0 : index
    %c0_12 = arith.constant 0 : index
    %6 = vector.load %arg21[%c0_11, %c0_12] : memref<1x48xf32, #tpu.memory_space<vmem>>, vector<1x48xf32>
    %c0_13 = arith.constant 0 : index
    %c0_14 = arith.constant 0 : index
    %7 = vector.load %arg22[%c0_13, %c0_14] : memref<1x48xf32, #tpu.memory_space<vmem>>, vector<1x48xf32>
    %c0_15 = arith.constant 0 : index
    %c0_16 = arith.constant 0 : index
    %8 = vector.load %arg23[%c0_15, %c0_16] : memref<1x48xf32, #tpu.memory_space<vmem>>, vector<1x48xf32>
    %c0_17 = arith.constant 0 : index
    %c0_18 = arith.constant 0 : index
    %9 = vector.load %arg24[%c0_17, %c0_18] : memref<1x48xf32, #tpu.memory_space<vmem>>, vector<1x48xf32>
    %c0_19 = arith.constant 0 : index
    %c0_20 = arith.constant 0 : index
    %10 = vector.load %arg25[%c0_19, %c0_20] : memref<48x48xf32, #tpu.memory_space<vmem>>, vector<48x48xf32>
    %c0_21 = arith.constant 0 : index
    %c0_22 = arith.constant 0 : index
    %11 = vector.load %arg26[%c0_21, %c0_22] : memref<48x48xf32, #tpu.memory_space<vmem>>, vector<48x48xf32>
    %c0_23 = arith.constant 0 : index
    %c0_24 = arith.constant 0 : index
    %12 = vector.load %arg27[%c0_23, %c0_24] : memref<48x48xf32, #tpu.memory_space<vmem>>, vector<48x48xf32>
    %c0_25 = arith.constant 0 : index
    %c0_26 = arith.constant 0 : index
    %13 = vector.load %arg28[%c0_25, %c0_26] : memref<48x48xf32, #tpu.memory_space<vmem>>, vector<48x48xf32>
    %c0_27 = arith.constant 0 : index
    %c0_28 = arith.constant 0 : index
    %14 = vector.load %arg29[%c0_27, %c0_28] : memref<1x48xf32, #tpu.memory_space<vmem>>, vector<1x48xf32>
    %c0_29 = arith.constant 0 : index
    %c0_30 = arith.constant 0 : index
    %15 = vector.load %arg30[%c0_29, %c0_30] : memref<1x48xf32, #tpu.memory_space<vmem>>, vector<1x48xf32>
    %c0_31 = arith.constant 0 : index
    %c0_32 = arith.constant 0 : index
    %16 = vector.load %arg31[%c0_31, %c0_32] : memref<1x48xf32, #tpu.memory_space<vmem>>, vector<1x48xf32>
    %c0_33 = arith.constant 0 : index
    %c0_34 = arith.constant 0 : index
    %17 = vector.load %arg32[%c0_33, %c0_34] : memref<48x48xf32, #tpu.memory_space<vmem>>, vector<48x48xf32>
    %c0_35 = arith.constant 0 : index
    %c0_36 = arith.constant 0 : index
    %18 = vector.load %arg33[%c0_35, %c0_36] : memref<48x48xf32, #tpu.memory_space<vmem>>, vector<48x48xf32>
    %c0_37 = arith.constant 0 : index
    %c0_38 = arith.constant 0 : index
    %19 = vector.load %arg34[%c0_37, %c0_38] : memref<48x48xf32, #tpu.memory_space<vmem>>, vector<48x48xf32>
    %c0_39 = arith.constant 0 : index
    %c0_40 = arith.constant 0 : index
    %20 = vector.load %arg35[%c0_39, %c0_40] : memref<48x48xf32, #tpu.memory_space<vmem>>, vector<48x48xf32>
    %c0_41 = arith.constant 0 : index
    %c0_42 = arith.constant 0 : index
    %21 = vector.load %arg36[%c0_41, %c0_42] : memref<1x48xf32, #tpu.memory_space<vmem>>, vector<1x48xf32>
    %c0_43 = arith.constant 0 : index
    %c0_44 = arith.constant 0 : index
    %22 = vector.load %arg37[%c0_43, %c0_44] : memref<1x48xf32, #tpu.memory_space<vmem>>, vector<1x48xf32>
    %c0_45 = arith.constant 0 : index
    %c0_46 = arith.constant 0 : index
    %23 = vector.load %arg38[%c0_45, %c0_46] : memref<1x48xf32, #tpu.memory_space<vmem>>, vector<1x48xf32>
    %c0_47 = arith.constant 0 : index
    %c0_48 = arith.constant 0 : index
    %24 = vector.load %arg39[%c0_47, %c0_48] : memref<48x32xf32, #tpu.memory_space<vmem>>, vector<48x32xf32>
    %c0_49 = arith.constant 0 : index
    %c0_50 = arith.constant 0 : index
    %25 = vector.load %arg40[%c0_49, %c0_50] : memref<1x32xf32, #tpu.memory_space<vmem>>, vector<1x32xf32>
    %c0_51 = arith.constant 0 : index
    %c0_52 = arith.constant 0 : index
    %26 = vector.load %arg41[%c0_51, %c0_52] : memref<32x32xf32, #tpu.memory_space<vmem>>, vector<32x32xf32>
    %c0_53 = arith.constant 0 : index
    %c0_54 = arith.constant 0 : index
    %27 = vector.load %arg42[%c0_53, %c0_54] : memref<1x32xf32, #tpu.memory_space<vmem>>, vector<1x32xf32>
    %c0_55 = arith.constant 0 : index
    %c0_56 = arith.constant 0 : index
    %28 = vector.load %arg43[%c0_55, %c0_56] : memref<1x48xf32, #tpu.memory_space<vmem>>, vector<1x48xf32>
    %c0_57 = arith.constant 0 : index
    %c0_58 = arith.constant 0 : index
    %29 = vector.load %arg44[%c0_57, %c0_58] : memref<1x48xf32, #tpu.memory_space<vmem>>, vector<1x48xf32>
    %c0_59 = arith.constant 0 : index
    %c0_60 = arith.constant 0 : index
    %30 = vector.load %arg45[%c0_59, %c0_60] : memref<48x32xf32, #tpu.memory_space<vmem>>, vector<48x32xf32>
    %c0_61 = arith.constant 0 : index
    %c0_62 = arith.constant 0 : index
    %31 = vector.load %arg46[%c0_61, %c0_62] : memref<1x32xf32, #tpu.memory_space<vmem>>, vector<1x32xf32>
    %c0_63 = arith.constant 0 : index
    %c0_64 = arith.constant 0 : index
    %32 = vector.load %arg47[%c0_63, %c0_64] : memref<32x32xf32, #tpu.memory_space<vmem>>, vector<32x32xf32>
    %c0_65 = arith.constant 0 : index
    %c0_66 = arith.constant 0 : index
    %33 = vector.load %arg48[%c0_65, %c0_66] : memref<1x32xf32, #tpu.memory_space<vmem>>, vector<1x32xf32>
    %c0_67 = arith.constant 0 : index
    %c0_68 = arith.constant 0 : index
    %c0_69 = arith.constant 0 : index
    %34 = vector.load %arg1[%c0_67, %c0_68, %c0_69] : memref<1x14x32xf32, #tpu.memory_space<vmem>>, vector<1x14x32xf32>
    %35 = vector.shape_cast %34 : vector<1x14x32xf32> to vector<14x32xf32>
    %cst = arith.constant dense<0.000000e+00> : vector<14xf32>
    %36 = vector.multi_reduction <add>, %35, %cst [1] : vector<14x32xf32> to vector<14xf32>
    %37 = vector.shape_cast %36 : vector<14xf32> to vector<14x1xf32>
    %cst_70 = arith.constant 3.200000e+01 : f32
    %38 = vector.broadcast %cst_70 : f32 to vector<14x1xf32>
    %39 = arith.divf %37, %38 : vector<14x1xf32>
    %40 = vector.broadcast %39 : vector<14x1xf32> to vector<14x32xf32>
    %41 = arith.subf %35, %40 : vector<14x32xf32>
    %42 = arith.mulf %41, %41 : vector<14x32xf32>
    %cst_71 = arith.constant dense<0.000000e+00> : vector<14xf32>
    %43 = vector.multi_reduction <add>, %42, %cst_71 [1] : vector<14x32xf32> to vector<14xf32>
    %44 = vector.shape_cast %43 : vector<14xf32> to vector<14x1xf32>
    %cst_72 = arith.constant 3.200000e+01 : f32
    %45 = vector.broadcast %cst_72 : f32 to vector<14x1xf32>
    %46 = arith.divf %44, %45 : vector<14x1xf32>
    %47 = vector.broadcast %39 : vector<14x1xf32> to vector<14x32xf32>
    %48 = arith.subf %35, %47 : vector<14x32xf32>
    %cst_73 = arith.constant 9.99999974E-6 : f32
    %49 = vector.broadcast %cst_73 : f32 to vector<14x1xf32>
    %50 = arith.addf %46, %49 : vector<14x1xf32>
    %51 = math.rsqrt %50 : vector<14x1xf32>
    %52 = vector.broadcast %51 : vector<14x1xf32> to vector<14x32xf32>
    %53 = arith.mulf %48, %52 : vector<14x32xf32>
    %54 = vector.broadcast %0 : vector<1x32xf32> to vector<14x32xf32>
    %55 = arith.mulf %53, %54 : vector<14x32xf32>
    %56 = vector.broadcast %1 : vector<1x32xf32> to vector<14x32xf32>
    %57 = arith.addf %55, %56 : vector<14x32xf32>
    %cst_74 = arith.constant dense<0.000000e+00> : vector<14x48xf32>
    %58 = tpu.matmul %57, %2, %cst_74 {dimension_numbers = #tpu.dot_dimension_numbers<[1], [0], [0], [1], [0, 0, 1, 1], [], []>} : vector<14x32xf32>, vector<32x48xf32>, vector<14x48xf32> -> vector<14x48xf32>
    %59 = vector.broadcast %3 : vector<1x48xf32> to vector<14x48xf32>
    %60 = arith.addf %58, %59 : vector<14x48xf32>
    %cst_75 = arith.constant 5.000000e-01 : f32
    %61 = vector.broadcast %cst_75 : f32 to vector<14x48xf32>
    %62 = arith.mulf %61, %60 : vector<14x48xf32>
    %cst_76 = arith.constant 0.707106769 : f32
    %63 = vector.broadcast %cst_76 : f32 to vector<14x48xf32>
    %64 = arith.mulf %60, %63 : vector<14x48xf32>
    %cst_77 = arith.constant 0.000000e+00 : f32
    %65 = vector.broadcast %cst_77 : f32 to vector<14x48xf32>
    %66 = arith.cmpf oge, %64, %65 : vector<14x48xf32>
    %cst_78 = arith.constant 1.000000e+00 : f32
    %cst_79 = arith.constant -1.000000e+00 : f32
    %67 = vector.broadcast %cst_78 : f32 to vector<14x48xf32>
    %68 = vector.broadcast %cst_79 : f32 to vector<14x48xf32>
    %69 = arith.select %66, %67, %68 : vector<14x48xi1>, vector<14x48xf32>
    %70 = math.absf %64 : vector<14x48xf32>
    %cst_80 = arith.constant 0.327591091 : f32
    %71 = vector.broadcast %cst_80 : f32 to vector<14x48xf32>
    %72 = arith.mulf %71, %70 : vector<14x48xf32>
    %cst_81 = arith.constant 1.000000e+00 : f32
    %73 = vector.broadcast %cst_81 : f32 to vector<14x48xf32>
    %74 = arith.addf %73, %72 : vector<14x48xf32>
    %cst_82 = arith.constant 1.000000e+00 : f32
    %75 = vector.broadcast %cst_82 : f32 to vector<14x48xf32>
    %76 = arith.divf %75, %74 : vector<14x48xf32>
    %cst_83 = arith.constant 1.06140542 : f32
    %77 = vector.broadcast %cst_83 : f32 to vector<14x48xf32>
    %78 = arith.mulf %77, %76 : vector<14x48xf32>
    %cst_84 = arith.constant -1.45315206 : f32
    %79 = vector.broadcast %cst_84 : f32 to vector<14x48xf32>
    %80 = arith.addf %78, %79 : vector<14x48xf32>
    %81 = arith.mulf %80, %76 : vector<14x48xf32>
    %cst_85 = arith.constant 1.42141378 : f32
    %82 = vector.broadcast %cst_85 : f32 to vector<14x48xf32>
    %83 = arith.addf %81, %82 : vector<14x48xf32>
    %84 = arith.mulf %83, %76 : vector<14x48xf32>
    %cst_86 = arith.constant -0.284496725 : f32
    %85 = vector.broadcast %cst_86 : f32 to vector<14x48xf32>
    %86 = arith.addf %84, %85 : vector<14x48xf32>
    %87 = arith.mulf %86, %76 : vector<14x48xf32>
    %cst_87 = arith.constant 0.254829586 : f32
    %88 = vector.broadcast %cst_87 : f32 to vector<14x48xf32>
    %89 = arith.addf %87, %88 : vector<14x48xf32>
    %90 = arith.mulf %89, %76 : vector<14x48xf32>
    %cst_88 = arith.constant 0.000000e+00 : f32
    %91 = vector.broadcast %cst_88 : f32 to vector<14x48xf32>
    %92 = arith.subf %91, %70 : vector<14x48xf32>
    %93 = arith.mulf %92, %70 : vector<14x48xf32>
    %94 = math.exp %93 : vector<14x48xf32>
    %95 = arith.mulf %90, %94 : vector<14x48xf32>
    %cst_89 = arith.constant 1.000000e+00 : f32
    %96 = vector.broadcast %cst_89 : f32 to vector<14x48xf32>
    %97 = arith.subf %96, %95 : vector<14x48xf32>
    %98 = arith.mulf %69, %97 : vector<14x48xf32>
    %cst_90 = arith.constant 1.000000e+00 : f32
    %99 = vector.broadcast %cst_90 : f32 to vector<14x48xf32>
    %100 = arith.addf %99, %98 : vector<14x48xf32>
    %101 = arith.mulf %62, %100 : vector<14x48xf32>
    %cst_91 = arith.constant dense<0.000000e+00> : vector<14x48xf32>
    %102 = tpu.matmul %101, %4, %cst_91 {dimension_numbers = #tpu.dot_dimension_numbers<[1], [0], [0], [1], [0, 0, 1, 1], [], []>} : vector<14x48xf32>, vector<48x48xf32>, vector<14x48xf32> -> vector<14x48xf32>
    %103 = vector.broadcast %5 : vector<1x48xf32> to vector<14x48xf32>
    %104 = arith.addf %102, %103 : vector<14x48xf32>
    %c0_92 = arith.constant 0 : index
    %c0_93 = arith.constant 0 : index
    %c0_94 = arith.constant 0 : index
    %105 = vector.load %arg2[%c0_92, %c0_93, %c0_94] : memref<1x1x48xf32, #tpu.memory_space<vmem>>, vector<1x1x48xf32>
    %106 = vector.shape_cast %105 : vector<1x1x48xf32> to vector<1x48xf32>
    %c0_95 = arith.constant 0 : index
    %c0_96 = arith.constant 0 : index
    %107 = vector.load %arg54[%c0_95, %c0_96] : memref<16x48xf32, #tpu.memory_space<vmem>>, vector<1x48xf32>
    tpu.vector_store %arg54[%c0_95, %c0_96], %106 {strides = array<i32>} : memref<16x48xf32, #tpu.memory_space<vmem>>, vector<1x48xf32>,
    %c1 = arith.constant 1 : index
    %c0_97 = arith.constant 0 : index
    %108 = vector.load %arg54[%c1, %c0_97] : memref<16x48xf32, #tpu.memory_space<vmem>>, vector<14x48xf32>
    tpu.vector_store %arg54[%c1, %c0_97], %104 {strides = array<i32>} : memref<16x48xf32, #tpu.memory_space<vmem>>, vector<14x48xf32>,
    %c0_98 = arith.constant 0 : index
    %c0_99 = arith.constant 0 : index
    %c0_100 = arith.constant 0 : index
    %109 = vector.load %arg3[%c0_98, %c0_99, %c0_100] : memref<1x1x48xf32, #tpu.memory_space<vmem>>, vector<1x1x48xf32>
    %110 = vector.shape_cast %109 : vector<1x1x48xf32> to vector<1x48xf32>
    %c15 = arith.constant 15 : index
    %c0_101 = arith.constant 0 : index
    %111 = vector.load %arg54[%c15, %c0_101] : memref<16x48xf32, #tpu.memory_space<vmem>>, vector<1x48xf32>
    tpu.vector_store %arg54[%c15, %c0_101], %110 {strides = array<i32>} : memref<16x48xf32, #tpu.memory_space<vmem>>, vector<1x48xf32>,
    %c0_102 = arith.constant 0 : index
    %c0_103 = arith.constant 0 : index
    %112 = vector.load %arg54[%c0_102, %c0_103] : memref<16x48xf32, #tpu.memory_space<vmem>>, vector<16x48xf32>
    %c0_104 = arith.constant 0 : index
    %c0_105 = arith.constant 0 : index
    %c0_106 = arith.constant 0 : index
    %113 = vector.load %arg10[%c0_104, %c0_105, %c0_106] : memref<2x1x48xf32, #tpu.memory_space<vmem>>, vector<1x1x48xf32>
    %114 = vector.shape_cast %113 : vector<1x1x48xf32> to vector<1x48xf32>
    %c0_107 = arith.constant 0 : index
    %c0_108 = arith.constant 0 : index
    %c0_109 = arith.constant 0 : index
    %115 = vector.load %arg11[%c0_107, %c0_108, %c0_109] : memref<2x1x48xf32, #tpu.memory_space<vmem>>, vector<1x1x48xf32>
    %116 = vector.shape_cast %115 : vector<1x1x48xf32> to vector<1x48xf32>
    %cst_110 = arith.constant dense<0.000000e+00> : vector<16xf32>
    %117 = vector.multi_reduction <add>, %112, %cst_110 [1] : vector<16x48xf32> to vector<16xf32>
    %118 = vector.shape_cast %117 : vector<16xf32> to vector<16x1xf32>
    %cst_111 = arith.constant 4.800000e+01 : f32
    %119 = vector.broadcast %cst_111 : f32 to vector<16x1xf32>
    %120 = arith.divf %118, %119 : vector<16x1xf32>
    %121 = vector.broadcast %120 : vector<16x1xf32> to vector<16x48xf32>
    %122 = arith.subf %112, %121 : vector<16x48xf32>
    %123 = arith.mulf %122, %122 : vector<16x48xf32>
    %cst_112 = arith.constant dense<0.000000e+00> : vector<16xf32>
    %124 = vector.multi_reduction <add>, %123, %cst_112 [1] : vector<16x48xf32> to vector<16xf32>
    %125 = vector.shape_cast %124 : vector<16xf32> to vector<16x1xf32>
    %cst_113 = arith.constant 4.800000e+01 : f32
    %126 = vector.broadcast %cst_113 : f32 to vector<16x1xf32>
    %127 = arith.divf %125, %126 : vector<16x1xf32>
    %128 = vector.broadcast %120 : vector<16x1xf32> to vector<16x48xf32>
    %129 = arith.subf %112, %128 : vector<16x48xf32>
    %cst_114 = arith.constant 9.99999974E-6 : f32
    %130 = vector.broadcast %cst_114 : f32 to vector<16x1xf32>
    %131 = arith.addf %127, %130 : vector<16x1xf32>
    %132 = math.rsqrt %131 : vector<16x1xf32>
    %133 = vector.broadcast %132 : vector<16x1xf32> to vector<16x48xf32>
    %134 = arith.mulf %129, %133 : vector<16x48xf32>
    %135 = vector.broadcast %114 : vector<1x48xf32> to vector<16x48xf32>
    %136 = arith.mulf %134, %135 : vector<16x48xf32>
    %137 = vector.broadcast %116 : vector<1x48xf32> to vector<16x48xf32>
    %138 = arith.addf %136, %137 : vector<16x48xf32>
    %c0_115 = arith.constant 0 : index
    %c0_116 = arith.constant 0 : index
    %c0_117 = arith.constant 0 : index
    %139 = vector.load %arg12[%c0_115, %c0_116, %c0_117] : memref<2x48x144xf32, #tpu.memory_space<vmem>>, vector<1x48x144xf32>
    %140 = vector.shape_cast %139 : vector<1x48x144xf32> to vector<48x144xf32>
    %c0_118 = arith.constant 0 : index
    %c0_119 = arith.constant 0 : index
    %c0_120 = arith.constant 0 : index
    %141 = vector.load %arg13[%c0_118, %c0_119, %c0_120] : memref<2x48x48xf32, #tpu.memory_space<vmem>>, vector<1x48x48xf32>
    %142 = vector.shape_cast %141 : vector<1x48x48xf32> to vector<48x48xf32>
    %c0_121 = arith.constant 0 : index
    %c0_122 = arith.constant 0 : index
    %c0_123 = arith.constant 0 : index
    %143 = vector.load %arg14[%c0_121, %c0_122, %c0_123] : memref<2x1x48xf32, #tpu.memory_space<vmem>>, vector<1x1x48xf32>
    %144 = vector.shape_cast %143 : vector<1x1x48xf32> to vector<1x48xf32>
    %cst_124 = arith.constant dense<0.000000e+00> : vector<16x144xf32>
    %145 = tpu.matmul %138, %140, %cst_124 {dimension_numbers = #tpu.dot_dimension_numbers<[1], [0], [0], [1], [0, 0, 1, 1], [], []>} : vector<16x48xf32>, vector<48x144xf32>, vector<16x144xf32> -> vector<16x144xf32>
    %146 = vector.extract_strided_slice %145 {offsets = [0, 0], sizes = [16, 8], strides = [1, 1]} : vector<16x144xf32> to vector<16x8xf32>
    %147 = vector.extract_strided_slice %145 {offsets = [0, 8], sizes = [16, 8], strides = [1, 1]} : vector<16x144xf32> to vector<16x8xf32>
    %148 = vector.extract_strided_slice %145 {offsets = [0, 16], sizes = [16, 8], strides = [1, 1]} : vector<16x144xf32> to vector<16x8xf32>
    %149 = vector.extract_strided_slice %145 {offsets = [0, 24], sizes = [16, 8], strides = [1, 1]} : vector<16x144xf32> to vector<16x8xf32>
    %150 = vector.extract_strided_slice %145 {offsets = [0, 32], sizes = [16, 8], strides = [1, 1]} : vector<16x144xf32> to vector<16x8xf32>
    %151 = vector.extract_strided_slice %145 {offsets = [0, 40], sizes = [16, 8], strides = [1, 1]} : vector<16x144xf32> to vector<16x8xf32>
    %152 = vector.shape_cast %146 : vector<16x8xf32> to vector<1x16x8xf32>
    %153 = vector.shape_cast %147 : vector<16x8xf32> to vector<1x16x8xf32>
    %154 = vector.shape_cast %148 : vector<16x8xf32> to vector<1x16x8xf32>
    %155 = vector.shape_cast %149 : vector<16x8xf32> to vector<1x16x8xf32>
    %156 = vector.shape_cast %150 : vector<16x8xf32> to vector<1x16x8xf32>
    %157 = vector.shape_cast %151 : vector<16x8xf32> to vector<1x16x8xf32>
    %158 = tpu.concatenate %152, %153, %154, %155, %156, %157 in 0 : vector<1x16x8xf32>, vector<1x16x8xf32>, vector<1x16x8xf32>, vector<1x16x8xf32>, vector<1x16x8xf32>, vector<1x16x8xf32> -> vector<6x16x8xf32>
    %159 = vector.extract_strided_slice %145 {offsets = [0, 48], sizes = [16, 8], strides = [1, 1]} : vector<16x144xf32> to vector<16x8xf32>
    %160 = vector.extract_strided_slice %145 {offsets = [0, 56], sizes = [16, 8], strides = [1, 1]} : vector<16x144xf32> to vector<16x8xf32>
    %161 = vector.extract_strided_slice %145 {offsets = [0, 64], sizes = [16, 8], strides = [1, 1]} : vector<16x144xf32> to vector<16x8xf32>
    %162 = vector.extract_strided_slice %145 {offsets = [0, 72], sizes = [16, 8], strides = [1, 1]} : vector<16x144xf32> to vector<16x8xf32>
    %163 = vector.extract_strided_slice %145 {offsets = [0, 80], sizes = [16, 8], strides = [1, 1]} : vector<16x144xf32> to vector<16x8xf32>
    %164 = vector.extract_strided_slice %145 {offsets = [0, 88], sizes = [16, 8], strides = [1, 1]} : vector<16x144xf32> to vector<16x8xf32>
    %165 = vector.shape_cast %159 : vector<16x8xf32> to vector<1x16x8xf32>
    %166 = vector.shape_cast %160 : vector<16x8xf32> to vector<1x16x8xf32>
    %167 = vector.shape_cast %161 : vector<16x8xf32> to vector<1x16x8xf32>
    %168 = vector.shape_cast %162 : vector<16x8xf32> to vector<1x16x8xf32>
    %169 = vector.shape_cast %163 : vector<16x8xf32> to vector<1x16x8xf32>
    %170 = vector.shape_cast %164 : vector<16x8xf32> to vector<1x16x8xf32>
    %171 = tpu.concatenate %165, %166, %167, %168, %169, %170 in 0 : vector<1x16x8xf32>, vector<1x16x8xf32>, vector<1x16x8xf32>, vector<1x16x8xf32>, vector<1x16x8xf32>, vector<1x16x8xf32> -> vector<6x16x8xf32>
    %172 = vector.extract_strided_slice %145 {offsets = [0, 96], sizes = [16, 8], strides = [1, 1]} : vector<16x144xf32> to vector<16x8xf32>
    %173 = vector.extract_strided_slice %145 {offsets = [0, 104], sizes = [16, 8], strides = [1, 1]} : vector<16x144xf32> to vector<16x8xf32>
    %174 = vector.extract_strided_slice %145 {offsets = [0, 112], sizes = [16, 8], strides = [1, 1]} : vector<16x144xf32> to vector<16x8xf32>
    %175 = vector.extract_strided_slice %145 {offsets = [0, 120], sizes = [16, 8], strides = [1, 1]} : vector<16x144xf32> to vector<16x8xf32>
    %176 = vector.extract_strided_slice %145 {offsets = [0, 128], sizes = [16, 8], strides = [1, 1]} : vector<16x144xf32> to vector<16x8xf32>
    %177 = vector.extract_strided_slice %145 {offsets = [0, 136], sizes = [16, 8], strides = [1, 1]} : vector<16x144xf32> to vector<16x8xf32>
    %178 = vector.shape_cast %172 : vector<16x8xf32> to vector<1x16x8xf32>
    %179 = vector.shape_cast %173 : vector<16x8xf32> to vector<1x16x8xf32>
    %180 = vector.shape_cast %174 : vector<16x8xf32> to vector<1x16x8xf32>
    %181 = vector.shape_cast %175 : vector<16x8xf32> to vector<1x16x8xf32>
    %182 = vector.shape_cast %176 : vector<16x8xf32> to vector<1x16x8xf32>
    %183 = vector.shape_cast %177 : vector<16x8xf32> to vector<1x16x8xf32>
    %184 = tpu.concatenate %178, %179, %180, %181, %182, %183 in 0 : vector<1x16x8xf32>, vector<1x16x8xf32>, vector<1x16x8xf32>, vector<1x16x8xf32>, vector<1x16x8xf32>, vector<1x16x8xf32> -> vector<6x16x8xf32>
    %cst_125 = arith.constant dense<0.000000e+00> : vector<6x16x16xf32>
    %185 = tpu.matmul %158, %171, %cst_125 {dimension_numbers = #tpu.dot_dimension_numbers<[2], [2], [1], [1], [0, 0, 0, 1, 1, 1], [0], [0]>} : vector<6x16x8xf32>, vector<6x16x8xf32>, vector<6x16x16xf32> -> vector<6x16x16xf32>
    %cst_126 = arith.constant 0.353553385 : f32
    %186 = vector.broadcast %cst_126 : f32 to vector<6x16x16xf32>
    %187 = arith.mulf %185, %186 : vector<6x16x16xf32>
    %cst_127 = arith.constant dense<0xFF800000> : vector<6x16xf32>
    %188 = vector.multi_reduction <maximumf>, %187, %cst_127 [2] : vector<6x16x16xf32> to vector<6x16xf32>
    %189 = vector.shape_cast %188 : vector<6x16xf32> to vector<6x16x1xf32>
    %190 = vector.broadcast %189 : vector<6x16x1xf32> to vector<6x16x16xf32>
    %191 = arith.subf %187, %190 : vector<6x16x16xf32>
    %192 = math.exp %191 : vector<6x16x16xf32>
    %cst_128 = arith.constant dense<0.000000e+00> : vector<6x16xf32>
    %193 = vector.multi_reduction <add>, %192, %cst_128 [2] : vector<6x16x16xf32> to vector<6x16xf32>
    %194 = vector.shape_cast %193 : vector<6x16xf32> to vector<6x16x1xf32>
    %195 = tpu.reciprocal %194 {approx = true} : vector<6x16x1xf32> -> vector<6x16x1xf32>
    %196 = vector.broadcast %195 : vector<6x16x1xf32> to vector<6x16x16xf32>
    %197 = arith.mulf %192, %196 : vector<6x16x16xf32>
    %cst_129 = arith.constant dense<0.000000e+00> : vector<6x16x8xf32>
    %198 = tpu.matmul %197, %184, %cst_129 {dimension_numbers = #tpu.dot_dimension_numbers<[2], [1], [1], [2], [0, 0, 0, 1, 1, 2], [0], [0]>} : vector<6x16x16xf32>, vector<6x16x8xf32>, vector<6x16x8xf32> -> vector<6x16x8xf32>
    %199 = vector.extract_strided_slice %198 {offsets = [0, 0, 0], sizes = [1, 16, 8], strides = [1, 1, 1]} : vector<6x16x8xf32> to vector<1x16x8xf32>
    %200 = vector.shape_cast %199 : vector<1x16x8xf32> to vector<16x8xf32>
    %201 = vector.extract_strided_slice %198 {offsets = [1, 0, 0], sizes = [1, 16, 8], strides = [1, 1, 1]} : vector<6x16x8xf32> to vector<1x16x8xf32>
    %202 = vector.shape_cast %201 : vector<1x16x8xf32> to vector<16x8xf32>
    %203 = vector.extract_strided_slice %198 {offsets = [2, 0, 0], sizes = [1, 16, 8], strides = [1, 1, 1]} : vector<6x16x8xf32> to vector<1x16x8xf32>
    %204 = vector.shape_cast %203 : vector<1x16x8xf32> to vector<16x8xf32>
    %205 = vector.extract_strided_slice %198 {offsets = [3, 0, 0], sizes = [1, 16, 8], strides = [1, 1, 1]} : vector<6x16x8xf32> to vector<1x16x8xf32>
    %206 = vector.shape_cast %205 : vector<1x16x8xf32> to vector<16x8xf32>
    %207 = vector.extract_strided_slice %198 {offsets = [4, 0, 0], sizes = [1, 16, 8], strides = [1, 1, 1]} : vector<6x16x8xf32> to vector<1x16x8xf32>
    %208 = vector.shape_cast %207 : vector<1x16x8xf32> to vector<16x8xf32>
    %209 = vector.extract_strided_slice %198 {offsets = [5, 0, 0], sizes = [1, 16, 8], strides = [1, 1, 1]} : vector<6x16x8xf32> to vector<1x16x8xf32>
    %210 = vector.shape_cast %209 : vector<1x16x8xf32> to vector<16x8xf32>
    %211 = tpu.concatenate %200, %202, %204, %206, %208, %210 in 1 : vector<16x8xf32>, vector<16x8xf32>, vector<16x8xf32>, vector<16x8xf32>, vector<16x8xf32>, vector<16x8xf32> -> vector<16x48xf32>
    %cst_130 = arith.constant dense<0.000000e+00> : vector<16x48xf32>
    %212 = tpu.matmul %211, %142, %cst_130 {dimension_numbers = #tpu.dot_dimension_numbers<[1], [0], [0], [1], [0, 0, 1, 1], [], []>} : vector<16x48xf32>, vector<48x48xf32>, vector<16x48xf32> -> vector<16x48xf32>
    %213 = vector.broadcast %144 : vector<1x48xf32> to vector<16x48xf32>
    %214 = arith.addf %212, %213 : vector<16x48xf32>
    %215 = arith.addf %112, %214 : vector<16x48xf32>
    %c0_131 = arith.constant 0 : index
    %c0_132 = arith.constant 0 : index
    %c0_133 = arith.constant 0 : index
    %216 = vector.load %arg15[%c0_131, %c0_132, %c0_133] : memref<2x1x48xf32, #tpu.memory_space<vmem>>, vector<1x1x48xf32>
    %217 = vector.shape_cast %216 : vector<1x1x48xf32> to vector<1x48xf32>
    %c0_134 = arith.constant 0 : index
    %c0_135 = arith.constant 0 : index
    %c0_136 = arith.constant 0 : index
    %218 = vector.load %arg16[%c0_134, %c0_135, %c0_136] : memref<2x1x48xf32, #tpu.memory_space<vmem>>, vector<1x1x48xf32>
    %219 = vector.shape_cast %218 : vector<1x1x48xf32> to vector<1x48xf32>
    %cst_137 = arith.constant dense<0.000000e+00> : vector<16xf32>
    %220 = vector.multi_reduction <add>, %215, %cst_137 [1] : vector<16x48xf32> to vector<16xf32>
    %221 = vector.shape_cast %220 : vector<16xf32> to vector<16x1xf32>
    %cst_138 = arith.constant 4.800000e+01 : f32
    %222 = vector.broadcast %cst_138 : f32 to vector<16x1xf32>
    %223 = arith.divf %221, %222 : vector<16x1xf32>
    %224 = vector.broadcast %223 : vector<16x1xf32> to vector<16x48xf32>
    %225 = arith.subf %215, %224 : vector<16x48xf32>
    %226 = arith.mulf %225, %225 : vector<16x48xf32>
    %cst_139 = arith.constant dense<0.000000e+00> : vector<16xf32>
    %227 = vector.multi_reduction <add>, %226, %cst_139 [1] : vector<16x48xf32> to vector<16xf32>
    %228 = vector.shape_cast %227 : vector<16xf32> to vector<16x1xf32>
    %cst_140 = arith.constant 4.800000e+01 : f32
    %229 = vector.broadcast %cst_140 : f32 to vector<16x1xf32>
    %230 = arith.divf %228, %229 : vector<16x1xf32>
    %231 = vector.broadcast %223 : vector<16x1xf32> to vector<16x48xf32>
    %232 = arith.subf %215, %231 : vector<16x48xf32>
    %cst_141 = arith.constant 9.99999974E-6 : f32
    %233 = vector.broadcast %cst_141 : f32 to vector<16x1xf32>
    %234 = arith.addf %230, %233 : vector<16x1xf32>
    %235 = math.rsqrt %234 : vector<16x1xf32>
    %236 = vector.broadcast %235 : vector<16x1xf32> to vector<16x48xf32>
    %237 = arith.mulf %232, %236 : vector<16x48xf32>
    %238 = vector.broadcast %217 : vector<1x48xf32> to vector<16x48xf32>
    %239 = arith.mulf %237, %238 : vector<16x48xf32>
    %240 = vector.broadcast %219 : vector<1x48xf32> to vector<16x48xf32>
    %241 = arith.addf %239, %240 : vector<16x48xf32>
    %c0_142 = arith.constant 0 : index
    %c0_143 = arith.constant 0 : index
    %c0_144 = arith.constant 0 : index
    %242 = vector.load %arg17[%c0_142, %c0_143, %c0_144] : memref<2x48x144xf32, #tpu.memory_space<vmem>>, vector<1x48x144xf32>
    %243 = vector.shape_cast %242 : vector<1x48x144xf32> to vector<48x144xf32>
    %cst_145 = arith.constant dense<0.000000e+00> : vector<16x144xf32>
    %244 = tpu.matmul %241, %243, %cst_145 {dimension_numbers = #tpu.dot_dimension_numbers<[1], [0], [0], [1], [0, 0, 1, 1], [], []>} : vector<16x48xf32>, vector<48x144xf32>, vector<16x144xf32> -> vector<16x144xf32>
    %c0_146 = arith.constant 0 : index
    %c0_147 = arith.constant 0 : index
    %c0_148 = arith.constant 0 : index
    %245 = vector.load %arg18[%c0_146, %c0_147, %c0_148] : memref<2x1x144xf32, #tpu.memory_space<vmem>>, vector<1x1x144xf32>
    %246 = vector.shape_cast %245 : vector<1x1x144xf32> to vector<1x144xf32>
    %247 = vector.broadcast %246 : vector<1x144xf32> to vector<16x144xf32>
    %248 = arith.addf %244, %247 : vector<16x144xf32>
    %cst_149 = arith.constant 5.000000e-01 : f32
    %249 = vector.broadcast %cst_149 : f32 to vector<16x144xf32>
    %250 = arith.mulf %249, %248 : vector<16x144xf32>
    %cst_150 = arith.constant 0.707106769 : f32
    %251 = vector.broadcast %cst_150 : f32 to vector<16x144xf32>
    %252 = arith.mulf %248, %251 : vector<16x144xf32>
    %cst_151 = arith.constant 0.000000e+00 : f32
    %253 = vector.broadcast %cst_151 : f32 to vector<16x144xf32>
    %254 = arith.cmpf oge, %252, %253 : vector<16x144xf32>
    %cst_152 = arith.constant 1.000000e+00 : f32
    %cst_153 = arith.constant -1.000000e+00 : f32
    %255 = vector.broadcast %cst_152 : f32 to vector<16x144xf32>
    %256 = vector.broadcast %cst_153 : f32 to vector<16x144xf32>
    %257 = arith.select %254, %255, %256 : vector<16x144xi1>, vector<16x144xf32>
    %258 = math.absf %252 : vector<16x144xf32>
    %cst_154 = arith.constant 0.327591091 : f32
    %259 = vector.broadcast %cst_154 : f32 to vector<16x144xf32>
    %260 = arith.mulf %259, %258 : vector<16x144xf32>
    %cst_155 = arith.constant 1.000000e+00 : f32
    %261 = vector.broadcast %cst_155 : f32 to vector<16x144xf32>
    %262 = arith.addf %261, %260 : vector<16x144xf32>
    %cst_156 = arith.constant 1.000000e+00 : f32
    %263 = vector.broadcast %cst_156 : f32 to vector<16x144xf32>
    %264 = arith.divf %263, %262 : vector<16x144xf32>
    %cst_157 = arith.constant 1.06140542 : f32
    %265 = vector.broadcast %cst_157 : f32 to vector<16x144xf32>
    %266 = arith.mulf %265, %264 : vector<16x144xf32>
    %cst_158 = arith.constant -1.45315206 : f32
    %267 = vector.broadcast %cst_158 : f32 to vector<16x144xf32>
    %268 = arith.addf %266, %267 : vector<16x144xf32>
    %269 = arith.mulf %268, %264 : vector<16x144xf32>
    %cst_159 = arith.constant 1.42141378 : f32
    %270 = vector.broadcast %cst_159 : f32 to vector<16x144xf32>
    %271 = arith.addf %269, %270 : vector<16x144xf32>
    %272 = arith.mulf %271, %264 : vector<16x144xf32>
    %cst_160 = arith.constant -0.284496725 : f32
    %273 = vector.broadcast %cst_160 : f32 to vector<16x144xf32>
    %274 = arith.addf %272, %273 : vector<16x144xf32>
    %275 = arith.mulf %274, %264 : vector<16x144xf32>
    %cst_161 = arith.constant 0.254829586 : f32
    %276 = vector.broadcast %cst_161 : f32 to vector<16x144xf32>
    %277 = arith.addf %275, %276 : vector<16x144xf32>
    %278 = arith.mulf %277, %264 : vector<16x144xf32>
    %cst_162 = arith.constant 0.000000e+00 : f32
    %279 = vector.broadcast %cst_162 : f32 to vector<16x144xf32>
    %280 = arith.subf %279, %258 : vector<16x144xf32>
    %281 = arith.mulf %280, %258 : vector<16x144xf32>
    %282 = math.exp %281 : vector<16x144xf32>
    %283 = arith.mulf %278, %282 : vector<16x144xf32>
    %cst_163 = arith.constant 1.000000e+00 : f32
    %284 = vector.broadcast %cst_163 : f32 to vector<16x144xf32>
    %285 = arith.subf %284, %283 : vector<16x144xf32>
    %286 = arith.mulf %257, %285 : vector<16x144xf32>
    %cst_164 = arith.constant 1.000000e+00 : f32
    %287 = vector.broadcast %cst_164 : f32 to vector<16x144xf32>
    %288 = arith.addf %287, %286 : vector<16x144xf32>
    %289 = arith.mulf %250, %288 : vector<16x144xf32>
    %c0_165 = arith.constant 0 : index
    %c0_166 = arith.constant 0 : index
    %c0_167 = arith.constant 0 : index
    %290 = vector.load %arg19[%c0_165, %c0_166, %c0_167] : memref<2x144x48xf32, #tpu.memory_space<vmem>>, vector<1x144x48xf32>
    %291 = vector.shape_cast %290 : vector<1x144x48xf32> to vector<144x48xf32>
    %cst_168 = arith.constant dense<0.000000e+00> : vector<16x48xf32>
    %292 = tpu.matmul %289, %291, %cst_168 {dimension_numbers = #tpu.dot_dimension_numbers<[1], [0], [0], [1], [0, 0, 1, 1], [], []>} : vector<16x144xf32>, vector<144x48xf32>, vector<16x48xf32> -> vector<16x48xf32>
    %293 = arith.addf %215, %292 : vector<16x48xf32>
    %c0_169 = arith.constant 0 : index
    %c0_170 = arith.constant 0 : index
    %c0_171 = arith.constant 0 : index
    %294 = vector.load %arg20[%c0_169, %c0_170, %c0_171] : memref<2x1x48xf32, #tpu.memory_space<vmem>>, vector<1x1x48xf32>
    %295 = vector.shape_cast %294 : vector<1x1x48xf32> to vector<1x48xf32>
    %296 = vector.broadcast %295 : vector<1x48xf32> to vector<16x48xf32>
    %297 = arith.addf %293, %296 : vector<16x48xf32>
    %c1_172 = arith.constant 1 : index
    %c0_173 = arith.constant 0 : index
    %c0_174 = arith.constant 0 : index
    %298 = vector.load %arg10[%c1_172, %c0_173, %c0_174] : memref<2x1x48xf32, #tpu.memory_space<vmem>>, vector<1x1x48xf32>
    %299 = vector.shape_cast %298 : vector<1x1x48xf32> to vector<1x48xf32>
    %c1_175 = arith.constant 1 : index
    %c0_176 = arith.constant 0 : index
    %c0_177 = arith.constant 0 : index
    %300 = vector.load %arg11[%c1_175, %c0_176, %c0_177] : memref<2x1x48xf32, #tpu.memory_space<vmem>>, vector<1x1x48xf32>
    %301 = vector.shape_cast %300 : vector<1x1x48xf32> to vector<1x48xf32>
    %cst_178 = arith.constant dense<0.000000e+00> : vector<16xf32>
    %302 = vector.multi_reduction <add>, %297, %cst_178 [1] : vector<16x48xf32> to vector<16xf32>
    %303 = vector.shape_cast %302 : vector<16xf32> to vector<16x1xf32>
    %cst_179 = arith.constant 4.800000e+01 : f32
    %304 = vector.broadcast %cst_179 : f32 to vector<16x1xf32>
    %305 = arith.divf %303, %304 : vector<16x1xf32>
    %306 = vector.broadcast %305 : vector<16x1xf32> to vector<16x48xf32>
    %307 = arith.subf %297, %306 : vector<16x48xf32>
    %308 = arith.mulf %307, %307 : vector<16x48xf32>
    %cst_180 = arith.constant dense<0.000000e+00> : vector<16xf32>
    %309 = vector.multi_reduction <add>, %308, %cst_180 [1] : vector<16x48xf32> to vector<16xf32>
    %310 = vector.shape_cast %309 : vector<16xf32> to vector<16x1xf32>
    %cst_181 = arith.constant 4.800000e+01 : f32
    %311 = vector.broadcast %cst_181 : f32 to vector<16x1xf32>
    %312 = arith.divf %310, %311 : vector<16x1xf32>
    %313 = vector.broadcast %305 : vector<16x1xf32> to vector<16x48xf32>
    %314 = arith.subf %297, %313 : vector<16x48xf32>
    %cst_182 = arith.constant 9.99999974E-6 : f32
    %315 = vector.broadcast %cst_182 : f32 to vector<16x1xf32>
    %316 = arith.addf %312, %315 : vector<16x1xf32>
    %317 = math.rsqrt %316 : vector<16x1xf32>
    %318 = vector.broadcast %317 : vector<16x1xf32> to vector<16x48xf32>
    %319 = arith.mulf %314, %318 : vector<16x48xf32>
    %320 = vector.broadcast %299 : vector<1x48xf32> to vector<16x48xf32>
    %321 = arith.mulf %319, %320 : vector<16x48xf32>
    %322 = vector.broadcast %301 : vector<1x48xf32> to vector<16x48xf32>
    %323 = arith.addf %321, %322 : vector<16x48xf32>
    %c1_183 = arith.constant 1 : index
    %c0_184 = arith.constant 0 : index
    %c0_185 = arith.constant 0 : index
    %324 = vector.load %arg12[%c1_183, %c0_184, %c0_185] : memref<2x48x144xf32, #tpu.memory_space<vmem>>, vector<1x48x144xf32>
    %325 = vector.shape_cast %324 : vector<1x48x144xf32> to vector<48x144xf32>
    %c1_186 = arith.constant 1 : index
    %c0_187 = arith.constant 0 : index
    %c0_188 = arith.constant 0 : index
    %326 = vector.load %arg13[%c1_186, %c0_187, %c0_188] : memref<2x48x48xf32, #tpu.memory_space<vmem>>, vector<1x48x48xf32>
    %327 = vector.shape_cast %326 : vector<1x48x48xf32> to vector<48x48xf32>
    %c1_189 = arith.constant 1 : index
    %c0_190 = arith.constant 0 : index
    %c0_191 = arith.constant 0 : index
    %328 = vector.load %arg14[%c1_189, %c0_190, %c0_191] : memref<2x1x48xf32, #tpu.memory_space<vmem>>, vector<1x1x48xf32>
    %329 = vector.shape_cast %328 : vector<1x1x48xf32> to vector<1x48xf32>
    %cst_192 = arith.constant dense<0.000000e+00> : vector<16x144xf32>
    %330 = tpu.matmul %323, %325, %cst_192 {dimension_numbers = #tpu.dot_dimension_numbers<[1], [0], [0], [1], [0, 0, 1, 1], [], []>} : vector<16x48xf32>, vector<48x144xf32>, vector<16x144xf32> -> vector<16x144xf32>
    %331 = vector.extract_strided_slice %330 {offsets = [0, 0], sizes = [16, 8], strides = [1, 1]} : vector<16x144xf32> to vector<16x8xf32>
    %332 = vector.extract_strided_slice %330 {offsets = [0, 8], sizes = [16, 8], strides = [1, 1]} : vector<16x144xf32> to vector<16x8xf32>
    %333 = vector.extract_strided_slice %330 {offsets = [0, 16], sizes = [16, 8], strides = [1, 1]} : vector<16x144xf32> to vector<16x8xf32>
    %334 = vector.extract_strided_slice %330 {offsets = [0, 24], sizes = [16, 8], strides = [1, 1]} : vector<16x144xf32> to vector<16x8xf32>
    %335 = vector.extract_strided_slice %330 {offsets = [0, 32], sizes = [16, 8], strides = [1, 1]} : vector<16x144xf32> to vector<16x8xf32>
    %336 = vector.extract_strided_slice %330 {offsets = [0, 40], sizes = [16, 8], strides = [1, 1]} : vector<16x144xf32> to vector<16x8xf32>
    %337 = vector.shape_cast %331 : vector<16x8xf32> to vector<1x16x8xf32>
    %338 = vector.shape_cast %332 : vector<16x8xf32> to vector<1x16x8xf32>
    %339 = vector.shape_cast %333 : vector<16x8xf32> to vector<1x16x8xf32>
    %340 = vector.shape_cast %334 : vector<16x8xf32> to vector<1x16x8xf32>
    %341 = vector.shape_cast %335 : vector<16x8xf32> to vector<1x16x8xf32>
    %342 = vector.shape_cast %336 : vector<16x8xf32> to vector<1x16x8xf32>
    %343 = tpu.concatenate %337, %338, %339, %340, %341, %342 in 0 : vector<1x16x8xf32>, vector<1x16x8xf32>, vector<1x16x8xf32>, vector<1x16x8xf32>, vector<1x16x8xf32>, vector<1x16x8xf32> -> vector<6x16x8xf32>
    %344 = vector.extract_strided_slice %330 {offsets = [0, 48], sizes = [16, 8], strides = [1, 1]} : vector<16x144xf32> to vector<16x8xf32>
    %345 = vector.extract_strided_slice %330 {offsets = [0, 56], sizes = [16, 8], strides = [1, 1]} : vector<16x144xf32> to vector<16x8xf32>
    %346 = vector.extract_strided_slice %330 {offsets = [0, 64], sizes = [16, 8], strides = [1, 1]} : vector<16x144xf32> to vector<16x8xf32>
    %347 = vector.extract_strided_slice %330 {offsets = [0, 72], sizes = [16, 8], strides = [1, 1]} : vector<16x144xf32> to vector<16x8xf32>
    %348 = vector.extract_strided_slice %330 {offsets = [0, 80], sizes = [16, 8], strides = [1, 1]} : vector<16x144xf32> to vector<16x8xf32>
    %349 = vector.extract_strided_slice %330 {offsets = [0, 88], sizes = [16, 8], strides = [1, 1]} : vector<16x144xf32> to vector<16x8xf32>
    %350 = vector.shape_cast %344 : vector<16x8xf32> to vector<1x16x8xf32>
    %351 = vector.shape_cast %345 : vector<16x8xf32> to vector<1x16x8xf32>
    %352 = vector.shape_cast %346 : vector<16x8xf32> to vector<1x16x8xf32>
    %353 = vector.shape_cast %347 : vector<16x8xf32> to vector<1x16x8xf32>
    %354 = vector.shape_cast %348 : vector<16x8xf32> to vector<1x16x8xf32>
    %355 = vector.shape_cast %349 : vector<16x8xf32> to vector<1x16x8xf32>
    %356 = tpu.concatenate %350, %351, %352, %353, %354, %355 in 0 : vector<1x16x8xf32>, vector<1x16x8xf32>, vector<1x16x8xf32>, vector<1x16x8xf32>, vector<1x16x8xf32>, vector<1x16x8xf32> -> vector<6x16x8xf32>
    %357 = vector.extract_strided_slice %330 {offsets = [0, 96], sizes = [16, 8], strides = [1, 1]} : vector<16x144xf32> to vector<16x8xf32>
    %358 = vector.extract_strided_slice %330 {offsets = [0, 104], sizes = [16, 8], strides = [1, 1]} : vector<16x144xf32> to vector<16x8xf32>
    %359 = vector.extract_strided_slice %330 {offsets = [0, 112], sizes = [16, 8], strides = [1, 1]} : vector<16x144xf32> to vector<16x8xf32>
    %360 = vector.extract_strided_slice %330 {offsets = [0, 120], sizes = [16, 8], strides = [1, 1]} : vector<16x144xf32> to vector<16x8xf32>
    %361 = vector.extract_strided_slice %330 {offsets = [0, 128], sizes = [16, 8], strides = [1, 1]} : vector<16x144xf32> to vector<16x8xf32>
    %362 = vector.extract_strided_slice %330 {offsets = [0, 136], sizes = [16, 8], strides = [1, 1]} : vector<16x144xf32> to vector<16x8xf32>
    %363 = vector.shape_cast %357 : vector<16x8xf32> to vector<1x16x8xf32>
    %364 = vector.shape_cast %358 : vector<16x8xf32> to vector<1x16x8xf32>
    %365 = vector.shape_cast %359 : vector<16x8xf32> to vector<1x16x8xf32>
    %366 = vector.shape_cast %360 : vector<16x8xf32> to vector<1x16x8xf32>
    %367 = vector.shape_cast %361 : vector<16x8xf32> to vector<1x16x8xf32>
    %368 = vector.shape_cast %362 : vector<16x8xf32> to vector<1x16x8xf32>
    %369 = tpu.concatenate %363, %364, %365, %366, %367, %368 in 0 : vector<1x16x8xf32>, vector<1x16x8xf32>, vector<1x16x8xf32>, vector<1x16x8xf32>, vector<1x16x8xf32>, vector<1x16x8xf32> -> vector<6x16x8xf32>
    %cst_193 = arith.constant dense<0.000000e+00> : vector<6x16x16xf32>
    %370 = tpu.matmul %343, %356, %cst_193 {dimension_numbers = #tpu.dot_dimension_numbers<[2], [2], [1], [1], [0, 0, 0, 1, 1, 1], [0], [0]>} : vector<6x16x8xf32>, vector<6x16x8xf32>, vector<6x16x16xf32> -> vector<6x16x16xf32>
    %cst_194 = arith.constant 0.353553385 : f32
    %371 = vector.broadcast %cst_194 : f32 to vector<6x16x16xf32>
    %372 = arith.mulf %370, %371 : vector<6x16x16xf32>
    %cst_195 = arith.constant dense<0xFF800000> : vector<6x16xf32>
    %373 = vector.multi_reduction <maximumf>, %372, %cst_195 [2] : vector<6x16x16xf32> to vector<6x16xf32>
    %374 = vector.shape_cast %373 : vector<6x16xf32> to vector<6x16x1xf32>
    %375 = vector.broadcast %374 : vector<6x16x1xf32> to vector<6x16x16xf32>
    %376 = arith.subf %372, %375 : vector<6x16x16xf32>
    %377 = math.exp %376 : vector<6x16x16xf32>
    %cst_196 = arith.constant dense<0.000000e+00> : vector<6x16xf32>
    %378 = vector.multi_reduction <add>, %377, %cst_196 [2] : vector<6x16x16xf32> to vector<6x16xf32>
    %379 = vector.shape_cast %378 : vector<6x16xf32> to vector<6x16x1xf32>
    %380 = tpu.reciprocal %379 {approx = true} : vector<6x16x1xf32> -> vector<6x16x1xf32>
    %381 = vector.broadcast %380 : vector<6x16x1xf32> to vector<6x16x16xf32>
    %382 = arith.mulf %377, %381 : vector<6x16x16xf32>
    %cst_197 = arith.constant dense<0.000000e+00> : vector<6x16x8xf32>
    %383 = tpu.matmul %382, %369, %cst_197 {dimension_numbers = #tpu.dot_dimension_numbers<[2], [1], [1], [2], [0, 0, 0, 1, 1, 2], [0], [0]>} : vector<6x16x16xf32>, vector<6x16x8xf32>, vector<6x16x8xf32> -> vector<6x16x8xf32>
    %384 = vector.extract_strided_slice %383 {offsets = [0, 0, 0], sizes = [1, 16, 8], strides = [1, 1, 1]} : vector<6x16x8xf32> to vector<1x16x8xf32>
    %385 = vector.shape_cast %384 : vector<1x16x8xf32> to vector<16x8xf32>
    %386 = vector.extract_strided_slice %383 {offsets = [1, 0, 0], sizes = [1, 16, 8], strides = [1, 1, 1]} : vector<6x16x8xf32> to vector<1x16x8xf32>
    %387 = vector.shape_cast %386 : vector<1x16x8xf32> to vector<16x8xf32>
    %388 = vector.extract_strided_slice %383 {offsets = [2, 0, 0], sizes = [1, 16, 8], strides = [1, 1, 1]} : vector<6x16x8xf32> to vector<1x16x8xf32>
    %389 = vector.shape_cast %388 : vector<1x16x8xf32> to vector<16x8xf32>
    %390 = vector.extract_strided_slice %383 {offsets = [3, 0, 0], sizes = [1, 16, 8], strides = [1, 1, 1]} : vector<6x16x8xf32> to vector<1x16x8xf32>
    %391 = vector.shape_cast %390 : vector<1x16x8xf32> to vector<16x8xf32>
    %392 = vector.extract_strided_slice %383 {offsets = [4, 0, 0], sizes = [1, 16, 8], strides = [1, 1, 1]} : vector<6x16x8xf32> to vector<1x16x8xf32>
    %393 = vector.shape_cast %392 : vector<1x16x8xf32> to vector<16x8xf32>
    %394 = vector.extract_strided_slice %383 {offsets = [5, 0, 0], sizes = [1, 16, 8], strides = [1, 1, 1]} : vector<6x16x8xf32> to vector<1x16x8xf32>
    %395 = vector.shape_cast %394 : vector<1x16x8xf32> to vector<16x8xf32>
    %396 = tpu.concatenate %385, %387, %389, %391, %393, %395 in 1 : vector<16x8xf32>, vector<16x8xf32>, vector<16x8xf32>, vector<16x8xf32>, vector<16x8xf32>, vector<16x8xf32> -> vector<16x48xf32>
    %cst_198 = arith.constant dense<0.000000e+00> : vector<16x48xf32>
    %397 = tpu.matmul %396, %327, %cst_198 {dimension_numbers = #tpu.dot_dimension_numbers<[1], [0], [0], [1], [0, 0, 1, 1], [], []>} : vector<16x48xf32>, vector<48x48xf32>, vector<16x48xf32> -> vector<16x48xf32>
    %398 = vector.broadcast %329 : vector<1x48xf32> to vector<16x48xf32>
    %399 = arith.addf %397, %398 : vector<16x48xf32>
    %400 = arith.addf %297, %399 : vector<16x48xf32>
    %c1_199 = arith.constant 1 : index
    %c0_200 = arith.constant 0 : index
    %c0_201 = arith.constant 0 : index
    %401 = vector.load %arg15[%c1_199, %c0_200, %c0_201] : memref<2x1x48xf32, #tpu.memory_space<vmem>>, vector<1x1x48xf32>
    %402 = vector.shape_cast %401 : vector<1x1x48xf32> to vector<1x48xf32>
    %c1_202 = arith.constant 1 : index
    %c0_203 = arith.constant 0 : index
    %c0_204 = arith.constant 0 : index
    %403 = vector.load %arg16[%c1_202, %c0_203, %c0_204] : memref<2x1x48xf32, #tpu.memory_space<vmem>>, vector<1x1x48xf32>
    %404 = vector.shape_cast %403 : vector<1x1x48xf32> to vector<1x48xf32>
    %cst_205 = arith.constant dense<0.000000e+00> : vector<16xf32>
    %405 = vector.multi_reduction <add>, %400, %cst_205 [1] : vector<16x48xf32> to vector<16xf32>
    %406 = vector.shape_cast %405 : vector<16xf32> to vector<16x1xf32>
    %cst_206 = arith.constant 4.800000e+01 : f32
    %407 = vector.broadcast %cst_206 : f32 to vector<16x1xf32>
    %408 = arith.divf %406, %407 : vector<16x1xf32>
    %409 = vector.broadcast %408 : vector<16x1xf32> to vector<16x48xf32>
    %410 = arith.subf %400, %409 : vector<16x48xf32>
    %411 = arith.mulf %410, %410 : vector<16x48xf32>
    %cst_207 = arith.constant dense<0.000000e+00> : vector<16xf32>
    %412 = vector.multi_reduction <add>, %411, %cst_207 [1] : vector<16x48xf32> to vector<16xf32>
    %413 = vector.shape_cast %412 : vector<16xf32> to vector<16x1xf32>
    %cst_208 = arith.constant 4.800000e+01 : f32
    %414 = vector.broadcast %cst_208 : f32 to vector<16x1xf32>
    %415 = arith.divf %413, %414 : vector<16x1xf32>
    %416 = vector.broadcast %408 : vector<16x1xf32> to vector<16x48xf32>
    %417 = arith.subf %400, %416 : vector<16x48xf32>
    %cst_209 = arith.constant 9.99999974E-6 : f32
    %418 = vector.broadcast %cst_209 : f32 to vector<16x1xf32>
    %419 = arith.addf %415, %418 : vector<16x1xf32>
    %420 = math.rsqrt %419 : vector<16x1xf32>
    %421 = vector.broadcast %420 : vector<16x1xf32> to vector<16x48xf32>
    %422 = arith.mulf %417, %421 : vector<16x48xf32>
    %423 = vector.broadcast %402 : vector<1x48xf32> to vector<16x48xf32>
    %424 = arith.mulf %422, %423 : vector<16x48xf32>
    %425 = vector.broadcast %404 : vector<1x48xf32> to vector<16x48xf32>
    %426 = arith.addf %424, %425 : vector<16x48xf32>
    %c1_210 = arith.constant 1 : index
    %c0_211 = arith.constant 0 : index
    %c0_212 = arith.constant 0 : index
    %427 = vector.load %arg17[%c1_210, %c0_211, %c0_212] : memref<2x48x144xf32, #tpu.memory_space<vmem>>, vector<1x48x144xf32>
    %428 = vector.shape_cast %427 : vector<1x48x144xf32> to vector<48x144xf32>
    %cst_213 = arith.constant dense<0.000000e+00> : vector<16x144xf32>
    %429 = tpu.matmul %426, %428, %cst_213 {dimension_numbers = #tpu.dot_dimension_numbers<[1], [0], [0], [1], [0, 0, 1, 1], [], []>} : vector<16x48xf32>, vector<48x144xf32>, vector<16x144xf32> -> vector<16x144xf32>
    %c1_214 = arith.constant 1 : index
    %c0_215 = arith.constant 0 : index
    %c0_216 = arith.constant 0 : index
    %430 = vector.load %arg18[%c1_214, %c0_215, %c0_216] : memref<2x1x144xf32, #tpu.memory_space<vmem>>, vector<1x1x144xf32>
    %431 = vector.shape_cast %430 : vector<1x1x144xf32> to vector<1x144xf32>
    %432 = vector.broadcast %431 : vector<1x144xf32> to vector<16x144xf32>
    %433 = arith.addf %429, %432 : vector<16x144xf32>
    %cst_217 = arith.constant 5.000000e-01 : f32
    %434 = vector.broadcast %cst_217 : f32 to vector<16x144xf32>
    %435 = arith.mulf %434, %433 : vector<16x144xf32>
    %cst_218 = arith.constant 0.707106769 : f32
    %436 = vector.broadcast %cst_218 : f32 to vector<16x144xf32>
    %437 = arith.mulf %433, %436 : vector<16x144xf32>
    %cst_219 = arith.constant 0.000000e+00 : f32
    %438 = vector.broadcast %cst_219 : f32 to vector<16x144xf32>
    %439 = arith.cmpf oge, %437, %438 : vector<16x144xf32>
    %cst_220 = arith.constant 1.000000e+00 : f32
    %cst_221 = arith.constant -1.000000e+00 : f32
    %440 = vector.broadcast %cst_220 : f32 to vector<16x144xf32>
    %441 = vector.broadcast %cst_221 : f32 to vector<16x144xf32>
    %442 = arith.select %439, %440, %441 : vector<16x144xi1>, vector<16x144xf32>
    %443 = math.absf %437 : vector<16x144xf32>
    %cst_222 = arith.constant 0.327591091 : f32
    %444 = vector.broadcast %cst_222 : f32 to vector<16x144xf32>
    %445 = arith.mulf %444, %443 : vector<16x144xf32>
    %cst_223 = arith.constant 1.000000e+00 : f32
    %446 = vector.broadcast %cst_223 : f32 to vector<16x144xf32>
    %447 = arith.addf %446, %445 : vector<16x144xf32>
    %cst_224 = arith.constant 1.000000e+00 : f32
    %448 = vector.broadcast %cst_224 : f32 to vector<16x144xf32>
    %449 = arith.divf %448, %447 : vector<16x144xf32>
    %cst_225 = arith.constant 1.06140542 : f32
    %450 = vector.broadcast %cst_225 : f32 to vector<16x144xf32>
    %451 = arith.mulf %450, %449 : vector<16x144xf32>
    %cst_226 = arith.constant -1.45315206 : f32
    %452 = vector.broadcast %cst_226 : f32 to vector<16x144xf32>
    %453 = arith.addf %451, %452 : vector<16x144xf32>
    %454 = arith.mulf %453, %449 : vector<16x144xf32>
    %cst_227 = arith.constant 1.42141378 : f32
    %455 = vector.broadcast %cst_227 : f32 to vector<16x144xf32>
    %456 = arith.addf %454, %455 : vector<16x144xf32>
    %457 = arith.mulf %456, %449 : vector<16x144xf32>
    %cst_228 = arith.constant -0.284496725 : f32
    %458 = vector.broadcast %cst_228 : f32 to vector<16x144xf32>
    %459 = arith.addf %457, %458 : vector<16x144xf32>
    %460 = arith.mulf %459, %449 : vector<16x144xf32>
    %cst_229 = arith.constant 0.254829586 : f32
    %461 = vector.broadcast %cst_229 : f32 to vector<16x144xf32>
    %462 = arith.addf %460, %461 : vector<16x144xf32>
    %463 = arith.mulf %462, %449 : vector<16x144xf32>
    %cst_230 = arith.constant 0.000000e+00 : f32
    %464 = vector.broadcast %cst_230 : f32 to vector<16x144xf32>
    %465 = arith.subf %464, %443 : vector<16x144xf32>
    %466 = arith.mulf %465, %443 : vector<16x144xf32>
    %467 = math.exp %466 : vector<16x144xf32>
    %468 = arith.mulf %463, %467 : vector<16x144xf32>
    %cst_231 = arith.constant 1.000000e+00 : f32
    %469 = vector.broadcast %cst_231 : f32 to vector<16x144xf32>
    %470 = arith.subf %469, %468 : vector<16x144xf32>
    %471 = arith.mulf %442, %470 : vector<16x144xf32>
    %cst_232 = arith.constant 1.000000e+00 : f32
    %472 = vector.broadcast %cst_232 : f32 to vector<16x144xf32>
    %473 = arith.addf %472, %471 : vector<16x144xf32>
    %474 = arith.mulf %435, %473 : vector<16x144xf32>
    %c1_233 = arith.constant 1 : index
    %c0_234 = arith.constant 0 : index
    %c0_235 = arith.constant 0 : index
    %475 = vector.load %arg19[%c1_233, %c0_234, %c0_235] : memref<2x144x48xf32, #tpu.memory_space<vmem>>, vector<1x144x48xf32>
    %476 = vector.shape_cast %475 : vector<1x144x48xf32> to vector<144x48xf32>
    %cst_236 = arith.constant dense<0.000000e+00> : vector<16x48xf32>
    %477 = tpu.matmul %474, %476, %cst_236 {dimension_numbers = #tpu.dot_dimension_numbers<[1], [0], [0], [1], [0, 0, 1, 1], [], []>} : vector<16x144xf32>, vector<144x48xf32>, vector<16x48xf32> -> vector<16x48xf32>
    %478 = arith.addf %400, %477 : vector<16x48xf32>
    %c1_237 = arith.constant 1 : index
    %c0_238 = arith.constant 0 : index
    %c0_239 = arith.constant 0 : index
    %479 = vector.load %arg20[%c1_237, %c0_238, %c0_239] : memref<2x1x48xf32, #tpu.memory_space<vmem>>, vector<1x1x48xf32>
    %480 = vector.shape_cast %479 : vector<1x1x48xf32> to vector<1x48xf32>
    %481 = vector.broadcast %480 : vector<1x48xf32> to vector<16x48xf32>
    %482 = arith.addf %478, %481 : vector<16x48xf32>
    %cst_240 = arith.constant dense<0.000000e+00> : vector<16xf32>
    %483 = vector.multi_reduction <add>, %482, %cst_240 [1] : vector<16x48xf32> to vector<16xf32>
    %484 = vector.shape_cast %483 : vector<16xf32> to vector<16x1xf32>
    %cst_241 = arith.constant 4.800000e+01 : f32
    %485 = vector.broadcast %cst_241 : f32 to vector<16x1xf32>
    %486 = arith.divf %484, %485 : vector<16x1xf32>
    %487 = vector.broadcast %486 : vector<16x1xf32> to vector<16x48xf32>
    %488 = arith.subf %482, %487 : vector<16x48xf32>
    %489 = arith.mulf %488, %488 : vector<16x48xf32>
    %cst_242 = arith.constant dense<0.000000e+00> : vector<16xf32>
    %490 = vector.multi_reduction <add>, %489, %cst_242 [1] : vector<16x48xf32> to vector<16xf32>
    %491 = vector.shape_cast %490 : vector<16xf32> to vector<16x1xf32>
    %cst_243 = arith.constant 4.800000e+01 : f32
    %492 = vector.broadcast %cst_243 : f32 to vector<16x1xf32>
    %493 = arith.divf %491, %492 : vector<16x1xf32>
    %494 = vector.broadcast %486 : vector<16x1xf32> to vector<16x48xf32>
    %495 = arith.subf %482, %494 : vector<16x48xf32>
    %cst_244 = arith.constant 9.99999974E-6 : f32
    %496 = vector.broadcast %cst_244 : f32 to vector<16x1xf32>
    %497 = arith.addf %493, %496 : vector<16x1xf32>
    %498 = math.rsqrt %497 : vector<16x1xf32>
    %499 = vector.broadcast %498 : vector<16x1xf32> to vector<16x48xf32>
    %500 = arith.mulf %495, %499 : vector<16x48xf32>
    %501 = vector.broadcast %6 : vector<1x48xf32> to vector<16x48xf32>
    %502 = arith.mulf %500, %501 : vector<16x48xf32>
    %503 = vector.broadcast %7 : vector<1x48xf32> to vector<16x48xf32>
    %504 = arith.addf %502, %503 : vector<16x48xf32>
    %cst_245 = arith.constant dense<0.000000e+00> : vector<16xf32>
    %505 = vector.multi_reduction <add>, %504, %cst_245 [1] : vector<16x48xf32> to vector<16xf32>
    %506 = vector.shape_cast %505 : vector<16xf32> to vector<16x1xf32>
    %cst_246 = arith.constant 4.800000e+01 : f32
    %507 = vector.broadcast %cst_246 : f32 to vector<16x1xf32>
    %508 = arith.divf %506, %507 : vector<16x1xf32>
    %509 = vector.broadcast %508 : vector<16x1xf32> to vector<16x48xf32>
    %510 = arith.subf %504, %509 : vector<16x48xf32>
    %511 = arith.mulf %510, %510 : vector<16x48xf32>
    %cst_247 = arith.constant dense<0.000000e+00> : vector<16xf32>
    %512 = vector.multi_reduction <add>, %511, %cst_247 [1] : vector<16x48xf32> to vector<16xf32>
    %513 = vector.shape_cast %512 : vector<16xf32> to vector<16x1xf32>
    %cst_248 = arith.constant 4.800000e+01 : f32
    %514 = vector.broadcast %cst_248 : f32 to vector<16x1xf32>
    %515 = arith.divf %513, %514 : vector<16x1xf32>
    %516 = vector.broadcast %508 : vector<16x1xf32> to vector<16x48xf32>
    %517 = arith.subf %504, %516 : vector<16x48xf32>
    %cst_249 = arith.constant 9.99999974E-6 : f32
    %518 = vector.broadcast %cst_249 : f32 to vector<16x1xf32>
    %519 = arith.addf %515, %518 : vector<16x1xf32>
    %520 = math.rsqrt %519 : vector<16x1xf32>
    %521 = vector.broadcast %520 : vector<16x1xf32> to vector<16x48xf32>
    %522 = arith.mulf %517, %521 : vector<16x48xf32>
    %523 = vector.broadcast %8 : vector<1x48xf32> to vector<16x48xf32>
    %524 = arith.mulf %522, %523 : vector<16x48xf32>
    %525 = vector.broadcast %9 : vector<1x48xf32> to vector<16x48xf32>
    %526 = arith.addf %524, %525 : vector<16x48xf32>
    %527 = vector.extract_strided_slice %526 {offsets = [0, 0], sizes = [1, 48], strides = [1, 1]} : vector<16x48xf32> to vector<1x48xf32>
    %528 = vector.extract_strided_slice %526 {offsets = [1, 0], sizes = [14, 48], strides = [1, 1]} : vector<16x48xf32> to vector<14x48xf32>
    %cst_250 = arith.constant dense<0.000000e+00> : vector<14x48xf32>
    %529 = tpu.matmul %528, %10, %cst_250 {dimension_numbers = #tpu.dot_dimension_numbers<[1], [0], [0], [1], [0, 0, 1, 1], [], []>} : vector<14x48xf32>, vector<48x48xf32>, vector<14x48xf32> -> vector<14x48xf32>
    %cst_251 = arith.constant dense<0.000000e+00> : vector<1x48xf32>
    %530 = tpu.matmul %527, %11, %cst_251 {dimension_numbers = #tpu.dot_dimension_numbers<[1], [0], [0], [1], [0, 0, 1, 1], [], []>} : vector<1x48xf32>, vector<48x48xf32>, vector<1x48xf32> -> vector<1x48xf32>
    %cst_252 = arith.constant dense<0.000000e+00> : vector<1x48xf32>
    %531 = tpu.matmul %527, %12, %cst_252 {dimension_numbers = #tpu.dot_dimension_numbers<[1], [0], [0], [1], [0, 0, 1, 1], [], []>} : vector<1x48xf32>, vector<48x48xf32>, vector<1x48xf32> -> vector<1x48xf32>
    %cst_253 = arith.constant dense<0.000000e+00> : vector<14x1xf32>
    %532 = tpu.matmul %529, %530, %cst_253 {dimension_numbers = #tpu.dot_dimension_numbers<[1], [1], [0], [0], [0, 0, 1, 0], [], []>} : vector<14x48xf32>, vector<1x48xf32>, vector<14x1xf32> -> vector<14x1xf32>
    %cst_254 = arith.constant 0.144337565 : f32
    %533 = vector.broadcast %cst_254 : f32 to vector<14x1xf32>
    %534 = arith.mulf %532, %533 : vector<14x1xf32>
    %cst_255 = arith.constant 0.000000e+00 : f32
    %535 = vector.broadcast %cst_255 : f32 to vector<14x1xf32>
    %536 = arith.subf %535, %534 : vector<14x1xf32>
    %537 = math.exp %536 : vector<14x1xf32>
    %cst_256 = arith.constant 1.000000e+00 : f32
    %538 = vector.broadcast %cst_256 : f32 to vector<14x1xf32>
    %539 = arith.addf %538, %537 : vector<14x1xf32>
    %540 = tpu.reciprocal %539 {approx = true} : vector<14x1xf32> -> vector<14x1xf32>
    %541 = vector.broadcast %540 : vector<14x1xf32> to vector<14x48xf32>
    %542 = vector.broadcast %531 : vector<1x48xf32> to vector<14x48xf32>
    %543 = arith.mulf %541, %542 : vector<14x48xf32>
    %cst_257 = arith.constant dense<0.000000e+00> : vector<14x48xf32>
    %544 = tpu.matmul %543, %13, %cst_257 {dimension_numbers = #tpu.dot_dimension_numbers<[1], [0], [0], [1], [0, 0, 1, 1], [], []>} : vector<14x48xf32>, vector<48x48xf32>, vector<14x48xf32> -> vector<14x48xf32>
    %545 = vector.broadcast %14 : vector<1x48xf32> to vector<14x48xf32>
    %546 = arith.addf %544, %545 : vector<14x48xf32>
    %547 = vector.extract_strided_slice %504 {offsets = [1, 0], sizes = [14, 48], strides = [1, 1]} : vector<16x48xf32> to vector<14x48xf32>
    %548 = arith.addf %546, %547 : vector<14x48xf32>
    %cst_258 = arith.constant dense<0.000000e+00> : vector<16xf32>
    %549 = vector.multi_reduction <add>, %504, %cst_258 [1] : vector<16x48xf32> to vector<16xf32>
    %550 = vector.shape_cast %549 : vector<16xf32> to vector<16x1xf32>
    %cst_259 = arith.constant 4.800000e+01 : f32
    %551 = vector.broadcast %cst_259 : f32 to vector<16x1xf32>
    %552 = arith.divf %550, %551 : vector<16x1xf32>
    %553 = vector.broadcast %552 : vector<16x1xf32> to vector<16x48xf32>
    %554 = arith.subf %504, %553 : vector<16x48xf32>
    %555 = arith.mulf %554, %554 : vector<16x48xf32>
    %cst_260 = arith.constant dense<0.000000e+00> : vector<16xf32>
    %556 = vector.multi_reduction <add>, %555, %cst_260 [1] : vector<16x48xf32> to vector<16xf32>
    %557 = vector.shape_cast %556 : vector<16xf32> to vector<16x1xf32>
    %cst_261 = arith.constant 4.800000e+01 : f32
    %558 = vector.broadcast %cst_261 : f32 to vector<16x1xf32>
    %559 = arith.divf %557, %558 : vector<16x1xf32>
    %560 = vector.broadcast %552 : vector<16x1xf32> to vector<16x48xf32>
    %561 = arith.subf %504, %560 : vector<16x48xf32>
    %cst_262 = arith.constant 9.99999974E-6 : f32
    %562 = vector.broadcast %cst_262 : f32 to vector<16x1xf32>
    %563 = arith.addf %559, %562 : vector<16x1xf32>
    %564 = math.rsqrt %563 : vector<16x1xf32>
    %565 = vector.broadcast %564 : vector<16x1xf32> to vector<16x48xf32>
    %566 = arith.mulf %561, %565 : vector<16x48xf32>
    %567 = vector.broadcast %15 : vector<1x48xf32> to vector<16x48xf32>
    %568 = arith.mulf %566, %567 : vector<16x48xf32>
    %569 = vector.broadcast %16 : vector<1x48xf32> to vector<16x48xf32>
    %570 = arith.addf %568, %569 : vector<16x48xf32>
    %571 = vector.extract_strided_slice %570 {offsets = [15, 0], sizes = [1, 48], strides = [1, 1]} : vector<16x48xf32> to vector<1x48xf32>
    %572 = vector.extract_strided_slice %570 {offsets = [1, 0], sizes = [14, 48], strides = [1, 1]} : vector<16x48xf32> to vector<14x48xf32>
    %cst_263 = arith.constant dense<0.000000e+00> : vector<14x48xf32>
    %573 = tpu.matmul %572, %17, %cst_263 {dimension_numbers = #tpu.dot_dimension_numbers<[1], [0], [0], [1], [0, 0, 1, 1], [], []>} : vector<14x48xf32>, vector<48x48xf32>, vector<14x48xf32> -> vector<14x48xf32>
    %cst_264 = arith.constant dense<0.000000e+00> : vector<1x48xf32>
    %574 = tpu.matmul %571, %18, %cst_264 {dimension_numbers = #tpu.dot_dimension_numbers<[1], [0], [0], [1], [0, 0, 1, 1], [], []>} : vector<1x48xf32>, vector<48x48xf32>, vector<1x48xf32> -> vector<1x48xf32>
    %cst_265 = arith.constant dense<0.000000e+00> : vector<1x48xf32>
    %575 = tpu.matmul %571, %19, %cst_265 {dimension_numbers = #tpu.dot_dimension_numbers<[1], [0], [0], [1], [0, 0, 1, 1], [], []>} : vector<1x48xf32>, vector<48x48xf32>, vector<1x48xf32> -> vector<1x48xf32>
    %cst_266 = arith.constant dense<0.000000e+00> : vector<14x1xf32>
    %576 = tpu.matmul %573, %574, %cst_266 {dimension_numbers = #tpu.dot_dimension_numbers<[1], [1], [0], [0], [0, 0, 1, 0], [], []>} : vector<14x48xf32>, vector<1x48xf32>, vector<14x1xf32> -> vector<14x1xf32>
    %cst_267 = arith.constant 0.144337565 : f32
    %577 = vector.broadcast %cst_267 : f32 to vector<14x1xf32>
    %578 = arith.mulf %576, %577 : vector<14x1xf32>
    %cst_268 = arith.constant 0.000000e+00 : f32
    %579 = vector.broadcast %cst_268 : f32 to vector<14x1xf32>
    %580 = arith.subf %579, %578 : vector<14x1xf32>
    %581 = math.exp %580 : vector<14x1xf32>
    %cst_269 = arith.constant 1.000000e+00 : f32
    %582 = vector.broadcast %cst_269 : f32 to vector<14x1xf32>
    %583 = arith.addf %582, %581 : vector<14x1xf32>
    %584 = tpu.reciprocal %583 {approx = true} : vector<14x1xf32> -> vector<14x1xf32>
    %585 = vector.broadcast %584 : vector<14x1xf32> to vector<14x48xf32>
    %586 = vector.broadcast %575 : vector<1x48xf32> to vector<14x48xf32>
    %587 = arith.mulf %585, %586 : vector<14x48xf32>
    %cst_270 = arith.constant dense<0.000000e+00> : vector<14x48xf32>
    %588 = tpu.matmul %587, %20, %cst_270 {dimension_numbers = #tpu.dot_dimension_numbers<[1], [0], [0], [1], [0, 0, 1, 1], [], []>} : vector<14x48xf32>, vector<48x48xf32>, vector<14x48xf32> -> vector<14x48xf32>
    %589 = vector.broadcast %21 : vector<1x48xf32> to vector<14x48xf32>
    %590 = arith.addf %588, %589 : vector<14x48xf32>
    %591 = vector.extract_strided_slice %504 {offsets = [1, 0], sizes = [14, 48], strides = [1, 1]} : vector<16x48xf32> to vector<14x48xf32>
    %592 = arith.addf %590, %591 : vector<14x48xf32>
    %cst_271 = arith.constant dense<0.000000e+00> : vector<14xf32>
    %593 = vector.multi_reduction <add>, %548, %cst_271 [1] : vector<14x48xf32> to vector<14xf32>
    %594 = vector.shape_cast %593 : vector<14xf32> to vector<14x1xf32>
    %cst_272 = arith.constant 4.800000e+01 : f32
    %595 = vector.broadcast %cst_272 : f32 to vector<14x1xf32>
    %596 = arith.divf %594, %595 : vector<14x1xf32>
    %597 = vector.broadcast %596 : vector<14x1xf32> to vector<14x48xf32>
    %598 = arith.subf %548, %597 : vector<14x48xf32>
    %599 = arith.mulf %598, %598 : vector<14x48xf32>
    %cst_273 = arith.constant dense<0.000000e+00> : vector<14xf32>
    %600 = vector.multi_reduction <add>, %599, %cst_273 [1] : vector<14x48xf32> to vector<14xf32>
    %601 = vector.shape_cast %600 : vector<14xf32> to vector<14x1xf32>
    %cst_274 = arith.constant 4.800000e+01 : f32
    %602 = vector.broadcast %cst_274 : f32 to vector<14x1xf32>
    %603 = arith.divf %601, %602 : vector<14x1xf32>
    %604 = vector.broadcast %596 : vector<14x1xf32> to vector<14x48xf32>
    %605 = arith.subf %548, %604 : vector<14x48xf32>
    %cst_275 = arith.constant 9.99999974E-6 : f32
    %606 = vector.broadcast %cst_275 : f32 to vector<14x1xf32>
    %607 = arith.addf %603, %606 : vector<14x1xf32>
    %608 = math.rsqrt %607 : vector<14x1xf32>
    %609 = vector.broadcast %608 : vector<14x1xf32> to vector<14x48xf32>
    %610 = arith.mulf %605, %609 : vector<14x48xf32>
    %611 = vector.broadcast %22 : vector<1x48xf32> to vector<14x48xf32>
    %612 = arith.mulf %610, %611 : vector<14x48xf32>
    %613 = vector.broadcast %23 : vector<1x48xf32> to vector<14x48xf32>
    %614 = arith.addf %612, %613 : vector<14x48xf32>
    %cst_276 = arith.constant dense<0.000000e+00> : vector<14x32xf32>
    %615 = tpu.matmul %614, %24, %cst_276 {dimension_numbers = #tpu.dot_dimension_numbers<[1], [0], [0], [1], [0, 0, 1, 1], [], []>} : vector<14x48xf32>, vector<48x32xf32>, vector<14x32xf32> -> vector<14x32xf32>
    %616 = vector.broadcast %25 : vector<1x32xf32> to vector<14x32xf32>
    %617 = arith.addf %615, %616 : vector<14x32xf32>
    %cst_277 = arith.constant 5.000000e-01 : f32
    %618 = vector.broadcast %cst_277 : f32 to vector<14x32xf32>
    %619 = arith.mulf %618, %617 : vector<14x32xf32>
    %cst_278 = arith.constant 0.707106769 : f32
    %620 = vector.broadcast %cst_278 : f32 to vector<14x32xf32>
    %621 = arith.mulf %617, %620 : vector<14x32xf32>
    %cst_279 = arith.constant 0.000000e+00 : f32
    %622 = vector.broadcast %cst_279 : f32 to vector<14x32xf32>
    %623 = arith.cmpf oge, %621, %622 : vector<14x32xf32>
    %cst_280 = arith.constant 1.000000e+00 : f32
    %cst_281 = arith.constant -1.000000e+00 : f32
    %624 = vector.broadcast %cst_280 : f32 to vector<14x32xf32>
    %625 = vector.broadcast %cst_281 : f32 to vector<14x32xf32>
    %626 = arith.select %623, %624, %625 : vector<14x32xi1>, vector<14x32xf32>
    %627 = math.absf %621 : vector<14x32xf32>
    %cst_282 = arith.constant 0.327591091 : f32
    %628 = vector.broadcast %cst_282 : f32 to vector<14x32xf32>
    %629 = arith.mulf %628, %627 : vector<14x32xf32>
    %cst_283 = arith.constant 1.000000e+00 : f32
    %630 = vector.broadcast %cst_283 : f32 to vector<14x32xf32>
    %631 = arith.addf %630, %629 : vector<14x32xf32>
    %cst_284 = arith.constant 1.000000e+00 : f32
    %632 = vector.broadcast %cst_284 : f32 to vector<14x32xf32>
    %633 = arith.divf %632, %631 : vector<14x32xf32>
    %cst_285 = arith.constant 1.06140542 : f32
    %634 = vector.broadcast %cst_285 : f32 to vector<14x32xf32>
    %635 = arith.mulf %634, %633 : vector<14x32xf32>
    %cst_286 = arith.constant -1.45315206 : f32
    %636 = vector.broadcast %cst_286 : f32 to vector<14x32xf32>
    %637 = arith.addf %635, %636 : vector<14x32xf32>
    %638 = arith.mulf %637, %633 : vector<14x32xf32>
    %cst_287 = arith.constant 1.42141378 : f32
    %639 = vector.broadcast %cst_287 : f32 to vector<14x32xf32>
    %640 = arith.addf %638, %639 : vector<14x32xf32>
    %641 = arith.mulf %640, %633 : vector<14x32xf32>
    %cst_288 = arith.constant -0.284496725 : f32
    %642 = vector.broadcast %cst_288 : f32 to vector<14x32xf32>
    %643 = arith.addf %641, %642 : vector<14x32xf32>
    %644 = arith.mulf %643, %633 : vector<14x32xf32>
    %cst_289 = arith.constant 0.254829586 : f32
    %645 = vector.broadcast %cst_289 : f32 to vector<14x32xf32>
    %646 = arith.addf %644, %645 : vector<14x32xf32>
    %647 = arith.mulf %646, %633 : vector<14x32xf32>
    %cst_290 = arith.constant 0.000000e+00 : f32
    %648 = vector.broadcast %cst_290 : f32 to vector<14x32xf32>
    %649 = arith.subf %648, %627 : vector<14x32xf32>
    %650 = arith.mulf %649, %627 : vector<14x32xf32>
    %651 = math.exp %650 : vector<14x32xf32>
    %652 = arith.mulf %647, %651 : vector<14x32xf32>
    %cst_291 = arith.constant 1.000000e+00 : f32
    %653 = vector.broadcast %cst_291 : f32 to vector<14x32xf32>
    %654 = arith.subf %653, %652 : vector<14x32xf32>
    %655 = arith.mulf %626, %654 : vector<14x32xf32>
    %cst_292 = arith.constant 1.000000e+00 : f32
    %656 = vector.broadcast %cst_292 : f32 to vector<14x32xf32>
    %657 = arith.addf %656, %655 : vector<14x32xf32>
    %658 = arith.mulf %619, %657 : vector<14x32xf32>
    %cst_293 = arith.constant dense<0.000000e+00> : vector<14x32xf32>
    %659 = tpu.matmul %658, %26, %cst_293 {dimension_numbers = #tpu.dot_dimension_numbers<[1], [0], [0], [1], [0, 0, 1, 1], [], []>} : vector<14x32xf32>, vector<32x32xf32>, vector<14x32xf32> -> vector<14x32xf32>
    %660 = vector.broadcast %27 : vector<1x32xf32> to vector<14x32xf32>
    %661 = arith.addf %659, %660 : vector<14x32xf32>
    %c0_294 = arith.constant 0 : index
    %c0_295 = arith.constant 0 : index
    %c0_296 = arith.constant 0 : index
    %662 = vector.load %arg49[%c0_294, %c0_295, %c0_296] : memref<1x14x32xf32, #tpu.memory_space<vmem>>, vector<1x14x32xf32>
    %663 = vector.shape_cast %662 : vector<1x14x32xf32> to vector<14x32xf32>
    %664 = vector.shape_cast %661 : vector<14x32xf32> to vector<1x14x32xf32>
    tpu.vector_store %arg49[%c0_294, %c0_295, %c0_296], %664 {strides = array<i32>} : memref<1x14x32xf32, #tpu.memory_space<vmem>>, vector<1x14x32xf32>,
    %cst_297 = arith.constant dense<0.000000e+00> : vector<14xf32>
    %665 = vector.multi_reduction <add>, %592, %cst_297 [1] : vector<14x48xf32> to vector<14xf32>
    %666 = vector.shape_cast %665 : vector<14xf32> to vector<14x1xf32>
    %cst_298 = arith.constant 4.800000e+01 : f32
    %667 = vector.broadcast %cst_298 : f32 to vector<14x1xf32>
    %668 = arith.divf %666, %667 : vector<14x1xf32>
    %669 = vector.broadcast %668 : vector<14x1xf32> to vector<14x48xf32>
    %670 = arith.subf %592, %669 : vector<14x48xf32>
    %671 = arith.mulf %670, %670 : vector<14x48xf32>
    %cst_299 = arith.constant dense<0.000000e+00> : vector<14xf32>
    %672 = vector.multi_reduction <add>, %671, %cst_299 [1] : vector<14x48xf32> to vector<14xf32>
    %673 = vector.shape_cast %672 : vector<14xf32> to vector<14x1xf32>
    %cst_300 = arith.constant 4.800000e+01 : f32
    %674 = vector.broadcast %cst_300 : f32 to vector<14x1xf32>
    %675 = arith.divf %673, %674 : vector<14x1xf32>
    %676 = vector.broadcast %668 : vector<14x1xf32> to vector<14x48xf32>
    %677 = arith.subf %592, %676 : vector<14x48xf32>
    %cst_301 = arith.constant 9.99999974E-6 : f32
    %678 = vector.broadcast %cst_301 : f32 to vector<14x1xf32>
    %679 = arith.addf %675, %678 : vector<14x1xf32>
    %680 = math.rsqrt %679 : vector<14x1xf32>
    %681 = vector.broadcast %680 : vector<14x1xf32> to vector<14x48xf32>
    %682 = arith.mulf %677, %681 : vector<14x48xf32>
    %683 = vector.broadcast %28 : vector<1x48xf32> to vector<14x48xf32>
    %684 = arith.mulf %682, %683 : vector<14x48xf32>
    %685 = vector.broadcast %29 : vector<1x48xf32> to vector<14x48xf32>
    %686 = arith.addf %684, %685 : vector<14x48xf32>
    %cst_302 = arith.constant dense<0.000000e+00> : vector<14x32xf32>
    %687 = tpu.matmul %686, %30, %cst_302 {dimension_numbers = #tpu.dot_dimension_numbers<[1], [0], [0], [1], [0, 0, 1, 1], [], []>} : vector<14x48xf32>, vector<48x32xf32>, vector<14x32xf32> -> vector<14x32xf32>
    %688 = vector.broadcast %31 : vector<1x32xf32> to vector<14x32xf32>
    %689 = arith.addf %687, %688 : vector<14x32xf32>
    %cst_303 = arith.constant 5.000000e-01 : f32
    %690 = vector.broadcast %cst_303 : f32 to vector<14x32xf32>
    %691 = arith.mulf %690, %689 : vector<14x32xf32>
    %cst_304 = arith.constant 0.707106769 : f32
    %692 = vector.broadcast %cst_304 : f32 to vector<14x32xf32>
    %693 = arith.mulf %689, %692 : vector<14x32xf32>
    %cst_305 = arith.constant 0.000000e+00 : f32
    %694 = vector.broadcast %cst_305 : f32 to vector<14x32xf32>
    %695 = arith.cmpf oge, %693, %694 : vector<14x32xf32>
    %cst_306 = arith.constant 1.000000e+00 : f32
    %cst_307 = arith.constant -1.000000e+00 : f32
    %696 = vector.broadcast %cst_306 : f32 to vector<14x32xf32>
    %697 = vector.broadcast %cst_307 : f32 to vector<14x32xf32>
    %698 = arith.select %695, %696, %697 : vector<14x32xi1>, vector<14x32xf32>
    %699 = math.absf %693 : vector<14x32xf32>
    %cst_308 = arith.constant 0.327591091 : f32
    %700 = vector.broadcast %cst_308 : f32 to vector<14x32xf32>
    %701 = arith.mulf %700, %699 : vector<14x32xf32>
    %cst_309 = arith.constant 1.000000e+00 : f32
    %702 = vector.broadcast %cst_309 : f32 to vector<14x32xf32>
    %703 = arith.addf %702, %701 : vector<14x32xf32>
    %cst_310 = arith.constant 1.000000e+00 : f32
    %704 = vector.broadcast %cst_310 : f32 to vector<14x32xf32>
    %705 = arith.divf %704, %703 : vector<14x32xf32>
    %cst_311 = arith.constant 1.06140542 : f32
    %706 = vector.broadcast %cst_311 : f32 to vector<14x32xf32>
    %707 = arith.mulf %706, %705 : vector<14x32xf32>
    %cst_312 = arith.constant -1.45315206 : f32
    %708 = vector.broadcast %cst_312 : f32 to vector<14x32xf32>
    %709 = arith.addf %707, %708 : vector<14x32xf32>
    %710 = arith.mulf %709, %705 : vector<14x32xf32>
    %cst_313 = arith.constant 1.42141378 : f32
    %711 = vector.broadcast %cst_313 : f32 to vector<14x32xf32>
    %712 = arith.addf %710, %711 : vector<14x32xf32>
    %713 = arith.mulf %712, %705 : vector<14x32xf32>
    %cst_314 = arith.constant -0.284496725 : f32
    %714 = vector.broadcast %cst_314 : f32 to vector<14x32xf32>
    %715 = arith.addf %713, %714 : vector<14x32xf32>
    %716 = arith.mulf %715, %705 : vector<14x32xf32>
    %cst_315 = arith.constant 0.254829586 : f32
    %717 = vector.broadcast %cst_315 : f32 to vector<14x32xf32>
    %718 = arith.addf %716, %717 : vector<14x32xf32>
    %719 = arith.mulf %718, %705 : vector<14x32xf32>
    %cst_316 = arith.constant 0.000000e+00 : f32
    %720 = vector.broadcast %cst_316 : f32 to vector<14x32xf32>
    %721 = arith.subf %720, %699 : vector<14x32xf32>
    %722 = arith.mulf %721, %699 : vector<14x32xf32>
    %723 = math.exp %722 : vector<14x32xf32>
    %724 = arith.mulf %719, %723 : vector<14x32xf32>
    %cst_317 = arith.constant 1.000000e+00 : f32
    %725 = vector.broadcast %cst_317 : f32 to vector<14x32xf32>
    %726 = arith.subf %725, %724 : vector<14x32xf32>
    %727 = arith.mulf %698, %726 : vector<14x32xf32>
    %cst_318 = arith.constant 1.000000e+00 : f32
    %728 = vector.broadcast %cst_318 : f32 to vector<14x32xf32>
    %729 = arith.addf %728, %727 : vector<14x32xf32>
    %730 = arith.mulf %691, %729 : vector<14x32xf32>
    %cst_319 = arith.constant dense<0.000000e+00> : vector<14x32xf32>
    %731 = tpu.matmul %730, %32, %cst_319 {dimension_numbers = #tpu.dot_dimension_numbers<[1], [0], [0], [1], [0, 0, 1, 1], [], []>} : vector<14x32xf32>, vector<32x32xf32>, vector<14x32xf32> -> vector<14x32xf32>
    %732 = vector.broadcast %33 : vector<1x32xf32> to vector<14x32xf32>
    %733 = arith.addf %731, %732 : vector<14x32xf32>
    %c0_320 = arith.constant 0 : index
    %c0_321 = arith.constant 0 : index
    %c0_322 = arith.constant 0 : index
    %734 = vector.load %arg50[%c0_320, %c0_321, %c0_322] : memref<1x14x32xf32, #tpu.memory_space<vmem>>, vector<1x14x32xf32>
    %735 = vector.shape_cast %734 : vector<1x14x32xf32> to vector<14x32xf32>
    %736 = vector.shape_cast %733 : vector<14x32xf32> to vector<1x14x32xf32>
    tpu.vector_store %arg50[%c0_320, %c0_321, %c0_322], %736 {strides = array<i32>} : memref<1x14x32xf32, #tpu.memory_space<vmem>>, vector<1x14x32xf32>,
    %c0_323 = arith.constant 0 : index
    %c0_324 = arith.constant 0 : index
    %c0_325 = arith.constant 0 : index
    %737 = vector.load %arg51[%c0_323, %c0_324, %c0_325] : memref<1x16x48xf32, #tpu.memory_space<vmem>>, vector<1x16x48xf32>
    %738 = vector.shape_cast %737 : vector<1x16x48xf32> to vector<16x48xf32>
    %739 = vector.shape_cast %504 : vector<16x48xf32> to vector<1x16x48xf32>
    tpu.vector_store %arg51[%c0_323, %c0_324, %c0_325], %739 {strides = array<i32>} : memref<1x16x48xf32, #tpu.memory_space<vmem>>, vector<1x16x48xf32>,
    %740 = vector.extract_strided_slice %504 {offsets = [0, 0], sizes = [1, 48], strides = [1, 1]} : vector<16x48xf32> to vector<1x48xf32>
    %c0_326 = arith.constant 0 : index
    %c0_327 = arith.constant 0 : index
    %c0_328 = arith.constant 0 : index
    %741 = vector.load %arg52[%c0_326, %c0_327, %c0_328] : memref<1x1x48xf32, #tpu.memory_space<vmem>>, vector<1x1x48xf32>
    %742 = vector.shape_cast %741 : vector<1x1x48xf32> to vector<1x48xf32>
    %743 = vector.shape_cast %740 : vector<1x48xf32> to vector<1x1x48xf32>
    tpu.vector_store %arg52[%c0_326, %c0_327, %c0_328], %743 {strides = array<i32>} : memref<1x1x48xf32, #tpu.memory_space<vmem>>, vector<1x1x48xf32>,
    %744 = vector.extract_strided_slice %504 {offsets = [15, 0], sizes = [1, 48], strides = [1, 1]} : vector<16x48xf32> to vector<1x48xf32>
    %c0_329 = arith.constant 0 : index
    %c0_330 = arith.constant 0 : index
    %c0_331 = arith.constant 0 : index
    %745 = vector.load %arg53[%c0_329, %c0_330, %c0_331] : memref<1x1x48xf32, #tpu.memory_space<vmem>>, vector<1x1x48xf32>
    %746 = vector.shape_cast %745 : vector<1x1x48xf32> to vector<1x48xf32>
    %747 = vector.shape_cast %744 : vector<1x48xf32> to vector<1x1x48xf32>
    tpu.vector_store %arg53[%c0_329, %c0_330, %c0_331], %747 {strides = array<i32>} : memref<1x1x48xf32, #tpu.memory_space<vmem>>, vector<1x1x48xf32>,
    return
  }
  func.func @transform_0(%arg0: i32) -> (i32, i32, i32) {
    %c0_i32 = arith.constant 0 : i32
    %c0_i32_0 = arith.constant 0 : i32
    %c0_i32_1 = arith.constant 0 : i32
    return %arg0, %c0_i32, %c0_i32_0 : i32, i32, i32
  }
  func.func @transform_1(%arg0: i32) -> (i32, i32, i32) {
    %c0_i32 = arith.constant 0 : i32
    %c0_i32_0 = arith.constant 0 : i32
    %c0_i32_1 = arith.constant 0 : i32
    return %arg0, %c0_i32, %c0_i32_0 : i32, i32, i32
  }
  func.func @transform_2(%arg0: i32) -> (i32, i32, i32) {
    %c0_i32 = arith.constant 0 : i32
    %c0_i32_0 = arith.constant 0 : i32
    %c0_i32_1 = arith.constant 0 : i32
    return %arg0, %c0_i32, %c0_i32_0 : i32, i32, i32
  }
  func.func @transform_3(%arg0: i32) -> (i32, i32) {
    %c0_i32 = arith.constant 0 : i32
    %c0_i32_0 = arith.constant 0 : i32
    %c0_i32_1 = arith.constant 0 : i32
    return %c0_i32, %c0_i32_0 : i32, i32
  }
  func.func @transform_4(%arg0: i32) -> (i32, i32) {
    %c0_i32 = arith.constant 0 : i32
    %c0_i32_0 = arith.constant 0 : i32
    %c0_i32_1 = arith.constant 0 : i32
    return %c0_i32, %c0_i32_0 : i32, i32
  }
  func.func @transform_5(%arg0: i32) -> (i32, i32) {
    %c0_i32 = arith.constant 0 : i32
    %c0_i32_0 = arith.constant 0 : i32
    %c0_i32_1 = arith.constant 0 : i32
    return %c0_i32, %c0_i32_0 : i32, i32
  }
  func.func @transform_6(%arg0: i32) -> (i32, i32) {
    %c0_i32 = arith.constant 0 : i32
    %c0_i32_0 = arith.constant 0 : i32
    %c0_i32_1 = arith.constant 0 : i32
    return %c0_i32, %c0_i32_0 : i32, i32
  }
  func.func @transform_7(%arg0: i32) -> (i32, i32) {
    %c0_i32 = arith.constant 0 : i32
    %c0_i32_0 = arith.constant 0 : i32
    %c0_i32_1 = arith.constant 0 : i32
    return %c0_i32, %c0_i32_0 : i32, i32
  }
  func.func @transform_8(%arg0: i32) -> (i32, i32) {
    %c0_i32 = arith.constant 0 : i32
    %c0_i32_0 = arith.constant 0 : i32
    %c0_i32_1 = arith.constant 0 : i32
    return %c0_i32, %c0_i32_0 : i32, i32
  }
  func.func @transform_9(%arg0: i32) -> (i32, i32, i32) {
    %c0_i32 = arith.constant 0 : i32
    %c0_i32_0 = arith.constant 0 : i32
    %c0_i32_1 = arith.constant 0 : i32
    %c0_i32_2 = arith.constant 0 : i32
    return %c0_i32, %c0_i32_0, %c0_i32_1 : i32, i32, i32
  }
  func.func @transform_10(%arg0: i32) -> (i32, i32, i32) {
    %c0_i32 = arith.constant 0 : i32
    %c0_i32_0 = arith.constant 0 : i32
    %c0_i32_1 = arith.constant 0 : i32
    %c0_i32_2 = arith.constant 0 : i32
    return %c0_i32, %c0_i32_0, %c0_i32_1 : i32, i32, i32
  }
  func.func @transform_11(%arg0: i32) -> (i32, i32, i32) {
    %c0_i32 = arith.constant 0 : i32
    %c0_i32_0 = arith.constant 0 : i32
    %c0_i32_1 = arith.constant 0 : i32
    %c0_i32_2 = arith.constant 0 : i32
    return %c0_i32, %c0_i32_0, %c0_i32_1 : i32, i32, i32
  }
  func.func @transform_12(%arg0: i32) -> (i32, i32, i32) {
    %c0_i32 = arith.constant 0 : i32
    %c0_i32_0 = arith.constant 0 : i32
    %c0_i32_1 = arith.constant 0 : i32
    %c0_i32_2 = arith.constant 0 : i32
    return %c0_i32, %c0_i32_0, %c0_i32_1 : i32, i32, i32
  }
  func.func @transform_13(%arg0: i32) -> (i32, i32, i32) {
    %c0_i32 = arith.constant 0 : i32
    %c0_i32_0 = arith.constant 0 : i32
    %c0_i32_1 = arith.constant 0 : i32
    %c0_i32_2 = arith.constant 0 : i32
    return %c0_i32, %c0_i32_0, %c0_i32_1 : i32, i32, i32
  }
  func.func @transform_14(%arg0: i32) -> (i32, i32, i32) {
    %c0_i32 = arith.constant 0 : i32
    %c0_i32_0 = arith.constant 0 : i32
    %c0_i32_1 = arith.constant 0 : i32
    %c0_i32_2 = arith.constant 0 : i32
    return %c0_i32, %c0_i32_0, %c0_i32_1 : i32, i32, i32
  }
  func.func @transform_15(%arg0: i32) -> (i32, i32, i32) {
    %c0_i32 = arith.constant 0 : i32
    %c0_i32_0 = arith.constant 0 : i32
    %c0_i32_1 = arith.constant 0 : i32
    %c0_i32_2 = arith.constant 0 : i32
    return %c0_i32, %c0_i32_0, %c0_i32_1 : i32, i32, i32
  }
  func.func @transform_16(%arg0: i32) -> (i32, i32, i32) {
    %c0_i32 = arith.constant 0 : i32
    %c0_i32_0 = arith.constant 0 : i32
    %c0_i32_1 = arith.constant 0 : i32
    %c0_i32_2 = arith.constant 0 : i32
    return %c0_i32, %c0_i32_0, %c0_i32_1 : i32, i32, i32
  }
  func.func @transform_17(%arg0: i32) -> (i32, i32, i32) {
    %c0_i32 = arith.constant 0 : i32
    %c0_i32_0 = arith.constant 0 : i32
    %c0_i32_1 = arith.constant 0 : i32
    %c0_i32_2 = arith.constant 0 : i32
    return %c0_i32, %c0_i32_0, %c0_i32_1 : i32, i32, i32
  }
  func.func @transform_18(%arg0: i32) -> (i32, i32, i32) {
    %c0_i32 = arith.constant 0 : i32
    %c0_i32_0 = arith.constant 0 : i32
    %c0_i32_1 = arith.constant 0 : i32
    %c0_i32_2 = arith.constant 0 : i32
    return %c0_i32, %c0_i32_0, %c0_i32_1 : i32, i32, i32
  }
  func.func @transform_19(%arg0: i32) -> (i32, i32, i32) {
    %c0_i32 = arith.constant 0 : i32
    %c0_i32_0 = arith.constant 0 : i32
    %c0_i32_1 = arith.constant 0 : i32
    %c0_i32_2 = arith.constant 0 : i32
    return %c0_i32, %c0_i32_0, %c0_i32_1 : i32, i32, i32
  }
  func.func @transform_20(%arg0: i32) -> (i32, i32) {
    %c0_i32 = arith.constant 0 : i32
    %c0_i32_0 = arith.constant 0 : i32
    %c0_i32_1 = arith.constant 0 : i32
    return %c0_i32, %c0_i32_0 : i32, i32
  }
  func.func @transform_21(%arg0: i32) -> (i32, i32) {
    %c0_i32 = arith.constant 0 : i32
    %c0_i32_0 = arith.constant 0 : i32
    %c0_i32_1 = arith.constant 0 : i32
    return %c0_i32, %c0_i32_0 : i32, i32
  }
  func.func @transform_22(%arg0: i32) -> (i32, i32) {
    %c0_i32 = arith.constant 0 : i32
    %c0_i32_0 = arith.constant 0 : i32
    %c0_i32_1 = arith.constant 0 : i32
    return %c0_i32, %c0_i32_0 : i32, i32
  }
  func.func @transform_23(%arg0: i32) -> (i32, i32) {
    %c0_i32 = arith.constant 0 : i32
    %c0_i32_0 = arith.constant 0 : i32
    %c0_i32_1 = arith.constant 0 : i32
    return %c0_i32, %c0_i32_0 : i32, i32
  }
  func.func @transform_24(%arg0: i32) -> (i32, i32) {
    %c0_i32 = arith.constant 0 : i32
    %c0_i32_0 = arith.constant 0 : i32
    %c0_i32_1 = arith.constant 0 : i32
    return %c0_i32, %c0_i32_0 : i32, i32
  }
  func.func @transform_25(%arg0: i32) -> (i32, i32) {
    %c0_i32 = arith.constant 0 : i32
    %c0_i32_0 = arith.constant 0 : i32
    %c0_i32_1 = arith.constant 0 : i32
    return %c0_i32, %c0_i32_0 : i32, i32
  }
  func.func @transform_26(%arg0: i32) -> (i32, i32) {
    %c0_i32 = arith.constant 0 : i32
    %c0_i32_0 = arith.constant 0 : i32
    %c0_i32_1 = arith.constant 0 : i32
    return %c0_i32, %c0_i32_0 : i32, i32
  }
  func.func @transform_27(%arg0: i32) -> (i32, i32) {
    %c0_i32 = arith.constant 0 : i32
    %c0_i32_0 = arith.constant 0 : i32
    %c0_i32_1 = arith.constant 0 : i32
    return %c0_i32, %c0_i32_0 : i32, i32
  }
  func.func @transform_28(%arg0: i32) -> (i32, i32) {
    %c0_i32 = arith.constant 0 : i32
    %c0_i32_0 = arith.constant 0 : i32
    %c0_i32_1 = arith.constant 0 : i32
    return %c0_i32, %c0_i32_0 : i32, i32
  }
  func.func @transform_29(%arg0: i32) -> (i32, i32) {
    %c0_i32 = arith.constant 0 : i32
    %c0_i32_0 = arith.constant 0 : i32
    %c0_i32_1 = arith.constant 0 : i32
    return %c0_i32, %c0_i32_0 : i32, i32
  }
  func.func @transform_30(%arg0: i32) -> (i32, i32) {
    %c0_i32 = arith.constant 0 : i32
    %c0_i32_0 = arith.constant 0 : i32
    %c0_i32_1 = arith.constant 0 : i32
    return %c0_i32, %c0_i32_0 : i32, i32
  }
  func.func @transform_31(%arg0: i32) -> (i32, i32) {
    %c0_i32 = arith.constant 0 : i32
    %c0_i32_0 = arith.constant 0 : i32
    %c0_i32_1 = arith.constant 0 : i32
    return %c0_i32, %c0_i32_0 : i32, i32
  }
  func.func @transform_32(%arg0: i32) -> (i32, i32) {
    %c0_i32 = arith.constant 0 : i32
    %c0_i32_0 = arith.constant 0 : i32
    %c0_i32_1 = arith.constant 0 : i32
    return %c0_i32, %c0_i32_0 : i32, i32
  }
  func.func @transform_33(%arg0: i32) -> (i32, i32) {
    %c0_i32 = arith.constant 0 : i32
    %c0_i32_0 = arith.constant 0 : i32
    %c0_i32_1 = arith.constant 0 : i32
    return %c0_i32, %c0_i32_0 : i32, i32
  }
  func.func @transform_34(%arg0: i32) -> (i32, i32) {
    %c0_i32 = arith.constant 0 : i32
    %c0_i32_0 = arith.constant 0 : i32
    %c0_i32_1 = arith.constant 0 : i32
    return %c0_i32, %c0_i32_0 : i32, i32
  }
  func.func @transform_35(%arg0: i32) -> (i32, i32) {
    %c0_i32 = arith.constant 0 : i32
    %c0_i32_0 = arith.constant 0 : i32
    %c0_i32_1 = arith.constant 0 : i32
    return %c0_i32, %c0_i32_0 : i32, i32
  }
  func.func @transform_36(%arg0: i32) -> (i32, i32) {
    %c0_i32 = arith.constant 0 : i32
    %c0_i32_0 = arith.constant 0 : i32
    %c0_i32_1 = arith.constant 0 : i32
    return %c0_i32, %c0_i32_0 : i32, i32
  }
  func.func @transform_37(%arg0: i32) -> (i32, i32) {
    %c0_i32 = arith.constant 0 : i32
    %c0_i32_0 = arith.constant 0 : i32
    %c0_i32_1 = arith.constant 0 : i32
    return %c0_i32, %c0_i32_0 : i32, i32
  }
  func.func @transform_38(%arg0: i32) -> (i32, i32) {
    %c0_i32 = arith.constant 0 : i32
    %c0_i32_0 = arith.constant 0 : i32
    %c0_i32_1 = arith.constant 0 : i32
    return %c0_i32, %c0_i32_0 : i32, i32
  }
  func.func @transform_39(%arg0: i32) -> (i32, i32) {
    %c0_i32 = arith.constant 0 : i32
    %c0_i32_0 = arith.constant 0 : i32
    %c0_i32_1 = arith.constant 0 : i32
    return %c0_i32, %c0_i32_0 : i32, i32
  }
  func.func @transform_40(%arg0: i32) -> (i32, i32) {
    %c0_i32 = arith.constant 0 : i32
    %c0_i32_0 = arith.constant 0 : i32
    %c0_i32_1 = arith.constant 0 : i32
    return %c0_i32, %c0_i32_0 : i32, i32
  }
  func.func @transform_41(%arg0: i32) -> (i32, i32) {
    %c0_i32 = arith.constant 0 : i32
    %c0_i32_0 = arith.constant 0 : i32
    %c0_i32_1 = arith.constant 0 : i32
    return %c0_i32, %c0_i32_0 : i32, i32
  }
  func.func @transform_42(%arg0: i32) -> (i32, i32) {
    %c0_i32 = arith.constant 0 : i32
    %c0_i32_0 = arith.constant 0 : i32
    %c0_i32_1 = arith.constant 0 : i32
    return %c0_i32, %c0_i32_0 : i32, i32
  }
  func.func @transform_43(%arg0: i32) -> (i32, i32) {
    %c0_i32 = arith.constant 0 : i32
    %c0_i32_0 = arith.constant 0 : i32
    %c0_i32_1 = arith.constant 0 : i32
    return %c0_i32, %c0_i32_0 : i32, i32
  }
  func.func @transform_44(%arg0: i32) -> (i32, i32) {
    %c0_i32 = arith.constant 0 : i32
    %c0_i32_0 = arith.constant 0 : i32
    %c0_i32_1 = arith.constant 0 : i32
    return %c0_i32, %c0_i32_0 : i32, i32
  }
  func.func @transform_45(%arg0: i32) -> (i32, i32) {
    %c0_i32 = arith.constant 0 : i32
    %c0_i32_0 = arith.constant 0 : i32
    %c0_i32_1 = arith.constant 0 : i32
    return %c0_i32, %c0_i32_0 : i32, i32
  }
  func.func @transform_46(%arg0: i32) -> (i32, i32) {
    %c0_i32 = arith.constant 0 : i32
    %c0_i32_0 = arith.constant 0 : i32
    %c0_i32_1 = arith.constant 0 : i32
    return %c0_i32, %c0_i32_0 : i32, i32
  }
  func.func @transform_47(%arg0: i32) -> (i32, i32) {
    %c0_i32 = arith.constant 0 : i32
    %c0_i32_0 = arith.constant 0 : i32
    %c0_i32_1 = arith.constant 0 : i32
    return %c0_i32, %c0_i32_0 : i32, i32
  }
  func.func @transform_48(%arg0: i32) -> (i32, i32, i32) {
    %c0_i32 = arith.constant 0 : i32
    %c0_i32_0 = arith.constant 0 : i32
    %c0_i32_1 = arith.constant 0 : i32
    return %arg0, %c0_i32, %c0_i32_0 : i32, i32, i32
  }
  func.func @transform_49(%arg0: i32) -> (i32, i32, i32) {
    %c0_i32 = arith.constant 0 : i32
    %c0_i32_0 = arith.constant 0 : i32
    %c0_i32_1 = arith.constant 0 : i32
    return %arg0, %c0_i32, %c0_i32_0 : i32, i32, i32
  }
  func.func @transform_50(%arg0: i32) -> (i32, i32, i32) {
    %c0_i32 = arith.constant 0 : i32
    %c0_i32_0 = arith.constant 0 : i32
    %c0_i32_1 = arith.constant 0 : i32
    return %arg0, %c0_i32, %c0_i32_0 : i32, i32, i32
  }
  func.func @transform_51(%arg0: i32) -> (i32, i32, i32) {
    %c0_i32 = arith.constant 0 : i32
    %c0_i32_0 = arith.constant 0 : i32
    %c0_i32_1 = arith.constant 0 : i32
    return %arg0, %c0_i32, %c0_i32_0 : i32, i32, i32
  }
  func.func @transform_52(%arg0: i32) -> (i32, i32, i32) {
    %c0_i32 = arith.constant 0 : i32
    %c0_i32_0 = arith.constant 0 : i32
    %c0_i32_1 = arith.constant 0 : i32
    return %arg0, %c0_i32, %c0_i32_0 : i32, i32, i32
  }
}

</mosaic_0001>

<bundles_post_ra>
// kernel: tpu_custom_call.1
= control target key start
LH: loop header
LB: loop body
LE: loop exit
PB: predicated region body
PF: predicated region fallthrough
CT: control target
= control target key end

     0   :  { %s10800_s6 = smov 1   ;;  %s10801_s10 = smov 2   ;;  %s12717_s0 = inlined_call_operand.smem [shape: u32[53], index: -1, kind: input, shape index: {}] }
   0x1   :  { %s10909_s5 = sld [smem:[%s12717_s0]]   ;;  %s10802_s14 = smov 3  }
   0x2   :  { %s10914_s9 = sld [smem:[%s12717_s0 + %s10800_s6]]   ;;  %s10803_s18 = smov 4  }
   0x3   :  { %s10919_s13 = sld [smem:[%s12717_s0 + %s10801_s10]]   ;;  %s10804_s22 = smov 5  }
   0x4   :  { %s10924_s17 = sld [smem:[%s12717_s0 + %s10802_s14]]   ;;  %s10805_s26 = smov 6  }
   0x5   :  { %s10929_s21 = sld [smem:[%s12717_s0 + %s10803_s18]]   ;;  %s10806_s30 = smov 7  }
   0x6   :  { %s10934_s25 = sld [smem:[%s12717_s0 + %s10804_s22]]   ;;  %s10807_s4 = smov 8  }
   0x7   :  { %12796 = sst [smem:[#allocation61_spill]] %s10909_s5  ;;  %s10808_s10 = smov 9  }
   0x8   :  { %12797 = sst [smem:[#allocation62_spill]] %s10914_s9  ;;  %s10809_s15 = smov 10  }
   0x9   :  { %12798 = sst [smem:[#allocation63_spill]] %s10919_s13  ;;  %s10810_s20 = smov 11  }
   0xa   :  { %12799 = sst [smem:[#allocation64_spill]] %s10924_s17  ;;  %s10812_s1 = smov 13  }
   0xb   :  { %12800 = sst [smem:[#allocation65_spill]] %s10929_s21  ;;  %s10813_s7 = smov 14  }
   0xc   :  { %s10939_s29 = sld [smem:[%s12717_s0 + %s10805_s26]]   ;;  %s10811_s26 = smov 12  }
   0xd   :  { %s10944_s3 = sld [smem:[%s12717_s0 + %s10806_s30]]   ;;  %s10815_s22 = smov 16  }
   0xe   :  { %s10949_s8 = sld [smem:[%s12717_s0 + %s10807_s4]]   ;;  %s10816_s28 = smov 17  }
   0xf   :  { %s10954_s14 = sld [smem:[%s12717_s0 + %s10808_s10]]  }
  0x10   :  { %s10959_s19 = sld [smem:[%s12717_s0 + %s10809_s15]]   ;;  %s10814_s15 = smov 15  }
  0x11   :  { %s10964_s24 = sld [smem:[%s12717_s0 + %s10810_s20]]  }
  0x12   :  { %s10969_s30 = sld [smem:[%s12717_s0 + %s10811_s26]]  }
  0x13   :  { %12801 = sst [smem:[#allocation66_spill]] %s10944_s3 }
  0x14   :  { %12802 = sst [smem:[#allocation67_spill]] %s10949_s8 }
  0x15   :  { %12803 = sst [smem:[#allocation68_spill]] %s10954_s14 }
  0x16   :  { %12804 = sst [smem:[#allocation69_spill]] %s10959_s19 }
  0x17   :  { %12805 = sst [smem:[#allocation70_spill]] %s10964_s24 }
  0x18   :  { %12806 = sst [smem:[#allocation71_spill]] %s10969_s30 }
  0x19   :  { %s10974_s6 = sld [smem:[%s12717_s0 + %s10812_s1]]  }
  0x1a   :  { %s10979_s12 = sld [smem:[%s12717_s0 + %s10813_s7]]   ;;  %s10817_s7 = smov 18  }
  0x1b   :  { %s10984_s20 = sld [smem:[%s12717_s0 + %s10814_s15]]   ;;  %s10818_s15 = smov 19  }
  0x1c   :  { %s10989_s27 = sld [smem:[%s12717_s0 + %s10815_s22]]   ;;  %s10819_s22 = smov 20  }
  0x1d   :  { %s10994_s4 = sld [smem:[%s12717_s0 + %s10816_s28]]   ;;  %s10820_s28 = smov 21  }
  0x1e   :  { %s10999_s30 = sld [smem:[%s12717_s0 + %s10817_s7]]   ;;  %s10821_s7 = smov 22  }
  0x1f   :  { %12807 = sst [smem:[#allocation72_spill]] %s10974_s6 }
  0x20   :  { %12808 = sst [smem:[#allocation73_spill]] %s10979_s12 }
  0x21   :  { %12809 = sst [smem:[#allocation74_spill]] %s10984_s20 }
  0x22   :  { %12810 = sst [smem:[#allocation75_spill]] %s10989_s27 }
  0x23   :  { %12811 = sst [smem:[#allocation76_spill]] %s10994_s4 }
  0x24   :  { %12812 = sst [smem:[#allocation77_spill]] %s10999_s30 }
  0x25   :  { %s11004_s24 = sld [smem:[%s12717_s0 + %s10818_s15]]   ;;  %s10822_s15 = smov 23  }
  0x26   :  { %s11009_s27 = sld [smem:[%s12717_s0 + %s10819_s22]]   ;;  %s10823_s22 = smov 24  }
  0x27   :  { %s11014_s3 = sld [smem:[%s12717_s0 + %s10820_s28]]   ;;  %s10824_s28 = smov 25  }
  0x28   :  { %s11019_s30 = sld [smem:[%s12717_s0 + %s10821_s7]]   ;;  %s10825_s7 = smov 26  }
  0x29   :  { %s11024_s5 = sld [smem:[%s12717_s0 + %s10822_s15]]   ;;  %s10826_s15 = smov 27  }
  0x2a   :  { %s11029_s13 = sld [smem:[%s12717_s0 + %s10823_s22]]   ;;  %s10827_s22 = smov 28  }
  0x2b   :  { %12813 = sst [smem:[#allocation78_spill]] %s11004_s24 }
  0x2c   :  { %12814 = sst [smem:[#allocation79_spill]] %s11009_s27 }
  0x2d   :  { %12815 = sst [smem:[#allocation80_spill]] %s11014_s3 }
  0x2e   :  { %12816 = sst [smem:[#allocation81_spill]] %s11019_s30 }
  0x2f   :  { %12817 = sst [smem:[#allocation82_spill]] %s11024_s5 }
  0x30   :  { %12818 = sst [smem:[#allocation83_spill]] %s11029_s13 }
  0x31   :  { %s11034_s3 = sld [smem:[%s12717_s0 + %s10824_s28]]   ;;  %s10828_s28 = smov 29  }
  0x32   :  { %s11039_s30 = sld [smem:[%s12717_s0 + %s10825_s7]]   ;;  %s10829_s7 = smov 30  }
  0x33   :  { %s11044_s5 = sld [smem:[%s12717_s0 + %s10826_s15]]   ;;  %s10830_s15 = smov 31  }
  0x34   :  { %s11049_s13 = sld [smem:[%s12717_s0 + %s10827_s22]]   ;;  %s10831_s22 = smov 32  }
  0x35   :  { %s11054_s9 = sld [smem:[%s12717_s0 + %s10828_s28]]   ;;  %s10832_s28 = smov 33  }
  0x36   :  { %s11064_s27 = sld [smem:[%s12717_s0 + %s10830_s15]]   ;;  %s10834_s15 = smov 35  }
  0x37   :  { %12819 = sst [smem:[#allocation84_spill]] %s11034_s3 }
  0x38   :  { %12820 = sst [smem:[#allocation85_spill]] %s11039_s30 }
  0x39   :  { %12821 = sst [smem:[#allocation86_spill]] %s11044_s5 }
  0x3a   :  { %12822 = sst [smem:[#allocation87_spill]] %s11049_s13 }
  0x3b   :  { %12823 = sst [smem:[#allocation88_spill]] %s11054_s9 }
  0x3c   :  { %s11059_s30 = sld [smem:[%s12717_s0 + %s10829_s7]]   ;;  %s10833_s7 = smov 34  }
  0x3d   :  { %12825 = sst [smem:[#allocation90_spill]] %s11064_s27 }
  0x3e   :  { %s11069_s13 = sld [smem:[%s12717_s0 + %s10831_s22]]   ;;  %s10835_s22 = smov 36  }
  0x3f   :  { %s11074_s9 = sld [smem:[%s12717_s0 + %s10832_s28]]   ;;  %s10836_s28 = smov 37  }
  0x40   :  { %s11084_s27 = sld [smem:[%s12717_s0 + %s10834_s15]]   ;;  %s10838_s15 = smov 39  }
  0x41   :  { %s11089_s4 = sld [smem:[%s12717_s0 + %s10835_s22]]   ;;  %s10839_s22 = smov 40  }
  0x42   :  { %12824 = sst [smem:[#allocation89_spill]] %s11059_s30 }
  0x43   :  { %s11079_s30 = sld [smem:[%s12717_s0 + %s10833_s7]]   ;;  %s10837_s7 = smov 38  }
  0x44   :  { %12826 = sst [smem:[#allocation91_spill]] %s11069_s13 }
  0x45   :  { %12827 = sst [smem:[#allocation92_spill]] %s11074_s9 }
  0x46   :  { %12829 = sst [smem:[#allocation94_spill]] %s11084_s27 }
  0x47   :  { %12830 = sst [smem:[#allocation95_spill]] %s11089_s4 }
  0x48   :  { %s11094_s9 = sld [smem:[%s12717_s0 + %s10836_s28]]   ;;  %s10840_s28 = smov 41  }
  0x49   :  { %12828 = sst [smem:[#allocation93_spill]] %s11079_s30 }
  0x4a   :  { %s11099_s30 = sld [smem:[%s12717_s0 + %s10837_s7]]   ;;  %s10841_s7 = smov 42  }
  0x4b   :  { %s11104_s27 = sld [smem:[%s12717_s0 + %s10838_s15]]   ;;  %s10842_s15 = smov 43  }
  0x4c   :  { %s11109_s4 = sld [smem:[%s12717_s0 + %s10839_s22]]   ;;  %s10843_s22 = smov 44  }
  0x4d   :  { %s11129_s12 = sld [smem:[%s12717_s0 + %s10843_s22]]   ;;  %s10847_s22 = smov 48  }
  0x4e   :  { %12831 = sst [smem:[#allocation96_spill]] %s11094_s9 }
  0x4f   :  { %s11114_s9 = sld [smem:[%s12717_s0 + %s10840_s28]]   ;;  %s10844_s28 = smov 45  }
  0x50   :  { %12832 = sst [smem:[#allocation97_spill]] %s11099_s30 }
  0x51   :  { %12833 = sst [smem:[#allocation98_spill]] %s11104_s27 }
  0x52   :  { %12834 = sst [smem:[#allocation99_spill]] %s11109_s4 }
  0x53   :  { %s11119_s30 = sld [smem:[%s12717_s0 + %s10841_s7]]   ;;  %s10845_s7 = smov 46  }
  0x54   :  { %s11124_s27 = sld [smem:[%s12717_s0 + %s10842_s15]]   ;;  %s10846_s15 = smov 47  }
  0x55   :  { %12835 = sst [smem:[#allocation100_spill]] %s11114_s9 }
  0x56   :  { %12838 = sst [smem:[#allocation103_spill]] %s11129_s12 }
  0x57   :  { %s11134_s9 = sld [smem:[%s12717_s0 + %s10844_s28]]   ;;  %s10848_s28 = smov 49  }
  0x58   :  { %s11149_s12 = sld [smem:[%s12717_s0 + %s10847_s22]]   ;;  %s10851_s22 = smov 52  }
  0x59   :  { %12836 = sst [smem:[#allocation101_spill]] %s11119_s30 }
  0x5a   :  { %12837 = sst [smem:[#allocation102_spill]] %s11124_s27 }
  0x5b   :  { %s11139_s30 = sld [smem:[%s12717_s0 + %s10845_s7]]   ;;  %s10849_s7 = smov 50  }
  0x5c   :  { %s11144_s27 = sld [smem:[%s12717_s0 + %s10846_s15]]   ;;  %s10850_s15 = smov 51  }
  0x5d   :  { %12839 = sst [smem:[#allocation104_spill]] %s11134_s9 }
  0x5e   :  { %12842 = sst [smem:[#allocation107_spill]] %s11149_s12 }
  0x5f   :  { %s11154_s9 = sld [smem:[%s12717_s0 + %s10848_s28]]  }
  0x60   :  { %s11169_s12 = sld [smem:[%s12717_s0 + %s10851_s22]]  }
  0x61   :  { %12840 = sst [smem:[#allocation105_spill]] %s11139_s30 }
  0x62   :  { %12841 = sst [smem:[#allocation106_spill]] %s11144_s27 }
  0x63   :  { %s11159_s30 = sld [smem:[%s12717_s0 + %s10849_s7]]  }
  0x64   :  { %s11164_s27 = sld [smem:[%s12717_s0 + %s10850_s15]]  }
  0x65   :  { %12843 = sst [smem:[#allocation108_spill]] %s11154_s9 }
  0x69   :  { %12844 = sst [smem:[#allocation109_spill]] %s11159_s30 }
  0x6a   :  { %111 = vsyncpa [#allocation4], 0 }
  0x6b   :  { %113 = vsyncpa [#allocation4 + $0x1], 0 }
  0x6c   :  { %114 = vsyncpa [#allocation7], 0 }
  0x6d   :  { %116 = vsyncpa [#allocation7 + $0x1], 0 }
  0x6e   :  { %117 = vsyncpa [#allocation10], 0 }
  0x6f   :  { %118 = vsyncpa [#allocation13], 0 }
  0x70   :  { %119 = vsyncpa [#allocation16], 0 }
  0x71   :  { %120 = vsyncpa [#allocation19], 0 }
  0x72   :  { %121 = vsyncpa [#allocation22], 0 }
  0x73   :  { %122 = vsyncpa [#allocation25], 0 }
  0x74   :  { %123 = vsyncpa [#allocation28], 0 }
  0x75   :  { %124 = vsyncpa [#allocation31], 0 }
  0x76   :  { %125 = vsyncpa [#allocation34], 0 }
  0x77   :  { %126 = vsyncpa [#allocation37], 0 }
  0x78   :  { %127 = vsyncpa [#allocation40], 0 }
  0x79   :  { %128 = vsyncpa [#allocation5], 0 }
  0x7a   :  { %130 = vsyncpa [#allocation5 + $0x1], 0 }
  0x7b   :  { %131 = vsyncpa [#allocation43], 0 }
  0x7c   :  { %133 = vsyncpa [#allocation43 + $0x1], 0  ;;  %s11171_s0 = smov 0   ;;  %s11173_s28 = smov 0  }
  0x7d   :  { %s11175_s1 = smov 0   ;;  %s11177_s2 = smov 0  }
  0x7e LB: > { %s12845_s24 = sld [smem:[#allocation78_spill]]  ;;  %s12846_s20 = sld [smem:[#allocation74_spill]]  ;;  %s10798_s2 = sphi %s11177_s2, %s12950_s2   ;;  %s10794_s1 = sphi %s11175_s1, %s12949_s1   ;;  %s10790_s28 = sphi %s11173_s28, %s12948_s28   ;;  %s10786_s0 = sphi %s11171_s0, %s12947_s0  }
  0x7f   : > { %s12847_s19 = sld [smem:[#allocation69_spill]]  ;;  %s12848_s14 = sld [smem:[#allocation68_spill]] }
  0x80   : > { %s12849_s13 = sld [smem:[#allocation91_spill]]  ;;  %s12851_s6 = sld [smem:[#allocation72_spill]] }
  0x81   : > { %s12850_s8 = sld [smem:[#allocation67_spill]]  ;;  %s12852_s5 = sld [smem:[#allocation86_spill]] }
  0x82   : > { %s12853_s4 = sld [smem:[#allocation99_spill]]  ;;  %s12854_s3 = sld [smem:[#allocation84_spill]] }
  0x83   : > { %s12855_s21 = sld [smem:[#allocation65_spill]]  ;;  %s12856_s17 = sld [smem:[#allocation64_spill]] }
  0x84   : > { %s10852_s7 = smov [#allocation8]   ;;  %s11192_s11 = sadd.s32 4294967295, %s10798_s2  }
  0x85   : > { %s1310_s10 = sshll.u32 %s10852_s7, 4  ;;  %p7985_p0 = scmp.ge.s32.totalorder %s10798_s2, 1  ;;  %s11197_s10 = int_to_ptr.vmem [resolvable:$true] %s1310_s10 }
  0x86   : > { %p12739_p1 = scmp.eq.s32.totalorder %s11192_s11, 0  ;;  %p1297_p2 = scmp.lt.s32.totalorder %s10798_s2, 3 }
  0x87   : > { %s10853_s16 = smov [#allocation9]   ;;  %s10854_s22 = smov [#allocation12]  }
  0x88   : > { %p11199_p3 = pnand %p7985_p0, %p1297_p2  ;;  %s1321_s18 = sshll.u32 %s10853_s16, 4  ;;  %s11206_s18 = int_to_ptr.vmem [resolvable:$true] %s1321_s18 }
  0x89   : > { %s1345_s23 = sshll.u32 %s10854_s22, 4  ;;  %s10855_s7 = smov [#allocation15]   ;;  %s11214_s23 = int_to_ptr.vmem [resolvable:$true] %s1345_s23 }
  0x8a   : > { %s12857_s15 = scalar_select %p11199_p3, 1, 0 }
  0x8b   : > { %p9342_p5 = pneg %p11199_p3  ;;  %s11216_s9 = sshll.u32 %s10855_s7, 4  ;;  %s1370_s9 = int_to_ptr.vmem [resolvable:$true] %s11216_s9 }
  0x8c   : > { %s9944_s30 = scalar_lea.hbm %s12856_s17, 16 }
  0x8d   : > { %p11210_p6 = pnand %p9342_p5, %p12739_p1  ;;  %p9945_p7 = scmp.ne.s32.totalorder %s12856_s17, %s9944_s30 }
  0x8e   : > { %p9951_p11 = scmp.lt.u32.totalorder %s9944_s30, %s12856_s17 }
  0x8f   : > { %p11222_p8 = pneg %p11210_p6 }
  0x91   : > { %p9947_p9 = pnand %p11222_p8, %p9945_p7 }
  0x93   : > { %p9948_p10 = pneg %p9947_p9 }
  0x95   : > { %p9953_p12 = pnand %p9951_p11, %p9948_p10 }
  0x97   : > { %9956 = shalt.err (!%p9953_p12)
}
  0x98   : > { %s9957_s22 = scalar_lea.vmem %s11197_s10, 16  ;;  %s9964_s7 = scalar_lea.vmem %s11197_s10, 32 }
  0x99   : > { %p9958_p13 = scmp.ne.s32.totalorder %s11197_s10, %s9957_s22  ;;  %p9965_p5 = scmp.lt.s32.totalorder %s11197_s10, %s11197_s10 }
  0x9a   : > { %p9966_p4 = scmp.lt.s32.totalorder %s9964_s7, %s9957_s22 }
  0x9b   : > { %p9960_p0 = pnand %p9958_p13, %p11222_p8 }
  0x9c   : > { %p9967_p1 = por %p9966_p4, %p9965_p5 }
  0x9d   : > { %p9961_p2 = pneg %p9960_p0 }
  0x9f   : > { %p9968_p7 = pnand %p9967_p1, %p9961_p2 }
  0xa1   : > { %9971 = shalt.err (!%p9968_p7)
}
  0xa2   : > { %9345 = dma.hbm_to_vmem [thread:$0]  (!%p11210_p6), %s12856_s17, 16, %s11197_s10, [#allocation7]  }
  0xa3   : > { %s9972_s30 = scalar_lea.hbm %s12855_s21, 16 }
  0xa4   : > { %p9973_p9 = scmp.ne.s32.totalorder %s12855_s21, %s9972_s30  ;;  %p9979_p12 = scmp.lt.u32.totalorder %s9972_s30, %s12855_s21 }
  0xa6   : > { %p9975_p10 = pnand %p9973_p9, %p11222_p8 }
  0xa8   : > { %p9976_p11 = pneg %p9975_p10 }
  0xaa   : > { %p9981_p13 = pnand %p9979_p12, %p9976_p11 }
  0xac   : > { %9984 = shalt.err (!%p9981_p13)
}
  0xad   : > { %s9985_s22 = scalar_lea.vmem %s11206_s18, 16  ;;  %s9992_s7 = scalar_lea.vmem %s11206_s18, 32 }
  0xae   : > { %p9986_p1 = scmp.ne.s32.totalorder %s11206_s18, %s9985_s22  ;;  %p9993_p2 = scmp.lt.s32.totalorder %s11206_s18, %s11206_s18 }
  0xaf   : > { %p9994_p5 = scmp.lt.s32.totalorder %s9992_s7, %s9985_s22 }
  0xb0   : > { %p9988_p4 = pnand %p9986_p1, %p11222_p8 }
  0xb1   : > { %p9995_p7 = por %p9994_p5, %p9993_p2 }
  0xb2   : > { %p9989_p0 = pneg %p9988_p4 }
  0xb4   : > { %p9996_p9 = pnand %p9995_p7, %p9989_p0 }
  0xb6   : > { %9999 = shalt.err (!%p9996_p9)
}
  0xb7   : > { %9348 = dma.hbm_to_vmem [thread:$0]  (!%p11210_p6), %s12855_s21, 16, %s11206_s18, [#allocation10]  }
  0xb8   : > { %s10000_s10 = scalar_lea.hbm %s10939_s29, 16 }
  0xb9   : > { %p10001_p10 = scmp.ne.s32.totalorder %s10939_s29, %s10000_s10  ;;  %p10007_p13 = scmp.lt.u32.totalorder %s10000_s10, %s10939_s29 }
  0xbb   : > { %p10003_p11 = pnand %p10001_p10, %p11222_p8 }
  0xbd   : > { %p10004_p12 = pneg %p10003_p11 }
  0xbf   : > { %p10009_p1 = pnand %p10007_p13, %p10004_p12 }
  0xc1   : > { %10012 = shalt.err (!%p10009_p1)
}
  0xc2   : > { %s10013_s30 = scalar_lea.vmem %s11214_s23, 16  ;;  %s10020_s22 = scalar_lea.vmem %s11214_s23, 32 }
  0xc3   : > { %p10014_p4 = scmp.ne.s32.totalorder %s11214_s23, %s10013_s30  ;;  %p10021_p5 = scmp.lt.s32.totalorder %s11214_s23, %s11214_s23 }
  0xc4   : > { %p10022_p7 = scmp.lt.s32.totalorder %s10020_s22, %s10013_s30 }
  0xc5   : > { %p10016_p0 = pnand %p10014_p4, %p11222_p8 }
  0xc6   : > { %p10023_p9 = por %p10022_p7, %p10021_p5 }
  0xc7   : > { %p10017_p2 = pneg %p10016_p0 }
  0xc9   : > { %p10024_p10 = pnand %p10023_p9, %p10017_p2 }
  0xcb   : > { %10027 = shalt.err (!%p10024_p10)
}
  0xcc   : > { %9354 = dma.hbm_to_vmem [thread:$0]  (!%p11210_p6), %s10939_s29, 16, %s11214_s23, [#allocation13]  }
  0xcd   : > { %s10028_s18 = scalar_lea.hbm %s12848_s14, 32 }
  0xce   : > { %p10029_p11 = scmp.ne.s32.totalorder %s12848_s14, %s10028_s18  ;;  %p10035_p1 = scmp.lt.u32.totalorder %s10028_s18, %s12848_s14 }
  0xd0   : > { %p10031_p12 = pnand %p10029_p11, %p11222_p8 }
  0xd2   : > { %p10032_p13 = pneg %p10031_p12 }
  0xd4   : > { %p10037_p4 = pnand %p10035_p1, %p10032_p13 }
  0xd6   : > { %10040 = shalt.err (!%p10037_p4)
}
  0xd7   : > { %s10041_s7 = scalar_lea.vmem %s1370_s9, 32  ;;  %p10049_p7 = scmp.lt.s32.totalorder %s1370_s9, %s1370_s9 }
  0xd8   : > { %p10042_p0 = scmp.ne.s32.totalorder %s1370_s9, %s10041_s7  ;;  %p10050_p9 = scmp.lt.s32.totalorder %s10041_s7, %s10041_s7 }
  0xda   : > { %p10044_p2 = pnand %p10042_p0, %p11222_p8  ;;  %p10051_p10 = por %p10050_p9, %p10049_p7 }
  0xdc   : > { %p10045_p5 = pneg %p10044_p2 }
  0xde   : > { %p10052_p3 = pnand %p10051_p10, %p10045_p5 }
  0xe0   : > { %10055 = shalt.err (!%p10052_p3)
}
  0xe1   : > { %s12743_s23 = smov 16   ;;  %s12745_s10 = smov 1  }
  0xe2   : > { %9360 = dma.hbm_to_vmem [thread:$0]  (!%p11210_p6), %s12848_s14, 32, %s1370_s9, [#allocation16], %s12743_s23, %s12743_s23, %s12745_s10  }
  0xe3   : > { %s10858_s30 = smov [#allocation18]   ;;  %s10859_s18 = smov [#allocation21]  }
  0xe4   : > { %s1401_s22 = sshll.u32 %s10858_s30, 4  ;;  %s1427_s7 = sshll.u32 %s10859_s18, 4  ;;  %s1402_s22 = int_to_ptr.vmem [resolvable:$true] %s1401_s22  ;;  %s11286_s7 = int_to_ptr.vmem [resolvable:$true] %s1427_s7 }
  0xe5   : > { %s10056_s17 = scalar_lea.hbm %s12851_s6, 32 }
  0xe6   : > { %p10057_p3 = scmp.ne.s32.totalorder %s12851_s6, %s10056_s17  ;;  %p10063_p13 = scmp.lt.u32.totalorder %s10056_s17, %s12851_s6 }
  0xe8   : > { %p10059_p11 = pnand %p10057_p3, %p11222_p8 }
  0xea   : > { %p10060_p12 = pneg %p10059_p11 }
  0xec   : > { %p10065_p1 = pnand %p10063_p13, %p10060_p12 }
  0xee   : > { %10068 = shalt.err (!%p10065_p1)
}
  0xef   : > { %s10069_s21 = scalar_lea.vmem %s1402_s22, 32  ;;  %p10077_p5 = scmp.lt.s32.totalorder %s1402_s22, %s1402_s22 }
  0xf0   : > { %p10070_p4 = scmp.ne.s32.totalorder %s1402_s22, %s10069_s21  ;;  %p10078_p7 = scmp.lt.s32.totalorder %s10069_s21, %s10069_s21 }
  0xf2   : > { %p10072_p0 = pnand %p10070_p4, %p11222_p8  ;;  %p10079_p9 = por %p10078_p7, %p10077_p5 }
  0xf4   : > { %p10073_p2 = pneg %p10072_p0 }
  0xf6   : > { %p10080_p10 = pnand %p10079_p9, %p10073_p2 }
  0xf8   : > { %10083 = shalt.err (!%p10080_p10)
}
  0xf9   : > { %9366 = dma.hbm_to_vmem [thread:$0]  (!%p11210_p6), %s12851_s6, 32, %s1402_s22, [#allocation19], %s12743_s23, %s12743_s23, %s12745_s10  }
  0xfa   : > { %s10084_s9 = scalar_lea.hbm %s12846_s20, 32 }
  0xfb   : > { %p10085_p3 = scmp.ne.s32.totalorder %s12846_s20, %s10084_s9  ;;  %p10091_p13 = scmp.lt.u32.totalorder %s10084_s9, %s12846_s20 }
  0xfd   : > { %p10087_p11 = pnand %p10085_p3, %p11222_p8 }
  0xff   : > { %p10088_p12 = pneg %p10087_p11 }
 0x101   : > { %p10093_p1 = pnand %p10091_p13, %p10088_p12 }
 0x103   : > { %10096 = shalt.err (!%p10093_p1)
}
 0x104   : > { %s10097_s17 = scalar_lea.vmem %s11286_s7, 32  ;;  %p10105_p5 = scmp.lt.s32.totalorder %s11286_s7, %s11286_s7 }
 0x105   : > { %p10098_p4 = scmp.ne.s32.totalorder %s11286_s7, %s10097_s17  ;;  %p10106_p7 = scmp.lt.s32.totalorder %s10097_s17, %s10097_s17 }
 0x107   : > { %p10100_p0 = pnand %p10098_p4, %p11222_p8  ;;  %p10107_p9 = por %p10106_p7, %p10105_p5 }
 0x109   : > { %p10101_p2 = pneg %p10100_p0 }
 0x10b   : > { %p10108_p10 = pnand %p10107_p9, %p10101_p2 }
 0x10d   : > { %10111 = shalt.err (!%p10108_p10)
}
 0x10e   : > { %9372 = dma.hbm_to_vmem [thread:$0]  (!%p11210_p6), %s12846_s20, 32, %s11286_s7, [#allocation22], %s12743_s23, %s12743_s23, %s12745_s10  }
 0x10f   : > { %s10860_s21 = smov [#allocation24]   ;;  %s10112_s22 = scalar_lea.hbm %s12845_s24, 32 }
 0x110   : > { %s1459_s30 = sshll.u32 %s10860_s21, 4  ;;  %p10113_p3 = scmp.ne.s32.totalorder %s12845_s24, %s10112_s22  ;;  %s1460_s30 = int_to_ptr.vmem [resolvable:$true] %s1459_s30 }
 0x111   : > { %p10119_p13 = scmp.lt.u32.totalorder %s10112_s22, %s12845_s24 }
 0x112   : > { %p10115_p11 = pnand %p10113_p3, %p11222_p8 }
 0x114   : > { %p10116_p12 = pneg %p10115_p11 }
 0x116   : > { %p10121_p1 = pnand %p10119_p13, %p10116_p12 }
 0x118   : > { %10124 = shalt.err (!%p10121_p1)
}
 0x119   : > { %s10125_s18 = scalar_lea.vmem %s1460_s30, 32  ;;  %p10133_p5 = scmp.lt.s32.totalorder %s1460_s30, %s1460_s30 }
 0x11a   : > { %p10126_p4 = scmp.ne.s32.totalorder %s1460_s30, %s10125_s18  ;;  %p10134_p7 = scmp.lt.s32.totalorder %s10125_s18, %s10125_s18 }
 0x11c   : > { %p10128_p0 = pnand %p10126_p4, %p11222_p8  ;;  %p10135_p9 = por %p10134_p7, %p10133_p5 }
 0x11e   : > { %p10129_p2 = pneg %p10128_p0 }
 0x120   : > { %p10136_p10 = pnand %p10135_p9, %p10129_p2 }
 0x122   : > { %10139 = shalt.err (!%p10136_p10)
}
 0x123   : > { %9378 = dma.hbm_to_vmem [thread:$0]  (!%p11210_p6), %s12845_s24, 32, %s1460_s30, [#allocation25], %s12743_s23, %s12743_s23, %s12745_s10  }
 0x124   : > { %s10861_s7 = smov [#allocation27]   ;;  %s10862_s17 = smov [#allocation30]  }
 0x125   : > { %s1495_s9 = sshll.u32 %s10861_s7, 4  ;;  %s1521_s21 = sshll.u32 %s10862_s17, 4  ;;  %s1496_s9 = int_to_ptr.vmem [resolvable:$true] %s1495_s9  ;;  %s1522_s21 = int_to_ptr.vmem [resolvable:$true] %s1521_s21 }
 0x126   : > { %s10140_s22 = scalar_lea.hbm %s12854_s3, 768 }
 0x127   : > { %p10141_p3 = scmp.ne.s32.totalorder %s12854_s3, %s10140_s22  ;;  %p10147_p13 = scmp.lt.u32.totalorder %s10140_s22, %s12854_s3 }
 0x129   : > { %p10143_p11 = pnand %p10141_p3, %p11222_p8 }
 0x12b   : > { %p10144_p12 = pneg %p10143_p11 }
 0x12d   : > { %p10149_p1 = pnand %p10147_p13, %p10144_p12 }
 0x12f   : > { %10152 = shalt.err (!%p10149_p1)
}
 0x130   : > { %s10153_s18 = scalar_lea.vmem %s1496_s9, 768  ;;  %p10161_p5 = scmp.lt.s32.totalorder %s1496_s9, %s1496_s9 }
 0x131   : > { %p10154_p4 = scmp.ne.s32.totalorder %s1496_s9, %s10153_s18  ;;  %p10162_p7 = scmp.lt.s32.totalorder %s10153_s18, %s10153_s18 }
 0x133   : > { %p10156_p0 = pnand %p10154_p4, %p11222_p8  ;;  %p10163_p9 = por %p10162_p7, %p10161_p5 }
 0x135   : > { %p10157_p2 = pneg %p10156_p0 }
 0x137   : > { %p10164_p10 = pnand %p10163_p9, %p10157_p2 }
 0x139   : > { %10167 = shalt.err (!%p10164_p10)
}
 0x13a   : > { %s12747_s30 = smov 128   ;;  %s12749_s7 = smov 8  }
 0x13b   : > { %9384 = dma.hbm_to_vmem [thread:$0]  (!%p11210_p6), %s12854_s3, 768, %s1496_s9, [#allocation28], %s12747_s30, %s12747_s30, %s12749_s7  }
 0x13c   : > { %s10168_s17 = scalar_lea.hbm %s12852_s5, 768 }
 0x13d   : > { %p10169_p3 = scmp.ne.s32.totalorder %s12852_s5, %s10168_s17  ;;  %p10175_p13 = scmp.lt.u32.totalorder %s10168_s17, %s12852_s5 }
 0x13f   : > { %p10171_p11 = pnand %p10169_p3, %p11222_p8 }
 0x141   : > { %p10172_p12 = pneg %p10171_p11 }
 0x143   : > { %p10177_p1 = pnand %p10175_p13, %p10172_p12 }
 0x145   : > { %10180 = shalt.err (!%p10177_p1)
}
 0x146   : > { %s10181_s22 = scalar_lea.vmem %s1522_s21, 768  ;;  %p10189_p5 = scmp.lt.s32.totalorder %s1522_s21, %s1522_s21 }
 0x147   : > { %p10182_p4 = scmp.ne.s32.totalorder %s1522_s21, %s10181_s22  ;;  %p10190_p7 = scmp.lt.s32.totalorder %s10181_s22, %s10181_s22 }
 0x149   : > { %p10184_p0 = pnand %p10182_p4, %p11222_p8  ;;  %p10191_p9 = por %p10190_p7, %p10189_p5 }
 0x14b   : > { %p10185_p2 = pneg %p10184_p0 }
 0x14d   : > { %p10192_p10 = pnand %p10191_p9, %p10185_p2 }
 0x14f   : > { %10195 = shalt.err (!%p10192_p10)
}
 0x150   : > { %9390 = dma.hbm_to_vmem [thread:$0]  (!%p11210_p6), %s12852_s5, 768, %s1522_s21, [#allocation31], %s12747_s30, %s12747_s30, %s12749_s7  }
 0x151   : > { %s10865_s9 = smov [#allocation33]   ;;  %s10866_s17 = smov [#allocation36]  }
 0x152   : > { %s1556_s18 = sshll.u32 %s10865_s9, 4  ;;  %s1600_s23 = sshll.u32 %s10866_s17, 4  ;;  %s1557_s18 = int_to_ptr.vmem [resolvable:$true] %s1556_s18  ;;  %s1601_s23 = int_to_ptr.vmem [resolvable:$true] %s1600_s23 }
 0x153   : > { %s10196_s22 = scalar_lea.hbm %s12849_s13, 768 }
 0x154   : > { %p10197_p3 = scmp.ne.s32.totalorder %s12849_s13, %s10196_s22  ;;  %p10203_p13 = scmp.lt.u32.totalorder %s10196_s22, %s12849_s13 }
 0x156   : > { %p10199_p11 = pnand %p10197_p3, %p11222_p8 }
 0x158   : > { %p10200_p12 = pneg %p10199_p11 }
 0x15a   : > { %p10205_p1 = pnand %p10203_p13, %p10200_p12 }
 0x15c   : > { %10208 = shalt.err (!%p10205_p1)
}
 0x15d   : > { %s10209_s10 = scalar_lea.vmem %s1557_s18, 768  ;;  %p10217_p5 = scmp.lt.s32.totalorder %s1557_s18, %s1557_s18 }
 0x15e   : > { %p10210_p4 = scmp.ne.s32.totalorder %s1557_s18, %s10209_s10  ;;  %p10218_p7 = scmp.lt.s32.totalorder %s10209_s10, %s10209_s10 }
 0x160   : > { %p10212_p0 = pnand %p10210_p4, %p11222_p8  ;;  %p10219_p9 = por %p10218_p7, %p10217_p5 }
 0x162   : > { %p10213_p2 = pneg %p10212_p0 }
 0x164   : > { %p10220_p10 = pnand %p10219_p9, %p10213_p2 }
 0x166   : > { %10223 = shalt.err (!%p10220_p10)
}
 0x167   : > { %9396 = dma.hbm_to_vmem [thread:$0]  (!%p11210_p6), %s12849_s13, 768, %s1557_s18, [#allocation34], %s12747_s30, %s12747_s30, %s12749_s7  }
 0x168   : > { %s10224_s21 = scalar_lea.hbm %s12853_s4, 512 }
 0x169   : > { %p10225_p3 = scmp.ne.s32.totalorder %s12853_s4, %s10224_s21  ;;  %p10231_p13 = scmp.lt.u32.totalorder %s10224_s21, %s12853_s4 }
 0x16b   : > { %p10227_p11 = pnand %p10225_p3, %p11222_p8 }
 0x16d   : > { %p10228_p12 = pneg %p10227_p11 }
 0x16f   : > { %p10233_p1 = pnand %p10231_p13, %p10228_p12 }
 0x171   : > { %10236 = shalt.err (!%p10233_p1)
}
 0x172   : > { %s10237_s10 = scalar_lea.vmem %s1601_s23, 512  ;;  %p10245_p5 = scmp.lt.s32.totalorder %s1601_s23, %s1601_s23 }
 0x173   : > { %p10238_p4 = scmp.ne.s32.totalorder %s1601_s23, %s10237_s10  ;;  %p10246_p7 = scmp.lt.s32.totalorder %s10237_s10, %s10237_s10 }
 0x175   : > { %p10240_p0 = pnand %p10238_p4, %p11222_p8  ;;  %p10247_p9 = por %p10246_p7, %p10245_p5 }
 0x177   : > { %p10241_p2 = pneg %p10240_p0 }
 0x179   : > { %p10248_p10 = pnand %p10247_p9, %p10241_p2 }
 0x17b   : > { %10251 = shalt.err (!%p10248_p10)
}
 0x17c   : > { %9402 = dma.hbm_to_vmem [thread:$0]  (!%p11210_p6), %s12853_s4, 512, %s1601_s23, [#allocation37], %s12747_s30, %s12747_s30, %s12749_s7  }
 0x17d   : > { %s10867_s9 = smov [#allocation11]   ;;  %s10868_s17 = smov [#allocation14]  }
 0x17e   : > { %s1331_s18 = sshll.u32 %s10867_s9, 4  ;;  %s1359_s22 = sshll.u32 %s10868_s17, 4  ;;  %s1332_s18 = int_to_ptr.vmem [resolvable:$true] %s1331_s18  ;;  %s1360_s22 = int_to_ptr.vmem [resolvable:$true] %s1359_s22 }
 0x17f   : > { %s10252_s21 = scalar_lea.hbm %s10934_s25, 512 }
 0x180   : > { %p10253_p3 = scmp.ne.s32.totalorder %s10934_s25, %s10252_s21  ;;  %p10259_p13 = scmp.lt.u32.totalorder %s10252_s21, %s10934_s25 }
 0x182   : > { %p10255_p11 = pnand %p10253_p3, %p11222_p8 }
 0x184   : > { %p10256_p12 = pneg %p10255_p11 }
 0x186   : > { %p10261_p1 = pnand %p10259_p13, %p10256_p12 }
 0x188   : > { %10264 = shalt.err (!%p10261_p1)
}
 0x189   : > { %s10265_s10 = scalar_lea.vmem %s1332_s18, 512  ;;  %p10273_p5 = scmp.lt.s32.totalorder %s1332_s18, %s1332_s18 }
 0x18a   : > { %p10266_p4 = scmp.ne.s32.totalorder %s1332_s18, %s10265_s10  ;;  %p10274_p7 = scmp.lt.s32.totalorder %s10265_s10, %s10265_s10 }
 0x18c   : > { %p10268_p0 = pnand %p10266_p4, %p11222_p8  ;;  %p10275_p9 = por %p10274_p7, %p10273_p5 }
 0x18e   : > { %p10269_p2 = pneg %p10268_p0 }
 0x190   : > { %p10276_p10 = pnand %p10275_p9, %p10269_p2 }
 0x192   : > { %10279 = shalt.err (!%p10276_p10)
}
 0x193   : > { %9351 = dma.hbm_to_vmem [thread:$0]  (!%p11210_p6), %s10934_s25, 512, %s1332_s18, [#allocation10], %s12747_s30, %s12747_s30, %s12749_s7  }
 0x194   : > { %s10280_s23 = scalar_lea.hbm %s12850_s8, 16 }
 0x195   : > { %p10281_p3 = scmp.ne.s32.totalorder %s12850_s8, %s10280_s23  ;;  %p10287_p13 = scmp.lt.u32.totalorder %s10280_s23, %s12850_s8 }
 0x197   : > { %p10283_p11 = pnand %p10281_p3, %p11222_p8 }
 0x199   : > { %p10284_p12 = pneg %p10283_p11 }
 0x19b   : > { %p10289_p1 = pnand %p10287_p13, %p10284_p12 }
 0x19d   : > { %10292 = shalt.err (!%p10289_p1)
}
 0x19e   : > { %s10293_s9 = scalar_lea.vmem %s1360_s22, 16  ;;  %s10300_s17 = scalar_lea.vmem %s1360_s22, 32 }
 0x19f   : > { %p10294_p4 = scmp.ne.s32.totalorder %s1360_s22, %s10293_s9  ;;  %p10301_p5 = scmp.lt.s32.totalorder %s1360_s22, %s1360_s22 }
 0x1a0   : > { %p10302_p7 = scmp.lt.s32.totalorder %s10300_s17, %s10293_s9 }
 0x1a1   : > { %p10296_p0 = pnand %p10294_p4, %p11222_p8 }
 0x1a2   : > { %p10303_p9 = por %p10302_p7, %p10301_p5 }
 0x1a3   : > { %p10297_p2 = pneg %p10296_p0 }
 0x1a5   : > { %p10304_p10 = pnand %p10303_p9, %p10297_p2 }
 0x1a7   : > { %10307 = shalt.err (!%p10304_p10)
}
 0x1a8   : > { %9357 = dma.hbm_to_vmem [thread:$0]  (!%p11210_p6), %s12850_s8, 16, %s1360_s22, [#allocation13]  }
 0x1a9   : > { %s10869_s18 = smov [#allocation17]   ;;  %s10870_s10 = smov [#allocation20]  }
 0x1aa   : > { %s1382_s21 = sshll.u32 %s10869_s18, 4  ;;  %s1414_s23 = sshll.u32 %s10870_s10, 4  ;;  %s1383_s21 = int_to_ptr.vmem [resolvable:$true] %s1382_s21  ;;  %s1415_s23 = int_to_ptr.vmem [resolvable:$true] %s1414_s23 }
 0x1ab   : > { %s10308_s30 = scalar_lea.hbm %s12847_s19, 32 }
 0x1ac   : > { %p10309_p3 = scmp.ne.s32.totalorder %s12847_s19, %s10308_s30  ;;  %p10315_p13 = scmp.lt.u32.totalorder %s10308_s30, %s12847_s19 }
 0x1ae   : > { %p10311_p11 = pnand %p10309_p3, %p11222_p8 }
 0x1b0   : > { %p10312_p12 = pneg %p10311_p11 }
 0x1b2   : > { %p10317_p1 = pnand %p10315_p13, %p10312_p12 }
 0x1b4   : > { %10320 = shalt.err (!%p10317_p1)
}
 0x1b5   : > { %s10321_s9 = scalar_lea.vmem %s1383_s21, 32  ;;  %p10329_p5 = scmp.lt.s32.totalorder %s1383_s21, %s1383_s21 }
 0x1b6   : > { %p10322_p4 = scmp.ne.s32.totalorder %s1383_s21, %s10321_s9  ;;  %p10330_p7 = scmp.lt.s32.totalorder %s10321_s9, %s10321_s9 }
 0x1b8   : > { %p10324_p0 = pnand %p10322_p4, %p11222_p8  ;;  %p10331_p9 = por %p10330_p7, %p10329_p5 }
 0x1ba   : > { %p10325_p2 = pneg %p10324_p0 }
 0x1bc   : > { %p10332_p10 = pnand %p10331_p9, %p10325_p2 }
 0x1be   : > { %10335 = shalt.err (!%p10332_p10)
}
 0x1bf   : > { %s12860_s22 = smov 1   ;;  %s12861_s17 = smov 16  }
 0x1c0   : > { %s12862_s30 = sld [smem:[#allocation73_spill]] }
 0x1c1   : > { %9363 = dma.hbm_to_vmem [thread:$0]  (!%p11210_p6), %s12847_s19, 32, %s1383_s21, [#allocation16], %s12861_s17, %s12861_s17, %s12860_s22  }
 0x1c6   : > { %s10336_s18 = scalar_lea.hbm %s12862_s30, 32 }
 0x1c7   : > { %p10337_p3 = scmp.ne.s32.totalorder %s12862_s30, %s10336_s18  ;;  %p10343_p13 = scmp.lt.u32.totalorder %s10336_s18, %s12862_s30 }
 0x1c9   : > { %p10339_p11 = pnand %p10337_p3, %p11222_p8 }
 0x1cb   : > { %p10340_p12 = pneg %p10339_p11 }
 0x1cd   : > { %p10345_p1 = pnand %p10343_p13, %p10340_p12 }
 0x1cf   : > { %10348 = shalt.err (!%p10345_p1)
}
 0x1d0   : > { %s10349_s10 = scalar_lea.vmem %s1415_s23, 32  ;;  %p10357_p5 = scmp.lt.s32.totalorder %s1415_s23, %s1415_s23 }
 0x1d1   : > { %p10350_p4 = scmp.ne.s32.totalorder %s1415_s23, %s10349_s10  ;;  %p10358_p7 = scmp.lt.s32.totalorder %s10349_s10, %s10349_s10 }
 0x1d3   : > { %p10352_p0 = pnand %p10350_p4, %p11222_p8  ;;  %p10359_p9 = por %p10358_p7, %p10357_p5 }
 0x1d5   : > { %p10353_p2 = pneg %p10352_p0 }
 0x1d7   : > { %p10360_p10 = pnand %p10359_p9, %p10353_p2 }
 0x1d9   : > { %10363 = shalt.err (!%p10360_p10)
}
 0x1da   : > { %s12863_s21 = sld [smem:[#allocation76_spill]]  ;;  %s10871_s9 = smov [#allocation23]  }
 0x1db   : > { %9369 = dma.hbm_to_vmem [thread:$0]  (!%p11210_p6), %s12862_s30, 32, %s1415_s23, [#allocation19], %s12861_s17, %s12861_s17, %s12860_s22  }
 0x1dc   : > { %s1443_s18 = sshll.u32 %s10871_s9, 4  ;;  %s1444_s18 = int_to_ptr.vmem [resolvable:$true] %s1443_s18 }
 0x1e0   : > { %s10364_s7 = scalar_lea.hbm %s12863_s21, 64 }
 0x1e1   : > { %p10365_p3 = scmp.ne.s32.totalorder %s12863_s21, %s10364_s7  ;;  %p10371_p13 = scmp.lt.u32.totalorder %s10364_s7, %s12863_s21 }
 0x1e3   : > { %p10367_p11 = pnand %p10365_p3, %p11222_p8 }
 0x1e5   : > { %p10368_p12 = pneg %p10367_p11 }
 0x1e7   : > { %p10373_p1 = pnand %p10371_p13, %p10368_p12 }
 0x1e9   : > { %10376 = shalt.err (!%p10373_p1)
}
 0x1ea   : > { %s10377_s10 = scalar_lea.vmem %s1444_s18, 64  ;;  %p10385_p5 = scmp.lt.s32.totalorder %s1444_s18, %s1444_s18 }
 0x1eb   : > { %p10378_p4 = scmp.ne.s32.totalorder %s1444_s18, %s10377_s10  ;;  %p10386_p7 = scmp.lt.s32.totalorder %s10377_s10, %s10377_s10 }
 0x1ed   : > { %p10380_p0 = pnand %p10378_p4, %p11222_p8  ;;  %p10387_p9 = por %p10386_p7, %p10385_p5 }
 0x1ef   : > { %p10381_p2 = pneg %p10380_p0 }
 0x1f1   : > { %p10388_p10 = pnand %p10387_p9, %p10381_p2 }
 0x1f3   : > { %10391 = shalt.err (!%p10388_p10)
}
 0x1f4   : > { %s10872_s23 = smov 32   ;;  %s12864_s22 = sld [smem:[#allocation79_spill]] }
 0x1f5   : > { %s10873_s7 = smov 2   ;;  %s10874_s17 = smov [#allocation26]  }
 0x1f6   : > { %9375 = dma.hbm_to_vmem [thread:$0]  (!%p11210_p6), %s12863_s21, 64, %s1444_s18, [#allocation22], %s10872_s23, %s10872_s23, %s10873_s7  }
 0x1f7   : > { %s1473_s9 = sshll.u32 %s10874_s17, 4  ;;  %s10875_s3 = smov [#allocation29]   ;;  %s1474_s9 = int_to_ptr.vmem [resolvable:$true] %s1473_s9 }
 0x1f8   : > { %s1508_s4 = sshll.u32 %s10875_s3, 4  ;;  %s11443_s4 = int_to_ptr.vmem [resolvable:$true] %s1508_s4 }
 0x1fa   : > { %s10392_s10 = scalar_lea.hbm %s12864_s22, 16 }
 0x1fb   : > { %p10393_p3 = scmp.ne.s32.totalorder %s12864_s22, %s10392_s10  ;;  %p10399_p13 = scmp.lt.u32.totalorder %s10392_s10, %s12864_s22 }
 0x1fd   : > { %p10395_p11 = pnand %p10393_p3, %p11222_p8 }
 0x1ff   : > { %p10396_p12 = pneg %p10395_p11 }
 0x201   : > { %p10401_p1 = pnand %p10399_p13, %p10396_p12 }
 0x203   : > { %10404 = shalt.err (!%p10401_p1)
}
 0x204   : > { %s10405_s5 = scalar_lea.vmem %s1474_s9, 16  ;;  %s10412_s18 = scalar_lea.vmem %s1474_s9, 32 }
 0x205   : > { %p10406_p4 = scmp.ne.s32.totalorder %s1474_s9, %s10405_s5  ;;  %p10413_p5 = scmp.lt.s32.totalorder %s1474_s9, %s1474_s9 }
 0x206   : > { %p10414_p7 = scmp.lt.s32.totalorder %s10412_s18, %s10405_s5 }
 0x207   : > { %p10408_p0 = pnand %p10406_p4, %p11222_p8 }
 0x208   : > { %p10415_p9 = por %p10414_p7, %p10413_p5 }
 0x209   : > { %p10409_p2 = pneg %p10408_p0 }
 0x20b   : > { %p10416_p10 = pnand %p10415_p9, %p10409_p2 }
 0x20d   : > { %10419 = shalt.err (!%p10416_p10)
}
 0x20e   : > { %s12865_s3 = sld [smem:[#allocation85_spill]] }
 0x20f   : > { %9381 = dma.hbm_to_vmem [thread:$0]  (!%p11210_p6), %s12864_s22, 16, %s1474_s9, [#allocation25]  }
 0x214   : > { %s10420_s23 = scalar_lea.hbm %s12865_s3, 768 }
 0x215   : > { %p10421_p3 = scmp.ne.s32.totalorder %s12865_s3, %s10420_s23  ;;  %p10427_p13 = scmp.lt.u32.totalorder %s10420_s23, %s12865_s3 }
 0x217   : > { %p10423_p11 = pnand %p10421_p3, %p11222_p8 }
 0x219   : > { %p10424_p12 = pneg %p10423_p11 }
 0x21b   : > { %p10429_p1 = pnand %p10427_p13, %p10424_p12 }
 0x21d   : > { %10432 = shalt.err (!%p10429_p1)
}
 0x21e   : > { %s10433_s5 = scalar_lea.vmem %s11443_s4, 768  ;;  %p10441_p5 = scmp.lt.s32.totalorder %s11443_s4, %s11443_s4 }
 0x21f   : > { %p10434_p4 = scmp.ne.s32.totalorder %s11443_s4, %s10433_s5  ;;  %p10442_p7 = scmp.lt.s32.totalorder %s10433_s5, %s10433_s5 }
 0x221   : > { %p10436_p0 = pnand %p10434_p4, %p11222_p8  ;;  %p10443_p9 = por %p10442_p7, %p10441_p5 }
 0x223   : > { %p10437_p2 = pneg %p10436_p0 }
 0x225   : > { %p10444_p10 = pnand %p10443_p9, %p10437_p2 }
 0x227   : > { %10447 = shalt.err (!%p10444_p10)
}
 0x228   : > { %s12866_s7 = smov 8   ;;  %s12867_s17 = smov 128  }
 0x229   : > { %s12868_s9 = sld [smem:[#allocation90_spill]]  ;;  %s10876_s10 = smov [#allocation32]  }
 0x22a   : > { %9387 = dma.hbm_to_vmem [thread:$0]  (!%p11210_p6), %s12865_s3, 768, %s11443_s4, [#allocation28], %s12867_s17, %s12867_s17, %s12866_s7  }
 0x22b   : > { %s1543_s18 = sshll.u32 %s10876_s10, 4  ;;  %s10877_s23 = smov [#allocation35]   ;;  %s1544_s18 = int_to_ptr.vmem [resolvable:$true] %s1543_s18 }
 0x22c   : > { %s1572_s6 = sshll.u32 %s10877_s23, 4  ;;  %s11473_s6 = int_to_ptr.vmem [resolvable:$true] %s1572_s6 }
 0x22f   : > { %s10448_s5 = scalar_lea.hbm %s12868_s9, 768 }
 0x230   : > { %p10449_p3 = scmp.ne.s32.totalorder %s12868_s9, %s10448_s5  ;;  %p10455_p13 = scmp.lt.u32.totalorder %s10448_s5, %s12868_s9 }
 0x232   : > { %p10451_p11 = pnand %p10449_p3, %p11222_p8 }
 0x234   : > { %p10452_p12 = pneg %p10451_p11 }
 0x236   : > { %p10457_p1 = pnand %p10455_p13, %p10452_p12 }
 0x238   : > { %10460 = shalt.err (!%p10457_p1)
}
 0x239   : > { %s10461_s8 = scalar_lea.vmem %s1544_s18, 768  ;;  %p10469_p5 = scmp.lt.s32.totalorder %s1544_s18, %s1544_s18 }
 0x23a   : > { %p10462_p4 = scmp.ne.s32.totalorder %s1544_s18, %s10461_s8  ;;  %p10470_p7 = scmp.lt.s32.totalorder %s10461_s8, %s10461_s8 }
 0x23c   : > { %p10464_p0 = pnand %p10462_p4, %p11222_p8  ;;  %p10471_p9 = por %p10470_p7, %p10469_p5 }
 0x23e   : > { %p10465_p2 = pneg %p10464_p0 }
 0x240   : > { %p10472_p10 = pnand %p10471_p9, %p10465_p2 }
 0x242   : > { %10475 = shalt.err (!%p10472_p10)
}
 0x243   : > { %s12869_s4 = sld [smem:[#allocation93_spill]] }
 0x244   : > { %9393 = dma.hbm_to_vmem [thread:$0]  (!%p11210_p6), %s12868_s9, 768, %s1544_s18, [#allocation31], %s12867_s17, %s12867_s17, %s12866_s7  }
 0x249   : > { %s10476_s10 = scalar_lea.hbm %s12869_s4, 768 }
 0x24a   : > { %p10477_p3 = scmp.ne.s32.totalorder %s12869_s4, %s10476_s10  ;;  %p10483_p13 = scmp.lt.u32.totalorder %s10476_s10, %s12869_s4 }
 0x24c   : > { %p10479_p11 = pnand %p10477_p3, %p11222_p8 }
 0x24e   : > { %p10480_p12 = pneg %p10479_p11 }
 0x250   : > { %p10485_p1 = pnand %p10483_p13, %p10480_p12 }
 0x252   : > { %10488 = shalt.err (!%p10485_p1)
}
 0x253   : > { %s10489_s8 = scalar_lea.vmem %s11473_s6, 768  ;;  %p10497_p5 = scmp.lt.s32.totalorder %s11473_s6, %s11473_s6 }
 0x254   : > { %p10490_p4 = scmp.ne.s32.totalorder %s11473_s6, %s10489_s8  ;;  %p10498_p7 = scmp.lt.s32.totalorder %s10489_s8, %s10489_s8 }
 0x256   : > { %p10492_p0 = pnand %p10490_p4, %p11222_p8  ;;  %p10499_p9 = por %p10498_p7, %p10497_p5 }
 0x258   : > { %p10493_p2 = pneg %p10492_p0 }
 0x25a   : > { %p10500_p10 = pnand %p10499_p9, %p10493_p2 }
 0x25c   : > { %10503 = shalt.err (!%p10500_p10)
}
 0x25d   : > { %s12870_s18 = sld [smem:[#allocation101_spill]]  ;;  %s10878_s23 = smov [#allocation38]  }
 0x25e   : > { %9399 = dma.hbm_to_vmem [thread:$0]  (!%p11210_p6), %s12869_s4, 768, %s11473_s6, [#allocation34], %s12867_s17, %s12867_s17, %s12866_s7  }
 0x25f   : > { %s1617_s5 = sshll.u32 %s10878_s23, 4  ;;  %s10879_s10 = smov [#allocation39]   ;;  %s1618_s5 = int_to_ptr.vmem [resolvable:$true] %s1617_s5 }
 0x260   : > { %s1628_s3 = sshll.u32 %s10879_s10, 4  ;;  %s11506_s3 = int_to_ptr.vmem [resolvable:$true] %s1628_s3 }
 0x263   : > { %s10504_s8 = scalar_lea.hbm %s12870_s18, 16 }
 0x264   : > { %p10505_p3 = scmp.ne.s32.totalorder %s12870_s18, %s10504_s8  ;;  %p10511_p13 = scmp.lt.u32.totalorder %s10504_s8, %s12870_s18 }
 0x266   : > { %p10507_p11 = pnand %p10505_p3, %p11222_p8 }
 0x268   : > { %p10508_p12 = pneg %p10507_p11 }
 0x26a   : > { %p10513_p1 = pnand %p10511_p13, %p10508_p12 }
 0x26c   : > { %10516 = shalt.err (!%p10513_p1)
}
 0x26d   : > { %s10517_s9 = scalar_lea.vmem %s1618_s5, 16  ;;  %s10524_s6 = scalar_lea.vmem %s1618_s5, 32 }
 0x26e   : > { %p10518_p4 = scmp.ne.s32.totalorder %s1618_s5, %s10517_s9  ;;  %p10525_p5 = scmp.lt.s32.totalorder %s1618_s5, %s1618_s5 }
 0x26f   : > { %p10526_p7 = scmp.lt.s32.totalorder %s10524_s6, %s10517_s9 }
 0x270   : > { %p10520_p0 = pnand %p10518_p4, %p11222_p8 }
 0x271   : > { %p10527_p9 = por %p10526_p7, %p10525_p5 }
 0x272   : > { %p10521_p2 = pneg %p10520_p0 }
 0x274   : > { %p10528_p10 = pnand %p10527_p9, %p10521_p2 }
 0x276   : > { %10531 = shalt.err (!%p10528_p10)
}
 0x277   : > { %s12871_s7 = sld [smem:[#allocation102_spill]] }
 0x278   : > { %9405 = dma.hbm_to_vmem [thread:$0]  (!%p11210_p6), %s12870_s18, 16, %s1618_s5, [#allocation37]  }
 0x27d   : > { %s10532_s17 = scalar_lea.hbm %s12871_s7, 16 }
 0x27e   : > { %p10533_p3 = scmp.ne.s32.totalorder %s12871_s7, %s10532_s17  ;;  %p10539_p13 = scmp.lt.u32.totalorder %s10532_s17, %s12871_s7 }
 0x280   : > { %p10535_p11 = pnand %p10533_p3, %p11222_p8 }
 0x282   : > { %p10536_p12 = pneg %p10535_p11 }
 0x284   : > { %p10541_p1 = pnand %p10539_p13, %p10536_p12 }
 0x286   : > { %10544 = shalt.err (!%p10541_p1)
}
 0x287   : > { %s10545_s9 = scalar_lea.vmem %s11506_s3, 16  ;;  %s10552_s23 = scalar_lea.vmem %s11506_s3, 32 }
 0x288   : > { %p10546_p4 = scmp.ne.s32.totalorder %s11506_s3, %s10545_s9  ;;  %p10553_p5 = scmp.lt.s32.totalorder %s11506_s3, %s11506_s3 }
 0x289   : > { %p10554_p7 = scmp.lt.s32.totalorder %s10552_s23, %s10545_s9 }
 0x28a   : > { %p10548_p0 = pnand %p10546_p4, %p11222_p8 }
 0x28b   : > { %p10555_p9 = por %p10554_p7, %p10553_p5 }
 0x28c   : > { %p10549_p2 = pneg %p10548_p0 }
 0x28e   : > { %p10556_p10 = pnand %p10555_p9, %p10549_p2 }
 0x290   : > { %10559 = shalt.err (!%p10556_p10)
}
 0x291   : > { %9408 = dma.hbm_to_vmem [thread:$0]  (!%p11210_p6), %s12871_s7, 16, %s11506_s3, [#allocation40]  }
 0x292   : > { %s12762_s16 = sadd.s32 4294967294, %s10798_s2   ;;  %s11536_s26 = sadd.s32 1, %s10798_s2  }
 0x293   : > { %s169_s5 = ssub.s32 %s10798_s2, %s11536_s26  ;;  %s172_s10 = sadd.s32 1, %s10794_s1 }
 0x294   : > { %p170_p8 = scmp.eq.s32.totalorder %s169_s5, 0  ;;  %s12872_s8 = sld [smem:[#allocation62_spill]] }
 0x295   : > { %p179_p3 = scmp.ne.s32.totalorder %s10794_s1, %s10790_s28  ;;  %p180_p11 = scmp.eq.s32.totalorder %s10798_s2, 0 }
 0x296   : > { %p185_p12 = scmp.ne.s32.totalorder %s10790_s28, %s10786_s0  ;;  %s12873_s6 = sld [smem:[#allocation63_spill]] }
 0x297   : > { %s11547_s17 = scalar_select %p170_p8, %s10794_s1, %s172_s10  }
 0x298   : > { %p11549_p13 = por %p180_p11, %p179_p3  ;;  %p12875_p6 = scmp.eq.s32.totalorder %s11192_s11, 0 }
 0x299   : > { %p1232_p4 = scmp.eq.s32.totalorder %s11192_s11, 1  ;;  %p1238_p0 = scmp.eq.s32.totalorder %s12762_s16, 1 }
 0x29a   : > { %p11555_p1 = por %p12875_p6, %p185_p12  ;;  %p9448_p2 = scmp.lt.s32.totalorder %s10798_s2, 2 }
 0x29b   : > { %s11564_s23 = sand.u32 1, %s10794_s1   ;;  %p11566_p5 = por %p1232_p4, %p179_p3 }
 0x29c   : > { %s12876_s3 = scalar_select %p11555_p1, 1, 0 }
 0x29d   : > { %s12877_s5 = scalar_select %p11566_p5, 1, 0 }
 0x29e   : > { %p11570_p7 = por %p1238_p0, %p185_p12  ;;  %s8009_s4 = sshll.u32 %s10798_s2, 4 }
 0x29f   : > { %s1662_s7 = scalar_lea.vmem [#allocation3], %s11564_s23  ;;  %s11577_s14 = scalar_lea.hbm %s12872_s8, %s8009_s4 }
 0x2a0   : > { %s12878_s10 = scalar_select %p11570_p7, 1, 0 }
 0x2a1   : > { %s1669_s13 = sshll.u32 %s1662_s7, 4  ;;  %p11583_p9 = pnand %p9448_p2, %p11549_p13  ;;  %s11579_s13 = int_to_ptr.vmem [resolvable:$true] %s1669_s13 }
 0x2a2   : > { %s11588_s18 = scalar_lea.hbm %s12873_s6, %s8009_s4  ;;  %s1660_s20 = scalar_lea.sflag [#allocation4], %s11564_s23 }
 0x2a3   : > { %s10560_s7 = scalar_lea.hbm %s11577_s14, 16  ;;  %p10562_p8 = pneg %p11583_p9 }
 0x2a4   : > { %p10561_p10 = scmp.ne.s32.totalorder %s11577_s14, %s10560_s7  ;;  %s10565_s21 = scalar_lea.hbm %s12872_s8, 32 }
 0x2a5   : > { %p10566_p12 = scmp.lt.u32.totalorder %s11577_s14, %s12872_s8  ;;  %p10567_p13 = scmp.lt.u32.totalorder %s10565_s21, %s10560_s7 }
 0x2a6   : > { %p10563_p3 = pnand %p10562_p8, %p10561_p10  ;;  %p10569_p4 = scmp.lt.u32.totalorder %s10560_s7, %s11577_s14 }
 0x2a7   : > { %p10568_p6 = por %p10567_p13, %p10566_p12 }
 0x2a8   : > { %p10564_p11 = pneg %p10563_p3 }
 0x2a9   : > { %p10570_p0 = por %p10569_p4, %p10568_p6 }
 0x2ab   : > { %p10571_p2 = pnand %p10570_p0, %p10564_p11 }
 0x2ad   : > { %10574 = shalt.err (!%p10571_p2)
}
 0x2ae   : > { %s10575_s4 = scalar_lea.vmem %s11579_s13, 16  ;;  %s10880_s9 = smov [#allocation3]  }
 0x2af   : > { %p10576_p7 = scmp.ne.s32.totalorder %s11579_s13, %s10575_s4  ;;  %s10580_s19 = sshll.u32 %s10880_s9, 4  ;;  %s10581_s19 = int_to_ptr.vmem [resolvable:$false] %s10580_s19 }
 0x2b0   : > { %s10582_s8 = scalar_lea.vmem %s10581_s19, 32  ;;  %p10583_p10 = scmp.lt.s32.totalorder %s11579_s13, %s10581_s19 }
 0x2b1   : > { %p10578_p5 = pnand %p10576_p7, %p10562_p8  ;;  %p10584_p3 = scmp.lt.s32.totalorder %s10582_s8, %s10575_s4 }
 0x2b3   : > { %p10579_p1 = pneg %p10578_p5  ;;  %p10585_p12 = por %p10584_p3, %p10583_p10 }
 0x2b5   : > { %p10586_p13 = pnand %p10585_p12, %p10579_p1 }
 0x2b7   : > { %10589 = shalt.err (!%p10586_p13)
}
 0x2b8   : > { %9412 = dma.hbm_to_vmem [thread:$0]  (!%p11583_p9), %s11577_s14, 16, %s11579_s13, %s1660_s20  }
 0x2b9   : > { %s1679_s21 = scalar_lea.vmem [#allocation6], %s11564_s23  ;;  %s12880_s8 = sand.u32 1, %s10798_s2  }
 0x2ba   : > { %s1686_s19 = sshll.u32 %s1679_s21, 4  ;;  %s1677_s7 = scalar_lea.sflag [#allocation7], %s12880_s8  ;;  %s1687_s19 = int_to_ptr.vmem [resolvable:$true] %s1686_s19 }
 0x2bb   : > { %s10590_s4 = scalar_lea.hbm %s11588_s18, 16  ;;  %s10595_s9 = scalar_lea.hbm %s12873_s6, 32 }
 0x2bc   : > { %p10591_p1 = scmp.ne.s32.totalorder %s11588_s18, %s10590_s4  ;;  %p10596_p11 = scmp.lt.u32.totalorder %s11588_s18, %s12873_s6 }
 0x2bd   : > { %p10597_p6 = scmp.lt.u32.totalorder %s10595_s9, %s10590_s4  ;;  %p10599_p0 = scmp.lt.u32.totalorder %s10590_s4, %s11588_s18 }
 0x2be   : > { %p10593_p5 = pnand %p10591_p1, %p10562_p8 }
 0x2bf   : > { %p10598_p4 = por %p10597_p6, %p10596_p11 }
 0x2c0   : > { %p10594_p7 = pneg %p10593_p5 }
 0x2c1   : > { %p10600_p2 = por %p10599_p0, %p10598_p4 }
 0x2c3   : > { %p10601_p10 = pnand %p10600_p2, %p10594_p7 }
 0x2c5   : > { %10604 = shalt.err (!%p10601_p10)
}
 0x2c6   : > { %s10605_s13 = scalar_lea.vmem %s1687_s19, 16  ;;  %s10881_s14 = smov [#allocation6]  }
 0x2c7   : > { %p10606_p3 = scmp.ne.s32.totalorder %s1687_s19, %s10605_s13  ;;  %s10610_s20 = sshll.u32 %s10881_s14, 4  ;;  %s10611_s20 = int_to_ptr.vmem [resolvable:$false] %s10610_s20 }
 0x2c8   : > { %s10612_s23 = scalar_lea.vmem %s10611_s20, 32  ;;  %p10613_p1 = scmp.lt.s32.totalorder %s1687_s19, %s10611_s20 }
 0x2c9   : > { %p10608_p12 = pnand %p10606_p3, %p10562_p8  ;;  %p10614_p5 = scmp.lt.s32.totalorder %s10612_s23, %s10605_s13 }
 0x2cb   : > { %p10609_p13 = pneg %p10608_p12  ;;  %p10615_p6 = por %p10614_p5, %p10613_p1 }
 0x2cd   : > { %p10616_p11 = pnand %p10615_p6, %p10609_p13 }
 0x2cf   : > { %10619 = shalt.err (!%p10616_p11)
}
 0x2d0   : > { %9415 = dma.hbm_to_vmem [thread:$0]  (!%p11583_p9), %s11588_s18, 16, %s1687_s19, %s1677_s7  }
 0x2d1   : > { %p12881_p7 = scmp.ne.s32.totalorder %s12857_s15, 0 }
 0x2d2   : > { %s11634_s21 = sand.u32 (!%p12881_p7), 1, %s10790_s28   ;;  %p12882_p8 = scmp.ne.s32.totalorder (!%p12881_p7), %s12876_s3, 0 }
 0x2d3   : > { %1695 = sbr.rel (%p12881_p7) target bundleno = 9377 (0x24a1), region = 212  ;;  %s1698_s8 = scalar_lea.sflag (!%p12881_p7), [#allocation4], %s11634_s21 }
 0x2d4   : > { %s1700_s4 = scalar_lea.vmem (!%p12881_p7), [#allocation3], %s11634_s21 }
 0x2da   : > { %10721 = dma.done.wait (%p12882_p8), %s1698_s8, 16  }
 0x2db   : > { %10723 = vsyncadd (%p12882_p8), %s1698_s8, 4294967280  ;;  %s12770_s18 = sand.u32 1, %s11192_s11   ;;  %s1708_s16 = scalar_lea.vmem [#allocation6], %s11634_s21 }
 0x2dc   : > { %s1706_s15 = scalar_lea.sflag [#allocation7], %s12770_s18 }
 0x2dd   : > { %10725 = dma.done.wait (%p12882_p8), %s1706_s15, 16  }
 0x2de   : > { %10727 = vsyncadd (%p12882_p8), %s1706_s15, 4294967280  ;;  %p12883_p9 = scmp.eq.s32.totalorder %s11192_s11, 0 }
 0x2e0   : > { %10729 = dma.done.wait (%p12883_p9), [#allocation7], 16   ;;  %p12884_p4 = pmov %p12883_p9 }
 0x2e2   : > { %10731 = vsyncadd (%p12884_p4), [#allocation7], 4294967280  ;;  %p12885_p0 = pmov %p12884_p4 }
 0x2e4   : > { %10733 = dma.done.wait (%p12885_p0), [#allocation10], 528   ;;  %p12886_p2 = pmov %p12885_p0 }
 0x2e5   : > { %p12887_p10 = pmov %p12885_p0 }
 0x2e6   : > { %10735 = vsyncadd (%p12886_p2), [#allocation10], 4294966768 }
 0x2e7   : > { %10737 = dma.done.wait (%p12887_p10), [#allocation13], 32   ;;  %p12888_p3 = pmov %p12885_p0 }
 0x2e8   : > { %p12889_p12 = pmov %p12885_p0 }
 0x2e9   : > { %10739 = vsyncadd (%p12888_p3), [#allocation13], 4294967264 }
 0x2ea   : > { %10741 = dma.done.wait (%p12889_p12), [#allocation16], 64   ;;  %p12890_p13 = pmov %p12885_p0 }
 0x2eb   : > { %p12891_p1 = pmov %p12885_p0 }
 0x2ec   : > { %10743 = vsyncadd (%p12890_p13), [#allocation16], 4294967232 }
 0x2ed   : > { %10745 = dma.done.wait (%p12891_p1), [#allocation19], 64   ;;  %p12892_p5 = pmov %p12885_p0 }
 0x2ee   : > { %p12893_p6 = pmov %p12885_p0 }
 0x2ef   : > { %10747 = vsyncadd (%p12892_p5), [#allocation19], 4294967232 }
 0x2f0   : > { %10749 = dma.done.wait (%p12893_p6), [#allocation22], 96   ;;  %p12894_p11 = pmov %p12885_p0 }
 0x2f1   : > { %p12895_p7 = pmov %p12885_p0 }
 0x2f2   : > { %10751 = vsyncadd (%p12894_p11), [#allocation22], 4294967200 }
 0x2f3   : > { %10753 = dma.done.wait (%p12895_p7), [#allocation25], 48   ;;  %p12896_p8 = pmov %p12885_p0 }
 0x2f4   : > { %p12897_p9 = pmov %p12885_p0 }
 0x2f5   : > { %10755 = vsyncadd (%p12896_p8), [#allocation25], 4294967248 }
 0x2f6   : > { %10757 = dma.done.wait (%p12897_p9), [#allocation28], 1536   ;;  %p12898_p4 = pmov %p12885_p0 }
 0x2f8   : > { %10759 = vsyncadd (%p12898_p4), [#allocation28], 4294965760 }
 0x2f9   : > { %10761 = dma.done.wait (%p12885_p0), [#allocation31], 1536   ;;  %p12899_p2 = pmov %p12885_p0 }
 0x2fa   : > { %p12900_p10 = pmov %p12885_p0 }
 0x2fb   : > { %10763 = vsyncadd (%p12899_p2), [#allocation31], 4294965760 }
 0x2fc   : > { %10765 = dma.done.wait (%p12900_p10), [#allocation34], 1536   ;;  %p12901_p3 = pmov %p12885_p0 }
 0x2fd   : > { %p12902_p12 = pmov %p12885_p0 }
 0x2fe   : > { %10767 = vsyncadd (%p12901_p3), [#allocation34], 4294965760 }
 0x2ff   : > { %10769 = dma.done.wait (%p12902_p12), [#allocation37], 528   ;;  %p12903_p13 = pmov %p12885_p0 }
 0x300   : > { %p12904_p1 = pmov %p12885_p0 }
 0x301   : > { %10771 = vsyncadd (%p12903_p13), [#allocation37], 4294966768 }
 0x302   : > { %10773 = dma.done.wait (%p12904_p1), [#allocation40], 16   ;;  %p12905_p5 = pmov %p12885_p0 }
 0x303   : > { %s12906_s3 = sld [smem:[#allocation61_spill]]  ;;  %p1943_p6 = scmp.lt.s32.totalorder %s11192_s11, 1  ;;  %vm2058_vm0 = vcmask 261120   ;;  %vm2062_vm1 = vcmask 259072   ;;  %v1960_v14 = vld [vmem:[#allocation11] sm:$0xff]  ;;  %v1961_v15 = vld [vmem:[#allocation11 + $0x8] sm:$0xff] }
 0x304   : > { %10775 = vsyncadd (%p12905_p5), [#allocation40], 4294967280  ;;  %v1962_v16 = vld [vmem:[#allocation11 + $0x10] sm:$0xff]  ;;  %v8854_v17 = vpack.c.bf16 %v1961_v15, %v1960_v14  ;;  %v1963_v18 = vld [vmem:[#allocation11 + $0x18] sm:$0xff]  ;;  %s12907_s13 = sld [smem:[#allocation66_spill]]  ;;  %vm2250_vm4 = vcmask 392192  }
 0x305   : > { %s1944_s19 = scalar_select %p1943_p6, %s11192_s11, 1  ;;  %v8858_v19 = vpack.c.bf16 %v1963_v18, %v1962_v16  ;;  %v8041_v27 = vld [vmem:[#allocation8] ss:$0 sm:$0xff]  ;;  %v8042_v29 = vld [vmem:[#allocation9] ss:$0 sm:$0xff]  ;;  %vm2333_vm5 = vcmask 385024  }
 0x306   : > { %8855 = vmatprep.subr.bf16.mxu0 %v8854_v17  ;;  %v8043_v45 = vld [vmem:[#allocation12] ss:$0 sm:$0xff]  ;;  %vm2336_vm6 = vcmask 390144   ;;  %s12908_s14 = sld [smem:[#allocation70_spill]]  ;;  %vm2525_vm7 = vcmask 64512   ;;  %s10884_s20 = smov 112  }
 0x307   : > { %s11700_s7 = sshll.u32 %s1944_s19, 4  ;;  %8857 = vmatpush3.bf16.msra.mxu0 %v8854_v17  ;;  %s10885_s23 = smov 120   ;;  %vm11788_vm8 = vmpackc.low %vm2525_vm7, %vm2525_vm7  ;;  %vm3056_vm9 = vcmask 130048   ;;  %vm3755_vm10 = vcmask 195584   ;;  %vm3760_vm11 = vcmask 326656  }
 0x308   : > { %8859 = vmatprep.subr.bf16.mxu0 %v8858_v19  ;;  %s10886_s8 = smov 104   ;;  %s10888_s15 = smov 88  }
 0x309   : > { %s1947_s9 = scalar_lea.vmem %s12906_s3, %s11700_s7  ;;  %s10890_s3 = smov 32  }
 0x30a   : > { %v2056_v0 = vld [vmem:[%s1947_s9] sm:$0xff]  ;;  %v2057_v1 = vld [vmem:[%s1947_s9 + $0x8] sm:$0x3f]  ;;  %v1967_v39 = vld [vmem:[%s12907_s13 + $0x10] sm:$0xff]  ;;  %s12911_s19 = sld [smem:[#allocation71_spill]]  ;;  %s12773_s9 = smov 8  }
 0x30b   : > { %v2059_v2 = vsel %vm2058_vm0, %v2056_v0, 0.0  ;;  %v2063_v3 = vsel %vm2062_vm1, %v2057_v1, 0.0  ;;  %8861 = vmatpush3.bf16.msra.mxu0 %v8858_v19  ;;  %v1965_v36 = vld [vmem:[%s12907_s13] sm:$0xff]  ;;  %v1966_v37 = vld [vmem:[%s12907_s13 + $0x8] sm:$0xff]  ;;  %v1968_v40 = vld [vmem:[%s12907_s13 + $0x18] sm:$0xff]  ;;  %s12777_s18 = smov 16  }
 0x30c   : > { %2060 = vadd.xlane.f32.xlu0 %v2059_v2  ;;  %v8862_v38 = vpack.c.bf16 %v1966_v37, %v1965_v36  ;;  %v8866_v41 = vpack.c.bf16 %v1968_v40, %v1967_v39  ;;  %v1969_v42 = vld [vmem:[%s12907_s13 + $0x20] sm:$0xff]  ;;  %v1970_v43 = vld [vmem:[%s12907_s13 + $0x28] sm:$0xff]  ;;  %p12939_p7 = scmp.ne.s32.totalorder %s12877_s5, 0 }
 0x30d   : > { %v8870_v44 = vpack.c.bf16 %v1970_v43, %v1969_v42  ;;  %v2338_v37 = vld [vmem:[%s1708_s16] sm:$0x1]  ;;  %v8046_v39 = vld [vmem:[#allocation14] ss:$0 sm:$0xff]  ;;  %s12771_s16 = smov 80  }
 0x30e   : > { %8863 = vmatprep.subr.bf16.mxu1 %v8862_v38  ;;  %2339 = vst.msk [vmem:[#allocation2 + $0xf] sm:$0x1] %vm2333_vm5, %v2338_v37 }
 0x30f   : > { %8865 = vmatpush3.bf16.msra.mxu1 %v8862_v38  ;;  %v2332_v38 = vld [vmem:[%s1700_s4] sm:$0x1]  ;;  %s10887_s4 = smov 96  }
 0x310   : > { %2064 = vadd.xlane.f32.xlu0 %v2063_v3  ;;  %8867 = vmatprep.subr.bf16.mxu1 %v8866_v41  ;;  %2334 = vst.msk [vmem:[#allocation2] sm:$0x1] %vm2333_vm5, %v2332_v38 }
 0x313   : > { %8869 = vmatpush3.bf16.msra.mxu1 %v8866_v41 }
 0x314   : > { %8871 = vmatprep.subr.bf16.mxu1 %v8870_v44 }
 0x317   : > { %8873 = vmatpush3.bf16.msra.mxu1 %v8870_v44 }
 0x399   : > { %v2061_v4 = vpop.xlane.xlu0 %2060 }
 0x39a   : > { %v2067_v5 = vmul.f32 0.03125, %v2061_v4 }
 0x39c   : > { %v2069_v6 = vsub.f32 %v2056_v0, %v2067_v5 }
 0x39d   : > { %v2065_v7 = vpop.xlane.xlu0 %2064 }
 0x39e   : > { %v2068_v8 = vmul.f32 0.03125, %v2065_v7  ;;  %v2071_v9 = vmul.f32 %v2069_v6, %v2069_v6 }
 0x3a0   : > { %v2070_v10 = vsub.f32 %v2057_v1, %v2068_v8  ;;  %v2073_v11 = vsel %vm2058_vm0, %v2071_v9, 0.0 }
 0x3a1   : > { %2074 = vadd.xlane.f32.xlu1 %v2073_v11 }
 0x3a2   : > { %v2072_v12 = vmul.f32 %v2070_v10, %v2070_v10 }
 0x3a4   : > { %v2076_v13 = vsel %vm2062_vm1, %v2072_v12, 0.0 }
 0x3a5   : > { %2077 = vadd.xlane.f32.xlu1 %v2076_v13 }
 0x42e   : > { %v2075_v20 = vpop.xlane.xlu1 %2074 }
 0x42f   : > { %v2079_v21 = vmul.f32 0.03125, %v2075_v20 }
 0x431   : > { %v2081_v22 = vadd.f32 1e-05, %v2079_v21 }
 0x432   : > { %v2078_v23 = vpop.xlane.xlu1 %2077 }
 0x433   : > { %9740 = vrsqrt.f32 %v2081_v22  ;;  %v2080_v24 = vmul.f32 0.03125, %v2078_v23 }
 0x435   : > { %v2082_v25 = vadd.f32 1e-05, %v2080_v24 }
 0x437   : > { %9742 = vrsqrt.f32 %v2082_v25  ;;  %v10882_v25 = vmov -1.0  }
 0x43d   : > { %v9741_v26 = vpop.eup %9740 }
 0x43e   : > { %v2085_v28 = vmul.f32 %v9741_v26, %v2069_v6 }
 0x440   : > { %v2093_v30 = vmul.f32 %v8041_v27, %v2085_v28 }
 0x441   : > { %v9743_v31 = vpop.eup %9742 }
 0x442   : > { %v2086_v32 = vmul.f32 %v9743_v31, %v2070_v10  ;;  %v2101_v33 = vadd.f32 %v8042_v29, %v2093_v30 }
 0x444   : > { %v2094_v34 = vmul.f32 %v8041_v27, %v2086_v32  ;;  %8466 = vmatprep.mubr.msk.f32.mxu0 %vm2058_vm0, %v2101_v33 }
 0x446   : > { %v2102_v35 = vadd.f32 %v8042_v29, %v2094_v34 }
 0x448   : > { %8467 = vmatmul.mubr.msk.f32.vlgmr.msra.gmra.mrb[0].mxu0 %vm2058_vm0, %v2102_v35 }
 0x51b   : > { %v8468_v46 = vpop.f32.mrb[0].mxu0 }
 0x51c   : > { %v2187_v47 = vadd.f32 %v8468_v46, %v8043_v45  ;;  %v2181_v48 = vpop.f32.mrb[1].mxu0 }
 0x51d   : > { %v2182_v49 = vadd.f32 %v8043_v45, %v2181_v48 }
 0x51e   : > { %v2193_v50 = vmul.f32 0.70710677, %v2187_v47  ;;  %v2191_v34 = vmul.f32 0.5, %v2187_v47 }
 0x51f   : > { %v2192_v51 = vmul.f32 0.70710677, %v2182_v49  ;;  %v2190_v32 = vmul.f32 0.5, %v2182_v49 }
 0x520   : > { %v2199_v52 = vand.u32 2147483647, %v2193_v50  ;;  %vm2195_vm2 = vcmp.ge.f32.partialorder %v2193_v50, 0.0 }
 0x521   : > { %v2198_v53 = vand.u32 2147483647, %v2192_v51  ;;  %vm2194_vm3 = vcmp.ge.f32.partialorder %v2192_v51, 0.0  ;;  %v2197_v26 = vsel %vm2195_vm2, 1.0, %v10882_v25 }
 0x522   : > { %v2201_v54 = vmul.f32 0.3275911, %v2199_v52  ;;  %v2227_v58 = vsub.f32 0.0, %v2199_v52  ;;  %v2196_v29 = vsel %vm2194_vm3, 1.0, %v10882_v25 }
 0x523   : > { %v2200_v55 = vmul.f32 0.3275911, %v2198_v53  ;;  %v2226_v59 = vsub.f32 0.0, %v2198_v53 }
 0x524   : > { %v2203_v56 = vadd.f32 1.0, %v2201_v54  ;;  %v2229_v61 = vmul.f32 %v2227_v58, %v2199_v52  ;;  %v2388_v58 = vld [vmem:[%s12908_s14 + $0x8] sm:$0xff] }
 0x525   : > { %v2202_v57 = vadd.f32 1.0, %v2200_v55  ;;  %v2228_v0 = vmul.f32 %v2226_v59, %v2198_v53  ;;  %v2390_v59 = vld [vmem:[%s12908_s14 + $0x18] sm:$0xff] }
 0x526   : > { %9744 = vrcp.f32 %v2203_v56  ;;  %v2232_v3 = vmul.f32 1.442695, %v2229_v61  ;;  %v2387_v61 = vld [vmem:[%s12908_s14] sm:$0xff] }
 0x527   : > { %9746 = vrcp.f32 %v2202_v57  ;;  %v2230_v6 = vmul.f32 1.442695, %v2228_v0  ;;  %v2392_v0 = vld [vmem:[%s12908_s14 + $0x28] sm:$0xff] }
 0x528   : > { %9748 = vpow2.f32 %v2232_v3  ;;  %v2391_v3 = vld [vmem:[%s12908_s14 + $0x20] sm:$0xff] }
 0x529   : > { %9750 = vpow2.f32 %v2230_v6  ;;  %v2396_v6 = vld [vmem:[%s12908_s14 + $0x48] sm:$0xff] }
 0x530   : > { %v9745_v60 = vpop.eup %9744 }
 0x531   : > { %v9747_v62 = vpop.eup %9746  ;;  %v2209_v63 = vmul.f32 1.0614054, %v9745_v60 }
 0x532   : > { %v2208_v1 = vmul.f32 1.0614054, %v9747_v62  ;;  %v9749_v19 = vpop.eup %9748 }
 0x533   : > { %v2211_v2 = vadd.f32 -1.4531521, %v2209_v63  ;;  %v9751_v21 = vpop.eup %9750 }
 0x534   : > { %v2210_v4 = vadd.f32 -1.4531521, %v2208_v1  ;;  %v2394_v1 = vld [vmem:[%s12908_s14 + $0x38] sm:$0xff] }
 0x535   : > { %v2213_v5 = vmul.f32 %v9745_v60, %v2211_v2  ;;  %v8878_v2 = vpack.c.bf16 %v2394_v1, %v2392_v0 }
 0x536   : > { %v2212_v7 = vmul.f32 %v9747_v62, %v2210_v4  ;;  %v2393_v4 = vld [vmem:[%s12908_s14 + $0x30] sm:$0xff] }
 0x537   : > { %v2215_v8 = vadd.f32 1.4214138, %v2213_v5  ;;  %v8880_v5 = vpack.c.bf16 %v2393_v4, %v2391_v3 }
 0x538   : > { %v2214_v9 = vadd.f32 1.4214138, %v2212_v7  ;;  %v2398_v7 = vld [vmem:[%s12908_s14 + $0x58] sm:$0xff] }
 0x539   : > { %v2217_v10 = vmul.f32 %v9745_v60, %v2215_v8  ;;  %v8882_v8 = vpack.c.bf16 %v2398_v7, %v2396_v6 }
 0x53a   : > { %v2216_v11 = vmul.f32 %v9747_v62, %v2214_v9  ;;  %v2395_v9 = vld [vmem:[%s12908_s14 + $0x40] sm:$0xff] }
 0x53b   : > { %v2219_v12 = vadd.f32 -0.28449672, %v2217_v10  ;;  %v2397_v10 = vld [vmem:[%s12908_s14 + $0x50] sm:$0xff] }
 0x53c   : > { %v2218_v13 = vadd.f32 -0.28449672, %v2216_v11  ;;  %v8884_v11 = vpack.c.bf16 %v2397_v10, %v2395_v9 }
 0x53d   : > { %v2221_v14 = vmul.f32 %v9745_v60, %v2219_v12  ;;  %v10883_v12 = vmov 0.0  }
 0x53e   : > { %v2220_v15 = vmul.f32 %v9747_v62, %v2218_v13  ;;  %2476 = vmatprep.mubr.f32.mxu0 %v10883_v12 }
 0x53f   : > { %v2223_v16 = vadd.f32 0.2548296, %v2221_v14 }
 0x540   : > { %v2222_v17 = vadd.f32 0.2548296, %v2220_v15 }
 0x541   : > { %v2225_v18 = vmul.f32 %v9745_v60, %v2223_v16  ;;  %v8874_v60 = vpack.c.bf16 %v2390_v59, %v2388_v58 }
 0x542   : > { %v2224_v20 = vmul.f32 %v9747_v62, %v2222_v17  ;;  %v2389_v62 = vld [vmem:[%s12908_s14 + $0x10] sm:$0xff] }
 0x543   : > { %v2235_v22 = vmul.f32 %v9749_v19, %v2225_v18  ;;  %v8876_v63 = vpack.c.bf16 %v2389_v62, %v2387_v61  ;;  %8875 = vmatprep.subr.bf16.mxu0 %v8874_v60 }
 0x544   : > { %v2234_v23 = vmul.f32 %v9751_v21, %v2224_v20  ;;  %v8049_v21 = vld [vmem:[#allocation15] ss:$0 sm:$0xff] }
 0x545   : > { %v2237_v24 = vsub.f32 1.0, %v2235_v22  ;;  %8877 = vmatpush1.bf16.msra.mxu0 %v8876_v63 }
 0x546   : > { %v2236_v27 = vsub.f32 1.0, %v2234_v23  ;;  %8879 = vmatprep.subr.bf16.mxu0 %v8878_v2 }
 0x547   : > { %v2239_v28 = vmul.f32 %v2237_v24, %v2197_v26  ;;  %v8050_v24 = vld [vmem:[#allocation17] ss:$0 sm:$0xff] }
 0x548   : > { %v2238_v30 = vmul.f32 %v2236_v27, %v2196_v29 }
 0x549   : > { %v2241_v31 = vadd.f32 1.0, %v2239_v28  ;;  %8881 = vmatpush1.bf16.msra.mxu0 %v8880_v5 }
 0x54a   : > { %v2240_v33 = vadd.f32 1.0, %v2238_v30  ;;  %8883 = vmatprep.subr.bf16.mxu0 %v8882_v8 }
 0x54b   : > { %v2243_v36 = vmul.f32 %v2241_v31, %v2191_v34 }
 0x54c   : > { %v2242_v35 = vmul.f32 %v2240_v33, %v2190_v32 }
 0x54d   : > { %8885 = vmatpush1.bf16.msra.mxu0 %v8884_v11 }
 0x54e   : > { %8481 = vmatprep.mubr.msk.f32.mxu1 %vm2250_vm4, %v2242_v35 }
 0x54f   : > { %8482 = vmatmul.mubr.msk.f32.vlgmr.msra.gmra.mrb[0].mxu1 %vm2250_vm4, %v2243_v36 }
 0x622   : > { %v8483_v40 = vpop.f32.mrb[0].mxu1 }
 0x623   : > { %v2329_v41 = vadd.f32 %v8483_v40, %v8046_v39  ;;  %v2323_v42 = vpop.f32.mrb[1].mxu1 }
 0x624   : > { %v2324_v43 = vadd.f32 %v8046_v39, %v2323_v42 }
 0x625   : > { %2337 = vst.msk [vmem:[#allocation2 + $0x9] sm:$0x3f] %vm2336_vm6, %v2329_v41 }
 0x626   : > { %2335 = vst.msk [vmem:[#allocation2 + $0x1] sm:$0xff] %vm2250_vm4, %v2324_v43 }
 0x62d   : > { %v11728_v44 = vld [vmem:[#allocation2 + $0x8] sm:$0xff]  ;;  %v11730_v45 = vld [vmem:[#allocation2] sm:$0xff] }
 0x62e   : > { %v2347_v46 = vsel %vm2250_vm4, %v11728_v44, 0.0  ;;  %v2344_v47 = vsel %vm2250_vm4, %v11730_v45, 0.0 }
 0x62f   : > { %2348 = vadd.xlane.f32.xlu1 %v2347_v46  ;;  %2345 = vadd.xlane.f32.xlu0 %v2344_v47 }
 0x6bc   : > { %v2349_v48 = vpop.xlane.xlu1 %2348  ;;  %v2346_v49 = vpop.xlane.xlu0 %2345 }
 0x6bd   : > { %v2352_v50 = vmul.f32 0.020833334, %v2349_v48  ;;  %v2351_v51 = vmul.f32 0.020833334, %v2346_v49 }
 0x6bf   : > { %v2354_v52 = vsub.f32 %v11728_v44, %v2352_v50  ;;  %v2353_v53 = vsub.f32 %v11730_v45, %v2351_v51 }
 0x6c1   : > { %v2356_v54 = vmul.f32 %v2354_v52, %v2354_v52  ;;  %v2355_v55 = vmul.f32 %v2353_v53, %v2353_v53 }
 0x6c3   : > { %v2360_v56 = vsel %vm2250_vm4, %v2356_v54, 0.0  ;;  %v2357_v57 = vsel %vm2250_vm4, %v2355_v55, 0.0 }
 0x6c4   : > { %2361 = vadd.xlane.f32.xlu1 %v2360_v56  ;;  %2358 = vadd.xlane.f32.xlu0 %v2357_v57 }
 0x751   : > { %v2362_v13 = vpop.xlane.xlu1 %2361  ;;  %v2359_v14 = vpop.xlane.xlu0 %2358 }
 0x752   : > { %v2364_v15 = vmul.f32 0.020833334, %v2362_v13  ;;  %v2363_v16 = vmul.f32 0.020833334, %v2359_v14 }
 0x754   : > { %v2366_v17 = vadd.f32 1e-05, %v2364_v15  ;;  %v2365_v18 = vadd.f32 1e-05, %v2363_v16 }
 0x756   : > { %9752 = vrsqrt.f32 %v2366_v17 }
 0x757   : > { %9754 = vrsqrt.f32 %v2365_v18 }
 0x760   : > { %v9753_v19 = vpop.eup %9752 }
 0x761   : > { %v9755_v20 = vpop.eup %9754  ;;  %v2370_v23 = vmul.f32 %v9753_v19, %v2354_v52 }
 0x762   : > { %v2369_v22 = vmul.f32 %v9755_v20, %v2353_v53 }
 0x763   : > { %v2378_v28 = vmul.f32 %v8049_v21, %v2370_v23 }
 0x764   : > { %v2377_v26 = vmul.f32 %v8049_v21, %v2369_v22 }
 0x765   : > { %v2386_v29 = vadd.f32 %v8050_v24, %v2378_v28 }
 0x766   : > { %v2385_v27 = vadd.f32 %v8050_v24, %v2377_v26 }
 0x768   : > { %8051 = vmatmul.mubr.msk.f32.vlgmr.msra.gmra.mrb[2].mxu0 %vm2250_vm4, %v2385_v27 }
 0x769   : > { %2482 = vmatprep.mubr.f32.mxu0 %v10883_v12 }
 0x76c   : > { %8052 = vmatmul.mubr.msk.f32.gmra.mrb[4].mxu0 %vm2250_vm4, %v2386_v29 }
 0x83b   : > { %v2478_v30 = vpop.f32.mrb[2].mxu0 }
 0x83c   : > { %2495 = vrot.lane.b32.xlu1 %v2478_v30, %s10884_s20  ;;  %2491 = vrot.lane.b32.xlu0 %v2478_v30, %s10885_s23  ;;  %v2480_v31 = vpop.f32.mrb[3].mxu0 }
 0x83d   : > { %8488 = vmatprep.mubr.msk.f32.mxu1 %vm2525_vm7, %v2478_v30 }
 0x83f   : > { %v2484_v32 = vpop.f32.mrb[4].mxu0 }
 0x840   : > { %2499 = vrot.lane.b32.xlu0 %v2478_v30, %s10886_s8  ;;  %2493 = vrot.lane.b32.xlu1 %v2484_v32, %s10885_s23  ;;  %v2486_v33 = vpop.f32.mrb[5].mxu0  ;;  %v11761_v34 = vpack.i.bf16 %v2484_v32, %v2478_v30 }
 0x841   : > { %v11763_v35 = vpack.i.bf16 %v2486_v33, %v2480_v31 }
 0x844   : > { %2503 = vrot.lane.b32.xlu0 %v2478_v30, %s10887_s4  ;;  %2497 = vrot.lane.b32.xlu1 %v2484_v32, %s10884_s20 }
 0x848   : > { %2507 = vrot.lane.b32.xlu0 %v2478_v30, %s10888_s15  ;;  %2501 = vrot.lane.b32.xlu1 %v2484_v32, %s10886_s8 }
 0x84c   : > { %9601 = vrot.lane.b32.xlu0 %v11761_v34, %s12771_s16  ;;  %2505 = vrot.lane.b32.xlu1 %v2484_v32, %s10887_s4 }
 0x850   : > { %2509 = vrot.lane.b32.xlu1 %v2484_v32, %s10888_s15 }
 0x8ae   : > { %v2496_v36 = vpop.permute.xlu1 %2495  ;;  %v2492_v37 = vpop.permute.xlu0 %2491 }
 0x8af   : > { %8495 = vmatprep.mubr.msk.f32.mxu0 %vm2525_vm7, %v2492_v37 }
 0x8b2   : > { %v2500_v38 = vpop.permute.xlu0 %2499  ;;  %v2494_v39 = vpop.permute.xlu1 %2493 }
 0x8b3   : > { %v11774_v40 = vpack.i.bf16 %v2494_v39, %v2492_v37 }
 0x8b5   : > { %9606 = vrot.lane.b32.xlu1 %v11774_v40, %s12771_s16 }
 0x8b6   : > { %v2504_v41 = vpop.permute.xlu0 %2503  ;;  %v2498_v42 = vpop.permute.xlu1 %2497 }
 0x8b7   : > { %v11778_v43 = vpack.i.bf16 %v2498_v42, %v2496_v36 }
 0x8b9   : > { %9611 = vrot.lane.b32.xlu0 %v11778_v43, %s12771_s16 }
 0x8ba   : > { %v2508_v46 = vpop.permute.xlu0 %2507  ;;  %v2502_v47 = vpop.permute.xlu1 %2501 }
 0x8bb   : > { %v11782_v48 = vpack.i.bf16 %v2502_v47, %v2500_v38 }
 0x8bd   : > { %9616 = vrot.lane.b32.xlu1 %v11782_v48, %s12771_s16 }
 0x8be   : > { %v9602_v49 = vpop.permute.xlu0 %9601  ;;  %v2506_v50 = vpop.permute.xlu1 %2505 }
 0x8bf   : > { %v9604_v51 = vunpack.i.h.bf16 %v9602_v49  ;;  %v9603_v52 = vunpack.i.l.bf16 %v9602_v49  ;;  %v9620_v53 = vpack.i.bf16 %v2506_v50, %v2504_v41 }
 0x8c1   : > { %v8886_v55 = vpack.c.bf16 %v9604_v51, %v9603_v52  ;;  %9621 = vrot.lane.b32.xlu0 %v9620_v53, %s12771_s16 }
 0x8c2   : > { %v2510_v56 = vpop.permute.xlu1 %2509 }
 0x8c3   : > { %v9625_v57 = vpack.i.bf16 %v2510_v56, %v2508_v46  ;;  %8888 = vmatprep.subr.msk.bf16.mxu1 %vm11788_vm8, %v8886_v55 }
 0x8c4   : > { %8891 = vmatpush3.bf16.xpose.msk.msra.mxu1 %vm11788_vm8, %v8886_v55 }
 0x8c5   : > { %9626 = vrot.lane.b32.xlu1 %v9625_v57, %s12771_s16  ;;  %s12779_s16 = smov 24  }
 0x8cb   : > { %8489 = vmatmul.mubr.msk.f32.vlgmr.msra.gmra.mrb[2].mxu1 %vm2525_vm7, %v2484_v32 }
 0x8cc   : > { %8502 = vmatprep.mubr.msk.f32.mxu1 %vm2525_vm7, %v2496_v36 }
 0x927   : > { %v9607_v58 = vpop.permute.xlu1 %9606 }
 0x928   : > { %v9609_v59 = vunpack.i.h.bf16 %v9607_v58  ;;  %v9608_v60 = vunpack.i.l.bf16 %v9607_v58 }
 0x92a   : > { %v8892_v61 = vpack.c.bf16 %v9609_v59, %v9608_v60 }
 0x92b   : > { %v9612_v62 = vpop.permute.xlu0 %9611 }
 0x92c   : > { %v9614_v63 = vunpack.i.h.bf16 %v9612_v62  ;;  %v9613_v0 = vunpack.i.l.bf16 %v9612_v62  ;;  %8894 = vmatprep.subr.msk.bf16.mxu0 %vm11788_vm8, %v8892_v61 }
 0x92d   : > { %8897 = vmatpush3.bf16.xpose.msk.msra.mxu0 %vm11788_vm8, %v8892_v61 }
 0x92e   : > { %v8898_v1 = vpack.c.bf16 %v9614_v63, %v9613_v0 }
 0x92f   : > { %v9617_v2 = vpop.permute.xlu1 %9616 }
 0x930   : > { %v9619_v3 = vunpack.i.h.bf16 %v9617_v2  ;;  %v9618_v4 = vunpack.i.l.bf16 %v9617_v2  ;;  %8900 = vmatprep.subr.msk.bf16.mxu1 %vm11788_vm8, %v8898_v1 }
 0x931   : > { %8903 = vmatpush3.bf16.xpose.msk.msra.mxu1 %vm11788_vm8, %v8898_v1 }
 0x932   : > { %v8904_v5 = vpack.c.bf16 %v9619_v3, %v9618_v4 }
 0x933   : > { %v9622_v6 = vpop.permute.xlu0 %9621 }
 0x934   : > { %v9624_v7 = vunpack.i.h.bf16 %v9622_v6  ;;  %v9623_v8 = vunpack.i.l.bf16 %v9622_v6  ;;  %8496 = vmatmul.mubr.msk.f32.vlgmr.msra.gmra.mrb[6].mxu0 %vm2525_vm7, %v2494_v39  ;;  %8906 = vmatprep.subr.msk.bf16.mxu0 %vm11788_vm8, %v8904_v5 }
 0x935   : > { %8909 = vmatpush3.bf16.xpose.msk.msra.mxu0 %vm11788_vm8, %v8904_v5  ;;  %8509 = vmatprep.mubr.msk.f32.mxu0 %vm2525_vm7, %v2500_v38 }
 0x936   : > { %v8910_v9 = vpack.c.bf16 %v9624_v7, %v9623_v8 }
 0x937   : > { %v9627_v10 = vpop.permute.xlu1 %9626 }
 0x938   : > { %v9629_v11 = vunpack.i.h.bf16 %v9627_v10  ;;  %v9628_v13 = vunpack.i.l.bf16 %v9627_v10  ;;  %8503 = vmatmul.mubr.msk.f32.vlgmr.msra.gmra.mrb[4].mxu1 %vm2525_vm7, %v2498_v42  ;;  %8912 = vmatprep.subr.msk.bf16.mxu1 %vm11788_vm8, %v8910_v9 }
 0x939   : > { %8915 = vmatpush3.bf16.xpose.msk.msra.mxu1 %vm11788_vm8, %v8910_v9  ;;  %8516 = vmatprep.mubr.msk.f32.mxu1 %vm2525_vm7, %v2504_v41 }
 0x93a   : > { %v8916_v14 = vpack.c.bf16 %v9629_v11, %v9628_v13 }
 0x93c   : > { %8510 = vmatmul.mubr.msk.f32.vlgmr.msra.gmra.mrb[8].mxu0 %vm2525_vm7, %v2502_v47  ;;  %8918 = vmatprep.subr.msk.bf16.mxu0 %vm11788_vm8, %v8916_v14 }
 0x93d   : > { %8921 = vmatpush3.bf16.xpose.msk.msra.mxu0 %vm11788_vm8, %v8916_v14  ;;  %8523 = vmatprep.mubr.msk.f32.mxu0 %vm2525_vm7, %v2508_v46 }
 0x940   : > { %8517 = vmatmul.mubr.msk.f32.vlgmr.msra.gmra.mrb[6].mxu1 %vm2525_vm7, %v2506_v50 }
 0x944   : > { %8524 = vmatmul.mubr.msk.f32.vlgmr.msra.gmra.mrb[10].mxu0 %vm2525_vm7, %v2510_v56 }
 0x99e   : > { %v8490_v15 = vpop.f32.mrb[2].mxu1 }
 0x99f   : > { %v3045_v16 = vmul.f32 0.35355338, %v8490_v15  ;;  %v2600_v17 = vpop.f32.mrb[3].mxu1 }
 0x9a0   : > { %v3044_v18 = vmul.f32 0.35355338, %v2600_v17 }
 0x9a1   : > { %v3060_v19 = vsel %vm3056_vm9, %v3045_v16, -inf }
 0x9a2   : > { %3061 = vmax.xlane.f32.xlu1 %v3060_v19  ;;  %v3057_v20 = vsel %vm3056_vm9, %v3044_v18, -inf }
 0x9a3   : > { %3058 = vmax.xlane.f32.xlu0 %v3057_v20 }
 0xa07   : > { %v8497_v21 = vpop.f32.mrb[6].mxu0 }
 0xa08   : > { %v3047_v22 = vmul.f32 0.35355338, %v8497_v21  ;;  %v2687_v23 = vpop.f32.mrb[7].mxu0 }
 0xa09   : > { %v11830_v24 = vmul.f32 0.35355338, %v2687_v23 }
 0xa0a   : > { %v3066_v26 = vsel %vm3056_vm9, %v3047_v22, -inf }
 0xa0b   : > { %v8504_v27 = vpop.f32.mrb[4].mxu1  ;;  %3067 = vmax.xlane.f32.xlu0 %v3066_v26  ;;  %v3063_v32 = vsel %vm3056_vm9, %v11830_v24, -inf }
 0xa0c   : > { %v3049_v28 = vmul.f32 0.35355338, %v8504_v27  ;;  %v2774_v29 = vpop.f32.mrb[5].mxu1 }
 0xa0d   : > { %v11833_v30 = vmul.f32 0.35355338, %v2774_v29 }
 0xa0e   : > { %v3072_v31 = vsel %vm3056_vm9, %v3049_v28, -inf }
 0xa0f   : > { %3073 = vmax.xlane.f32.xlu1 %v3072_v31  ;;  %3064 = vmax.xlane.f32.xlu0 %v3063_v32  ;;  %v8511_v33 = vpop.f32.mrb[8].mxu0  ;;  %v3069_v39 = vsel %vm3056_vm9, %v11833_v30, -inf }
 0xa10   : > { %v11838_v36 = vmul.f32 0.35355338, %v8511_v33  ;;  %v2861_v37 = vpop.f32.mrb[9].mxu0 }
 0xa11   : > { %v11840_v38 = vmul.f32 0.35355338, %v2861_v37 }
 0xa12   : > { %v3078_v41 = vsel %vm3056_vm9, %v11838_v36, -inf }
 0xa13   : > { %v8518_v42 = vpop.f32.mrb[6].mxu1  ;;  %3070 = vmax.xlane.f32.xlu0 %v3069_v39  ;;  %3079 = vmax.xlane.f32.xlu1 %v3078_v41  ;;  %v3075_v51 = vsel %vm3056_vm9, %v11840_v38, -inf }
 0xa14   : > { %v11846_v46 = vmul.f32 0.35355338, %v8518_v42  ;;  %v2948_v47 = vpop.f32.mrb[7].mxu1 }
 0xa15   : > { %v11848_v49 = vmul.f32 0.35355338, %v2948_v47 }
 0xa16   : > { %v3084_v50 = vsel %vm3056_vm9, %v11846_v46, -inf }
 0xa17   : > { %3085 = vmax.xlane.f32.xlu1 %v3084_v50  ;;  %3076 = vmax.xlane.f32.xlu0 %v3075_v51  ;;  %v8525_v52 = vpop.f32.mrb[10].mxu0  ;;  %v3081_v57 = vsel %vm3056_vm9, %v11848_v49, -inf }
 0xa18   : > { %v11854_v53 = vmul.f32 0.35355338, %v8525_v52  ;;  %v3035_v55 = vpop.f32.mrb[11].mxu0 }
 0xa19   : > { %v11856_v56 = vmul.f32 0.35355338, %v3035_v55 }
 0xa1a   : > { %v3090_v58 = vsel %vm3056_vm9, %v11854_v53, -inf }
 0xa1b   : > { %3082 = vmax.xlane.f32.xlu0 %v3081_v57  ;;  %3091 = vmax.xlane.f32.xlu1 %v3090_v58  ;;  %v3087_v59 = vsel %vm3056_vm9, %v11856_v56, -inf }
 0xa1f   : > { %3088 = vmax.xlane.f32.xlu0 %v3087_v59 }
 0xa2c   : > { %9636 = vrot.lane.b32.xlu1 %v11763_v35, %s10888_s15 }
 0xa2f   : > { %v3062_v60 = vpop.xlane.xlu1 %3061 }
 0xa30   : > { %9646 = vrot.lane.b32.xlu1 %v11774_v40, %s10890_s3  ;;  %v3094_v61 = vsub.f32 %v3045_v16, %v3062_v60  ;;  %v3059_v62 = vpop.xlane.xlu0 %3058 }
 0xa31   : > { %v3093_v0 = vsub.f32 %v3044_v18, %v3059_v62 }
 0xa32   : > { %v3107_v63 = vmul.f32 1.442695, %v3094_v61 }
 0xa33   : > { %v3105_v1 = vmul.f32 1.442695, %v3093_v0 }
 0xa34   : > { %9651 = vrot.lane.b32.xlu1 %v11778_v43, %s10890_s3  ;;  %9756 = vpow2.f32 %v3107_v63 }
 0xa35   : > { %9631 = vrot.lane.b32.xlu0 %v11763_v35, %s10887_s4  ;;  %9758 = vpow2.f32 %v3105_v1 }
 0xa38   : > { %9656 = vrot.lane.b32.xlu1 %v11782_v48, %s10890_s3 }
 0xa39   : > { %9641 = vrot.lane.b32.xlu0 %v11761_v34, %s10890_s3 }
 0xa3e   : > { %v11876_v40 = vpop.eup %9756 }
 0xa3f   : > { %v3132_v43 = vsel %vm3056_vm9, %v11876_v40, 0.0  ;;  %v11880_v35 = vpop.eup %9758 }
 0xa40   : > { %v3129_v48 = vsel %vm3056_vm9, %v11880_v35, 0.0 }
 0xa58   : > { %3133 = vadd.xlane.f32.xlu0 %v3132_v43 }
 0xa5c   : > { %3130 = vadd.xlane.f32.xlu1 %v3129_v48 }
 0xa98   : > { %v3068_v34 = vpop.xlane.xlu0 %3067 }
 0xa99   : > { %v3096_v2 = vsub.f32 %v3047_v22, %v3068_v34 }
 0xa9b   : > { %v3111_v3 = vmul.f32 1.442695, %v3096_v2 }
 0xa9c   : > { %v3074_v4 = vpop.xlane.xlu1 %3073  ;;  %v3065_v5 = vpop.xlane.xlu0 %3064 }
 0xa9d   : > { %9760 = vpow2.f32 %v3111_v3  ;;  %v3098_v6 = vsub.f32 %v3049_v28, %v3074_v4  ;;  %v3095_v7 = vsub.f32 %v11830_v24, %v3065_v5 }
 0xa9f   : > { %v3115_v8 = vmul.f32 1.442695, %v3098_v6  ;;  %v3109_v9 = vmul.f32 1.442695, %v3095_v7 }
 0xaa0   : > { %v3071_v10 = vpop.xlane.xlu0 %3070  ;;  %v3080_v11 = vpop.xlane.xlu1 %3079 }
 0xaa1   : > { %9762 = vpow2.f32 %v3115_v8  ;;  %v3097_v13 = vsub.f32 %v11833_v30, %v3071_v10  ;;  %v3100_v14 = vsub.f32 %v11838_v36, %v3080_v11 }
 0xaa2   : > { %9764 = vpow2.f32 %v3109_v9 }
 0xaa3   : > { %v3113_v15 = vmul.f32 1.442695, %v3097_v13  ;;  %v3119_v16 = vmul.f32 1.442695, %v3100_v14 }
 0xaa4   : > { %v3086_v17 = vpop.xlane.xlu1 %3085  ;;  %v3077_v18 = vpop.xlane.xlu0 %3076 }
 0xaa5   : > { %9766 = vpow2.f32 %v3113_v15  ;;  %v3102_v19 = vsub.f32 %v11846_v46, %v3086_v17  ;;  %v3099_v20 = vsub.f32 %v11840_v38, %v3077_v18 }
 0xaa6   : > { %9768 = vpow2.f32 %v3119_v16 }
 0xaa7   : > { %v11889_v21 = vpop.eup %9760  ;;  %v3123_v22 = vmul.f32 1.442695, %v3102_v19  ;;  %v3117_v23 = vmul.f32 1.442695, %v3099_v20 }
 0xaa8   : > { %v3083_v24 = vpop.xlane.xlu0 %3082  ;;  %v3092_v26 = vpop.xlane.xlu1 %3091  ;;  %v3138_v27 = vsel %vm3056_vm9, %v11889_v21, 0.0 }
 0xaa9   : > { %9770 = vpow2.f32 %v3123_v22  ;;  %v3101_v28 = vsub.f32 %v11848_v49, %v3083_v24  ;;  %v3104_v29 = vsub.f32 %v11854_v53, %v3092_v26  ;;  %3139 = vadd.xlane.f32.xlu1 %v3138_v27 }
 0xaaa   : > { %9772 = vpow2.f32 %v3117_v23 }
 0xaab   : > { %v11895_v30 = vpop.eup %9762  ;;  %v3121_v31 = vmul.f32 1.442695, %v3101_v28  ;;  %v3127_v32 = vmul.f32 1.442695, %v3104_v29 }
 0xaac   : > { %v11897_v33 = vpop.eup %9764  ;;  %v9637_v36 = vpop.permute.xlu1 %9636  ;;  %v3144_v38 = vsel %vm3056_vm9, %v11895_v30, 0.0 }
 0xaad   : > { %v3089_v37 = vpop.xlane.xlu0 %3088  ;;  %9774 = vpow2.f32 %v3121_v31  ;;  %3145 = vadd.xlane.f32.xlu1 %v3144_v38  ;;  %v3135_v41 = vsel %vm3056_vm9, %v11897_v33, 0.0 }
 0xaae   : > { %v3103_v39 = vsub.f32 %v11856_v56, %v3089_v37  ;;  %9776 = vpow2.f32 %v3127_v32  ;;  %3136 = vadd.xlane.f32.xlu0 %v3135_v41 }
 0xaaf   : > { %v11904_v42 = vpop.eup %9766 }
 0xab0   : > { %v3125_v46 = vmul.f32 1.442695, %v3103_v39  ;;  %v11906_v47 = vpop.eup %9768  ;;  %v9647_v49 = vpop.permute.xlu1 %9646  ;;  %v3141_v51 = vsel %vm3056_vm9, %v11904_v42, 0.0 }
 0xab1   : > { %v9632_v50 = vpop.permute.xlu0 %9631  ;;  %v3150_v52 = vsel %vm3056_vm9, %v11906_v47, 0.0  ;;  %v9649_v63 = vunpack.i.h.bf16 %v9647_v49  ;;  %v9648_v0 = vunpack.i.l.bf16 %v9647_v49 }
 0xab2   : > { %9778 = vpow2.f32 %v3125_v46  ;;  %3151 = vadd.xlane.f32.xlu1 %v3150_v52  ;;  %3142 = vadd.xlane.f32.xlu0 %v3141_v51 }
 0xab3   : > { %v11912_v53 = vpop.eup %9770  ;;  %v8926_v5 = vpack.c.bf16 %v9649_v63, %v9648_v0 }
 0xab4   : > { %v11914_v55 = vpop.eup %9772  ;;  %v9652_v56 = vpop.permute.xlu1 %9651  ;;  %v3156_v58 = vsel %vm3056_vm9, %v11912_v53, 0.0 }
 0xab5   : > { %v9642_v57 = vpop.permute.xlu0 %9641  ;;  %v9654_v59 = vunpack.i.h.bf16 %v9652_v56  ;;  %v9653_v60 = vunpack.i.l.bf16 %v9652_v56  ;;  %v3147_v1 = vsel %vm3056_vm9, %v11914_v55, 0.0 }
 0xab6   : > { %v9644_v61 = vunpack.i.h.bf16 %v9642_v57  ;;  %v9643_v62 = vunpack.i.l.bf16 %v9642_v57  ;;  %3157 = vadd.xlane.f32.xlu1 %v3156_v58  ;;  %3148 = vadd.xlane.f32.xlu0 %v3147_v1 }
 0xab7   : > { %v11920_v43 = vpop.eup %9774  ;;  %v8930_v48 = vpack.c.bf16 %v9654_v59, %v9653_v60 }
 0xab8   : > { %v8922_v34 = vpack.c.bf16 %v9644_v61, %v9643_v62  ;;  %v11922_v2 = vpop.eup %9776  ;;  %v3153_v3 = vsel %vm3056_vm9, %v11920_v43, 0.0  ;;  %v9657_v8 = vpop.permute.xlu1 %9656 }
 0xab9   : > { %v3162_v4 = vsel %vm3056_vm9, %v11922_v2, 0.0  ;;  %8931 = vmatprep.subr.bf16.mxu0 %v8930_v48  ;;  %v9659_v14 = vunpack.i.h.bf16 %v9657_v8  ;;  %v9658_v15 = vunpack.i.l.bf16 %v9657_v8  ;;  %v2404_v8 = vld [vmem:[%s12911_s19 + $0x28] sm:$0xff] }
 0xaba   : > { %8923 = vmatprep.subr.bf16.mxu1 %v8922_v34  ;;  %8933 = vmatpush3.bf16.msra.mxu0 %v8930_v48  ;;  %v2399_v48 = vld [vmem:[%s12911_s19] sm:$0xff] }
 0xabb   : > { %8925 = vmatpush3.bf16.msra.mxu1 %v8922_v34  ;;  %3163 = vadd.xlane.f32.xlu1 %v3162_v4  ;;  %v8934_v18 = vpack.c.bf16 %v9659_v14, %v9658_v15  ;;  %v2400_v34 = vld [vmem:[%s12911_s19 + $0x8] sm:$0xff]  ;;  %v2402_v4 = vld [vmem:[%s12911_s19 + $0x18] sm:$0xff] }
 0xabc   : > { %v11928_v6 = vpop.eup %9778  ;;  %3154 = vadd.xlane.f32.xlu0 %v3153_v3  ;;  %8927 = vmatprep.subr.bf16.mxu1 %v8926_v5  ;;  %v8946_v3 = vpack.c.bf16 %v2400_v34, %v2399_v48 }
 0xabd   : > { %v3159_v7 = vsel %vm3056_vm9, %v11928_v6, 0.0 }
 0xac0   : > { %3160 = vadd.xlane.f32.xlu0 %v3159_v7  ;;  %v2403_v7 = vld [vmem:[%s12911_s19 + $0x20] sm:$0xff] }
 0xacc   : > { %9666 = vrot.lane.b32.xlu1 %v9637_v36, %s10890_s3 }
 0xad6   : > { %9661 = vrot.lane.b32.xlu0 %v9632_v50, %s10890_s3 }
 0xae5   : > { %v3134_v9 = vpop.xlane.xlu0 %3133 }
 0xae6   : > { %9780 = vrcp.f32 %v3134_v9  ;;  %v8954_v9 = vpack.c.bf16 %v2404_v8, %v2403_v7 }
 0xae9   : > { %v3131_v10 = vpop.xlane.xlu1 %3130 }
 0xaea   : > { %9782 = vrcp.f32 %v3131_v10 }
 0xaf0   : > { %v9781_v11 = vpop.eup %9780 }
 0xaf1   : > { %v3178_v17 = vmul.f32 %v9781_v11, %v11876_v40 }
 0xaf4   : > { %v9783_v13 = vpop.eup %9782 }
 0xaf5   : > { %v3177_v16 = vmul.f32 %v9783_v13, %v11880_v35 }
 0xaf7   : > { %8530 = vmatprep.mubr.msk.f32.mxu1 %vm3056_vm9, %v3177_v16 }
 0xaf8   : > { %8531 = vmatmul.mubr.msk.f32.vlgmr.msra.gmra.mrb[8].mxu1 %vm3056_vm9, %v3178_v17 }
 0xaf9   : > { %8929 = vmatpush3.bf16.msra.mxu1 %v8926_v5 }
 0xafa   : > { %8935 = vmatprep.subr.bf16.mxu1 %v8934_v18 }
 0xb36   : > { %v3140_v19 = vpop.xlane.xlu1 %3139 }
 0xb37   : > { %9784 = vrcp.f32 %v3140_v19 }
 0xb3a   : > { %v3146_v20 = vpop.xlane.xlu1 %3145 }
 0xb3b   : > { %v3137_v22 = vpop.xlane.xlu0 %3136 }
 0xb3c   : > { %9786 = vrcp.f32 %v3137_v22 }
 0xb3d   : > { %9788 = vrcp.f32 %v3146_v20 }
 0xb3f   : > { %v3152_v23 = vpop.xlane.xlu1 %3151  ;;  %v3143_v24 = vpop.xlane.xlu0 %3142 }
 0xb40   : > { %9790 = vrcp.f32 %v3143_v24 }
 0xb41   : > { %9792 = vrcp.f32 %v3152_v23  ;;  %v9785_v40 = vpop.eup %9784 }
 0xb42   : > { %v3180_v32 = vmul.f32 %v9785_v40, %v11889_v21 }
 0xb43   : > { %v3158_v26 = vpop.xlane.xlu1 %3157  ;;  %v3149_v35 = vpop.xlane.xlu0 %3148 }
 0xb44   : > { %9794 = vrcp.f32 %v3149_v35 }
 0xb45   : > { %9796 = vrcp.f32 %v3158_v26 }
 0xb46   : > { %v9787_v27 = vpop.eup %9786 }
 0xb47   : > { %v3179_v31 = vmul.f32 %v9787_v27, %v11897_v33  ;;  %v9789_v36 = vpop.eup %9788 }
 0xb48   : > { %v3164_v28 = vpop.xlane.xlu1 %3163  ;;  %v3182_v33 = vmul.f32 %v9789_v36, %v11895_v30 }
 0xb49   : > { %v3155_v29 = vpop.xlane.xlu0 %3154  ;;  %8537 = vmatprep.mubr.msk.f32.mxu1 %vm3056_vm9, %v3179_v31 }
 0xb4a   : > { %9798 = vrcp.f32 %v3155_v29  ;;  %8538 = vmatmul.mubr.msk.f32.vlgmr.msra.gmra.mrb[10].mxu1 %vm3056_vm9, %v3180_v32  ;;  %v9791_v37 = vpop.eup %9790 }
 0xb4b   : > { %9800 = vrcp.f32 %v3164_v28  ;;  %8937 = vmatpush3.bf16.msra.mxu1 %v8934_v18  ;;  %v3181_v49 = vmul.f32 %v9791_v37, %v11904_v42  ;;  %v9793_v50 = vpop.eup %9792 }
 0xb4c   : > { %v9667_v38 = vpop.permute.xlu1 %9666  ;;  %v3184_v59 = vmul.f32 %v9793_v50, %v11906_v47 }
 0xb4d   : > { %v3161_v39 = vpop.xlane.xlu0 %3160  ;;  %v9669_v41 = vunpack.i.h.bf16 %v9667_v38  ;;  %v9668_v46 = vunpack.i.l.bf16 %v9667_v38  ;;  %8544 = vmatprep.mubr.msk.f32.mxu0 %vm3056_vm9, %v3181_v49 }
 0xb4e   : > { %9802 = vrcp.f32 %v3161_v39  ;;  %v9795_v51 = vpop.eup %9794  ;;  %8545 = vmatmul.mubr.msk.f32.vlgmr.msra.gmra.mrb[12].mxu0 %vm3056_vm9, %v3182_v33  ;;  %v8089_v33 = vld [vmem:[#allocation18] ss:$0 sm:$0xff] }
 0xb4f   : > { %v8942_v21 = vpack.c.bf16 %v9669_v41, %v9668_v46  ;;  %v3183_v58 = vmul.f32 %v9795_v51, %v11914_v55  ;;  %v9797_v60 = vpop.eup %9796 }
 0xb50   : > { %v3186_v47 = vmul.f32 %v9797_v60, %v11912_v53  ;;  %v2401_v53 = vld [vmem:[%s12911_s19 + $0x10] sm:$0xff] }
 0xb51   : > { %v9662_v52 = vpop.permute.xlu0 %9661  ;;  %8943 = vmatprep.subr.bf16.mxu1 %v8942_v21  ;;  %8551 = vmatprep.mubr.msk.f32.mxu1 %vm3056_vm9, %v3183_v58  ;;  %v8950_v5 = vpack.c.bf16 %v2402_v4, %v2401_v53 }
 0xb52   : > { %v9664_v56 = vunpack.i.h.bf16 %v9662_v52  ;;  %v9663_v57 = vunpack.i.l.bf16 %v9662_v52  ;;  %8552 = vmatmul.mubr.msk.f32.vlgmr.msra.gmra.mrb[12].mxu1 %vm3056_vm9, %v3184_v59 }
 0xb53   : > { %8945 = vmatpush3.bf16.msra.mxu1 %v8942_v21 }
 0xb54   : > { %v8938_v42 = vpack.c.bf16 %v9664_v56, %v9663_v57  ;;  %v9799_v30 = vpop.eup %9798 }
 0xb55   : > { %v3185_v61 = vmul.f32 %v9799_v30, %v11920_v43  ;;  %v9801_v62 = vpop.eup %9800 }
 0xb56   : > { %8939 = vmatprep.subr.bf16.mxu0 %v8938_v42  ;;  %v3188_v0 = vmul.f32 %v9801_v62, %v11922_v2 }
 0xb57   : > { %8941 = vmatpush3.bf16.msra.mxu0 %v8938_v42  ;;  %8558 = vmatprep.mubr.msk.f32.mxu0 %vm3056_vm9, %v3185_v61 }
 0xb58   : > { %v9803_v55 = vpop.eup %9802  ;;  %8947 = vmatprep.subr.bf16.mxu0 %v8946_v3 }
 0xb59   : > { %v3187_v63 = vmul.f32 %v9803_v55, %v11928_v6 }
 0xb5a   : > { %8559 = vmatmul.mubr.msk.f32.vlgmr.msra.gmra.mrb[14].mxu0 %vm3056_vm9, %v3186_v47 }
 0xb5b   : > { %8565 = vmatprep.mubr.msk.f32.mxu1 %vm3056_vm9, %v3187_v63  ;;  %8949 = vmatpush3.bf16.msra.mxu0 %v8946_v3 }
 0xb5c   : > { %8566 = vmatmul.mubr.msk.f32.vlgmr.msra.gmra.mrb[14].mxu1 %vm3056_vm9, %v3188_v0  ;;  %8951 = vmatprep.subr.bf16.mxu0 %v8950_v5 }
 0xb5d   : > { %3990 = vmatprep.mubr.f32.mxu1 %v10883_v12 }
 0xb5f   : > { %8953 = vmatpush3.bf16.msra.mxu0 %v8950_v5 }
 0xb60   : > { %8955 = vmatprep.subr.bf16.mxu0 %v8954_v9 }
 0xb63   : > { %8957 = vmatpush3.bf16.msra.mxu0 %v8954_v9 }
 0xbcb   : > { %v8532_v1 = vpop.f32.mrb[8].mxu1 }
 0xbcc   : > { %v3267_v43 = vpop.f32.mrb[9].mxu1 }
 0xc1d   : > { %v8539_v6 = vpop.f32.mrb[10].mxu1 }
 0xc1e   : > { %3715 = vrot.lane.b32.xlu1 %v8539_v6, %s12773_s9  ;;  %v3354_v2 = vpop.f32.mrb[11].mxu1 }
 0xc1f   : > { %3713 = vrot.lane.b32.xlu0 %v3354_v2, %s12773_s9  ;;  %s12775_s9 = smov 40  }
 0xc21   : > { %v8546_v10 = vpop.f32.mrb[12].mxu0 }
 0xc22   : > { %v3441_v11 = vpop.f32.mrb[13].mxu0  ;;  %3723 = vrot.lane.b32.xlu1 %v8546_v10, %s12777_s18 }
 0xc23   : > { %3721 = vrot.lane.b32.xlu0 %v3441_v11, %s12777_s18  ;;  %s12913_s18 = sld [smem:[#allocation77_spill]] }
 0xc25   : > { %v8553_v13 = vpop.f32.mrb[12].mxu1 }
 0xc26   : > { %3731 = vrot.lane.b32.xlu1 %v8553_v13, %s12779_s16  ;;  %v3528_v14 = vpop.f32.mrb[13].mxu1 }
 0xc27   : > { %3729 = vrot.lane.b32.xlu0 %v3528_v14, %s12779_s16  ;;  %s12914_s16 = smov 80  }
 0xc2d   : > { %v8560_v15 = vpop.f32.mrb[14].mxu0 }
 0xc2e   : > { %3739 = vrot.lane.b32.xlu1 %v8560_v15, %s10890_s3  ;;  %v3615_v16 = vpop.f32.mrb[15].mxu0 }
 0xc2f   : > { %v8567_v17 = vpop.f32.mrb[14].mxu1  ;;  %3737 = vrot.lane.b32.xlu0 %v3615_v16, %s10890_s3 }
 0xc30   : > { %v3702_v18 = vpop.f32.mrb[15].mxu1 }
 0xc32   : > { %3747 = vrot.lane.b32.xlu1 %v8567_v17, %s12775_s9 }
 0xc33   : > { %3745 = vrot.lane.b32.xlu0 %v3702_v18, %s12775_s9  ;;  %s12912_s9 = sld [smem:[#allocation75_spill]] }
 0xc39   : > { %v3897_v0 = vld [vmem:[%s12912_s9 + $0x8] sm:$0xff]  ;;  %v3896_v48 = vld [vmem:[%s12912_s9] sm:$0xff]  ;;  %v3898_v34 = vld [vmem:[%s12912_s9 + $0x10] sm:$0xff] }
 0xc3a   : > { %v8960_v3 = vpack.c.bf16 %v3898_v34, %v3896_v48  ;;  %v3901_v53 = vld [vmem:[%s12912_s9 + $0x28] sm:$0xff]  ;;  %v3903_v4 = vld [vmem:[%s12912_s9 + $0x38] sm:$0xff]  ;;  %v3900_v6 = vld [vmem:[%s12912_s9 + $0x20] sm:$0xff]  ;;  %v3910_v48 = vlaneseq }
 0xc3b   : > { %v8962_v5 = vpack.c.bf16 %v3903_v4, %v3901_v53  ;;  %v3902_v2 = vld [vmem:[%s12912_s9 + $0x30] sm:$0xff]  ;;  %v3905_v8 = vld [vmem:[%s12912_s9 + $0x48] sm:$0xff]  ;;  %v3907_v9 = vld [vmem:[%s12912_s9 + $0x58] sm:$0xff] }
 0xc3c   : > { %v8964_v7 = vpack.c.bf16 %v3902_v2, %v3900_v6  ;;  %v3904_v10 = vld [vmem:[%s12912_s9 + $0x40] sm:$0xff]  ;;  %v8966_v11 = vpack.c.bf16 %v3907_v9, %v3905_v8  ;;  %v3906_v13 = vld [vmem:[%s12912_s9 + $0x50] sm:$0xff]  ;;  %v12044_v34 = vshrl.u32 %v3910_v48, 7 }
 0xc3d   : > { %v8968_v14 = vpack.c.bf16 %v3906_v13, %v3904_v10  ;;  %v3908_v53 = vld [vmem:[#allocation23] sm:$0x3] }
 0xc3e   : > { %v3916_v4 = vsub.s32 1, %v12044_v34 }
 0xc40   : > { %v3917_v6 = vrot.slane %v3908_v53, %v3916_v4 }
 0xc90   : > { %v3716_v19 = vpop.permute.xlu1 %3715 }
 0xc91   : > { %v3714_v20 = vpop.permute.xlu0 %3713  ;;  %v3752_v28 = vsel %vm2525_vm7, %v8532_v1, %v3716_v19  ;;  %v3899_v1 = vld [vmem:[%s12912_s9 + $0x18] sm:$0xff] }
 0xc92   : > { %v3751_v27 = vsel %vm2525_vm7, %v3267_v43, %v3714_v20  ;;  %v8958_v43 = vpack.c.bf16 %v3899_v1, %v3897_v0  ;;  %v4127_v0 = vld [vmem:[%s12913_s18 + $0x80] sm:$0xff]  ;;  %v4128_v1 = vld [vmem:[%s12913_s18 + $0x88] sm:$0xff] }
 0xc94   : > { %v3724_v22 = vpop.permute.xlu1 %3723  ;;  %8959 = vmatprep.subr.bf16.mxu1 %v8958_v43  ;;  %v8995_v43 = vpack.c.bf16 %v4128_v1, %v4127_v0 }
 0xc95   : > { %v3722_v23 = vpop.permute.xlu0 %3721  ;;  %v3754_v31 = vsel %vm3056_vm9, %v3752_v28, %v3724_v22  ;;  %8961 = vmatpush1.bf16.msra.mxu1 %v8960_v3  ;;  %v12047_v3 = vsub.s32 0, %v12044_v34 }
 0xc96   : > { %v3753_v29 = vsel %vm3056_vm9, %v3751_v27, %v3722_v23  ;;  %8963 = vmatprep.subr.bf16.mxu1 %v8962_v5  ;;  %v8092_v23 = vld [vmem:[#allocation20] ss:$0 sm:$0xff] }
 0xc97   : > { %v3913_v5 = vrot.slane %v3908_v53, %v12047_v3 }
 0xc98   : > { %v3732_v24 = vpop.permute.xlu1 %3731 }
 0xc99   : > { %v3730_v26 = vpop.permute.xlu0 %3729  ;;  %v3757_v37 = vsel %vm3755_vm10, %v3754_v31, %v3732_v24  ;;  %8965 = vmatpush1.bf16.msra.mxu1 %v8964_v7 }
 0xc9a   : > { %v3756_v32 = vsel %vm3755_vm10, %v3753_v29, %v3730_v26  ;;  %8967 = vmatprep.subr.bf16.mxu1 %v8966_v11  ;;  %v8093_v26 = vld [vmem:[#allocation21] ss:$0 sm:$0xff] }
 0xc9d   : > { %8969 = vmatpush1.bf16.msra.mxu1 %v8968_v14 }
 0xca0   : > { %v3740_v35 = vpop.permute.xlu1 %3739 }
 0xca1   : > { %v3738_v40 = vpop.permute.xlu0 %3737  ;;  %v3759_v41 = vsel %vm2058_vm0, %v3757_v37, %v3740_v35 }
 0xca2   : > { %v3758_v38 = vsel %vm2058_vm0, %v3756_v32, %v3738_v40  ;;  %v4111_v32 = vld [vmem:[%s12913_s18] sm:$0xff] }
 0xca4   : > { %v3748_v36 = vpop.permute.xlu1 %3747 }
 0xca5   : > { %v3746_v39 = vpop.permute.xlu0 %3745  ;;  %v3762_v49 = vsel %vm3760_vm11, %v3759_v41, %v3748_v36  ;;  %v4112_v36 = vld [vmem:[%s12913_s18 + $0x8] sm:$0xff]  ;;  %v4114_v41 = vld [vmem:[%s12913_s18 + $0x18] sm:$0xff] }
 0xca6   : > { %v3761_v46 = vsel %vm3760_vm11, %v3758_v38, %v3746_v39  ;;  %v8971_v37 = vpack.c.bf16 %v4112_v36, %v4111_v32  ;;  %v10895_v38 = vmov 0.0|0.0   ;;  %v4113_v39 = vld [vmem:[%s12913_s18 + $0x10] sm:$0xff] }
 0xca7   : > { %8580 = vmatprep.mubr.msk.f32.mxu0 %vm2250_vm4, %v3761_v46  ;;  %8970 = vmatprep.subr.bf16.mxu0 %v10895_v38  ;;  %v8974_v46 = vpack.c.bf16 %v4114_v41, %v4113_v39 }
 0xca8   : > { %8581 = vmatmul.mubr.msk.f32.vlgmr.msra.gmra.mrb[16].mxu0 %vm2250_vm4, %v3762_v49  ;;  %v4115_v49 = vld [vmem:[%s12913_s18 + $0x20] sm:$0xff] }
 0xca9   : > { %8972 = vmatpush1.bf16.msra.mxu0 %v8971_v37 }
 0xcaa   : > { %8973 = vmatprep.subr.bf16.mxu0 %v10895_v38 }
 0xcad   : > { %8975 = vmatpush1.bf16.msra.mxu0 %v8974_v46 }
 0xcae   : > { %8976 = vmatprep.subr.bf16.mxu0 %v10895_v38 }
 0xd7b   : > { %v8582_v50 = vpop.f32.mrb[16].mxu0 }
 0xd7c   : > { %v3847_v21 = vadd.f32 %v8582_v50, %v8089_v33  ;;  %v3841_v51 = vpop.f32.mrb[17].mxu0 }
 0xd7d   : > { %v3842_v52 = vadd.f32 %v8089_v33, %v3841_v51  ;;  %v4116_v33 = vld [vmem:[%s12913_s18 + $0x28] sm:$0xff]  ;;  %v4118_v51 = vld [vmem:[%s12913_s18 + $0x38] sm:$0xff] }
 0xd7e   : > { %v11988_v56 = vadd.f32 %v3847_v21, %v11728_v44  ;;  %v8977_v50 = vpack.c.bf16 %v4116_v33, %v4115_v49  ;;  %v4117_v21 = vld [vmem:[%s12913_s18 + $0x30] sm:$0xff] }
 0xd7f   : > { %v11991_v57 = vadd.f32 %v3842_v52, %v11730_v45  ;;  %v8980_v52 = vpack.c.bf16 %v4118_v51, %v4117_v21 }
 0xd80   : > { %v3857_v58 = vsel %vm2250_vm4, %v11988_v56, 0.0  ;;  %8978 = vmatpush1.bf16.msra.mxu0 %v8977_v50 }
 0xd81   : > { %3858 = vadd.xlane.f32.xlu1 %v3857_v58  ;;  %v3854_v59 = vsel %vm2250_vm4, %v11991_v57, 0.0  ;;  %8979 = vmatprep.subr.bf16.mxu0 %v10895_v38  ;;  %v4119_v58 = vld [vmem:[%s12913_s18 + $0x40] sm:$0xff] }
 0xd82   : > { %3855 = vadd.xlane.f32.xlu0 %v3854_v59  ;;  %v4120_v59 = vld [vmem:[%s12913_s18 + $0x48] sm:$0xff] }
 0xd84   : > { %8981 = vmatpush1.bf16.msra.mxu0 %v8980_v52 }
 0xd85   : > { %8982 = vmatprep.subr.bf16.mxu0 %v10895_v38 }
 0xe0e   : > { %v3859_v60 = vpop.xlane.xlu1 %3858 }
 0xe0f   : > { %v3861_v42 = vmul.f32 0.020833334, %v3859_v60  ;;  %v3856_v30 = vpop.xlane.xlu0 %3855  ;;  %v8983_v60 = vpack.c.bf16 %v4120_v59, %v4119_v58 }
 0xe10   : > { %v3860_v44 = vmul.f32 0.020833334, %v3856_v30  ;;  %v4122_v30 = vld [vmem:[%s12913_s18 + $0x58] sm:$0xff] }
 0xe11   : > { %v3863_v61 = vsub.f32 %v11988_v56, %v3861_v42  ;;  %8984 = vmatpush1.bf16.msra.mxu0 %v8983_v60  ;;  %v4121_v42 = vld [vmem:[%s12913_s18 + $0x50] sm:$0xff] }
 0xe12   : > { %v3862_v45 = vsub.f32 %v11991_v57, %v3860_v44  ;;  %8985 = vmatprep.subr.bf16.mxu0 %v10895_v38  ;;  %v8986_v44 = vpack.c.bf16 %v4122_v30, %v4121_v42 }
 0xe13   : > { %v3865_v47 = vmul.f32 %v3863_v61, %v3863_v61 }
 0xe14   : > { %v3864_v62 = vmul.f32 %v3862_v45, %v3862_v45 }
 0xe15   : > { %v3869_v63 = vsel %vm2250_vm4, %v3865_v47, 0.0  ;;  %8987 = vmatpush1.bf16.msra.mxu0 %v8986_v44  ;;  %v4126_v47 = vld [vmem:[%s12913_s18 + $0x78] sm:$0xff] }
 0xe16   : > { %v3866_v55 = vsel %vm2250_vm4, %v3864_v62, 0.0  ;;  %8988 = vmatprep.subr.bf16.mxu0 %v10895_v38 }
 0xe17   : > { %3867 = vadd.xlane.f32.xlu0 %v3866_v55  ;;  %v4125_v55 = vld [vmem:[%s12913_s18 + $0x70] sm:$0xff] }
 0xe1b   : > { %3870 = vadd.xlane.f32.xlu0 %v3869_v63  ;;  %v8992_v63 = vpack.c.bf16 %v4126_v47, %v4125_v55 }
 0xea4   : > { %v3868_v15 = vpop.xlane.xlu0 %3867 }
 0xea5   : > { %v3872_v16 = vmul.f32 0.020833334, %v3868_v15 }
 0xea7   : > { %v3874_v17 = vadd.f32 1e-05, %v3872_v16 }
 0xea8   : > { %v3871_v18 = vpop.xlane.xlu0 %3870 }
 0xea9   : > { %9804 = vrsqrt.f32 %v3874_v17  ;;  %v3873_v19 = vmul.f32 0.020833334, %v3871_v18 }
 0xeab   : > { %v3875_v20 = vadd.f32 1e-05, %v3873_v19 }
 0xead   : > { %9806 = vrsqrt.f32 %v3875_v20 }
 0xeb3   : > { %v9805_v22 = vpop.eup %9804 }
 0xeb4   : > { %v3878_v24 = vmul.f32 %v9805_v22, %v3862_v45  ;;  %v4124_v45 = vld [vmem:[%s12913_s18 + $0x68] sm:$0xff] }
 0xeb6   : > { %v3886_v35 = vmul.f32 %v8092_v23, %v3878_v24 }
 0xeb7   : > { %v9807_v40 = vpop.eup %9806 }
 0xeb8   : > { %v3894_v27 = vadd.f32 %v8093_v26, %v3886_v35  ;;  %v3879_v28 = vmul.f32 %v9807_v40, %v3863_v61  ;;  %v4123_v61 = vld [vmem:[%s12913_s18 + $0x60] sm:$0xff] }
 0xeb9   : > { %v8989_v62 = vpack.c.bf16 %v4124_v45, %v4123_v61 }
 0xeba   : > { %8094 = vmatmul.mubr.msk.f32.vlgmr.msra.gmra.mrb[16].mxu1 %vm2250_vm4, %v3894_v27  ;;  %v3887_v29 = vmul.f32 %v8092_v23, %v3879_v28 }
 0xebb   : > { %3996 = vmatprep.mubr.f32.mxu1 %v10883_v12  ;;  %8990 = vmatpush1.bf16.msra.mxu0 %v8989_v62 }
 0xebc   : > { %v3895_v31 = vadd.f32 %v8093_v26, %v3887_v29  ;;  %8991 = vmatprep.subr.bf16.mxu0 %v10895_v38 }
 0xebe   : > { %8095 = vmatmul.mubr.msk.f32.gmra.mrb[18].mxu1 %vm2250_vm4, %v3895_v31 }
 0xebf   : > { %4359 = vmatprep.mubr.f32.mxu1 %v10883_v12  ;;  %8993 = vmatpush1.bf16.msra.mxu0 %v8992_v63 }
 0xec0   : > { %8994 = vmatprep.subr.bf16.mxu0 %v10895_v38 }
 0xec3   : > { %8996 = vmatpush1.bf16.msra.mxu0 %v8995_v43 }
 0xf8d   : > { %v3992_v2 = vpop.f32.mrb[16].mxu1 }
 0xf8e   : > { %v12053_v7 = vadd.f32 %v3992_v2, %v3913_v5  ;;  %v3994_v8 = vpop.f32.mrb[17].mxu1 }
 0xf8f   : > { %v12055_v9 = vadd.f32 %v3994_v8, %v3917_v6 }
 0xf90   : > { %v12058_v10 = vmul.f32 0.70710677, %v12053_v7 }
 0xf91   : > { %v12061_v11 = vmul.f32 0.70710677, %v12055_v9  ;;  %v3998_v13 = vpop.f32.mrb[18].mxu1 }
 0xf92   : > { %v4019_v14 = vand.u32 2147483647, %v12058_v10  ;;  %v12064_v15 = vadd.f32 %v3998_v13, %v3913_v5  ;;  %v4000_v16 = vpop.f32.mrb[19].mxu1  ;;  %vm4011_vm12 = vcmp.ge.f32.partialorder %v12058_v10, 0.0 }
 0xf93   : > { %v4020_v17 = vand.u32 2147483647, %v12061_v11  ;;  %v12067_v18 = vadd.f32 %v4000_v16, %v3917_v6  ;;  %vm4012_vm13 = vcmp.ge.f32.partialorder %v12061_v11, 0.0 }
 0xf94   : > { %v4023_v19 = vmul.f32 0.3275911, %v4019_v14  ;;  %v12070_v22 = vmul.f32 0.70710677, %v12064_v15  ;;  %v4075_v31 = vsub.f32 0.0, %v4019_v14 }
 0xf95   : > { %v4024_v20 = vmul.f32 0.3275911, %v4020_v17  ;;  %v12073_v24 = vmul.f32 0.70710677, %v12067_v18  ;;  %v4076_v36 = vsub.f32 0.0, %v4020_v17 }
 0xf96   : > { %v4027_v23 = vadd.f32 1.0, %v4023_v19  ;;  %v4021_v35 = vand.u32 2147483647, %v12070_v22  ;;  %v4079_v39 = vmul.f32 %v4075_v31, %v4019_v14  ;;  %vm4013_vm14 = vcmp.ge.f32.partialorder %v12070_v22, 0.0 }
 0xf97   : > { %v4028_v26 = vadd.f32 1.0, %v4024_v20  ;;  %v4022_v27 = vand.u32 2147483647, %v12073_v24  ;;  %v4080_v49 = vmul.f32 %v4076_v36, %v4020_v17  ;;  %vm4014_vm15 = vcmp.ge.f32.partialorder %v12073_v24, 0.0 }
 0xf98   : > { %9808 = vrcp.f32 %v4027_v23  ;;  %v4025_v40 = vmul.f32 0.3275911, %v4021_v35  ;;  %v4077_v33 = vsub.f32 0.0, %v4021_v35  ;;  %v4083_v51 = vmul.f32 1.442695, %v4079_v39 }
 0xf99   : > { %9810 = vrcp.f32 %v4028_v26  ;;  %v4026_v29 = vmul.f32 0.3275911, %v4022_v27  ;;  %v4078_v58 = vsub.f32 0.0, %v4022_v27  ;;  %v4085_v42 = vmul.f32 1.442695, %v4080_v49 }
 0xf9a   : > { %v4029_v28 = vadd.f32 1.0, %v4025_v40  ;;  %v4081_v30 = vmul.f32 %v4077_v33, %v4021_v35  ;;  %v4018_v22 = vsel %vm4014_vm15, 1.0, %v10882_v25 }
 0xf9b   : > { %v4030_v32 = vadd.f32 1.0, %v4026_v29  ;;  %v4082_v47 = vmul.f32 %v4078_v58, %v4022_v27 }
 0xf9c   : > { %9812 = vrcp.f32 %v4029_v28  ;;  %v4087_v1 = vmul.f32 1.442695, %v4081_v30 }
 0xf9d   : > { %9814 = vrcp.f32 %v4030_v32  ;;  %v4089_v8 = vmul.f32 1.442695, %v4082_v47  ;;  %v4003_v47 = vmul.f32 0.5, %v12053_v7  ;;  %v4005_v7 = vmul.f32 0.5, %v12064_v15 }
 0xf9e   : > { %9816 = vpow2.f32 %v4083_v51 }
 0xf9f   : > { %9818 = vpow2.f32 %v4085_v42 }
 0xfa0   : > { %9820 = vpow2.f32 %v4087_v1 }
 0xfa1   : > { %9822 = vpow2.f32 %v4089_v8  ;;  %v8098_v8 = vld [vmem:[#allocation24] ss:$0 sm:$0xff] }
 0xfa2   : > { %v9809_v37 = vpop.eup %9808 }
 0xfa3   : > { %v9811_v41 = vpop.eup %9810  ;;  %v4039_v46 = vmul.f32 1.0614054, %v9809_v37 }
 0xfa4   : > { %v4040_v50 = vmul.f32 1.0614054, %v9811_v41 }
 0xfa5   : > { %v4043_v21 = vadd.f32 -1.4531521, %v4039_v46 }
 0xfa6   : > { %v4044_v52 = vadd.f32 -1.4531521, %v4040_v50  ;;  %v9813_v59 = vpop.eup %9812 }
 0xfa7   : > { %v4047_v60 = vmul.f32 %v9809_v37, %v4043_v21  ;;  %v4041_v61 = vmul.f32 1.0614054, %v9813_v59  ;;  %v9815_v62 = vpop.eup %9814  ;;  %v4015_v21 = vsel %vm4011_vm12, 1.0, %v10882_v25 }
 0xfa8   : > { %v4048_v44 = vmul.f32 %v9811_v41, %v4044_v52  ;;  %v4042_v43 = vmul.f32 1.0614054, %v9815_v62  ;;  %v9817_v28 = vpop.eup %9816 }
 0xfa9   : > { %v4051_v45 = vadd.f32 1.4214138, %v4047_v60  ;;  %v4045_v63 = vadd.f32 -1.4531521, %v4041_v61  ;;  %v9819_v32 = vpop.eup %9818  ;;  %v4004_v61 = vmul.f32 0.5, %v12055_v9 }
 0xfaa   : > { %v4052_v55 = vadd.f32 1.4214138, %v4048_v44  ;;  %v4046_v6 = vadd.f32 -1.4531521, %v4042_v43 }
 0xfab   : > { %v4055_v0 = vmul.f32 %v9809_v37, %v4051_v45  ;;  %v4049_v53 = vmul.f32 %v9813_v59, %v4045_v63 }
 0xfac   : > { %v4056_v48 = vmul.f32 %v9811_v41, %v4052_v55  ;;  %v4050_v16 = vmul.f32 %v9815_v62, %v4046_v6 }
 0xfad   : > { %v4059_v5 = vadd.f32 -0.28449672, %v4055_v0  ;;  %v4053_v13 = vadd.f32 1.4214138, %v4049_v53  ;;  %v4006_v53 = vmul.f32 0.5, %v12067_v18 }
 0xfae   : > { %v4060_v2 = vadd.f32 -0.28449672, %v4056_v48  ;;  %v4054_v23 = vadd.f32 1.4214138, %v4050_v16 }
 0xfaf   : > { %v4063_v14 = vmul.f32 %v9809_v37, %v4059_v5  ;;  %v4057_v19 = vmul.f32 %v9813_v59, %v4053_v13 }
 0xfb0   : > { %v4064_v17 = vmul.f32 %v9811_v41, %v4060_v2  ;;  %v4058_v27 = vmul.f32 %v9815_v62, %v4054_v23 }
 0xfb1   : > { %v4067_v20 = vadd.f32 0.2548296, %v4063_v14  ;;  %v4061_v35 = vadd.f32 -0.28449672, %v4057_v19 }
 0xfb2   : > { %v4068_v26 = vadd.f32 0.2548296, %v4064_v17  ;;  %v4062_v39 = vadd.f32 -0.28449672, %v4058_v27 }
 0xfb3   : > { %v4071_v40 = vmul.f32 %v9809_v37, %v4067_v20  ;;  %v4065_v31 = vmul.f32 %v9813_v59, %v4061_v35  ;;  %v9821_v37 = vpop.eup %9820 }
 0xfb4   : > { %v4072_v29 = vmul.f32 %v9811_v41, %v4068_v26  ;;  %v4066_v50 = vmul.f32 %v9815_v62, %v4062_v39  ;;  %v4016_v41 = vsel %vm4012_vm13, 1.0, %v10882_v25  ;;  %v9823_v11 = vpop.eup %9822  ;;  %v8104_v39 = vld [vmem:[%s12908_s14 + $0x78] sm:$0xff] }
 0xfb5   : > { %v4091_v36 = vmul.f32 %v9817_v28, %v4071_v40  ;;  %v4069_v49 = vadd.f32 0.2548296, %v4065_v31 }
 0xfb6   : > { %v4092_v46 = vmul.f32 %v9819_v32, %v4072_v29  ;;  %v4070_v60 = vadd.f32 0.2548296, %v4066_v50 }
 0xfb7   : > { %v4095_v33 = vsub.f32 1.0, %v4091_v36  ;;  %v4073_v52 = vmul.f32 %v9813_v59, %v4069_v49  ;;  %v4017_v59 = vsel %vm4013_vm14, 1.0, %v10882_v25  ;;  %v8102_v36 = vld [vmem:[%s12908_s14 + $0x68] sm:$0xff]  ;;  %v8101_v49 = vld [vmem:[%s12908_s14 + $0x60] sm:$0xff] }
 0xfb8   : > { %v4096_v51 = vsub.f32 1.0, %v4092_v46  ;;  %v4074_v44 = vmul.f32 %v9815_v62, %v4070_v60  ;;  %v8997_v46 = vpack.c.bf16 %v8104_v39, %v8102_v36  ;;  %v8110_v60 = vld [vmem:[%s12908_s14 + $0xa8] sm:$0xff] }
 0xfb9   : > { %v4099_v58 = vmul.f32 %v4095_v33, %v4015_v21  ;;  %v4093_v10 = vmul.f32 %v9821_v37, %v4073_v52  ;;  %v8103_v33 = vld [vmem:[%s12908_s14 + $0x70] sm:$0xff]  ;;  %v8106_v21 = vld [vmem:[%s12908_s14 + $0x88] sm:$0xff]  ;;  %v8105_v37 = vld [vmem:[%s12908_s14 + $0x80] sm:$0xff] }
 0xfba   : > { %v4100_v42 = vmul.f32 %v4096_v51, %v4016_v41  ;;  %v4094_v63 = vmul.f32 %v9823_v11, %v4074_v44  ;;  %v8999_v50 = vpack.c.bf16 %v8103_v33, %v8101_v49  ;;  %8998 = vmatprep.subr.bf16.mxu1 %v8997_v46  ;;  %v8108_v51 = vld [vmem:[%s12908_s14 + $0x98] sm:$0xff]  ;;  %v8111_v44 = vld [vmem:[%s12908_s14 + $0xb0] sm:$0xff] }
 0xfbb   : > { %v4103_v30 = vadd.f32 1.0, %v4099_v58  ;;  %v4097_v55 = vsub.f32 1.0, %v4093_v10  ;;  %v9001_v52 = vpack.c.bf16 %v8108_v51, %v8106_v21  ;;  %v8107_v58 = vld [vmem:[%s12908_s14 + $0x90] sm:$0xff] }
 0xfbc   : > { %v4104_v45 = vadd.f32 1.0, %v4100_v42  ;;  %v4098_v48 = vsub.f32 1.0, %v4094_v63  ;;  %9000 = vmatpush1.bf16.msra.mxu1 %v8999_v50  ;;  %v9003_v41 = vpack.c.bf16 %v8107_v58, %v8105_v37  ;;  %v8112_v42 = vld [vmem:[%s12908_s14 + $0xb8] sm:$0xff] }
 0xfbd   : > { %v4101_v1 = vmul.f32 %v4097_v55, %v4017_v59  ;;  %v4107_v43 = vmul.f32 %v4103_v30, %v4003_v47  ;;  %9002 = vmatprep.subr.bf16.mxu1 %v9001_v52  ;;  %v9005_v10 = vpack.c.bf16 %v8112_v42, %v8110_v60  ;;  %v8109_v30 = vld [vmem:[%s12908_s14 + $0xa0] sm:$0xff] }
 0xfbe   : > { %v4108_v0 = vmul.f32 %v4104_v45, %v4004_v61  ;;  %v4102_v62 = vmul.f32 %v4098_v48, %v4018_v22  ;;  %v9007_v11 = vpack.c.bf16 %v8111_v44, %v8109_v30  ;;  %v8100_v48 = vld [vmem:[#allocation17 + $0x1] ss:$0 sm:$0xff] }
 0xfbf   : > { %v4105_v9 = vadd.f32 1.0, %v4101_v1  ;;  %v8099_v1 = vld [vmem:[#allocation15 + $0x1] ss:$0 sm:$0xff] }
 0xfc0   : > { %8096 = vmatprep.mubr.msk.f32.mxu0 %vm3056_vm9, %v4108_v0  ;;  %v4106_v5 = vadd.f32 1.0, %v4102_v62  ;;  %9004 = vmatpush1.bf16.msra.mxu1 %v9003_v41 }
 0xfc1   : > { %4200 = vmatmul.mubr.f32.vlgmr.msra.gmra.mrb[18].mxu0 %v4107_v43  ;;  %v4109_v2 = vmul.f32 %v4105_v9, %v4005_v7  ;;  %9006 = vmatprep.subr.bf16.mxu1 %v9005_v10 }
 0xfc2   : > { %v4110_v6 = vmul.f32 %v4106_v5, %v4006_v53 }
 0xfc4   : > { %8097 = vmatprep.mubr.msk.f32.mxu0 %vm3056_vm9, %v4110_v6  ;;  %9008 = vmatpush1.bf16.msra.mxu1 %v9007_v11 }
 0xfc5   : > { %4205 = vmatmul.mubr.f32.gmra.mrb[20].mxu0 %v4109_v2 }
0x1094   : > { %v4201_v24 = vpop.f32.mrb[18].mxu0 }
0x1095   : > { %v4210_v13 = vadd.f32 %v4201_v24, %v11991_v57  ;;  %v4203_v14 = vpop.f32.mrb[19].mxu0 }
0x1097   : > { %v12092_v16 = vadd.f32 %v8098_v8, %v4210_v13 }
0x1098   : > { %v4206_v18 = vpop.f32.mrb[20].mxu0 }
0x1099   : > { %v4225_v17 = vsel %vm2250_vm4, %v12092_v16, 0.0  ;;  %v4211_v19 = vadd.f32 %v4206_v18, %v11988_v56  ;;  %v4208_v15 = vpop.f32.mrb[21].mxu0 }
0x109a   : > { %4226 = vadd.xlane.f32.xlu0 %v4225_v17 }
0x109b   : > { %v12097_v20 = vadd.f32 %v8098_v8, %v4211_v19 }
0x109d   : > { %v4228_v23 = vsel %vm2250_vm4, %v12097_v20, 0.0 }
0x109e   : > { %4229 = vadd.xlane.f32.xlu1 %v4228_v23 }
0x1127   : > { %v4227_v57 = vpop.xlane.xlu0 %4226 }
0x1128   : > { %v4231_v26 = vmul.f32 0.020833334, %v4227_v57 }
0x112a   : > { %v4233_v35 = vsub.f32 %v12092_v16, %v4231_v26 }
0x112b   : > { %v4230_v27 = vpop.xlane.xlu1 %4229 }
0x112c   : > { %v4235_v40 = vmul.f32 %v4233_v35, %v4233_v35  ;;  %v4232_v28 = vmul.f32 0.020833334, %v4230_v27 }
0x112e   : > { %v4237_v56 = vsel %vm2250_vm4, %v4235_v40, 0.0  ;;  %v4234_v29 = vsub.f32 %v12097_v20, %v4232_v28 }
0x112f   : > { %4238 = vadd.xlane.f32.xlu0 %v4237_v56 }
0x1130   : > { %v4236_v31 = vmul.f32 %v4234_v29, %v4234_v29 }
0x1132   : > { %v4240_v32 = vsel %vm2250_vm4, %v4236_v31, 0.0 }
0x1133   : > { %4241 = vadd.xlane.f32.xlu1 %v4240_v32 }
0x11bc   : > { %v4239_v61 = vpop.xlane.xlu0 %4238 }
0x11bd   : > { %v4243_v45 = vmul.f32 0.020833334, %v4239_v61 }
0x11bf   : > { %v4245_v55 = vadd.f32 1e-05, %v4243_v45 }
0x11c0   : > { %v4242_v47 = vpop.xlane.xlu1 %4241 }
0x11c1   : > { %9824 = vrsqrt.f32 %v4245_v55  ;;  %v4244_v59 = vmul.f32 0.020833334, %v4242_v47 }
0x11c3   : > { %v4246_v63 = vadd.f32 1e-05, %v4244_v59 }
0x11c5   : > { %9826 = vrsqrt.f32 %v4246_v63 }
0x11cb   : > { %v9825_v0 = vpop.eup %9824 }
0x11cc   : > { %v4249_v43 = vmul.f32 %v9825_v0, %v4233_v35 }
0x11ce   : > { %v4257_v22 = vmul.f32 %v8099_v1, %v4249_v43 }
0x11cf   : > { %v9827_v9 = vpop.eup %9826 }
0x11d0   : > { %v4265_v62 = vadd.f32 %v8100_v48, %v4257_v22  ;;  %v4250_v53 = vmul.f32 %v9827_v9, %v4234_v29 }
0x11d2   : > { %8119 = vmatmul.mubr.msk.f32.vlgmr.msra.gmra.mrb[20].mxu1 %vm2250_vm4, %v4265_v62  ;;  %v4258_v5 = vmul.f32 %v8099_v1, %v4250_v53 }
0x11d3   : > { %4365 = vmatprep.mubr.f32.mxu1 %v10883_v12 }
0x11d4   : > { %v4266_v7 = vadd.f32 %v8100_v48, %v4258_v5 }
0x11d6   : > { %8120 = vmatmul.mubr.msk.f32.gmra.mrb[22].mxu1 %vm2250_vm4, %v4266_v7 }
0x12a5   : > { %v4361_v6 = vpop.f32.mrb[20].mxu1 }
0x12a6   : > { %4374 = vrot.lane.b32.xlu0 %v4361_v6, %s10885_s23  ;;  %v4363_v2 = vpop.f32.mrb[21].mxu1  ;;  %8587 = vmatprep.mubr.msk.f32.mxu1 %vm2525_vm7, %v4361_v6 }
0x12a9   : > { %v4367_v24 = vpop.f32.mrb[22].mxu1 }
0x12aa   : > { %4382 = vrot.lane.b32.xlu0 %v4361_v6, %s10886_s8  ;;  %4376 = vrot.lane.b32.xlu1 %v4367_v24, %s10885_s23  ;;  %v4369_v8 = vpop.f32.mrb[23].mxu1  ;;  %v12124_v13 = vpack.i.bf16 %v4367_v24, %v4361_v6  ;;  %s12916_s23 = smov 24  }
0x12ab   : > { %v12126_v14 = vpack.i.bf16 %v4369_v8, %v4363_v2 }
0x12ae   : > { %4386 = vrot.lane.b32.xlu0 %v4361_v6, %s10887_s4  ;;  %4378 = vrot.lane.b32.xlu1 %v4361_v6, %s10884_s20 }
0x12b2   : > { %4390 = vrot.lane.b32.xlu0 %v4361_v6, %s10888_s15  ;;  %4380 = vrot.lane.b32.xlu1 %v4367_v24, %s10884_s20  ;;  %s12915_s20 = smov 8  }
0x12b6   : > { %9671 = vrot.lane.b32.xlu0 %v12124_v13, %s12914_s16  ;;  %4384 = vrot.lane.b32.xlu1 %v4367_v24, %s10886_s8  ;;  %s12917_s8 = smov 16  }
0x12ba   : > { %4388 = vrot.lane.b32.xlu1 %v4367_v24, %s10887_s4 }
0x12be   : > { %4392 = vrot.lane.b32.xlu1 %v4367_v24, %s10888_s15 }
0x1318   : > { %v4375_v17 = vpop.permute.xlu0 %4374 }
0x131c   : > { %v4383_v18 = vpop.permute.xlu0 %4382  ;;  %v4377_v19 = vpop.permute.xlu1 %4376 }
0x131d   : > { %8608 = vmatprep.mubr.msk.f32.mxu0 %vm2525_vm7, %v4383_v18  ;;  %v12138_v15 = vpack.i.bf16 %v4377_v19, %v4375_v17 }
0x131f   : > { %9676 = vrot.lane.b32.xlu1 %v12138_v15, %s12914_s16 }
0x1320   : > { %v4387_v23 = vpop.permute.xlu0 %4386  ;;  %v4379_v57 = vpop.permute.xlu1 %4378 }
0x1324   : > { %v4391_v26 = vpop.permute.xlu0 %4390  ;;  %v4381_v35 = vpop.permute.xlu1 %4380 }
0x1325   : > { %v12142_v40 = vpack.i.bf16 %v4381_v35, %v4379_v57 }
0x1327   : > { %9681 = vrot.lane.b32.xlu0 %v12142_v40, %s12914_s16 }
0x1328   : > { %v9672_v27 = vpop.permute.xlu0 %9671  ;;  %v4385_v31 = vpop.permute.xlu1 %4384 }
0x1329   : > { %v9674_v56 = vunpack.i.h.bf16 %v9672_v27  ;;  %v9673_v28 = vunpack.i.l.bf16 %v9672_v27  ;;  %v12146_v32 = vpack.i.bf16 %v4385_v31, %v4383_v18 }
0x132b   : > { %v9009_v29 = vpack.c.bf16 %v9674_v56, %v9673_v28  ;;  %9686 = vrot.lane.b32.xlu1 %v12146_v32, %s12914_s16 }
0x132c   : > { %v4389_v36 = vpop.permute.xlu1 %4388 }
0x132d   : > { %9011 = vmatprep.subr.msk.bf16.mxu1 %vm11788_vm8, %v9009_v29  ;;  %v9690_v39 = vpack.i.bf16 %v4389_v36, %v4387_v23 }
0x132e   : > { %9014 = vmatpush3.bf16.xpose.msk.msra.mxu1 %vm11788_vm8, %v9009_v29 }
0x132f   : > { %9691 = vrot.lane.b32.xlu0 %v9690_v39, %s12914_s16 }
0x1330   : > { %v4393_v46 = vpop.permute.xlu1 %4392 }
0x1331   : > { %v9695_v49 = vpack.i.bf16 %v4393_v46, %v4391_v26 }
0x1333   : > { %9696 = vrot.lane.b32.xlu1 %v9695_v49, %s12914_s16  ;;  %s8034_s16 = sshll.u32 %s11634_s21, 4 }
0x1335   : > { %8588 = vmatmul.mubr.msk.f32.vlgmr.msra.gmra.mrb[24].mxu1 %vm2525_vm7, %v4367_v24 }
0x1336   : > { %8594 = vmatprep.mubr.msk.f32.mxu1 %vm2525_vm7, %v4375_v17 }
0x1391   : > { %v9677_v33 = vpop.permute.xlu1 %9676 }
0x1392   : > { %v9679_v50 = vunpack.i.h.bf16 %v9677_v33  ;;  %v9678_v21 = vunpack.i.l.bf16 %v9677_v33 }
0x1394   : > { %v9015_v51 = vpack.c.bf16 %v9679_v50, %v9678_v21 }
0x1396   : > { %9017 = vmatprep.subr.msk.bf16.mxu1 %vm11788_vm8, %v9015_v51 }
0x1397   : > { %9020 = vmatpush3.bf16.xpose.msk.msra.mxu1 %vm11788_vm8, %v9015_v51 }
0x1399   : > { %v9682_v52 = vpop.permute.xlu0 %9681 }
0x139a   : > { %v9684_v37 = vunpack.i.h.bf16 %v9682_v52  ;;  %v9683_v58 = vunpack.i.l.bf16 %v9682_v52 }
0x139c   : > { %v9021_v41 = vpack.c.bf16 %v9684_v37, %v9683_v58 }
0x139d   : > { %v9687_v60 = vpop.permute.xlu1 %9686 }
0x139e   : > { %v9689_v42 = vunpack.i.h.bf16 %v9687_v60  ;;  %v9688_v10 = vunpack.i.l.bf16 %v9687_v60  ;;  %8595 = vmatmul.mubr.msk.f32.vlgmr.msra.gmra.mrb[26].mxu1 %vm2525_vm7, %v4377_v19  ;;  %9023 = vmatprep.subr.msk.bf16.mxu1 %vm11788_vm8, %v9021_v41 }
0x139f   : > { %9026 = vmatpush3.bf16.xpose.msk.msra.mxu1 %vm11788_vm8, %v9021_v41  ;;  %8601 = vmatprep.mubr.msk.f32.mxu1 %vm2525_vm7, %v4379_v57 }
0x13a0   : > { %v9027_v30 = vpack.c.bf16 %v9689_v42, %v9688_v10 }
0x13a1   : > { %v9692_v44 = vpop.permute.xlu0 %9691 }
0x13a2   : > { %v9694_v11 = vunpack.i.h.bf16 %v9692_v44  ;;  %v9693_v61 = vunpack.i.l.bf16 %v9692_v44  ;;  %9029 = vmatprep.subr.msk.bf16.mxu0 %vm11788_vm8, %v9027_v30 }
0x13a3   : > { %9032 = vmatpush3.bf16.xpose.msk.msra.mxu0 %vm11788_vm8, %v9027_v30 }
0x13a4   : > { %v9033_v45 = vpack.c.bf16 %v9694_v11, %v9693_v61 }
0x13a5   : > { %v9697_v55 = vpop.permute.xlu1 %9696 }
0x13a6   : > { %v9699_v47 = vunpack.i.h.bf16 %v9697_v55  ;;  %v9698_v59 = vunpack.i.l.bf16 %v9697_v55  ;;  %8602 = vmatmul.mubr.msk.f32.vlgmr.msra.gmra.mrb[28].mxu1 %vm2525_vm7, %v4381_v35  ;;  %9035 = vmatprep.subr.msk.bf16.mxu1 %vm11788_vm8, %v9033_v45 }
0x13a7   : > { %9038 = vmatpush3.bf16.xpose.msk.msra.mxu1 %vm11788_vm8, %v9033_v45  ;;  %8615 = vmatprep.mubr.msk.f32.mxu1 %vm2525_vm7, %v4387_v23 }
0x13a8   : > { %v9039_v63 = vpack.c.bf16 %v9699_v47, %v9698_v59 }
0x13aa   : > { %8609 = vmatmul.mubr.msk.f32.vlgmr.msra.gmra.mrb[22].mxu0 %vm2525_vm7, %v4385_v31  ;;  %9041 = vmatprep.subr.msk.bf16.mxu0 %vm11788_vm8, %v9039_v63 }
0x13ab   : > { %9044 = vmatpush3.bf16.xpose.msk.msra.mxu0 %vm11788_vm8, %v9039_v63  ;;  %8622 = vmatprep.mubr.msk.f32.mxu0 %vm2525_vm7, %v4391_v26 }
0x13ae   : > { %8616 = vmatmul.mubr.msk.f32.vlgmr.msra.gmra.mrb[30].mxu1 %vm2525_vm7, %v4389_v36 }
0x13b2   : > { %8623 = vmatmul.mubr.msk.f32.vlgmr.msra.gmra.mrb[24].mxu0 %vm2525_vm7, %v4393_v46 }
0x1408   : > { %v8589_v0 = vpop.f32.mrb[24].mxu1 }
0x1409   : > { %v4927_v1 = vmul.f32 0.35355338, %v8589_v0  ;;  %v4482_v43 = vpop.f32.mrb[25].mxu1 }
0x140a   : > { %v4926_v48 = vmul.f32 0.35355338, %v4482_v43 }
0x140b   : > { %v4941_v22 = vsel %vm3056_vm9, %v4927_v1, -inf }
0x140c   : > { %4942 = vmax.xlane.f32.xlu1 %v4941_v22  ;;  %v4938_v62 = vsel %vm3056_vm9, %v4926_v48, -inf }
0x140d   : > { %4939 = vmax.xlane.f32.xlu0 %v4938_v62 }
0x1471   : > { %v8596_v9 = vpop.f32.mrb[26].mxu1 }
0x1472   : > { %v4929_v53 = vmul.f32 0.35355338, %v8596_v9  ;;  %v4569_v54 = vpop.f32.mrb[27].mxu1 }
0x1473   : > { %v12188_v5 = vmul.f32 0.35355338, %v4569_v54 }
0x1474   : > { %v4947_v7 = vsel %vm3056_vm9, %v4929_v53, -inf }
0x1475   : > { %4948 = vmax.xlane.f32.xlu0 %v4947_v7  ;;  %v4944_v6 = vsel %vm3056_vm9, %v12188_v5, -inf }
0x1479   : > { %4945 = vmax.xlane.f32.xlu0 %v4944_v6  ;;  %v8603_v2 = vpop.f32.mrb[28].mxu1 }
0x147a   : > { %v4656_v24 = vpop.f32.mrb[29].mxu1  ;;  %v12193_v23 = vmul.f32 0.35355338, %v8603_v2 }
0x147b   : > { %v12196_v26 = vmul.f32 0.35355338, %v4656_v24 }
0x147c   : > { %v4953_v29 = vsel %vm3056_vm9, %v12193_v23, -inf }
0x147d   : > { %v8610_v8 = vpop.f32.mrb[22].mxu0  ;;  %v4950_v39 = vsel %vm3056_vm9, %v12196_v26, -inf }
0x147e   : > { %v4933_v17 = vmul.f32 0.35355338, %v8610_v8  ;;  %v4743_v18 = vpop.f32.mrb[23].mxu0 }
0x147f   : > { %v4932_v19 = vmul.f32 0.35355338, %v4743_v18 }
0x1480   : > { %v4959_v57 = vsel %vm3056_vm9, %v4933_v17, -inf }
0x1481   : > { %4960 = vmax.xlane.f32.xlu1 %v4959_v57  ;;  %v8617_v35 = vpop.f32.mrb[30].mxu1  ;;  %v4956_v27 = vsel %vm3056_vm9, %v4932_v19, -inf }
0x1482   : > { %4957 = vmax.xlane.f32.xlu0 %v4956_v27  ;;  %v4830_v56 = vpop.f32.mrb[31].mxu1  ;;  %v12199_v28 = vmul.f32 0.35355338, %v8617_v35 }
0x1483   : > { %v12203_v31 = vmul.f32 0.35355338, %v4830_v56 }
0x1484   : > { %v4965_v33 = vsel %vm3056_vm9, %v12199_v28, -inf }
0x1485   : > { %v8624_v36 = vpop.f32.mrb[24].mxu0  ;;  %4954 = vmax.xlane.f32.xlu1 %v4953_v29  ;;  %v4962_v21 = vsel %vm3056_vm9, %v12203_v31, -inf }
0x1486   : > { %v4917_v46 = vpop.f32.mrb[25].mxu0  ;;  %4951 = vmax.xlane.f32.xlu0 %v4950_v39  ;;  %v12207_v49 = vmul.f32 0.35355338, %v8624_v36 }
0x1487   : > { %v12211_v50 = vmul.f32 0.35355338, %v4917_v46 }
0x1488   : > { %v4971_v51 = vsel %vm3056_vm9, %v12207_v49, -inf }
0x1489   : > { %4966 = vmax.xlane.f32.xlu1 %v4965_v33  ;;  %v4968_v52 = vsel %vm3056_vm9, %v12211_v50, -inf }
0x148a   : > { %4963 = vmax.xlane.f32.xlu0 %v4962_v21 }
0x148d   : > { %4972 = vmax.xlane.f32.xlu1 %v4971_v51 }
0x148e   : > { %4969 = vmax.xlane.f32.xlu0 %v4968_v52 }
0x1499   : > { %v4943_v37 = vpop.xlane.xlu1 %4942 }
0x149a   : > { %v4975_v58 = vsub.f32 %v4927_v1, %v4943_v37  ;;  %v4940_v60 = vpop.xlane.xlu0 %4939 }
0x149b   : > { %v4974_v42 = vsub.f32 %v4926_v48, %v4940_v60 }
0x149c   : > { %v4988_v41 = vmul.f32 1.442695, %v4975_v58 }
0x149d   : > { %v4986_v10 = vmul.f32 1.442695, %v4974_v42 }
0x149e   : > { %9706 = vrot.lane.b32.xlu1 %v12126_v14, %s10888_s15  ;;  %9828 = vpow2.f32 %v4988_v41  ;;  %s12919_s15 = sld [smem:[#allocation80_spill]] }
0x149f   : > { %9830 = vpow2.f32 %v4986_v10 }
0x14a2   : > { %9716 = vrot.lane.b32.xlu1 %v12138_v15, %s10890_s3 }
0x14a4   : > { %9701 = vrot.lane.b32.xlu0 %v12126_v14, %s10887_s4  ;;  %s12918_s4 = smov 40  }
0x14a6   : > { %9721 = vrot.lane.b32.xlu1 %v12142_v40, %s10890_s3 }
0x14a8   : > { %9711 = vrot.lane.b32.xlu0 %v12124_v13, %s10890_s3  ;;  %v12231_v15 = vpop.eup %9828 }
0x14a9   : > { %v5013_v14 = vsel %vm3056_vm9, %v12231_v15, 0.0  ;;  %v12235_v40 = vpop.eup %9830 }
0x14aa   : > { %9726 = vrot.lane.b32.xlu1 %v12146_v32, %s10890_s3  ;;  %v5010_v13 = vsel %vm3056_vm9, %v12235_v40, 0.0 }
0x14c7   : > { %5014 = vadd.xlane.f32.xlu0 %v5013_v14 }
0x14ce   : > { %5011 = vadd.xlane.f32.xlu1 %v5010_v13 }
0x1502   : > { %v4949_v32 = vpop.xlane.xlu0 %4948 }
0x1503   : > { %v4977_v30 = vsub.f32 %v4929_v53, %v4949_v32 }
0x1505   : > { %v4992_v44 = vmul.f32 1.442695, %v4977_v30 }
0x1506   : > { %v4946_v11 = vpop.xlane.xlu0 %4945 }
0x1507   : > { %9832 = vpow2.f32 %v4992_v44  ;;  %v4976_v61 = vsub.f32 %v12188_v5, %v4946_v11 }
0x1509   : > { %v4990_v45 = vmul.f32 1.442695, %v4976_v61 }
0x150b   : > { %9834 = vpow2.f32 %v4990_v45 }
0x150e   : > { %v4961_v55 = vpop.xlane.xlu1 %4960 }
0x150f   : > { %v4981_v47 = vsub.f32 %v4933_v17, %v4961_v55  ;;  %v4958_v59 = vpop.xlane.xlu0 %4957 }
0x1510   : > { %v4980_v63 = vsub.f32 %v4932_v19, %v4958_v59 }
0x1511   : > { %v12240_v0 = vpop.eup %9832  ;;  %v5000_v1 = vmul.f32 1.442695, %v4981_v47 }
0x1512   : > { %v4998_v43 = vmul.f32 1.442695, %v4980_v63  ;;  %v4955_v48 = vpop.xlane.xlu1 %4954  ;;  %v5019_v22 = vsel %vm3056_vm9, %v12240_v0, 0.0 }
0x1513   : > { %9836 = vpow2.f32 %v5000_v1  ;;  %v4979_v62 = vsub.f32 %v12193_v23, %v4955_v48  ;;  %v4952_v9 = vpop.xlane.xlu0 %4951  ;;  %5020 = vadd.xlane.f32.xlu1 %v5019_v22 }
0x1514   : > { %9838 = vpow2.f32 %v4998_v43  ;;  %v4978_v53 = vsub.f32 %v12196_v26, %v4952_v9 }
0x1515   : > { %v12246_v54 = vpop.eup %9834  ;;  %v4996_v5 = vmul.f32 1.442695, %v4979_v62 }
0x1516   : > { %v4994_v7 = vmul.f32 1.442695, %v4978_v53  ;;  %v4967_v6 = vpop.xlane.xlu1 %4966  ;;  %v5016_v2 = vsel %vm3056_vm9, %v12246_v54, 0.0 }
0x1517   : > { %9840 = vpow2.f32 %v4996_v5  ;;  %5017 = vadd.xlane.f32.xlu0 %v5016_v2  ;;  %v4964_v24 = vpop.xlane.xlu0 %4963  ;;  %v4983_v8 = vsub.f32 %v12199_v28, %v4967_v6 }
0x1518   : > { %9842 = vpow2.f32 %v4994_v7  ;;  %v4982_v17 = vsub.f32 %v12203_v31, %v4964_v24 }
0x1519   : > { %v5004_v35 = vmul.f32 1.442695, %v4983_v8 }
0x151a   : > { %v4973_v18 = vpop.xlane.xlu1 %4972  ;;  %v5002_v29 = vmul.f32 1.442695, %v4982_v17 }
0x151b   : > { %v4985_v19 = vsub.f32 %v12207_v49, %v4973_v18  ;;  %v4970_v23 = vpop.xlane.xlu0 %4969 }
0x151c   : > { %v4984_v57 = vsub.f32 %v12211_v50, %v4970_v23 }
0x151d   : > { %v12254_v26 = vpop.eup %9836  ;;  %v5008_v27 = vmul.f32 1.442695, %v4985_v19 }
0x151e   : > { %v12256_v56 = vpop.eup %9838  ;;  %v5006_v36 = vmul.f32 1.442695, %v4984_v57  ;;  %v9707_v39 = vpop.permute.xlu1 %9706  ;;  %v5031_v28 = vsel %vm3056_vm9, %v12254_v26, 0.0 }
0x151f   : > { %9844 = vpow2.f32 %v5008_v27  ;;  %5032 = vadd.xlane.f32.xlu1 %v5031_v28  ;;  %v9702_v31 = vpop.permute.xlu0 %9701  ;;  %v5028_v46 = vsel %vm3056_vm9, %v12256_v56, 0.0 }
0x1520   : > { %9846 = vpow2.f32 %v5006_v36  ;;  %5029 = vadd.xlane.f32.xlu0 %v5028_v46 }
0x1521   : > { %v12262_v49 = vpop.eup %9840  ;;  %9848 = vpow2.f32 %v5004_v35 }
0x1522   : > { %v12264_v33 = vpop.eup %9842  ;;  %9850 = vpow2.f32 %v5002_v29  ;;  %v9717_v50 = vpop.permute.xlu1 %9716  ;;  %v5025_v21 = vsel %vm3056_vm9, %v12262_v49, 0.0 }
0x1523   : > { %5026 = vadd.xlane.f32.xlu1 %v5025_v21  ;;  %v9712_v51 = vpop.permute.xlu0 %9711  ;;  %v5022_v52 = vsel %vm3056_vm9, %v12264_v33, 0.0  ;;  %v9719_v37 = vunpack.i.h.bf16 %v9717_v50  ;;  %v9718_v58 = vunpack.i.l.bf16 %v9717_v50 }
0x1524   : > { %v9714_v41 = vunpack.i.h.bf16 %v9712_v51  ;;  %v9713_v60 = vunpack.i.l.bf16 %v9712_v51  ;;  %5023 = vadd.xlane.f32.xlu0 %v5022_v52 }
0x1525   : > { %v9049_v32 = vpack.c.bf16 %v9719_v37, %v9718_v58 }
0x1526   : > { %v9045_v42 = vpack.c.bf16 %v9714_v41, %v9713_v60  ;;  %v9722_v10 = vpop.permute.xlu1 %9721 }
0x1527   : > { %v9724_v14 = vunpack.i.h.bf16 %v9722_v10  ;;  %v9723_v13 = vunpack.i.l.bf16 %v9722_v10 }
0x1528   : > { %9046 = vmatprep.subr.bf16.mxu1 %v9045_v42 }
0x1529   : > { %v12270_v30 = vpop.eup %9844  ;;  %v9053_v44 = vpack.c.bf16 %v9724_v14, %v9723_v13  ;;  %9048 = vmatpush3.bf16.msra.mxu1 %v9045_v42 }
0x152a   : > { %v12272_v11 = vpop.eup %9846  ;;  %9050 = vmatprep.subr.bf16.mxu1 %v9049_v32  ;;  %v5043_v61 = vsel %vm3056_vm9, %v12270_v30, 0.0  ;;  %v9727_v1 = vpop.permute.xlu1 %9726 }
0x152b   : > { %v12276_v45 = vpop.eup %9848  ;;  %5044 = vadd.xlane.f32.xlu1 %v5043_v61  ;;  %9054 = vmatprep.subr.bf16.mxu0 %v9053_v44  ;;  %v5040_v55 = vsel %vm3056_vm9, %v12272_v11, 0.0  ;;  %v9729_v9 = vunpack.i.h.bf16 %v9727_v1  ;;  %v9728_v53 = vunpack.i.l.bf16 %v9727_v1  ;;  %v8116_v1 = vld [vmem:[%s12911_s19 + $0x48] sm:$0xff] }
0x152c   : > { %v12280_v47 = vpop.eup %9850  ;;  %9056 = vmatpush3.bf16.msra.mxu0 %v9053_v44  ;;  %5041 = vadd.xlane.f32.xlu0 %v5040_v55  ;;  %v5037_v59 = vsel %vm3056_vm9, %v12276_v45, 0.0 }
0x152d   : > { %v5034_v63 = vsel %vm3056_vm9, %v12280_v47, 0.0  ;;  %v9057_v6 = vpack.c.bf16 %v9729_v9, %v9728_v53  ;;  %v8117_v53 = vld [vmem:[%s12911_s19 + $0x50] sm:$0xff] }
0x152f   : > { %5038 = vadd.xlane.f32.xlu1 %v5037_v59  ;;  %v8113_v59 = vld [vmem:[%s12911_s19 + $0x30] sm:$0xff] }
0x1530   : > { %5035 = vadd.xlane.f32.xlu0 %v5034_v63  ;;  %v8114_v63 = vld [vmem:[%s12911_s19 + $0x38] sm:$0xff] }
0x1540   : > { %9736 = vrot.lane.b32.xlu1 %v9707_v39, %s10890_s3 }
0x1546   : > { %9731 = vrot.lane.b32.xlu0 %v9702_v31, %s10890_s3 }
0x1554   : > { %v5015_v43 = vpop.xlane.xlu0 %5014 }
0x1555   : > { %9852 = vrcp.f32 %v5015_v43 }
0x155b   : > { %v5012_v48 = vpop.xlane.xlu1 %5011 }
0x155c   : > { %9854 = vrcp.f32 %v5012_v48 }
0x155f   : > { %v9853_v22 = vpop.eup %9852 }
0x1560   : > { %v5059_v7 = vmul.f32 %v9853_v22, %v12231_v15 }
0x1566   : > { %v9855_v62 = vpop.eup %9854 }
0x1567   : > { %v5058_v5 = vmul.f32 %v9855_v62, %v12235_v40 }
0x1569   : > { %8629 = vmatprep.mubr.msk.f32.mxu1 %vm3056_vm9, %v5058_v5  ;;  %v8118_v5 = vld [vmem:[%s12911_s19 + $0x58] sm:$0xff] }
0x156a   : > { %8630 = vmatmul.mubr.msk.f32.vlgmr.msra.gmra.mrb[32].mxu1 %vm3056_vm9, %v5059_v7  ;;  %v9077_v7 = vpack.c.bf16 %v8118_v5, %v8117_v53  ;;  %v8171_v53 = vld [vmem:[%s12912_s9 + $0xa8] sm:$0xff]  ;;  %v8173_v5 = vld [vmem:[%s12912_s9 + $0xb8] sm:$0xff] }
0x156b   : > { %9052 = vmatpush3.bf16.msra.mxu1 %v9049_v32 }
0x156c   : > { %9058 = vmatprep.subr.bf16.mxu1 %v9057_v6 }
0x15a0   : > { %v5021_v2 = vpop.xlane.xlu1 %5020 }
0x15a1   : > { %9856 = vrcp.f32 %v5021_v2 }
0x15a4   : > { %v5018_v24 = vpop.xlane.xlu0 %5017 }
0x15a5   : > { %9858 = vrcp.f32 %v5018_v24 }
0x15ab   : > { %v9857_v18 = vpop.eup %9856 }
0x15ac   : > { %v5033_v8 = vpop.xlane.xlu1 %5032  ;;  %v5061_v23 = vmul.f32 %v9857_v18, %v12240_v0 }
0x15ad   : > { %9860 = vrcp.f32 %v5033_v8  ;;  %v5030_v17 = vpop.xlane.xlu0 %5029 }
0x15ae   : > { %9862 = vrcp.f32 %v5030_v17 }
0x15af   : > { %v9859_v19 = vpop.eup %9858 }
0x15b0   : > { %v5027_v40 = vpop.xlane.xlu1 %5026  ;;  %v5060_v15 = vmul.f32 %v9859_v19, %v12246_v54 }
0x15b1   : > { %9864 = vrcp.f32 %v5027_v40  ;;  %v5024_v57 = vpop.xlane.xlu0 %5023 }
0x15b2   : > { %9866 = vrcp.f32 %v5024_v57  ;;  %8636 = vmatprep.mubr.msk.f32.mxu1 %vm3056_vm9, %v5060_v15 }
0x15b3   : > { %8637 = vmatmul.mubr.msk.f32.vlgmr.msra.gmra.mrb[34].mxu1 %vm3056_vm9, %v5061_v23 }
0x15b4   : > { %9060 = vmatpush3.bf16.msra.mxu1 %v9057_v6 }
0x15b7   : > { %v9861_v35 = vpop.eup %9860 }
0x15b8   : > { %v9863_v27 = vpop.eup %9862  ;;  %v5045_v29 = vpop.xlane.xlu1 %5044  ;;  %v5065_v28 = vmul.f32 %v9861_v35, %v12254_v26 }
0x15b9   : > { %9868 = vrcp.f32 %v5045_v29  ;;  %v5042_v36 = vpop.xlane.xlu0 %5041  ;;  %v5064_v39 = vmul.f32 %v9863_v27, %v12256_v56 }
0x15ba   : > { %9870 = vrcp.f32 %v5042_v36 }
0x15bb   : > { %v9865_v54 = vpop.eup %9864  ;;  %8650 = vmatprep.mubr.msk.f32.mxu1 %vm3056_vm9, %v5064_v39 }
0x15bc   : > { %v9867_v0 = vpop.eup %9866  ;;  %v5039_v31 = vpop.xlane.xlu1 %5038  ;;  %8651 = vmatmul.mubr.msk.f32.vlgmr.msra.gmra.mrb[36].mxu1 %vm3056_vm9, %v5065_v28  ;;  %v5063_v21 = vmul.f32 %v9865_v54, %v12262_v49 }
0x15bd   : > { %9872 = vrcp.f32 %v5039_v31  ;;  %v5036_v46 = vpop.xlane.xlu0 %5035  ;;  %v5062_v50 = vmul.f32 %v9867_v0, %v12264_v33 }
0x15be   : > { %9874 = vrcp.f32 %v5036_v46 }
0x15bf   : > { %8643 = vmatprep.mubr.msk.f32.mxu0 %vm3056_vm9, %v5062_v50 }
0x15c0   : > { %v9737_v56 = vpop.permute.xlu1 %9736  ;;  %8644 = vmatmul.mubr.msk.f32.vlgmr.msra.gmra.mrb[26].mxu0 %vm3056_vm9, %v5063_v21 }
0x15c1   : > { %v9739_v26 = vunpack.i.h.bf16 %v9737_v56  ;;  %v9738_v51 = vunpack.i.l.bf16 %v9737_v56  ;;  %v9732_v52 = vpop.permute.xlu0 %9731 }
0x15c2   : > { %v9734_v37 = vunpack.i.h.bf16 %v9732_v52  ;;  %v9733_v58 = vunpack.i.l.bf16 %v9732_v52 }
0x15c3   : > { %v9869_v41 = vpop.eup %9868  ;;  %v9065_v60 = vpack.c.bf16 %v9739_v26, %v9738_v51  ;;  %v8157_v26 = vld [vmem:[#allocation18 + $0x1] ss:$0 sm:$0xff] }
0x15c4   : > { %v9871_v42 = vpop.eup %9870  ;;  %v9061_v10 = vpack.c.bf16 %v9734_v37, %v9733_v58  ;;  %v5069_v14 = vmul.f32 %v9869_v41, %v12270_v30 }
0x15c5   : > { %9066 = vmatprep.subr.bf16.mxu1 %v9065_v60  ;;  %v5068_v33 = vmul.f32 %v9871_v42, %v12272_v11 }
0x15c6   : > { %9062 = vmatprep.subr.bf16.mxu0 %v9061_v10  ;;  %9068 = vmatpush3.bf16.msra.mxu1 %v9065_v60 }
0x15c7   : > { %v9873_v49 = vpop.eup %9872  ;;  %9064 = vmatpush3.bf16.msra.mxu0 %v9061_v10  ;;  %8664 = vmatprep.mubr.msk.f32.mxu1 %vm3056_vm9, %v5068_v33 }
0x15c8   : > { %v9875_v13 = vpop.eup %9874  ;;  %v5067_v44 = vmul.f32 %v9873_v49, %v12276_v45  ;;  %v9069_v45 = vpack.c.bf16 %v8114_v63, %v8113_v59  ;;  %v8162_v63 = vld [vmem:[%s12912_s9 + $0x60] sm:$0xff] }
0x15c9   : > { %8665 = vmatmul.mubr.msk.f32.vlgmr.msra.gmra.mrb[38].mxu1 %vm3056_vm9, %v5069_v14  ;;  %v5066_v32 = vmul.f32 %v9875_v13, %v12280_v47  ;;  %v8115_v47 = vld [vmem:[%s12911_s19 + $0x40] sm:$0xff] }
0x15ca   : > { %5873 = vmatprep.mubr.f32.mxu1 %v10883_v12  ;;  %v9073_v43 = vpack.c.bf16 %v8116_v1, %v8115_v47  ;;  %9070 = vmatprep.subr.bf16.mxu0 %v9069_v45  ;;  %v8164_v47 = vld [vmem:[%s12912_s9 + $0x70] sm:$0xff]  ;;  %v8167_v1 = vld [vmem:[%s12912_s9 + $0x88] sm:$0xff] }
0x15cb   : > { %8657 = vmatprep.mubr.msk.f32.mxu0 %vm3056_vm9, %v5066_v32 }
0x15cc   : > { %8658 = vmatmul.mubr.msk.f32.vlgmr.msra.gmra.mrb[28].mxu0 %vm3056_vm9, %v5067_v44 }
0x15cd   : > { %9072 = vmatpush3.bf16.msra.mxu0 %v9069_v45  ;;  %v9083_v45 = vpack.c.bf16 %v8164_v47, %v8162_v63  ;;  %v8193_v63 = vld [vmem:[%s12913_s18 + $0x118] sm:$0xff] }
0x15ce   : > { %9074 = vmatprep.subr.bf16.mxu0 %v9073_v43 }
0x15d1   : > { %9076 = vmatpush3.bf16.msra.mxu0 %v9073_v43  ;;  %v8169_v43 = vld [vmem:[%s12912_s9 + $0x98] sm:$0xff] }
0x15d2   : > { %9078 = vmatprep.subr.bf16.mxu0 %v9077_v7 }
0x15d5   : > { %9080 = vmatpush3.bf16.msra.mxu0 %v9077_v7  ;;  %v8170_v7 = vld [vmem:[%s12912_s9 + $0xa0] sm:$0xff] }
0x15d6   : > { %9093 = vmatprep.subr.bf16.mxu0 %v10895_v38 }
0x163d   : > { %v8631_v30 = vpop.f32.mrb[32].mxu1 }
0x163e   : > { %v5148_v11 = vpop.f32.mrb[33].mxu1 }
0x1686   : > { %v8638_v61 = vpop.f32.mrb[34].mxu1 }
0x1687   : > { %5596 = vrot.lane.b32.xlu1 %v8638_v61, %s12915_s20  ;;  %v5235_v55 = vpop.f32.mrb[35].mxu1  ;;  %v8163_v61 = vld [vmem:[%s12912_s9 + $0x68] sm:$0xff] }
0x1688   : > { %5594 = vrot.lane.b32.xlu0 %v5235_v55, %s12915_s20  ;;  %v8165_v55 = vld [vmem:[%s12912_s9 + $0x78] sm:$0xff] }
0x1689   : > { %v9081_v59 = vpack.c.bf16 %v8165_v55, %v8163_v61  ;;  %v8191_v61 = vld [vmem:[%s12913_s18 + $0x108] sm:$0xff] }
0x168b   : > { %9082 = vmatprep.subr.bf16.mxu1 %v9081_v59  ;;  %v8192_v59 = vld [vmem:[%s12913_s18 + $0x110] sm:$0xff] }
0x168c   : > { %9084 = vmatpush1.bf16.msra.mxu1 %v9083_v45  ;;  %v9118_v47 = vpack.c.bf16 %v8193_v63, %v8192_v59  ;;  %v5791_v45 = vld [vmem:[#allocation23 + $0x2] sm:$0x3] }
0x168f   : > { %v8652_v48 = vpop.f32.mrb[36].mxu1 }
0x1690   : > { %5612 = vrot.lane.b32.xlu1 %v8652_v48, %s12916_s23  ;;  %v5409_v22 = vpop.f32.mrb[37].mxu1  ;;  %v9085_v48 = vpack.c.bf16 %v8169_v43, %v8167_v1  ;;  %v5796_v1 = vrot.slane %v5791_v45, %v12047_v3  ;;  %v5800_v43 = vrot.slane %v5791_v45, %v3916_v4 }
0x1691   : > { %5610 = vrot.lane.b32.xlu0 %v5409_v22, %s12916_s23  ;;  %v8166_v22 = vld [vmem:[%s12912_s9 + $0x80] sm:$0xff]  ;;  %s12455_s23 = scalar_lea.vmem [#allocation41], %s8034_s16  ;;  %s12922_s16 = sld [smem:[#allocation82_spill]] }
0x1692   : > { %9086 = vmatprep.subr.bf16.mxu1 %v9085_v48 }
0x1693   : > { %v8645_v62 = vpop.f32.mrb[26].mxu0 }
0x1694   : > { %v5322_v9 = vpop.f32.mrb[27].mxu0  ;;  %5604 = vrot.lane.b32.xlu1 %v8645_v62, %s12917_s8  ;;  %v8168_v62 = vld [vmem:[%s12912_s9 + $0x90] sm:$0xff] }
0x1695   : > { %5602 = vrot.lane.b32.xlu0 %v5322_v9, %s12917_s8  ;;  %v9087_v9 = vpack.c.bf16 %v8168_v62, %v8166_v22  ;;  %s12920_s8 = sld [smem:[#allocation83_spill]] }
0x1697   : > { %9088 = vmatpush1.bf16.msra.mxu1 %v9087_v9 }
0x169c   : > { %v8666_v6 = vpop.f32.mrb[38].mxu1 }
0x169d   : > { %v5583_v2 = vpop.f32.mrb[39].mxu1 }
0x169f   : > { %v8659_v24 = vpop.f32.mrb[28].mxu0 }
0x16a0   : > { %5620 = vrot.lane.b32.xlu1 %v8659_v24, %s10890_s3  ;;  %v5496_v8 = vpop.f32.mrb[29].mxu0 }
0x16a1   : > { %5618 = vrot.lane.b32.xlu0 %v5496_v8, %s10890_s3  ;;  %s12782_s3 = scalar_lea.vmem [#allocation42], %s11634_s21 }
0x16a4   : > { %5628 = vrot.lane.b32.xlu1 %v8666_v6, %s12918_s4  ;;  %v9089_v6 = vpack.c.bf16 %v8173_v5, %v8171_v53 }
0x16a5   : > { %5626 = vrot.lane.b32.xlu0 %v5583_v2, %s12918_s4  ;;  %v8172_v2 = vld [vmem:[%s12912_s9 + $0xb0] sm:$0xff]  ;;  %s12781_s4 = scalar_lea.vmem [#allocation44], %s11634_s21  ;;  %s12937_s9 = scalar_lea.vmem [#allocation42], %s11634_s21 }
0x16a6   : > { %v9091_v24 = vpack.c.bf16 %v8172_v2, %v8170_v7  ;;  %9090 = vmatprep.subr.bf16.mxu1 %v9089_v6  ;;  %s7508_s13 = sshll.u32 %s12937_s9, 4  ;;  %s12621_s13 = int_to_ptr.vmem [resolvable:$true] %s7508_s13 }
0x16a8   : > { %9092 = vmatpush1.bf16.msra.mxu1 %v9091_v24 }
0x16f9   : > { %v5597_v17 = vpop.permute.xlu1 %5596 }
0x16fa   : > { %v5595_v18 = vpop.permute.xlu0 %5594  ;;  %v5633_v27 = vsel %vm2525_vm7, %v8631_v30, %v5597_v17 }
0x16fb   : > { %v5632_v57 = vsel %vm2525_vm7, %v5148_v11, %v5595_v18 }
0x1702   : > { %v5613_v19 = vpop.permute.xlu1 %5612 }
0x1703   : > { %v5611_v40 = vpop.permute.xlu0 %5610 }
0x1706   : > { %v5605_v15 = vpop.permute.xlu1 %5604 }
0x1707   : > { %v5603_v23 = vpop.permute.xlu0 %5602  ;;  %v5635_v39 = vsel %vm3056_vm9, %v5633_v27, %v5605_v15  ;;  %v8161_v27 = vld [vmem:[#allocation21 + $0x1] ss:$0 sm:$0xff] }
0x1708   : > { %v5634_v29 = vsel %vm3056_vm9, %v5632_v57, %v5603_v23  ;;  %v5637_v0 = vsel %vm3755_vm10, %v5635_v39, %v5613_v19  ;;  %v8160_v57 = vld [vmem:[#allocation20 + $0x1] ss:$0 sm:$0xff] }
0x1709   : > { %v5636_v28 = vsel %vm3755_vm10, %v5634_v29, %v5611_v40  ;;  %vm10896_vm10 = vmmov 0  }
0x1712   : > { %v5621_v35 = vpop.permute.xlu1 %5620 }
0x1713   : > { %v5619_v36 = vpop.permute.xlu0 %5618  ;;  %v5639_v50 = vsel %vm2058_vm0, %v5637_v0, %v5621_v35 }
0x1714   : > { %v5638_v31 = vsel %vm2058_vm0, %v5636_v28, %v5619_v36 }
0x1716   : > { %v5629_v54 = vpop.permute.xlu1 %5628 }
0x1717   : > { %v5627_v46 = vpop.permute.xlu0 %5626  ;;  %v5641_v56 = vsel %vm3760_vm11, %v5639_v50, %v5629_v54 }
0x1718   : > { %v5640_v21 = vsel %vm3760_vm11, %v5638_v31, %v5627_v46  ;;  %v8176_v31 = vld [vmem:[%s12913_s18 + $0x90] sm:$0xff]  ;;  %v8177_v46 = vld [vmem:[%s12913_s18 + $0x98] sm:$0xff] }
0x1719   : > { %8679 = vmatprep.mubr.msk.f32.mxu0 %vm2250_vm4, %v5640_v21  ;;  %v9094_v50 = vpack.c.bf16 %v8177_v46, %v8176_v31  ;;  %v8178_v21 = vld [vmem:[%s12913_s18 + $0xa0] sm:$0xff] }
0x171a   : > { %8680 = vmatmul.mubr.msk.f32.vlgmr.msra.gmra.mrb[30].mxu0 %vm2250_vm4, %v5641_v56  ;;  %v8179_v56 = vld [vmem:[%s12913_s18 + $0xa8] sm:$0xff] }
0x171b   : > { %9095 = vmatpush1.bf16.msra.mxu0 %v9094_v50 }
0x171c   : > { %9096 = vmatprep.subr.bf16.mxu0 %v10895_v38 }
0x17ed   : > { %v8681_v51 = vpop.f32.mrb[30].mxu0 }
0x17ee   : > { %v5726_v52 = vadd.f32 %v8681_v51, %v8157_v26  ;;  %v5720_v37 = vpop.f32.mrb[31].mxu0  ;;  %v8180_v51 = vld [vmem:[%s12913_s18 + $0xb0] sm:$0xff] }
0x17ef   : > { %v5721_v58 = vadd.f32 %v8157_v26, %v5720_v37  ;;  %v9097_v26 = vpack.c.bf16 %v8179_v56, %v8178_v21 }
0x17f0   : > { %v12343_v41 = vadd.f32 %v5726_v52, %v12097_v20  ;;  %v8181_v52 = vld [vmem:[%s12913_s18 + $0xb8] sm:$0xff] }
0x17f1   : > { %v12346_v60 = vadd.f32 %v5721_v58, %v12092_v16  ;;  %9098 = vmatpush1.bf16.msra.mxu0 %v9097_v26  ;;  %v9100_v37 = vpack.c.bf16 %v8181_v52, %v8180_v51  ;;  %v8182_v58 = vld [vmem:[%s12913_s18 + $0xc0] sm:$0xff] }
0x17f2   : > { %v5738_v42 = vsel %vm2250_vm4, %v12343_v41, 0.0  ;;  %9099 = vmatprep.subr.bf16.mxu0 %v10895_v38 }
0x17f3   : > { %5739 = vadd.xlane.f32.xlu1 %v5738_v42  ;;  %v5735_v10 = vsel %vm2250_vm4, %v12346_v60, 0.0  ;;  %v8183_v42 = vld [vmem:[%s12913_s18 + $0xc8] sm:$0xff] }
0x17f4   : > { %5736 = vadd.xlane.f32.xlu0 %v5735_v10  ;;  %v9103_v10 = vpack.c.bf16 %v8183_v42, %v8182_v58 }
0x17f5   : > { %9101 = vmatpush1.bf16.msra.mxu0 %v9100_v37 }
0x17f6   : > { %9102 = vmatprep.subr.bf16.mxu0 %v10895_v38 }
0x17f9   : > { %9104 = vmatpush1.bf16.msra.mxu0 %v9103_v10 }
0x17fa   : > { %9105 = vmatprep.subr.bf16.mxu0 %v10895_v38 }
0x1880   : > { %v5740_v33 = vpop.xlane.xlu1 %5739 }
0x1881   : > { %v5742_v49 = vmul.f32 0.020833334, %v5740_v33  ;;  %v5737_v14 = vpop.xlane.xlu0 %5736  ;;  %v8184_v33 = vld [vmem:[%s12913_s18 + $0xd0] sm:$0xff] }
0x1882   : > { %v5741_v20 = vmul.f32 0.020833334, %v5737_v14 }
0x1883   : > { %v5744_v13 = vsub.f32 %v12343_v41, %v5742_v49  ;;  %v8185_v49 = vld [vmem:[%s12913_s18 + $0xd8] sm:$0xff] }
0x1884   : > { %v5743_v16 = vsub.f32 %v12346_v60, %v5741_v20  ;;  %v9106_v14 = vpack.c.bf16 %v8185_v49, %v8184_v33  ;;  %v8186_v20 = vld [vmem:[%s12913_s18 + $0xe0] sm:$0xff] }
0x1885   : > { %v5746_v30 = vmul.f32 %v5744_v13, %v5744_v13 }
0x1886   : > { %v5745_v32 = vmul.f32 %v5743_v16, %v5743_v16  ;;  %9107 = vmatpush1.bf16.msra.mxu0 %v9106_v14 }
0x1887   : > { %v5750_v11 = vsel %vm2250_vm4, %v5746_v30, 0.0  ;;  %9108 = vmatprep.subr.bf16.mxu0 %v10895_v38 }
0x1888   : > { %v5747_v44 = vsel %vm2250_vm4, %v5745_v32, 0.0  ;;  %v8188_v32 = vld [vmem:[%s12913_s18 + $0xf0] sm:$0xff] }
0x1889   : > { %5748 = vadd.xlane.f32.xlu0 %v5747_v44  ;;  %v8189_v44 = vld [vmem:[%s12913_s18 + $0xf8] sm:$0xff] }
0x188a   : > { %v9112_v30 = vpack.c.bf16 %v8189_v44, %v8188_v32 }
0x188d   : > { %5751 = vadd.xlane.f32.xlu0 %v5750_v11  ;;  %v8190_v11 = vld [vmem:[%s12913_s18 + $0x100] sm:$0xff] }
0x188e   : > { %v9115_v55 = vpack.c.bf16 %v8191_v61, %v8190_v11 }
0x1916   : > { %v5749_v8 = vpop.xlane.xlu0 %5748 }
0x1917   : > { %v5753_v17 = vmul.f32 0.020833334, %v5749_v8 }
0x1919   : > { %v5755_v18 = vadd.f32 1e-05, %v5753_v17 }
0x191a   : > { %v5752_v19 = vpop.xlane.xlu0 %5751 }
0x191b   : > { %9876 = vrsqrt.f32 %v5755_v18  ;;  %v5754_v40 = vmul.f32 0.020833334, %v5752_v19 }
0x191d   : > { %v5756_v15 = vadd.f32 1e-05, %v5754_v40 }
0x191f   : > { %9878 = vrsqrt.f32 %v5756_v15 }
0x1925   : > { %v9877_v23 = vpop.eup %9876 }
0x1926   : > { %v5759_v35 = vmul.f32 %v9877_v23, %v5743_v16 }
0x1928   : > { %v5767_v29 = vmul.f32 %v8160_v57, %v5759_v35 }
0x1929   : > { %v9879_v36 = vpop.eup %9878 }
0x192a   : > { %v5775_v39 = vadd.f32 %v8161_v27, %v5767_v29  ;;  %v5760_v28 = vmul.f32 %v9879_v36, %v5744_v13  ;;  %v8187_v13 = vld [vmem:[%s12913_s18 + $0xe8] sm:$0xff] }
0x192b   : > { %v9109_v16 = vpack.c.bf16 %v8187_v13, %v8186_v20 }
0x192c   : > { %8174 = vmatmul.mubr.msk.f32.vlgmr.msra.gmra.mrb[40].mxu1 %vm2250_vm4, %v5775_v39  ;;  %v5768_v54 = vmul.f32 %v8160_v57, %v5760_v28 }
0x192d   : > { %5879 = vmatprep.mubr.f32.mxu1 %v10883_v12  ;;  %9110 = vmatpush1.bf16.msra.mxu0 %v9109_v16 }
0x192e   : > { %v5776_v0 = vadd.f32 %v8161_v27, %v5768_v54  ;;  %9111 = vmatprep.subr.bf16.mxu0 %v10895_v38 }
0x1930   : > { %8175 = vmatmul.mubr.msk.f32.gmra.mrb[42].mxu1 %vm2250_vm4, %v5776_v0 }
0x1931   : > { %9113 = vmatpush1.bf16.msra.mxu0 %v9112_v30 }
0x1932   : > { %9114 = vmatprep.subr.bf16.mxu0 %v10895_v38 }
0x1935   : > { %9116 = vmatpush1.bf16.msra.mxu0 %v9115_v55 }
0x1936   : > { %9117 = vmatprep.subr.bf16.mxu0 %v10895_v38 }
0x1939   : > { %9119 = vmatpush1.bf16.msra.mxu0 %v9118_v47 }
0x19ff   : > { %v5875_v48 = vpop.f32.mrb[40].mxu1 }
0x1a00   : > { %v12400_v22 = vadd.f32 %v5875_v48, %v5796_v1  ;;  %v5877_v62 = vpop.f32.mrb[41].mxu1 }
0x1a01   : > { %v12402_v9 = vadd.f32 %v5877_v62, %v5800_v43 }
0x1a02   : > { %v12405_v53 = vmul.f32 0.70710677, %v12400_v22 }
0x1a03   : > { %v12408_v5 = vmul.f32 0.70710677, %v12402_v9  ;;  %v5881_v7 = vpop.f32.mrb[42].mxu1 }
0x1a04   : > { %v5902_v6 = vand.u32 2147483647, %v12405_v53  ;;  %v12411_v2 = vadd.f32 %v5881_v7, %v5796_v1  ;;  %v5883_v24 = vpop.f32.mrb[43].mxu1  ;;  %vm5894_vm2 = vcmp.ge.f32.partialorder %v12405_v53, 0.0 }
0x1a05   : > { %v5903_v34 = vand.u32 2147483647, %v12408_v5  ;;  %v12414_v4 = vadd.f32 %v5883_v24, %v5800_v43  ;;  %vm5895_vm3 = vcmp.ge.f32.partialorder %v12408_v5, 0.0 }
0x1a06   : > { %v5906_v8 = vmul.f32 0.3275911, %v5902_v6  ;;  %v12417_v18 = vmul.f32 0.70710677, %v12411_v2  ;;  %v5958_v36 = vsub.f32 0.0, %v5902_v6 }
0x1a07   : > { %v5907_v17 = vmul.f32 0.3275911, %v5903_v34  ;;  %v12420_v40 = vmul.f32 0.70710677, %v12414_v4  ;;  %v5959_v28 = vsub.f32 0.0, %v5903_v34 }
0x1a08   : > { %v5910_v19 = vadd.f32 1.0, %v5906_v8  ;;  %v5904_v23 = vand.u32 2147483647, %v12417_v18  ;;  %v5962_v0 = vmul.f32 %v5958_v36, %v5902_v6  ;;  %vm5896_vm7 = vcmp.ge.f32.partialorder %v12417_v18, 0.0 }
0x1a09   : > { %v5911_v15 = vadd.f32 1.0, %v5907_v17  ;;  %v5905_v35 = vand.u32 2147483647, %v12420_v40  ;;  %v5963_v50 = vmul.f32 %v5959_v28, %v5903_v34  ;;  %vm5897_vm8 = vcmp.ge.f32.partialorder %v12420_v40, 0.0 }
0x1a0a   : > { %9880 = vrcp.f32 %v5910_v19  ;;  %v5908_v57 = vmul.f32 0.3275911, %v5904_v23  ;;  %v5960_v21 = vsub.f32 0.0, %v5904_v23  ;;  %v5966_v51 = vmul.f32 1.442695, %v5962_v0 }
0x1a0b   : > { %9882 = vrcp.f32 %v5911_v15  ;;  %v5909_v29 = vmul.f32 0.3275911, %v5905_v35  ;;  %v5961_v37 = vsub.f32 0.0, %v5905_v35  ;;  %v5968_v10 = vmul.f32 1.442695, %v5963_v50 }
0x1a0c   : > { %v5912_v27 = vadd.f32 1.0, %v5908_v57  ;;  %v5964_v33 = vmul.f32 %v5960_v21, %v5904_v23  ;;  %v5898_v50 = vsel %vm5894_vm2, 1.0, %v10882_v25  ;;  %v5901_v18 = vsel %vm5897_vm8, 1.0, %v10882_v25 }
0x1a0d   : > { %v5913_v39 = vadd.f32 1.0, %v5909_v29  ;;  %v5965_v32 = vmul.f32 %v5961_v37, %v5905_v35 }
0x1a0e   : > { %9884 = vrcp.f32 %v5912_v27  ;;  %v5970_v11 = vmul.f32 1.442695, %v5964_v33 }
0x1a0f   : > { %9886 = vrcp.f32 %v5913_v39  ;;  %v5972_v1 = vmul.f32 1.442695, %v5965_v32 }
0x1a10   : > { %9888 = vpow2.f32 %v5966_v51 }
0x1a11   : > { %9890 = vpow2.f32 %v5968_v10  ;;  %v5887_v10 = vmul.f32 0.5, %v12402_v9 }
0x1a12   : > { %9892 = vpow2.f32 %v5970_v11  ;;  %v5889_v11 = vmul.f32 0.5, %v12414_v4 }
0x1a13   : > { %9894 = vpow2.f32 %v5972_v1 }
0x1a14   : > { %v9881_v54 = vpop.eup %9880 }
0x1a15   : > { %v9883_v31 = vpop.eup %9882  ;;  %v5922_v46 = vmul.f32 1.0614054, %v9881_v54 }
0x1a16   : > { %v5923_v56 = vmul.f32 1.0614054, %v9883_v31 }
0x1a17   : > { %v5926_v26 = vadd.f32 -1.4531521, %v5922_v46 }
0x1a18   : > { %v5927_v52 = vadd.f32 -1.4531521, %v5923_v56  ;;  %v9885_v58 = vpop.eup %9884 }
0x1a19   : > { %v5930_v42 = vmul.f32 %v9881_v54, %v5926_v26  ;;  %v5924_v14 = vmul.f32 1.0614054, %v9885_v58  ;;  %v9887_v13 = vpop.eup %9886 }
0x1a1a   : > { %v5931_v49 = vmul.f32 %v9883_v31, %v5927_v52  ;;  %v5925_v61 = vmul.f32 1.0614054, %v9887_v13  ;;  %v9889_v23 = vpop.eup %9888 }
0x1a1b   : > { %v5934_v20 = vadd.f32 1.4214138, %v5930_v42  ;;  %v5928_v44 = vadd.f32 -1.4531521, %v5924_v14  ;;  %v9891_v27 = vpop.eup %9890  ;;  %v5886_v14 = vmul.f32 0.5, %v12400_v22  ;;  %v5888_v22 = vmul.f32 0.5, %v12411_v2 }
0x1a1c   : > { %v5935_v16 = vadd.f32 1.4214138, %v5931_v49  ;;  %v5929_v47 = vadd.f32 -1.4531521, %v5925_v61 }
0x1a1d   : > { %v5938_v30 = vmul.f32 %v9881_v54, %v5934_v20  ;;  %v5932_v59 = vmul.f32 %v9885_v58, %v5928_v44 }
0x1a1e   : > { %v5939_v55 = vmul.f32 %v9883_v31, %v5935_v16  ;;  %v5933_v62 = vmul.f32 %v9887_v13, %v5929_v47 }
0x1a1f   : > { %v5942_v63 = vadd.f32 -0.28449672, %v5938_v30  ;;  %v5936_v43 = vadd.f32 1.4214138, %v5932_v59 }
0x1a20   : > { %v5943_v45 = vadd.f32 -0.28449672, %v5939_v55  ;;  %v5937_v34 = vadd.f32 1.4214138, %v5933_v62 }
0x1a21   : > { %v5946_v48 = vmul.f32 %v9881_v54, %v5942_v63  ;;  %v5940_v6 = vmul.f32 %v9885_v58, %v5936_v43  ;;  %v8196_v63 = vld [vmem:[#allocation24 + $0x1] ss:$0 sm:$0xff] }
0x1a22   : > { %v5947_v7 = vmul.f32 %v9883_v31, %v5943_v45  ;;  %v5941_v15 = vmul.f32 %v9887_v13, %v5937_v34 }
0x1a23   : > { %v5950_v24 = vadd.f32 0.2548296, %v5946_v48  ;;  %v5944_v17 = vadd.f32 -0.28449672, %v5940_v6 }
0x1a24   : > { %v5951_v8 = vadd.f32 0.2548296, %v5947_v7  ;;  %v5945_v36 = vadd.f32 -0.28449672, %v5941_v15 }
0x1a25   : > { %v5954_v19 = vmul.f32 %v9881_v54, %v5950_v24  ;;  %v5948_v35 = vmul.f32 %v9885_v58, %v5944_v17  ;;  %v9893_v54 = vpop.eup %9892 }
0x1a26   : > { %v5955_v57 = vmul.f32 %v9883_v31, %v5951_v8  ;;  %v5949_v46 = vmul.f32 %v9887_v13, %v5945_v36  ;;  %v5899_v31 = vsel %vm5895_vm3, 1.0, %v10882_v25  ;;  %v9895_v5 = vpop.eup %9894 }
0x1a27   : > { %v5974_v29 = vmul.f32 %v9889_v23, %v5954_v19  ;;  %v5952_v28 = vadd.f32 0.2548296, %v5948_v35 }
0x1a28   : > { %v5975_v39 = vmul.f32 %v9891_v27, %v5955_v57  ;;  %v5953_v51 = vadd.f32 0.2548296, %v5949_v46 }
0x1a29   : > { %v5978_v0 = vsub.f32 1.0, %v5974_v29  ;;  %v5956_v56 = vmul.f32 %v9885_v58, %v5952_v28  ;;  %v5900_v58 = vsel %vm5896_vm7, 1.0, %v10882_v25 }
0x1a2a   : > { %v5979_v21 = vsub.f32 1.0, %v5975_v39  ;;  %v5957_v42 = vmul.f32 %v9887_v13, %v5953_v51 }
0x1a2b   : > { %v5982_v26 = vmul.f32 %v5978_v0, %v5898_v50  ;;  %v5976_v53 = vmul.f32 %v9893_v54, %v5956_v56  ;;  %v8197_v0 = vld [vmem:[#allocation26] ss:$0 sm:$0xff]  ;;  %v8198_v50 = vld [vmem:[%s12919_s15] ss:$0 sm:$0xff]  ;;  %s12921_s15 = sld [smem:[#allocation81_spill]] }
0x1a2c   : > { %v5983_v52 = vmul.f32 %v5979_v21, %v5899_v31  ;;  %v5977_v20 = vmul.f32 %v9895_v5, %v5957_v42 }
0x1a2d   : > { %v5986_v37 = vadd.f32 1.0, %v5982_v26  ;;  %v5980_v49 = vsub.f32 1.0, %v5976_v53 }
0x1a2e   : > { %v5987_v33 = vadd.f32 1.0, %v5983_v52  ;;  %v5981_v30 = vsub.f32 1.0, %v5977_v20 }
0x1a2f   : > { %v5984_v32 = vmul.f32 %v5980_v49, %v5900_v58  ;;  %v5990_v44 = vmul.f32 %v5986_v37, %v5886_v14 }
0x1a30   : > { %v5991_v16 = vmul.f32 %v5987_v33, %v5887_v10  ;;  %v5985_v13 = vmul.f32 %v5981_v30, %v5901_v18  ;;  %v1978_v30 = vld [vmem:[%s12920_s8 + $0x10] sm:$0xff] }
0x1a31   : > { %v5988_v9 = vadd.f32 1.0, %v5984_v32  ;;  %v1976_v32 = vld [vmem:[%s12920_s8] sm:$0xff] }
0x1a32   : > { %8194 = vmatprep.mubr.msk.f32.mxu0 %vm3056_vm9, %v5991_v16  ;;  %v5989_v61 = vadd.f32 1.0, %v5985_v13  ;;  %v1979_v13 = vld [vmem:[%s12920_s8 + $0x18] sm:$0xff] }
0x1a33   : > { %6084 = vmatmul.mubr.f32.vlgmr.msra.gmra.mrb[32].mxu0 %v5990_v44  ;;  %v5992_v59 = vmul.f32 %v5988_v9, %v5888_v22  ;;  %v1977_v44 = vld [vmem:[%s12920_s8 + $0x8] sm:$0xff]  ;;  %v9124_v9 = vpack.c.bf16 %v1979_v13, %v1978_v30 }
0x1a34   : > { %v5993_v55 = vmul.f32 %v5989_v61, %v5889_v11  ;;  %v9120_v18 = vpack.c.bf16 %v1977_v44, %v1976_v32  ;;  %v1980_v11 = vld [vmem:[%s12920_s8 + $0x20] sm:$0xff]  ;;  %v1981_v61 = vld [vmem:[%s12920_s8 + $0x28] sm:$0xff]  ;;  %s8236_s8 = sshll.u32 %s11192_s11, 4 }
0x1a35   : > { %v9128_v22 = vpack.c.bf16 %v1981_v61, %v1980_v11  ;;  %v2007_v30 = vld [vmem:[#allocation32 + $0x20] sm:$0xff]  ;;  %s12619_s14 = scalar_lea.hbm %s11164_s27, %s8236_s8 }
0x1a36   : > { %8195 = vmatprep.mubr.msk.f32.mxu0 %vm3056_vm9, %v5993_v55  ;;  %vm7452_vm9 = vcmask 392199   ;;  %9121 = vmatprep.subr.bf16.mxu1 %v9120_v18 }
0x1a37   : > { %6089 = vmatmul.mubr.f32.gmra.mrb[34].mxu0 %v5992_v59  ;;  %9123 = vmatpush3.bf16.msra.mxu1 %v9120_v18  ;;  %v2008_v18 = vld [vmem:[#allocation32 + $0x28] sm:$0xff] }
0x1a38   : > { %9125 = vmatprep.subr.bf16.mxu1 %v9124_v9 }
0x1a3b   : > { %9127 = vmatpush3.bf16.msra.mxu1 %v9124_v9  ;;  %v9170_v9 = vpack.c.bf16 %v2008_v18, %v2007_v30  ;;  %v2011_v18 = vld [vmem:[#allocation33 + $0x10] sm:$0xff] }
0x1a3c   : > { %9129 = vmatprep.subr.bf16.mxu1 %v9128_v22 }
0x1a3f   : > { %9131 = vmatpush3.bf16.msra.mxu1 %v9128_v22 }
0x1a40   : > { %9132 = vmatprep.subr.bf16.mxu1 %v10895_v38 }
0x1b06   : > { %v6085_v40 = vpop.f32.mrb[32].mxu0 }
0x1b07   : > { %v6094_v47 = vadd.f32 %v6085_v40, %v12346_v60  ;;  %v6087_v45 = vpop.f32.mrb[33].mxu0 }
0x1b09   : > { %v6104_v1 = vadd.f32 %v8196_v63, %v6094_v47 }
0x1b0a   : > { %v6090_v48 = vpop.f32.mrb[34].mxu0 }
0x1b0b   : > { %v6106_v43 = vsel %vm2250_vm4, %v6104_v1, 0.0  ;;  %v6095_v4 = vadd.f32 %v6090_v48, %v12343_v41  ;;  %v6092_v62 = vpop.f32.mrb[35].mxu0  ;;  %v8199_v48 = vld [vmem:[%s12921_s15] ss:$0 sm:$0xff]  ;;  %s12923_s15 = sld [smem:[#allocation88_spill]] }
0x1b0c   : > { %6107 = vadd.xlane.f32.xlu0 %v6106_v43 }
0x1b0d   : > { %v6105_v7 = vadd.f32 %v8196_v63, %v6095_v4 }
0x1b0f   : > { %v6109_v2 = vsel %vm2250_vm4, %v6105_v7, 0.0 }
0x1b10   : > { %6110 = vadd.xlane.f32.xlu1 %v6109_v2 }
0x1b99   : > { %v6108_v6 = vpop.xlane.xlu0 %6107 }
0x1b9a   : > { %v6112_v24 = vmul.f32 0.020833334, %v6108_v6 }
0x1b9c   : > { %v6114_v34 = vsub.f32 %v6104_v1, %v6112_v24 }
0x1b9d   : > { %v6111_v17 = vpop.xlane.xlu1 %6110 }
0x1b9e   : > { %v6116_v8 = vmul.f32 %v6114_v34, %v6114_v34  ;;  %v6113_v19 = vmul.f32 0.020833334, %v6111_v17  ;;  %v1983_v17 = vld [vmem:[#allocation27 + $0x8] sm:$0xff] }
0x1ba0   : > { %v6118_v60 = vsel %vm2250_vm4, %v6116_v8, 0.0  ;;  %v6115_v15 = vsub.f32 %v6105_v7, %v6113_v19  ;;  %v8200_v7 = vld [vmem:[%s12922_s16] ss:$0 sm:$0xff]  ;;  %s12924_s16 = sld [smem:[#allocation89_spill]] }
0x1ba1   : > { %6119 = vadd.xlane.f32.xlu0 %v6118_v60  ;;  %v1982_v8 = vld [vmem:[#allocation27] sm:$0xff] }
0x1ba2   : > { %v6117_v23 = vmul.f32 %v6115_v15, %v6115_v15 }
0x1ba4   : > { %v6121_v41 = vsel %vm2250_vm4, %v6117_v23, 0.0 }
0x1ba5   : > { %6122 = vadd.xlane.f32.xlu1 %v6121_v41  ;;  %v1984_v41 = vld [vmem:[#allocation27 + $0x10] sm:$0xff] }
0x1c2e   : > { %v6120_v57 = vpop.xlane.xlu0 %6119 }
0x1c2f   : > { %v6124_v35 = vmul.f32 0.020833334, %v6120_v57  ;;  %v1985_v57 = vld [vmem:[#allocation27 + $0x18] sm:$0xff] }
0x1c31   : > { %v6126_v27 = vadd.f32 1e-05, %v6124_v35  ;;  %v9136_v35 = vpack.c.bf16 %v1985_v57, %v1984_v41  ;;  %v1994_v41 = vld [vmem:[#allocation30] sm:$0xff]  ;;  %v1995_v57 = vld [vmem:[#allocation30 + $0x8] sm:$0xff] }
0x1c32   : > { %v6123_v29 = vpop.xlane.xlu1 %6122 }
0x1c33   : > { %9896 = vrsqrt.f32 %v6126_v27  ;;  %v6125_v36 = vmul.f32 0.020833334, %v6123_v29  ;;  %v1986_v27 = vld [vmem:[#allocation27 + $0x20] sm:$0xff]  ;;  %v1987_v29 = vld [vmem:[#allocation27 + $0x28] sm:$0xff] }
0x1c35   : > { %v6127_v39 = vadd.f32 1e-05, %v6125_v36  ;;  %v9139_v36 = vpack.c.bf16 %v1987_v29, %v1986_v27  ;;  %v1996_v27 = vld [vmem:[#allocation30 + $0x10] sm:$0xff]  ;;  %v1997_v29 = vld [vmem:[#allocation30 + $0x18] sm:$0xff] }
0x1c37   : > { %9898 = vrsqrt.f32 %v6127_v39  ;;  %v1988_v39 = vld [vmem:[#allocation29] sm:$0xff] }
0x1c3d   : > { %v9897_v28 = vpop.eup %9896 }
0x1c3e   : > { %v6130_v46 = vmul.f32 %v9897_v28, %v6114_v34  ;;  %v1989_v28 = vld [vmem:[#allocation29 + $0x8] sm:$0xff] }
0x1c40   : > { %v6138_v21 = vmul.f32 %v8197_v0, %v6130_v46  ;;  %v1990_v46 = vld [vmem:[#allocation29 + $0x10] sm:$0xff] }
0x1c41   : > { %v9899_v54 = vpop.eup %9898 }
0x1c42   : > { %v12446_v56 = vadd.f32 %v8198_v50, %v6138_v21  ;;  %v6131_v31 = vmul.f32 %v9899_v54, %v6115_v15  ;;  %v9133_v15 = vpack.c.bf16 %v1983_v17, %v1982_v8  ;;  %v8208_v21 = vld [vmem:[%s12923_s15] ss:$0 sm:$0xff]  ;;  %s12925_s15 = sld [smem:[#allocation92_spill]] }
0x1c44   : > { %v6148_v26 = vsel %vm2250_vm4, %v12446_v56, 0.0  ;;  %7451 = vst.msk [vmem:[%s12782_s3] sm:$0x1] %vm2333_vm5, %v12446_v56  ;;  %v6139_v51 = vmul.f32 %v8197_v0, %v6131_v31  ;;  %vm6192_vm5 = vcmask 1046528   ;;  %v9142_v0 = vpack.c.bf16 %v1989_v28, %v1988_v39  ;;  %v1992_v31 = vld [vmem:[#allocation29 + $0x20] sm:$0xff]  ;;  %v1998_v39 = vld [vmem:[#allocation30 + $0x20] sm:$0xff] }
0x1c45   : > { %7449 = vst.msk [vmem:[%s12455_s23] sm:$0xff] %vm2250_vm4, %v12446_v56  ;;  %6149 = vadd.xlane.f32.xlu0 %v6148_v26  ;;  %v1999_v28 = vld [vmem:[#allocation30 + $0x28] sm:$0xff]  ;;  %s12930_s3 = sld [smem:[#allocation96_spill]] }
0x1c46   : > { %v12460_v52 = vadd.f32 %v8198_v50, %v6139_v51  ;;  %v1991_v50 = vld [vmem:[#allocation29 + $0x18] sm:$0xff]  ;;  %v1993_v51 = vld [vmem:[#allocation29 + $0x28] sm:$0xff] }
0x1c47   : > { %v9145_v26 = vpack.c.bf16 %v1991_v50, %v1990_v46 }
0x1c48   : > { %v6151_v53 = vsel %vm2250_vm4, %v12460_v52, 0.0  ;;  %7450 = vst.msk [vmem:[%s12455_s23 + $0x8] sm:$0xff] %vm2250_vm4, %v12460_v52  ;;  %v2015_v11 = vld [vmem:[%s12925_s15] sm:$0xff]  ;;  %v2016_v61 = vld [vmem:[%s12925_s15 + $0x8] sm:$0xff] }
0x1c49   : > { %7453 = vst.msk [vmem:[%s12781_s4 - $0x7] sm:$0x80] %vm7452_vm9, %v12460_v52  ;;  %6152 = vadd.xlane.f32.xlu1 %v6151_v53  ;;  %v9184_v22 = vpack.c.bf16 %v2016_v61, %v2015_v11  ;;  %v2013_v11 = vld [vmem:[#allocation33 + $0x20] sm:$0xff]  ;;  %v2014_v61 = vld [vmem:[#allocation33 + $0x28] sm:$0xff]  ;;  %s12928_s4 = sld [smem:[#allocation97_spill]] }
0x1cd2   : > { %v6150_v37 = vpop.xlane.xlu0 %6149 }
0x1cd3   : > { %v6154_v42 = vmul.f32 0.020833334, %v6150_v37  ;;  %v2003_v37 = vld [vmem:[#allocation32] sm:$0xff] }
0x1cd5   : > { %v6156_v5 = vsub.f32 %v12446_v56, %v6154_v42  ;;  %v2004_v42 = vld [vmem:[#allocation32 + $0x8] sm:$0xff] }
0x1cd6   : > { %v6153_v33 = vpop.xlane.xlu1 %6152 }
0x1cd7   : > { %v6158_v10 = vmul.f32 %v6156_v5, %v6156_v5  ;;  %v6155_v14 = vmul.f32 0.020833334, %v6153_v33  ;;  %v9148_v33 = vpack.c.bf16 %v1993_v51, %v1992_v31 }
0x1cd9   : > { %v6160_v49 = vsel %vm2250_vm4, %v6158_v10, 0.0  ;;  %v6157_v58 = vsub.f32 %v12460_v52, %v6155_v14 }
0x1cda   : > { %6161 = vadd.xlane.f32.xlu0 %v6160_v49  ;;  %v9162_v49 = vpack.c.bf16 %v2004_v42, %v2003_v37 }
0x1cdb   : > { %v6159_v20 = vmul.f32 %v6157_v58, %v6157_v58 }
0x1cdd   : > { %v6163_v16 = vsel %vm2250_vm4, %v6159_v20, 0.0  ;;  %v2006_v20 = vld [vmem:[#allocation32 + $0x18] sm:$0xff] }
0x1cde   : > { %6164 = vadd.xlane.f32.xlu1 %v6163_v16 }
0x1d67   : > { %v6162_v55 = vpop.xlane.xlu0 %6161 }
0x1d68   : > { %v6166_v59 = vmul.f32 0.020833334, %v6162_v55  ;;  %v2017_v55 = vld [vmem:[%s12925_s15 + $0x10] sm:$0xff] }
0x1d6a   : > { %v6168_v40 = vadd.f32 1e-05, %v6166_v59  ;;  %v2018_v59 = vld [vmem:[%s12925_s15 + $0x18] sm:$0xff] }
0x1d6b   : > { %v6165_v63 = vpop.xlane.xlu1 %6164 }
0x1d6c   : > { %9900 = vrsqrt.f32 %v6168_v40  ;;  %v6167_v47 = vmul.f32 0.020833334, %v6165_v63  ;;  %v9187_v40 = vpack.c.bf16 %v2018_v59, %v2017_v55  ;;  %v2019_v63 = vld [vmem:[%s12925_s15 + $0x20] sm:$0xff] }
0x1d6e   : > { %v6169_v45 = vadd.f32 1e-05, %v6167_v47  ;;  %v2020_v47 = vld [vmem:[%s12925_s15 + $0x28] sm:$0xff] }
0x1d70   : > { %9902 = vrsqrt.f32 %v6169_v45  ;;  %v9190_v45 = vpack.c.bf16 %v2020_v47, %v2019_v63  ;;  %v12543_v63 = vrot.slane %v12460_v52, 1 }
0x1d76   : > { %v9901_v1 = vpop.eup %9900 }
0x1d77   : > { %v6172_v43 = vmul.f32 %v9901_v1, %v6156_v5  ;;  %v8209_v5 = vld [vmem:[%s12924_s16] ss:$0 sm:$0xff]  ;;  %s12926_s16 = sld [smem:[#allocation87_spill]] }
0x1d79   : > { %v6180_v4 = vmul.f32 %v8199_v48, %v6172_v43  ;;  %v6549_v53 = vmul.f32 %v8208_v21, %v6172_v43 }
0x1d7a   : > { %v9903_v62 = vpop.eup %9902 }
0x1d7b   : > { %v6173_v2 = vmul.f32 %v9903_v62, %v6157_v58  ;;  %v6188_v24 = vadd.f32 %v8200_v7, %v6180_v4  ;;  %v6557_v14 = vadd.f32 %v8209_v5, %v6549_v53  ;;  %v2005_v58 = vld [vmem:[#allocation32 + $0x10] sm:$0xff] }
0x1d7c   : > { %v9166_v44 = vpack.c.bf16 %v2006_v20, %v2005_v58  ;;  %v2010_v58 = vld [vmem:[#allocation33 + $0x8] sm:$0xff] }
0x1d7d   : > { %v6181_v6 = vmul.f32 %v8199_v48, %v6173_v2  ;;  %v6193_v60 = vrot.slane %v6188_v24, 1  ;;  %v6550_v54 = vmul.f32 %v8208_v21, %v6173_v2  ;;  %v6561_v32 = vrot.slane %v6557_v14, 1  ;;  %v2009_v14 = vld [vmem:[#allocation33] sm:$0xff] }
0x1d7e   : > { %v9175_v30 = vpack.c.bf16 %v2010_v58, %v2009_v14 }
0x1d7f   : > { %v6189_v34 = vadd.f32 %v8200_v7, %v6181_v6  ;;  %v12498_v10 = vadd.f32 %v8209_v5, %v6550_v54 }
0x1d81   : > { %v6194_v19 = vrot.slane %v6189_v34, 1  ;;  %v6562_v16 = vrot.slane %v12498_v10, 1  ;;  %v6643_v1 = vrot.slane %v12498_v10, 7 }
0x1d83   : > { %v6195_v23 = vsel %vm6192_vm5, %v6193_v60, %v6194_v19  ;;  %v6563_v13 = vsel %vm6192_vm5, %v6561_v32, %v6562_v16 }
0x1d84   : > { %8694 = vmatprep.mubr.msk.f32.mxu1 %vm2250_vm4, %v6195_v23 }
0x1d85   : > { %8695 = vmatmul.mubr.msk.f32.vlgmr.msra.gmra.mrb[44].mxu1 %vm2250_vm4, %v6194_v19 }
0x1d86   : > { %9134 = vmatpush3.bf16.msra.mxu1 %v9133_v15  ;;  %8709 = vmatprep.mubr.msk.f32.mxu1 %vm10896_vm10, %v10883_v12 }
0x1d87   : > { %9135 = vmatprep.subr.bf16.mxu1 %v10895_v38 }
0x1d8a   : > { %9137 = vmatpush3.bf16.msra.mxu1 %v9136_v35  ;;  %v9150_v35 = vpack.c.bf16 %v1995_v57, %v1994_v41  ;;  %v2026_v41 = vld [vmem:[#allocation35 + $0x28] sm:$0xff] }
0x1d8b   : > { %9138 = vmatprep.subr.bf16.mxu1 %v10895_v38 }
0x1d8c   : > { %9151 = vmatprep.subr.bf16.mxu0 %v9150_v35 }
0x1d8d   : > { %9153 = vmatpush3.bf16.msra.mxu0 %v9150_v35 }
0x1d8e   : > { %9140 = vmatpush3.bf16.msra.mxu1 %v9139_v36  ;;  %v9154_v36 = vpack.c.bf16 %v1997_v29, %v1996_v27 }
0x1d8f   : > { %9141 = vmatprep.subr.bf16.mxu1 %v10895_v38 }
0x1d90   : > { %9155 = vmatprep.subr.bf16.mxu0 %v9154_v36 }
0x1d91   : > { %8710 = vmatmul.mubr.msk.f32.vlgmr.msra.gmra.mrb[46].mxu1 %vm2250_vm4, %v6188_v24  ;;  %9157 = vmatpush3.bf16.msra.mxu0 %v9154_v36 }
0x1d92   : > { %9143 = vmatpush3.bf16.msra.mxu1 %v9142_v0  ;;  %8724 = vmatprep.mubr.msk.f32.mxu1 %vm10896_vm10, %v10883_v12  ;;  %v9158_v0 = vpack.c.bf16 %v1999_v28, %v1998_v39 }
0x1d93   : > { %9144 = vmatprep.subr.bf16.mxu1 %v10895_v38 }
0x1d94   : > { %9159 = vmatprep.subr.bf16.mxu0 %v9158_v0 }
0x1d95   : > { %9161 = vmatpush3.bf16.msra.mxu0 %v9158_v0 }
0x1d96   : > { %9146 = vmatpush3.bf16.msra.mxu1 %v9145_v26  ;;  %9174 = vmatprep.subr.bf16.mxu0 %v10895_v38 }
0x1d97   : > { %9147 = vmatprep.subr.bf16.mxu1 %v10895_v38 }
0x1d9a   : > { %9149 = vmatpush3.bf16.msra.mxu1 %v9148_v33 }
0x1d9b   : > { %9163 = vmatprep.subr.bf16.mxu1 %v9162_v49 }
0x1d9d   : > { %8725 = vmatmul.mubr.msk.f32.vlgmr.msra.gmra.mrb[48].mxu1 %vm2250_vm4, %v6188_v24 }
0x1d9e   : > { %9165 = vmatpush3.bf16.msra.mxu1 %v9162_v49  ;;  %8754 = vmatprep.mubr.msk.f32.mxu1 %vm2250_vm4, %v6563_v13  ;;  %v2012_v13 = vld [vmem:[#allocation33 + $0x18] sm:$0xff] }
0x1d9f   : > { %9167 = vmatprep.subr.bf16.mxu1 %v9166_v44 }
0x1da2   : > { %9169 = vmatpush3.bf16.msra.mxu1 %v9166_v44 }
0x1da3   : > { %9171 = vmatprep.subr.bf16.mxu1 %v9170_v9 }
0x1da6   : > { %9173 = vmatpush3.bf16.msra.mxu1 %v9170_v9  ;;  %v9178_v9 = vpack.c.bf16 %v2012_v13, %v2011_v18 }
0x1da7   : > { %9183 = vmatprep.subr.bf16.mxu1 %v10895_v38 }
0x1da9   : > { %8755 = vmatmul.mubr.msk.f32.vlgmr.msra.gmra.mrb[50].mxu1 %vm2250_vm4, %v6562_v16 }
0x1daa   : > { %9185 = vmatpush3.bf16.msra.mxu1 %v9184_v22  ;;  %8784 = vmatprep.mubr.msk.f32.mxu1 %vm10896_vm10, %v10883_v12  ;;  %v9181_v22 = vpack.c.bf16 %v2014_v61, %v2013_v11 }
0x1dab   : > { %9186 = vmatprep.subr.bf16.mxu1 %v10895_v38 }
0x1dae   : > { %9188 = vmatpush3.bf16.msra.mxu1 %v9187_v40  ;;  %v8205_v40 = vld [vmem:[%s12926_s16] ss:$0 sm:$0xff]  ;;  %s12927_s16 = sld [smem:[#allocation94_spill]] }
0x1daf   : > { %9189 = vmatprep.subr.bf16.mxu1 %v10895_v38 }
0x1db2   : > { %9191 = vmatpush3.bf16.msra.mxu1 %v9190_v45 }
0x1db4   : > { %v8214_v58 = vld [vmem:[%s12927_s16] ss:$0 sm:$0xff]  ;;  %s12929_s16 = sld [smem:[#allocation95_spill]] }
0x1db5   : > { %8785 = vmatmul.mubr.msk.f32.vlgmr.msra.gmra.mrb[52].mxu1 %vm2250_vm4, %v6643_v1 }
0x1e58   : > { %v8696_v43 = vpop.f32.mrb[44].mxu1 }
0x1e59   : > { %v6266_v48 = vpop.f32.mrb[45].mxu1 }
0x1e64   : > { %v6343_v4 = vpop.f32.mrb[46].mxu1 }
0x1e65   : > { %v6420_v62 = vrot.slane %v6343_v4, %v12047_v3  ;;  %v8711_v7 = vpop.f32.mrb[47].mxu1  ;;  %v6536_v4 = vrot.slane %v12446_v56, 1 }
0x1e67   : > { %v6421_v2 = vmul.f32 %v6420_v62, %v6266_v48  ;;  %v6422_v6 = vmul.f32 %v8696_v43, %v6420_v62 }
0x1e69   : > { %v6426_v24 = vsel %vm2336_vm6, %v6422_v6, 0.0  ;;  %v6423_v34 = vsel %vm2250_vm4, %v6421_v2, 0.0 }
0x1e6a   : > { %6427 = vadd.xlane.f32.xlu1 %v6426_v24  ;;  %6424 = vadd.xlane.f32.xlu0 %v6423_v34  ;;  %v2021_v24 = vld [vmem:[#allocation35] sm:$0xff]  ;;  %v2022_v34 = vld [vmem:[#allocation35 + $0x8] sm:$0xff] }
0x1e70   : > { %v6413_v8 = vpop.f32.mrb[48].mxu1 }
0x1e71   : > { %v8726_v17 = vpop.f32.mrb[49].mxu1  ;;  %v6444_v49 = vrot.slane %v6413_v8, %v12047_v3  ;;  %v9192_v8 = vpack.c.bf16 %v2022_v34, %v2021_v24 }
0x1e72   : > { %v2023_v17 = vld [vmem:[#allocation35 + $0x10] sm:$0xff] }
0x1e7c   : > { %v12524_v60 = vpop.f32.mrb[50].mxu1 }
0x1e7d   : > { %v12526_v19 = vpop.f32.mrb[51].mxu1 }
0x1e88   : > { %v12528_v15 = vpop.f32.mrb[52].mxu1 }
0x1e89   : > { %v8786_v23 = vpop.f32.mrb[53].mxu1 }
0x1e8a   : > { %v2025_v23 = vld [vmem:[#allocation35 + $0x20] sm:$0xff] }
0x1e8b   : > { %v9200_v57 = vpack.c.bf16 %v2026_v41, %v2025_v23 }
0x1ef7   : > { %v6428_v46 = vpop.xlane.xlu1 %6427  ;;  %v6425_v50 = vpop.xlane.xlu0 %6424 }
0x1ef8   : > { %v6430_v21 = vmul.f32 0.14433756, %v6428_v46  ;;  %v6429_v54 = vmul.f32 0.14433756, %v6425_v50 }
0x1efa   : > { %v6432_v26 = vsub.f32 0.0, %v6430_v21  ;;  %v6431_v31 = vsub.f32 0.0, %v6429_v54 }
0x1efc   : > { %v6435_v51 = vmul.f32 1.442695, %v6432_v26  ;;  %v6433_v53 = vmul.f32 1.442695, %v6431_v31  ;;  %v6813_v31 = vrot.slane %v12528_v15, %v12047_v3 }
0x1efe   : > { %9904 = vpow2.f32 %v6435_v51 }
0x1eff   : > { %9906 = vpow2.f32 %v6433_v53 }
0x1f08   : > { %v9905_v37 = vpop.eup %9904 }
0x1f09   : > { %v9907_v42 = vpop.eup %9906  ;;  %v6438_v5 = vadd.f32 1.0, %v9905_v37 }
0x1f0a   : > { %v6437_v33 = vadd.f32 1.0, %v9907_v42 }
0x1f0b   : > { %9908 = vrcp.f32 %v6438_v5 }
0x1f0c   : > { %9910 = vrcp.f32 %v6437_v33 }
0x1f15   : > { %v9909_v20 = vpop.eup %9908 }
0x1f16   : > { %v9911_v16 = vpop.eup %9910  ;;  %v6446_v32 = vmul.f32 %v9909_v20, %v6444_v49 }
0x1f17   : > { %v6445_v44 = vmul.f32 %v9911_v16, %v6444_v49 }
0x1f19   : > { %8739 = vmatprep.mubr.msk.f32.mxu0 %vm2250_vm4, %v6445_v44 }
0x1f1a   : > { %8740 = vmatmul.mubr.msk.f32.vlgmr.msra.gmra.mrb[36].mxu0 %vm2250_vm4, %v6446_v32 }
0x1f1b   : > { %9176 = vmatpush3.bf16.msra.mxu0 %v9175_v30  ;;  %8769 = vmatprep.mubr.msk.f32.mxu0 %vm10896_vm10, %v10883_v12 }
0x1f1c   : > { %9177 = vmatprep.subr.bf16.mxu0 %v10895_v38 }
0x1f1f   : > { %9179 = vmatpush3.bf16.msra.mxu0 %v9178_v9 }
0x1f20   : > { %9180 = vmatprep.subr.bf16.mxu0 %v10895_v38 }
0x1f23   : > { %9182 = vmatpush3.bf16.msra.mxu0 %v9181_v22 }
0x1f24   : > { %9193 = vmatprep.subr.bf16.mxu0 %v9192_v8 }
0x1f26   : > { %8770 = vmatmul.mubr.msk.f32.vlgmr.msra.gmra.mrb[38].mxu0 %vm2250_vm4, %v6643_v1  ;;  %v6538_v1 = vsel %vm6192_vm5, %v6536_v4, %v12543_v63 }
0x1f27   : > { %9195 = vmatpush3.bf16.msra.mxu0 %v9192_v8 }
0x1fed   : > { %v8741_v55 = vpop.f32.mrb[36].mxu0 }
0x1fee   : > { %v6525_v59 = vpop.f32.mrb[37].mxu0  ;;  %v6531_v47 = vadd.f32 %v8741_v55, %v8205_v40 }
0x1fef   : > { %v6526_v45 = vadd.f32 %v8205_v40, %v6525_v59  ;;  %v2030_v59 = vld [vmem:[%s12928_s4] sm:$0xff]  ;;  %v2031_v40 = vld [vmem:[%s12928_s4 + $0x8] sm:$0xff] }
0x1ff0   : > { %v6542_v62 = vadd.f32 %v12543_v63, %v6531_v47  ;;  %v2033_v47 = vld [vmem:[%s12928_s4 + $0x18] sm:$0xff] }
0x1ff1   : > { %v6541_v7 = vadd.f32 %v6538_v1, %v6526_v45 }
0x1ff2   : > { %v6908_v6 = vsel %vm2336_vm6, %v6542_v62, 0.0 }
0x1ff3   : > { %v6905_v56 = vsel %vm2250_vm4, %v6541_v7, 0.0 }
0x1ff9   : > { %v6712_v12 = vpop.f32.mrb[38].mxu0 }
0x1ffa   : > { %v6789_v43 = vrot.slane %v6712_v12, %v12047_v3  ;;  %v8771_v48 = vpop.f32.mrb[39].mxu0  ;;  %v2032_v12 = vld [vmem:[%s12928_s4 + $0x10] sm:$0xff] }
0x1ffb   : > { %v9208_v45 = vpack.c.bf16 %v2033_v47, %v2032_v12  ;;  %v2035_v48 = vld [vmem:[%s12928_s4 + $0x28] sm:$0xff] }
0x1ffc   : > { %v6790_v38 = vmul.f32 %v6789_v43, %v12526_v19  ;;  %v6791_v10 = vmul.f32 %v12524_v60, %v6789_v43  ;;  %v2024_v60 = vld [vmem:[#allocation35 + $0x18] sm:$0xff] }
0x1ffd   : > { %v9196_v19 = vpack.c.bf16 %v2024_v60, %v2023_v17  ;;  %v2034_v43 = vld [vmem:[%s12928_s4 + $0x20] sm:$0xff]  ;;  %s12931_s4 = sld [smem:[#allocation103_spill]] }
0x1ffe   : > { %v6795_v52 = vsel %vm2336_vm6, %v6791_v10, 0.0  ;;  %v6792_v2 = vsel %vm2250_vm4, %v6790_v38, 0.0  ;;  %v9212_v4 = vpack.c.bf16 %v2035_v48, %v2034_v43 }
0x1fff   : > { %6796 = vadd.xlane.f32.xlu1 %v6795_v52  ;;  %6793 = vadd.xlane.f32.xlu0 %v6792_v2 }
0x2000   : > { %9197 = vmatprep.subr.bf16.mxu0 %v9196_v19 }
0x2001   : > { %9199 = vmatpush3.bf16.msra.mxu0 %v9196_v19 }
0x2002   : > { %9201 = vmatprep.subr.bf16.mxu0 %v9200_v57 }
0x2003   : > { %6909 = vadd.xlane.f32.xlu1 %v6908_v6  ;;  %6906 = vadd.xlane.f32.xlu0 %v6905_v56 }
0x2005   : > { %9203 = vmatpush3.bf16.msra.mxu0 %v9200_v57  ;;  %v8217_v57 = vld [vmem:[%s12929_s16] ss:$0 sm:$0xff]  ;;  %s12933_s16 = sld [smem:[#allocation105_spill]] }
0x208c   : > { %v6797_v35 = vpop.xlane.xlu1 %6796  ;;  %v6794_v27 = vpop.xlane.xlu0 %6793 }
0x208d   : > { %v6799_v29 = vmul.f32 0.14433756, %v6797_v35  ;;  %v6798_v36 = vmul.f32 0.14433756, %v6794_v27 }
0x208f   : > { %v6801_v39 = vsub.f32 0.0, %v6799_v29  ;;  %v6800_v28 = vsub.f32 0.0, %v6798_v36  ;;  %v8218_v36 = vld [vmem:[%s12930_s3] ss:$0 sm:$0xff]  ;;  %s12932_s3 = sld [smem:[#allocation98_spill]] }
0x2090   : > { %v6910_v5 = vpop.xlane.xlu1 %6909  ;;  %v6907_v33 = vpop.xlane.xlu0 %6906 }
0x2091   : > { %v6804_v0 = vmul.f32 1.442695, %v6801_v39  ;;  %v6802_v46 = vmul.f32 1.442695, %v6800_v28  ;;  %v6912_v49 = vmul.f32 0.020833334, %v6910_v5 }
0x2092   : > { %v6911_v14 = vmul.f32 0.020833334, %v6907_v33 }
0x2093   : > { %9912 = vpow2.f32 %v6804_v0  ;;  %v6914_v16 = vsub.f32 %v6542_v62, %v6912_v49 }
0x2094   : > { %9914 = vpow2.f32 %v6802_v46  ;;  %v6913_v3 = vsub.f32 %v6541_v7, %v6911_v14 }
0x2095   : > { %v6916_v9 = vmul.f32 %v6914_v16, %v6914_v16  ;;  %v8219_v12 = vld [vmem:[%s12932_s3] ss:$0 sm:$0xff]  ;;  %s12934_s3 = sld [smem:[#allocation104_spill]] }
0x2096   : > { %v6915_v61 = vmul.f32 %v6913_v3, %v6913_v3 }
0x2097   : > { %v6920_v22 = vsel %vm2336_vm6, %v6916_v9, 0.0 }
0x2098   : > { %v6917_v55 = vsel %vm2250_vm4, %v6915_v61, 0.0 }
0x209d   : > { %v9913_v50 = vpop.eup %9912 }
0x209e   : > { %v9915_v21 = vpop.eup %9914  ;;  %v6807_v54 = vadd.f32 1.0, %v9913_v50  ;;  %v2044_v50 = vld [vmem:[%s12931_s4] sm:$0xff] }
0x209f   : > { %v6806_v26 = vadd.f32 1.0, %v9915_v21  ;;  %v2045_v21 = vld [vmem:[%s12931_s4 + $0x8] sm:$0xff] }
0x20a0   : > { %9916 = vrcp.f32 %v6807_v54  ;;  %v9224_v54 = vpack.c.bf16 %v2045_v21, %v2044_v50 }
0x20a1   : > { %9918 = vrcp.f32 %v6806_v26  ;;  %v2046_v26 = vld [vmem:[%s12931_s4 + $0x10] sm:$0xff] }
0x20aa   : > { %v9917_v51 = vpop.eup %9916 }
0x20ab   : > { %v9919_v53 = vpop.eup %9918  ;;  %v6815_v37 = vmul.f32 %v9917_v51, %v6813_v31 }
0x20ac   : > { %v6814_v42 = vmul.f32 %v9919_v53, %v6813_v31  ;;  %v2047_v31 = vld [vmem:[%s12931_s4 + $0x18] sm:$0xff]  ;;  %v2048_v53 = vld [vmem:[%s12931_s4 + $0x20] sm:$0xff] }
0x20ad   : > { %v9228_v51 = vpack.c.bf16 %v2047_v31, %v2046_v26 }
0x20ae   : > { %8799 = vmatprep.mubr.msk.f32.mxu0 %vm2250_vm4, %v6814_v42 }
0x20af   : > { %8800 = vmatmul.mubr.msk.f32.vlgmr.msra.gmra.mrb[40].mxu0 %vm2250_vm4, %v6815_v37  ;;  %v2049_v37 = vld [vmem:[%s12931_s4 + $0x28] sm:$0xff]  ;;  %s12936_s4 = sld [smem:[#allocation107_spill]] }
0x20b0   : > { %v9232_v42 = vpack.c.bf16 %v2049_v37, %v2048_v53 }
0x20b5   : > { %s1952_s6 = scalar_lea.vmem %s12936_s4, %s11700_s7  ;;  %s12938_s4 = sand.u32 1, %s11192_s11  }
0x20b6   : > { %s12628_s15 = scalar_lea.sflag [#allocation43], %s12938_s4 }
0x2182   : > { %v8801_v20 = vpop.f32.mrb[40].mxu0 }
0x2183   : > { %v6900_v32 = vadd.f32 %v8801_v20, %v8214_v58  ;;  %v6894_v44 = vpop.f32.mrb[41].mxu0  ;;  %v2037_v20 = vld [vmem:[#allocation36] sm:$0xff] }
0x2184   : > { %v6895_v15 = vadd.f32 %v8214_v58, %v6894_v44 }
0x2185   : > { %v6904_v30 = vadd.f32 %v6900_v32, %v12543_v63  ;;  %v9204_v63 = vpack.c.bf16 %v2031_v40, %v2030_v59 }
0x2186   : > { %v6903_v18 = vadd.f32 %v6895_v15, %v6538_v1  ;;  %v2040_v15 = vld [vmem:[#allocation36 + $0x18] sm:$0xff] }
0x2187   : > { %v7180_v13 = vsel %vm2336_vm6, %v6904_v30, 0.0  ;;  %9205 = vmatprep.subr.bf16.mxu1 %v9204_v63 }
0x2188   : > { %7181 = vadd.xlane.f32.xlu1 %v7180_v13  ;;  %v7177_v11 = vsel %vm2250_vm4, %v6903_v18, 0.0  ;;  %9207 = vmatpush3.bf16.msra.mxu1 %v9204_v63  ;;  %v8225_v13 = vld [vmem:[#allocation38] ss:$0 sm:$0xff] }
0x2189   : > { %7178 = vadd.xlane.f32.xlu0 %v7177_v11  ;;  %9209 = vmatprep.subr.bf16.mxu1 %v9208_v45 }
0x218c   : > { %6921 = vadd.xlane.f32.xlu1 %v6920_v22  ;;  %9211 = vmatpush3.bf16.msra.mxu1 %v9208_v45  ;;  %v8226_v22 = vld [vmem:[#allocation39] ss:$0 sm:$0xff] }
0x218d   : > { %6918 = vadd.xlane.f32.xlu0 %v6917_v55  ;;  %9213 = vmatprep.subr.bf16.mxu1 %v9212_v4 }
0x2190   : > { %9215 = vmatpush3.bf16.msra.mxu1 %v9212_v4 }
0x2191   : > { %9225 = vmatprep.subr.bf16.mxu1 %v9224_v54 }
0x2215   : > { %v7182_v38 = vpop.xlane.xlu1 %7181 }
0x2216   : > { %v7184_v10 = vmul.f32 0.020833334, %v7182_v38  ;;  %v7179_v1 = vpop.xlane.xlu0 %7178 }
0x2217   : > { %v7183_v62 = vmul.f32 0.020833334, %v7179_v1 }
0x2218   : > { %v12572_v7 = vsub.f32 %v6904_v30, %v7184_v10 }
0x2219   : > { %v12574_v52 = vsub.f32 %v6903_v18, %v7183_v62  ;;  %v6922_v2 = vpop.xlane.xlu1 %6921 }
0x221a   : > { %v6924_v6 = vmul.f32 0.020833334, %v6922_v2  ;;  %v6919_v56 = vpop.xlane.xlu0 %6918  ;;  %v7188_v24 = vmul.f32 %v12572_v7, %v12572_v7 }
0x221b   : > { %v6923_v34 = vmul.f32 0.020833334, %v6919_v56  ;;  %v7187_v8 = vmul.f32 %v12574_v52, %v12574_v52 }
0x221c   : > { %v6926_v17 = vadd.f32 1e-05, %v6924_v6  ;;  %v7192_v60 = vsel %vm2336_vm6, %v7188_v24, 0.0 }
0x221d   : > { %v6925_v19 = vadd.f32 1e-05, %v6923_v34  ;;  %7193 = vadd.xlane.f32.xlu1 %v7192_v60  ;;  %v7189_v23 = vsel %vm2250_vm4, %v7187_v8, 0.0 }
0x221e   : > { %9920 = vrsqrt.f32 %v6926_v17  ;;  %7190 = vadd.xlane.f32.xlu0 %v7189_v23 }
0x221f   : > { %9922 = vrsqrt.f32 %v6925_v19 }
0x2228   : > { %v9921_v41 = vpop.eup %9920 }
0x2229   : > { %v9923_v35 = vpop.eup %9922  ;;  %v6930_v27 = vmul.f32 %v9921_v41, %v6914_v16  ;;  %v2038_v16 = vld [vmem:[#allocation36 + $0x8] sm:$0xff] }
0x222a   : > { %v6929_v29 = vmul.f32 %v9923_v35, %v6913_v3  ;;  %v9216_v44 = vpack.c.bf16 %v2038_v16, %v2037_v20  ;;  %v2039_v3 = vld [vmem:[#allocation36 + $0x10] sm:$0xff] }
0x222b   : > { %v6938_v39 = vmul.f32 %v8217_v57, %v6930_v27  ;;  %v9220_v30 = vpack.c.bf16 %v2040_v15, %v2039_v3 }
0x222c   : > { %v6937_v28 = vmul.f32 %v8217_v57, %v6929_v29  ;;  %9217 = vmatprep.subr.bf16.mxu0 %v9216_v44 }
0x222d   : > { %v6946_v46 = vadd.f32 %v8218_v36, %v6938_v39  ;;  %9219 = vmatpush3.bf16.msra.mxu0 %v9216_v44 }
0x222e   : > { %v6945_v0 = vadd.f32 %v8218_v36, %v6937_v28  ;;  %9221 = vmatprep.subr.bf16.mxu0 %v9220_v30 }
0x2230   : > { %8814 = vmatprep.mubr.msk.f32.mxu1 %vm2250_vm4, %v6945_v0 }
0x2231   : > { %8815 = vmatmul.mubr.msk.f32.vlgmr.msra.gmra.mrb[54].mxu1 %vm2250_vm4, %v6946_v46  ;;  %9223 = vmatpush3.bf16.msra.mxu0 %v9220_v30 }
0x2232   : > { %9227 = vmatpush3.bf16.msra.mxu1 %v9224_v54 }
0x2233   : > { %9229 = vmatprep.subr.bf16.mxu1 %v9228_v51 }
0x2236   : > { %9231 = vmatpush3.bf16.msra.mxu1 %v9228_v51 }
0x2237   : > { %9233 = vmatprep.subr.bf16.mxu1 %v9232_v42 }
0x223a   : > { %9235 = vmatpush3.bf16.msra.mxu1 %v9232_v42 }
0x22aa   : > { %v7194_v5 = vpop.xlane.xlu1 %7193 }
0x22ab   : > { %v7196_v33 = vmul.f32 0.020833334, %v7194_v5  ;;  %v7191_v49 = vpop.xlane.xlu0 %7190 }
0x22ac   : > { %v7195_v14 = vmul.f32 0.020833334, %v7191_v49 }
0x22ad   : > { %v7198_v58 = vadd.f32 1e-05, %v7196_v33 }
0x22ae   : > { %v7197_v32 = vadd.f32 1e-05, %v7195_v14 }
0x22af   : > { %9924 = vrsqrt.f32 %v7198_v58 }
0x22b0   : > { %9926 = vrsqrt.f32 %v7197_v32 }
0x22b9   : > { %v9925_v18 = vpop.eup %9924 }
0x22ba   : > { %v9927_v9 = vpop.eup %9926  ;;  %v7202_v11 = vmul.f32 %v9925_v18, %v12572_v7 }
0x22bb   : > { %v7201_v61 = vmul.f32 %v9927_v9, %v12574_v52  ;;  %v2051_v9 = vld [vmem:[%s12933_s16] sm:$0xff] }
0x22bc   : > { %v7210_v55 = vmul.f32 %v8225_v13, %v7202_v11  ;;  %v2052_v11 = vld [vmem:[%s12933_s16 + $0x8] sm:$0xff] }
0x22bd   : > { %v7209_v59 = vmul.f32 %v8225_v13, %v7201_v61  ;;  %v9236_v61 = vpack.c.bf16 %v2052_v11, %v2051_v9 }
0x22be   : > { %v7218_v63 = vadd.f32 %v8226_v22, %v7210_v55  ;;  %v2054_v55 = vld [vmem:[%s12933_s16 + $0x18] sm:$0xff] }
0x22bf   : > { %v7217_v40 = vadd.f32 %v8226_v22, %v7209_v59  ;;  %9237 = vmatprep.subr.bf16.mxu0 %v9236_v61  ;;  %v2053_v22 = vld [vmem:[%s12933_s16 + $0x10] sm:$0xff]  ;;  %s10620_s16 = scalar_lea.vmem %s12621_s13, 16 }
0x22c0   : > { %v9240_v59 = vpack.c.bf16 %v2054_v55, %v2053_v22  ;;  %p10621_p11 = scmp.ne.s32.totalorder %s12621_s13, %s10620_s16 }
0x22c1   : > { %8840 = vmatprep.mubr.msk.f32.mxu1 %vm2250_vm4, %v7217_v40  ;;  %v8227_v40 = vld [vmem:[%s12934_s3] ss:$0 sm:$0xff]  ;;  %s12935_s3 = sld [smem:[#allocation100_spill]] }
0x22c2   : > { %8841 = vmatmul.mubr.msk.f32.vlgmr.msra.gmra.mrb[56].mxu1 %vm2250_vm4, %v7218_v63  ;;  %p10622_p8 = pnand %p10621_p11, %p12939_p7 }
0x22c4   : > { %p10623_p9 = pneg %p10622_p8 }
0x2304   : > { %v8816_v47 = vpop.f32.mrb[54].mxu1 }
0x2305   : > { %v7031_v45 = vadd.f32 %v8816_v47, %v8219_v12  ;;  %v7025_v43 = vpop.f32.mrb[55].mxu1 }
0x2306   : > { %v7026_v48 = vadd.f32 %v8219_v12, %v7025_v43 }
0x2307   : > { %v7037_v4 = vmul.f32 0.70710677, %v7031_v45  ;;  %v7035_v30 = vmul.f32 0.5, %v7031_v45 }
0x2308   : > { %v7036_v38 = vmul.f32 0.70710677, %v7026_v48  ;;  %v7034_v3 = vmul.f32 0.5, %v7026_v48 }
0x2309   : > { %v7043_v10 = vand.u32 2147483647, %v7037_v4  ;;  %vm7039_vm4 = vcmp.ge.f32.partialorder %v7037_v4, 0.0 }
0x230a   : > { %v7042_v1 = vand.u32 2147483647, %v7036_v38  ;;  %vm7038_vm6 = vcmp.ge.f32.partialorder %v7036_v38, 0.0  ;;  %v7041_v14 = vsel %vm7039_vm4, 1.0, %v10882_v25 }
0x230b   : > { %v7045_v62 = vmul.f32 0.3275911, %v7043_v10  ;;  %v7071_v6 = vsub.f32 0.0, %v7043_v10  ;;  %v7040_v16 = vsel %vm7038_vm6, 1.0, %v10882_v25 }
0x230c   : > { %v7044_v7 = vmul.f32 0.3275911, %v7042_v1  ;;  %v7070_v56 = vsub.f32 0.0, %v7042_v1 }
0x230d   : > { %v7047_v52 = vadd.f32 1.0, %v7045_v62  ;;  %v7073_v34 = vmul.f32 %v7071_v6, %v7043_v10 }
0x230e   : > { %v7046_v2 = vadd.f32 1.0, %v7044_v7  ;;  %v7072_v60 = vmul.f32 %v7070_v56, %v7042_v1 }
0x230f   : > { %9928 = vrcp.f32 %v7047_v52  ;;  %v7076_v41 = vmul.f32 1.442695, %v7073_v34 }
0x2310   : > { %9930 = vrcp.f32 %v7046_v2  ;;  %v7074_v27 = vmul.f32 1.442695, %v7072_v60 }
0x2311   : > { %9932 = vpow2.f32 %v7076_v41 }
0x2312   : > { %9934 = vpow2.f32 %v7074_v27 }
0x2319   : > { %v9929_v24 = vpop.eup %9928 }
0x231a   : > { %v9931_v8 = vpop.eup %9930  ;;  %v7053_v17 = vmul.f32 1.0614054, %v9929_v24 }
0x231b   : > { %v7052_v19 = vmul.f32 1.0614054, %v9931_v8  ;;  %v9933_v53 = vpop.eup %9932 }
0x231c   : > { %v7055_v23 = vadd.f32 -1.4531521, %v7053_v17  ;;  %v9935_v42 = vpop.eup %9934 }
0x231d   : > { %v7054_v57 = vadd.f32 -1.4531521, %v7052_v19 }
0x231e   : > { %v7057_v35 = vmul.f32 %v9929_v24, %v7055_v23 }
0x231f   : > { %v7056_v29 = vmul.f32 %v9931_v8, %v7054_v57 }
0x2320   : > { %v7059_v36 = vadd.f32 1.4214138, %v7057_v35 }
0x2321   : > { %v7058_v39 = vadd.f32 1.4214138, %v7056_v29 }
0x2322   : > { %v7061_v28 = vmul.f32 %v9929_v24, %v7059_v36 }
0x2323   : > { %v7060_v0 = vmul.f32 %v9931_v8, %v7058_v39 }
0x2324   : > { %v7063_v46 = vadd.f32 -0.28449672, %v7061_v28 }
0x2325   : > { %v7062_v50 = vadd.f32 -0.28449672, %v7060_v0 }
0x2326   : > { %v7065_v21 = vmul.f32 %v9929_v24, %v7063_v46 }
0x2327   : > { %v7064_v54 = vmul.f32 %v9931_v8, %v7062_v50 }
0x2328   : > { %v7067_v26 = vadd.f32 0.2548296, %v7065_v21 }
0x2329   : > { %v7066_v31 = vadd.f32 0.2548296, %v7064_v54 }
0x232a   : > { %v7069_v51 = vmul.f32 %v9929_v24, %v7067_v26 }
0x232b   : > { %v7068_v37 = vmul.f32 %v9931_v8, %v7066_v31 }
0x232c   : > { %v7079_v5 = vmul.f32 %v9933_v53, %v7069_v51 }
0x232d   : > { %v7078_v33 = vmul.f32 %v9935_v42, %v7068_v37 }
0x232e   : > { %v7081_v49 = vsub.f32 1.0, %v7079_v5 }
0x232f   : > { %v7080_v58 = vsub.f32 1.0, %v7078_v33 }
0x2330   : > { %v7083_v20 = vmul.f32 %v7081_v49, %v7041_v14 }
0x2331   : > { %v7082_v32 = vmul.f32 %v7080_v58, %v7040_v16 }
0x2332   : > { %v7085_v44 = vadd.f32 1.0, %v7083_v20 }
0x2333   : > { %v7084_v15 = vadd.f32 1.0, %v7082_v32 }
0x2334   : > { %v7087_v13 = vmul.f32 %v7085_v44, %v7035_v30 }
0x2335   : > { %v7086_v18 = vmul.f32 %v7084_v15, %v7034_v3 }
0x2337   : > { %8825 = vmatprep.mubr.msk.f32.mxu0 %vm2058_vm0, %v7086_v18  ;;  %v8222_v18 = vld [vmem:[%s12935_s3] ss:$0 sm:$0xff]  ;;  %s12624_s3 = scalar_lea.hbm %s11169_s12, %s8236_s8 }
0x2338   : > { %8826 = vmatmul.mubr.msk.f32.vlgmr.msra.gmra.mrb[42].mxu0 %vm2058_vm0, %v7087_v13 }
0x2339   : > { %9239 = vmatpush3.bf16.msra.mxu0 %v9236_v61 }
0x233a   : > { %9241 = vmatprep.subr.bf16.mxu0 %v9240_v59 }
0x233d   : > { %9243 = vmatpush3.bf16.msra.mxu0 %v9240_v59 }
0x2395   : > { %v8842_v63 = vpop.f32.mrb[56].mxu1 }
0x2396   : > { %v7303_v12 = vadd.f32 %v8842_v63, %v8227_v40  ;;  %v7297_v47 = vpop.f32.mrb[57].mxu1 }
0x2397   : > { %v7298_v45 = vadd.f32 %v8227_v40, %v7297_v47 }
0x2398   : > { %v7309_v43 = vmul.f32 0.70710677, %v7303_v12  ;;  %v7307_v3 = vmul.f32 0.5, %v7303_v12 }
0x2399   : > { %v7308_v48 = vmul.f32 0.70710677, %v7298_v45  ;;  %v7306_v32 = vmul.f32 0.5, %v7298_v45 }
0x239a   : > { %v7315_v4 = vand.u32 2147483647, %v7309_v43  ;;  %vm7311_vm11 = vcmp.ge.f32.partialorder %v7309_v43, 0.0 }
0x239b   : > { %v7314_v38 = vand.u32 2147483647, %v7308_v48  ;;  %vm7310_vm12 = vcmp.ge.f32.partialorder %v7308_v48, 0.0  ;;  %v7313_v33 = vsel %vm7311_vm11, 1.0, %v10882_v25 }
0x239c   : > { %v7317_v10 = vmul.f32 0.3275911, %v7315_v4  ;;  %v7343_v52 = vsub.f32 0.0, %v7315_v4  ;;  %v7312_v58 = vsel %vm7310_vm12, 1.0, %v10882_v25 }
0x239d   : > { %v7316_v1 = vmul.f32 0.3275911, %v7314_v38  ;;  %v7342_v2 = vsub.f32 0.0, %v7314_v38 }
0x239e   : > { %v7319_v62 = vadd.f32 1.0, %v7317_v10  ;;  %v7345_v56 = vmul.f32 %v7343_v52, %v7315_v4 }
0x239f   : > { %v7318_v7 = vadd.f32 1.0, %v7316_v1  ;;  %v7344_v8 = vmul.f32 %v7342_v2, %v7314_v38 }
0x23a0   : > { %9936 = vrcp.f32 %v7319_v62  ;;  %v7348_v19 = vmul.f32 1.442695, %v7345_v56 }
0x23a1   : > { %9938 = vrcp.f32 %v7318_v7  ;;  %v7346_v57 = vmul.f32 1.442695, %v7344_v8 }
0x23a2   : > { %9940 = vpow2.f32 %v7348_v19 }
0x23a3   : > { %9942 = vpow2.f32 %v7346_v57 }
0x23aa   : > { %v9937_v6 = vpop.eup %9936 }
0x23ab   : > { %v9939_v24 = vpop.eup %9938  ;;  %v7325_v34 = vmul.f32 1.0614054, %v9937_v6 }
0x23ac   : > { %v7324_v17 = vmul.f32 1.0614054, %v9939_v24  ;;  %v9941_v31 = vpop.eup %9940 }
0x23ad   : > { %v7327_v60 = vadd.f32 -1.4531521, %v7325_v34  ;;  %v9943_v53 = vpop.eup %9942 }
0x23ae   : > { %v7326_v23 = vadd.f32 -1.4531521, %v7324_v17 }
0x23af   : > { %v7329_v41 = vmul.f32 %v9937_v6, %v7327_v60 }
0x23b0   : > { %v7328_v35 = vmul.f32 %v9939_v24, %v7326_v23 }
0x23b1   : > { %v7331_v27 = vadd.f32 1.4214138, %v7329_v41 }
0x23b2   : > { %v7330_v29 = vadd.f32 1.4214138, %v7328_v35 }
0x23b3   : > { %v7333_v36 = vmul.f32 %v9937_v6, %v7331_v27 }
0x23b4   : > { %v7332_v39 = vmul.f32 %v9939_v24, %v7330_v29 }
0x23b5   : > { %v7335_v28 = vadd.f32 -0.28449672, %v7333_v36 }
0x23b6   : > { %v7334_v0 = vadd.f32 -0.28449672, %v7332_v39 }
0x23b7   : > { %v7337_v46 = vmul.f32 %v9937_v6, %v7335_v28 }
0x23b8   : > { %v7336_v50 = vmul.f32 %v9939_v24, %v7334_v0 }
0x23b9   : > { %v7339_v21 = vadd.f32 0.2548296, %v7337_v46 }
0x23ba   : > { %v7338_v54 = vadd.f32 0.2548296, %v7336_v50 }
0x23bb   : > { %v7341_v26 = vmul.f32 %v9937_v6, %v7339_v21 }
0x23bc   : > { %v7340_v51 = vmul.f32 %v9939_v24, %v7338_v54 }
0x23bd   : > { %v7351_v37 = vmul.f32 %v9941_v31, %v7341_v26 }
0x23be   : > { %v7350_v42 = vmul.f32 %v9943_v53, %v7340_v51 }
0x23bf   : > { %v7353_v5 = vsub.f32 1.0, %v7351_v37 }
0x23c0   : > { %v7352_v49 = vsub.f32 1.0, %v7350_v42 }
0x23c1   : > { %v7355_v14 = vmul.f32 %v7353_v5, %v7313_v33 }
0x23c2   : > { %v7354_v20 = vmul.f32 %v7352_v49, %v7312_v58 }
0x23c3   : > { %v7357_v16 = vadd.f32 1.0, %v7355_v14 }
0x23c4   : > { %v7356_v44 = vadd.f32 1.0, %v7354_v20 }
0x23c5   : > { %v7359_v30 = vmul.f32 %v7357_v16, %v7307_v3 }
0x23c6   : > { %v7358_v15 = vmul.f32 %v7356_v44, %v7306_v32 }
0x23c8   : > { %8851 = vmatprep.mubr.msk.f32.mxu0 %vm2058_vm0, %v7358_v15 }
0x23c9   : > { %8852 = vmatmul.mubr.msk.f32.vlgmr.msra.gmra.mrb[44].mxu0 %vm2058_vm0, %v7359_v30 }
0x240b   : > { %v8827_v25 = vpop.f32.mrb[42].mxu0 }
0x240c   : > { %v7172_v13 = vadd.f32 %v8827_v25, %v8222_v18  ;;  %v7166_v9 = vpop.f32.mrb[43].mxu0 }
0x240d   : > { %v7167_v11 = vadd.f32 %v8222_v18, %v7166_v9 }
0x240e   : > { %7176 = vst.msk [vmem:[%s1952_s6 + $0x8] sm:$0x3f] %vm2062_vm1, %v7172_v13 }
0x240f   : > { %7175 = vst.msk [vmem:[%s1952_s6] sm:$0xff] %vm2058_vm0, %v7167_v11  ;;  %s10897_s6 = smov [#allocation42]  }
0x2410   : > { %s10624_s18 = sshll.u32 %s10897_s6, 4  ;;  %s10625_s18 = int_to_ptr.vmem [resolvable:$false] %s10624_s18 }
0x2411   : > { %s10626_s9 = scalar_lea.vmem %s10625_s18, 32  ;;  %p10627_p4 = scmp.lt.s32.totalorder %s12621_s13, %s10625_s18 }
0x2412   : > { %p10628_p0 = scmp.lt.s32.totalorder %s10626_s9, %s10620_s16 }
0x2414   : > { %p10629_p2 = por %p10628_p0, %p10627_p4 }
0x2416   : > { %p10630_p10 = pnand %p10629_p2, %p10623_p9 }
0x2418   : > { %10633 = shalt.err (!%p10630_p10)
}
0x2419   : > { %s10634_s8 = scalar_lea.hbm %s12619_s14, 16  ;;  %s10638_s4 = scalar_lea.hbm %s11164_s27, 32 }
0x241a   : > { %p10635_p3 = scmp.ne.s32.totalorder %s12619_s14, %s10634_s8  ;;  %p10639_p1 = scmp.lt.u32.totalorder %s12619_s14, %s11164_s27 }
0x241b   : > { %p10640_p5 = scmp.lt.u32.totalorder %s10638_s4, %s10634_s8  ;;  %p10642_p11 = scmp.lt.u32.totalorder %s10634_s8, %s12619_s14 }
0x241c   : > { %p10636_p12 = pnand %p10635_p3, %p12939_p7 }
0x241d   : > { %p10641_p6 = por %p10640_p5, %p10639_p1 }
0x241e   : > { %p10637_p13 = pneg %p10636_p12 }
0x241f   : > { %p10643_p8 = por %p10642_p11, %p10641_p6 }
0x2421   : > { %p10644_p9 = pnand %p10643_p8, %p10637_p13 }
0x2423   : > { %10647 = shalt.err (!%p10644_p9)
}
0x2424   : > { %s12940_s18 = sld [smem:[#allocation109_spill]]  ;;  %s8243_s16 = sshll.u32 %s11192_s11, 8 }
0x2425   : > { %9337 = dma.vmem_to_hbm [thread:$0]  (%p12939_p7), %s12621_s13, 16, %s12619_s14, %s12628_s15  }
0x2426   : > { %s7492_s9 = sshll.u32 %s12455_s23, 4  ;;  %s7465_s8 = scalar_lea.sflag [#allocation5], %s11634_s21  ;;  %s12653_s9 = int_to_ptr.vmem [resolvable:$true] %s7492_s9 }
0x2427   : > { %s10648_s4 = scalar_lea.vmem %s12653_s9, 256  ;;  %s10898_s19 = smov [#allocation41]  }
0x2428   : > { %p10649_p4 = scmp.ne.s32.totalorder %s12653_s9, %s10648_s4  ;;  %s10652_s22 = sshll.u32 %s10898_s19, 4  ;;  %s10653_s22 = int_to_ptr.vmem [resolvable:$false] %s10652_s22 }
0x2429   : > { %s10654_s24 = scalar_lea.vmem %s10653_s22, 512  ;;  %p10655_p10 = scmp.lt.s32.totalorder %s12653_s9, %s10653_s22 }
0x242a   : > { %s12650_s6 = scalar_lea.hbm %s12940_s18, %s8243_s16  ;;  %p10650_p0 = pnand %p10649_p4, %p12939_p7 }
0x242b   : > { %p10656_p3 = scmp.lt.s32.totalorder %s10654_s24, %s10648_s4 }
0x242c   : > { %p10651_p2 = pneg %p10650_p0 }
0x242d   : > { %p10657_p12 = por %p10656_p3, %p10655_p10 }
0x242f   : > { %p10658_p13 = pnand %p10657_p12, %p10651_p2 }
0x2431   : > { %10661 = shalt.err (!%p10658_p13)
}
0x2432   : > { %s10662_s11 = scalar_lea.hbm %s12650_s6, 256  ;;  %s10666_s13 = scalar_lea.hbm %s12940_s18, 512 }
0x2433   : > { %p10663_p1 = scmp.ne.s32.totalorder %s12650_s6, %s10662_s11  ;;  %p10667_p11 = scmp.lt.u32.totalorder %s12650_s6, %s12940_s18 }
0x2434   : > { %p10668_p8 = scmp.lt.u32.totalorder %s10666_s13, %s10662_s11  ;;  %p10670_p4 = scmp.lt.u32.totalorder %s10662_s11, %s12650_s6 }
0x2435   : > { %p10664_p5 = pnand %p10663_p1, %p12939_p7 }
0x2436   : > { %p10669_p9 = por %p10668_p8, %p10667_p11 }
0x2437   : > { %p10665_p6 = pneg %p10664_p5 }
0x2438   : > { %p10671_p0 = por %p10670_p4, %p10669_p9 }
0x243a   : > { %p10672_p2 = pnand %p10671_p0, %p10665_p6 }
0x243c   : > { %10675 = shalt.err (!%p10672_p2)
}
0x243d   : > { %s10899_s24 = smov 128   ;;  %s12941_s22 = scalar_lea.vmem [#allocation44], %s11634_s21 }
0x243e   : > { %9336 = dma.vmem_to_hbm [thread:$0]  (%p12939_p7), %s12653_s9, 256, %s12650_s6, %s7465_s8, %s10899_s24, %s10899_s24, %s12915_s20  }
0x243f   : > { %s7521_s14 = sshll.u32 %s12941_s22, 4  ;;  %s10900_s23 = smov [#allocation44]   ;;  %s7522_s14 = int_to_ptr.vmem [resolvable:$true] %s7521_s14 }
0x2440   : > { %s10676_s19 = scalar_lea.vmem %s7522_s14, 16  ;;  %s10680_s16 = sshll.u32 %s10900_s23, 4  ;;  %s10681_s16 = int_to_ptr.vmem [resolvable:$false] %s10680_s16 }
0x2441   : > { %p10677_p10 = scmp.ne.s32.totalorder %s7522_s14, %s10676_s19  ;;  %s10682_s4 = scalar_lea.vmem %s10681_s16, 32 }
0x2442   : > { %p10683_p13 = scmp.lt.s32.totalorder %s7522_s14, %s10681_s16  ;;  %p10684_p1 = scmp.lt.s32.totalorder %s10682_s4, %s10676_s19 }
0x2443   : > { %p10678_p3 = pnand %p10677_p10, %p12939_p7 }
0x2444   : > { %p10685_p5 = por %p10684_p1, %p10683_p13 }
0x2445   : > { %p10679_p12 = pneg %p10678_p3 }
0x2447   : > { %p10686_p6 = pnand %p10685_p5, %p10679_p12 }
0x2449   : > { %10689 = shalt.err (!%p10686_p6)
}
0x244a   : > { %s10690_s21 = scalar_lea.hbm %s12624_s3, 16  ;;  %s10694_s20 = scalar_lea.hbm %s11169_s12, 32 }
0x244b   : > { %p10691_p11 = scmp.ne.s32.totalorder %s12624_s3, %s10690_s21  ;;  %p10695_p4 = scmp.lt.u32.totalorder %s12624_s3, %s11169_s12 }
0x244c   : > { %p10696_p0 = scmp.lt.u32.totalorder %s10694_s20, %s10690_s21  ;;  %p10698_p10 = scmp.lt.u32.totalorder %s10690_s21, %s12624_s3 }
0x244d   : > { %p10692_p8 = pnand %p10691_p11, %p12939_p7 }
0x244e   : > { %p10697_p2 = por %p10696_p0, %p10695_p4 }
0x244f   : > { %p10693_p9 = pneg %p10692_p8 }
0x2450   : > { %p10699_p3 = por %p10698_p10, %p10697_p2 }
0x2452   : > { %p10700_p12 = pnand %p10699_p3, %p10693_p9 }
0x2454   : > { %10703 = shalt.err (!%p10700_p12)
}
0x2455   : > { %s12942_s6 = sld [smem:[#allocation106_spill]]  ;;  %s12943_s9 = sld [smem:[#allocation108_spill]] }
0x2456   : > { %9338 = dma.vmem_to_hbm [thread:$0]  (%p12939_p7), %s7522_s14, 16, %s12624_s3, %s12628_s15  }
0x245b   : > { %v8230_v61 = vld [vmem:[%s12942_s6] ss:$0 sm:$0xff]  ;;  %s1957_s8 = scalar_lea.vmem %s12943_s9, %s11700_s7 }
0x249c   : > { %v8853_v22 = vpop.f32.mrb[44].mxu0 }
0x249d   : > { %v7444_v55 = vadd.f32 %v8853_v22, %v8230_v61  ;;  %v7438_v59 = vpop.f32.mrb[45].mxu0 }
0x249e   : > { %v7439_v40 = vadd.f32 %v8230_v61, %v7438_v59 }
0x249f   : > { %7448 = vst.msk [vmem:[%s1957_s8 + $0x8] sm:$0x3f] %vm2062_vm1, %v7444_v55 }
0x24a0   : > { %7447 = vst.msk [vmem:[%s1957_s8] sm:$0xff] %vm2058_vm0, %v7439_v40 }
0x24a1 PF: > { %s7549_s5 = sand.u32 1, %s10786_s0   ;;  %p12944_p13 = scmp.ne.s32.totalorder %s12878_s10, 0 }
0x24a2   : > { %p12945_p1 = scmp.ge.s32.totalorder %s10798_s2, 2  ;;  %s7550_s11 = scalar_lea.sflag [#allocation5], %s7549_s5 }
0x24a4   : > { %p9417_p5 = pnand %p12945_p1, %p12944_p13 }
0x24a6   : > { %10777 = dma.done.wait (!%p9417_p5), %s7550_s11, 256  }
0x24a7   : > { %10779 = vsyncadd (!%p9417_p5), %s7550_s11, 4294967040  ;;  %s12946_s7 = sadd.s32 4294967294, %s10798_s2  }
0x24a8   : > { %s7558_s15 = sand.u32 1, %s12946_s7  }
0x24a9   : > { %s7559_s3 = scalar_lea.sflag [#allocation43], %s7558_s15 }
0x24aa   : > { %10781 = dma.done.wait (!%p9417_p5), %s7559_s3, 32  }
0x24ab   : > { %10783 = vsyncadd (!%p9417_p5), %s7559_s3, 4294967264  ;;  %p136_p7 = scmp.ge.s32.totalorder %s11536_s26, 4   ;;  %s12947_s0 = smov %s10790_s28 }
0x24ac   : > { %s12948_s28 = smov %s10794_s1  ;;  %s12949_s1 = smov %s11547_s17 }
0x24ad   : > { %s12950_s2 = smov %s11536_s26  ;;  %138 = sbr.rel (!%p136_p7) target bundleno = 126 (0x7e), region = 480 }
0x24b4   :  { %7571 = vsyncpa [#allocation4], 1 }
0x24b5   :  { %7573 = vsyncpa [#allocation4 + $0x1], 1 }
0x24b6   :  { %7574 = vsyncpa [#allocation7], 1 }
0x24b7   :  { %7576 = vsyncpa [#allocation7 + $0x1], 1 }
0x24b8   :  { %7577 = vsyncpa [#allocation10], 1 }
0x24b9   :  { %7578 = vsyncpa [#allocation13], 1 }
0x24ba   :  { %7579 = vsyncpa [#allocation16], 1 }
0x24bb   :  { %7580 = vsyncpa [#allocation19], 1 }
0x24bc   :  { %7581 = vsyncpa [#allocation22], 1 }
0x24bd   :  { %7582 = vsyncpa [#allocation25], 1 }
0x24be   :  { %7583 = vsyncpa [#allocation28], 1 }
0x24bf   :  { %7584 = vsyncpa [#allocation31], 1 }
0x24c0   :  { %7585 = vsyncpa [#allocation34], 1 }
0x24c1   :  { %7586 = vsyncpa [#allocation37], 1 }
0x24c2   :  { %7587 = vsyncpa [#allocation40], 1 }
0x24c3   :  { %7588 = vsyncpa [#allocation5], 1 }
0x24c4   :  { %7590 = vsyncpa [#allocation5 + $0x1], 1 }
0x24c5   :  { %7591 = vsyncpa [#allocation43], 1 }
0x24c6   :  { %7593 = vsyncpa [#allocation43 + $0x1], 1 }

</bundles_post_ra>
